<compile_context>
chip_gen: v6e
topology: v6e:2x2x1
jax: 0.10.0
libtpu: 0.0.40
codegen_flags: <defaults>
</compile_context>

<pallas_src>
import functools

import jax
import jax.numpy as jnp
from jax.experimental import pallas as pl
from jax.experimental.pallas import tpu as pltpu


# ----------------------------------------------------------------------------
# Kernel 1: stem conv -> head conv -> masked global avg pool (MXU reduce)
# ----------------------------------------------------------------------------
def _backbone_kernel(x_ref,        # (thw, Kp)   bf16 im2col patches (+bias lane, zero pad)
                     stem_w_ref,   # (Kp, 128)   bf16 stem weight (BN scale folded, shift row)
                     head_w_ref,   # (128, 1792) bf16 head weight (BN scale folded)
                     head_sh_ref,  # (1, 1792)   f32 folded head BN shift
                     pooled_ref,   # (1, 1792)   bf16 pooled features for this batch row
                     acc_ref,      # (1, 1792)   f32 VMEM scratch: GAP accumulator
                     *, true_hw, thw, needs_mask):
    t = pl.program_id(1)

    @pl.when(t == 0)
    def _():
        acc_ref[...] = jnp.zeros_like(acc_ref)

    # --- stem: Conv3x3/s2 + folded BN, all on the MXU; Swish in f32 ----------
    h = jnp.dot(x_ref[...], stem_w_ref[...], preferred_element_type=jnp.float32)
    h = h * jax.nn.sigmoid(h)           # swish; padded channels stay exactly 0

    # --- head: Conv1x1 (-> 1792); BN scale folded into head_w, shift added ---
    f = jnp.dot(h.astype(jnp.bfloat16), head_w_ref[...],
                preferred_element_type=jnp.float32)
    f = f + head_sh_ref[...]
    f = f * jax.nn.sigmoid(f)

    # --- AdaptiveAvgPool2d((1,1)): spatial sum as an MXU matmul --------------
    # (frees the VPU/XLU from a sublane-axis reduce; also masks zero-padded HW rows,
    #  which would otherwise leak swish(head_shift) into the average).
    if needs_mask:
        row = jax.lax.broadcasted_iota(jnp.int32, (1, thw), 1) + t * thw
        ones_row = jnp.where(row < true_hw, 1.0, 0.0).astype(jnp.float32)
    else:
        ones_row = jnp.ones((1, thw), jnp.float32)
    acc_ref[...] += jnp.dot(ones_row, f, preferred_element_type=jnp.float32)

    # --- last HW tile of this batch row: finish GAP ---------------------------
    @pl.when(t == pl.num_programs(1) - 1)
    def _():
        pooled_ref[...] = (acc_ref[...] * (1.0 / true_hw)).astype(pooled_ref.dtype)


def _pick_hw_tile(hw):
    # 256-row M tiles fill the v6e/v7x 256-wide MXU (v5e runs them as 2x128 passes).
    # v6e could sweep up to 512; keep 256 for v7x's smaller VMEM.  Non-dividing HW is
    # handled by zero-padding + in-kernel row masking (no giant fallback block).
    if hw >= 256:
        return 256
    return max(8, -(-hw // 8) * 8)


def backbone_forward(patches, p, true_hw):
    """patches: (B, HW, Kp) bf16 im2col (+bias lane).  Returns pooled (B, 1792) bf16."""
    B, HW, Kp = patches.shape
    thw = _pick_hw_tile(HW)
    n_t = pl.cdiv(HW, thw)
    hw_pad = n_t * thw
    if hw_pad != HW:
        patches = jnp.pad(patches, ((0, 0), (0, hw_pad - HW), (0, 0)))

    c_stem_p = p["stem_w"].shape[1]      # 128 (padded)
    c_feat = p["head_w"].shape[1]        # 1792

    pooled = pl.pallas_call(
        functools.partial(_backbone_kernel, true_hw=true_hw, thw=thw,
                          needs_mask=(hw_pad != true_hw)),
        out_shape=jax.ShapeDtypeStruct((B, 1, c_feat), jnp.bfloat16),
        grid=(B, n_t),
        in_specs=[
            pl.BlockSpec((None, thw, Kp), lambda b, t: (b, t, 0)),
            pl.BlockSpec((Kp, c_stem_p), lambda b, t: (0, 0)),
            pl.BlockSpec((c_stem_p, c_feat), lambda b, t: (0, 0)),
            pl.BlockSpec((1, c_feat), lambda b, t: (0, 0)),
        ],
        out_specs=pl.BlockSpec((None, 1, c_feat), lambda b, t: (b, 0, 0)),
        scratch_shapes=[pltpu.VMEM((1, c_feat), jnp.float32)],
        compiler_params=pltpu.CompilerParams(
            # batch across TCs (B>=2 here); HW is the accumulator axis.
            dimension_semantics=("parallel", "arbitrary"),
        ),
    )(patches, p["stem_w"], p["head_w"], p["head_shift"])
    return pooled.reshape(B, c_feat)


# ----------------------------------------------------------------------------
# Kernel 2: ClassBlock (Linear -> folded BN1d -> Dropout(identity) -> Linear)
# ----------------------------------------------------------------------------
def _classblock_kernel(pooled_ref,            # (B, 1792) bf16
                       fc1_ref,               # (1792, 512) bf16 (BN1d scale folded)
                       bn1_sh_ref,            # (1, 512) f32 (fc1 bias folded into BN shift)
                       fc2_ref, fc2_b_ref,    # (512, C) bf16, (1, C) f32
                       o_ref):                # (B, C) f32 logits
    z = jnp.dot(pooled_ref[...], fc1_ref[...], preferred_element_type=jnp.float32)
    z = z + bn1_sh_ref[...]
    # TODO(synk): Dropout(p=0.5) is identity here (inference semantics).
    o_ref[...] = (jnp.dot(z.astype(jnp.bfloat16), fc2_ref[...],
                          preferred_element_type=jnp.float32)
                  + fc2_b_ref[...]).astype(o_ref.dtype)


def classblock_forward(pooled, p):
    B = pooled.shape[0]
    class_num = p["fc2_w"].shape[1]
    # Whole arrays fit VMEM (fc1 bf16 ~1.75 MiB); single full-block call, M = B.
    return pl.pallas_call(
        _classblock_kernel,
        out_shape=jax.ShapeDtypeStruct((B, class_num), jnp.float32),
    )(pooled, p["fc1_w"], p["bn1_shift"], p["fc2_w"], p["fc2_b"])


# ----------------------------------------------------------------------------
# Glue (plain JAX): im2col, BN folding, parameter construction
# ----------------------------------------------------------------------------
def im2col_nhwc(x, k, s, pad):
    """x: (B,H,W,C) NHWC -> (B, Ho*Wo, k*k*C) patches in (kh, kw, C_in) order."""
    # TODO(synk): at real 380x380 EfficientNet-B4 inputs this im2col materialization
    # should be replaced by in-kernel shifted accumulation / per-tap DMAs to avoid the
    # 9x HBM inflation.
    B, H, W, C = x.shape
    xp = jnp.pad(x, ((0, 0), (pad, pad), (pad, pad), (0, 0)))
    Ho = (H + 2 * pad - k) // s + 1
    Wo = (W + 2 * pad - k) // s + 1
    cols = []
    for i in range(k):
        for j in range(k):
            cols.append(xp[:, i:i + Ho * s:s, j:j + Wo * s:s, :])
    patches = jnp.concatenate(cols, axis=-1)          # (B, Ho, Wo, k*k*C)
    return patches.reshape(B, Ho * Wo, k * k * C), (Ho, Wo)


def _fold_bn(gamma, beta, mean, var, eps):
    scale = gamma / jnp.sqrt(var + eps)
    shift = beta - mean * scale
    return scale, shift


def init_params(key, class_num=128, linear_num=512):
    # NOTE: stem_w rows follow im2col's (kh, kw, C_in) order; real imported PyTorch
    # weights (C_out, C_in, kh, kw) must be permuted to match before flattening.
    C_IN, C_STEM, C_FEAT = 3, 48, 1792
    K_RAW, K_PAD = 3 * 3 * C_IN, 32      # 27 -> 32  (sublane-aligned; row 27 = bias lane)
    C_STEM_PAD = 128                     # 48 -> 128 (lane-dense stem output / head K)
    ks = jax.random.split(key, 16)
    p = {}

    # stem conv (3x3, stride 2, no bias) + BN (eps=1e-3): scale folded into weight
    # columns, shift written into the bias-lane row; zero-padded; bf16 for the MXU.
    stem_w = 0.05 * jax.random.normal(ks[0], (K_RAW, C_STEM), jnp.float32)
    g = 1.0 + 0.02 * jax.random.normal(ks[1], (C_STEM,), jnp.float32)
    b = 0.01 * jax.random.normal(ks[2], (C_STEM,), jnp.float32)
    m = 0.01 * jax.random.normal(ks[3], (C_STEM,), jnp.float32)
    v = 1.0 + 0.1 * jnp.abs(jax.random.normal(ks[4], (C_STEM,), jnp.float32))
    sc, sh = _fold_bn(g, b, m, v, 1e-3)
    stem_full = jnp.zeros((K_PAD, C_STEM_PAD), jnp.float32)
    stem_full = stem_full.at[:K_RAW, :C_STEM].set(stem_w * sc[None, :])
    stem_full = stem_full.at[K_RAW, :C_STEM].set(sh)        # bias lane row
    p["stem_w"] = stem_full.astype(jnp.bfloat16)

    # head 1x1 conv (48 -> 1792, no bias) + BN: scale folded into weight, rows padded.
    head_w = 0.05 * jax.random.normal(ks[5], (C_STEM, C_FEAT), jnp.float32)
    g = 1.0 + 0.02 * jax.random.normal(ks[6], (C_FEAT,), jnp.float32)
    b = 0.01 * jax.random.normal(ks[7], (C_FEAT,), jnp.float32)
    m = 0.01 * jax.random.normal(ks[8], (C_FEAT,), jnp.float32)
    v = 1.0 + 0.1 * jnp.abs(jax.random.normal(ks[9], (C_FEAT,), jnp.float32))
    hsc, hsh = _fold_bn(g, b, m, v, 1e-3)
    head_full = jnp.zeros((C_STEM_PAD, C_FEAT), jnp.float32)
    head_full = head_full.at[:C_STEM, :].set(head_w * hsc[None, :])
    p["head_w"] = head_full.astype(jnp.bfloat16)
    p["head_shift"] = hsh.reshape(1, C_FEAT)                 # f32 add in-kernel

    # ClassBlock: Linear(1792,512)+BatchNorm1d(eps=1e-5)+Dropout+Linear(512,class_num).
    fc1_w = 0.02 * jax.random.normal(ks[10], (C_FEAT, linear_num), jnp.float32)
    fc1_b = jnp.zeros((linear_num,), jnp.float32)            # kaiming init zeroes the bias
    g = 1.0 + 0.02 * jax.random.normal(ks[11], (linear_num,), jnp.float32)
    b = jnp.zeros((linear_num,), jnp.float32)
    m = 0.01 * jax.random.normal(ks[12], (linear_num,), jnp.float32)
    v = 1.0 + 0.1 * jnp.abs(jax.random.normal(ks[13], (linear_num,), jnp.float32))
    scale, shift = _fold_bn(g, b, m, v, 1e-5)
    p["fc1_w"] = (fc1_w * scale[None, :]).astype(jnp.bfloat16)       # BN scale folded
    p["bn1_shift"] = (fc1_b * scale + shift).reshape(1, linear_num)  # + fc1 bias folded
    p["fc2_w"] = (0.001 * jax.random.normal(ks[14], (linear_num, class_num),
                                            jnp.float32)).astype(jnp.bfloat16)
    p["fc2_b"] = jnp.zeros((1, class_num), jnp.float32)
    return p


def ft_net_efficient_forward(x_nchw, params):
    x = jnp.transpose(x_nchw, (0, 2, 3, 1)).astype(jnp.float32)   # NCHW -> NHWC
    patches, _ = im2col_nhwc(x, k=3, s=2, pad=1)                  # (B, HW, 27)
    B, HW, K_raw = patches.shape
    K_pad = params["stem_w"].shape[0]
    assert K_raw < K_pad
    # bias lane (col 27) = 1.0 so the folded stem-BN shift rides the MXU; rest zero-pad.
    patches = jnp.concatenate(
        [patches,
         jnp.ones((B, HW, 1), jnp.float32),
         jnp.zeros((B, HW, K_pad - K_raw - 1), jnp.float32)], axis=-1)
    patches = patches.astype(jnp.bfloat16)
    # extract_features (stem -> [MBConv omitted] -> head) + avgpool, fused:
    pooled = backbone_forward(patches, params, true_hw=HW)        # (B, 1792) bf16
    # view + ClassBlock:
    return classblock_forward(pooled, params)                     # (B, class_num) f32


if __name__ == "__main__":
    key = jax.random.PRNGKey(0)
    kx, kp = jax.random.split(key)

    CLASS_NUM = 128
    x = jax.random.normal(kx, (2, 3, 32, 32), jnp.float32)        # NCHW, like PyTorch
    params = init_params(kp, class_num=CLASS_NUM, linear_num=512)

    fwd = jax.jit(lambda inp: ft_net_efficient_forward(inp, params))
    out = jax.block_until_ready(fwd(x))
    assert out.shape == (2, CLASS_NUM), out.shape
    assert bool(jnp.all(jnp.isfinite(out)))
    print("KERNEL_OK")
</pallas_src>

<mosaic_0001>
module attributes {stable_mosaic.version = 11 : i64} {
  func.func @_backbone_kernel(%arg0: i32, %arg1: i32, %arg2: memref<1x256x32xbf16, #tpu.memory_space<vmem>>, %arg3: memref<32x128xbf16, #tpu.memory_space<vmem>>, %arg4: memref<128x1792xbf16, #tpu.memory_space<vmem>>, %arg5: memref<1x1792xf32, #tpu.memory_space<vmem>>, %arg6: memref<1x1x1792xbf16, #tpu.memory_space<vmem>>, %arg7: memref<1x1792xf32, #tpu.memory_space<vmem>>) attributes {dimension_semantics = [#tpu.dimension_semantics<parallel>, #tpu.dimension_semantics<arbitrary>], iteration_bounds = array<i64: 2, 1>, scalar_prefetch = 0 : i64, scratch_operands = 1 : i64, tpu.core_type = #tpu.core_type<tc>, window_params = [{transform_indices = @transform_0, window_bounds = array<i64: 1, 256, 32>}, {pipeline_mode = #tpu.pipeline_mode<synchronous>, transform_indices = @transform_1, window_bounds = array<i64: 32, 128>}, {pipeline_mode = #tpu.pipeline_mode<synchronous>, transform_indices = @transform_2, window_bounds = array<i64: 128, 1792>}, {pipeline_mode = #tpu.pipeline_mode<synchronous>, transform_indices = @transform_3, window_bounds = array<i64: 1, 1792>}, {transform_indices = @transform_4, window_bounds = array<i64: 1, 1, 1792>}]} {
    %c0_i32 = arith.constant 0 : i32
    %0 = arith.cmpi eq, %arg1, %c0_i32 : i32
    %1 = arith.extui %0 : i1 to i32
    %c0_i32_0 = arith.constant 0 : i32
    %2 = arith.cmpi ne, %1, %c0_i32_0 : i32
    scf.if %2 {
      %cst_20 = arith.constant 0.000000e+00 : f32
      %33 = vector.broadcast %cst_20 : f32 to vector<1x1792xf32>
      %c0_21 = arith.constant 0 : index
      %c0_22 = arith.constant 0 : index
      %34 = vector.load %arg7[%c0_21, %c0_22] : memref<1x1792xf32, #tpu.memory_space<vmem>>, vector<1x1792xf32>
      tpu.vector_store %arg7[%c0_21, %c0_22], %33 {strides = array<i32>} : memref<1x1792xf32, #tpu.memory_space<vmem>>, vector<1x1792xf32>,
    } else {
    }
    %c0 = arith.constant 0 : index
    %c0_1 = arith.constant 0 : index
    %c0_2 = arith.constant 0 : index
    %3 = vector.load %arg2[%c0, %c0_1, %c0_2] : memref<1x256x32xbf16, #tpu.memory_space<vmem>>, vector<1x256x32xbf16>
    %4 = vector.shape_cast %3 : vector<1x256x32xbf16> to vector<256x32xbf16>
    %c0_3 = arith.constant 0 : index
    %c0_4 = arith.constant 0 : index
    %5 = vector.load %arg3[%c0_3, %c0_4] : memref<32x128xbf16, #tpu.memory_space<vmem>>, vector<32x128xbf16>
    %cst = arith.constant dense<0.000000e+00> : vector<256x128xf32>
    %6 = tpu.matmul %4, %5, %cst {dimension_numbers = #tpu.dot_dimension_numbers<[1], [0], [0], [1], [0, 0, 1, 1], [], []>} : vector<256x32xbf16>, vector<32x128xbf16>, vector<256x128xf32> -> vector<256x128xf32>
    %7 = arith.negf %6 : vector<256x128xf32>
    %8 = math.exp %7 : vector<256x128xf32>
    %cst_5 = arith.constant 1.000000e+00 : f32
    %9 = vector.broadcast %cst_5 : f32 to vector<256x128xf32>
    %10 = arith.addf %9, %8 : vector<256x128xf32>
    %11 = arith.divf %9, %10 : vector<256x128xf32>
    %12 = arith.mulf %6, %11 : vector<256x128xf32>
    %13 = arith.truncf %12 : vector<256x128xf32> to vector<256x128xbf16>
    %c0_6 = arith.constant 0 : index
    %c0_7 = arith.constant 0 : index
    %14 = vector.load %arg4[%c0_6, %c0_7] : memref<128x1792xbf16, #tpu.memory_space<vmem>>, vector<128x1792xbf16>
    %cst_8 = arith.constant dense<0.000000e+00> : vector<256x1792xf32>
    %15 = tpu.matmul %13, %14, %cst_8 {dimension_numbers = #tpu.dot_dimension_numbers<[1], [0], [0], [1], [0, 0, 1, 1], [], []>} : vector<256x128xbf16>, vector<128x1792xbf16>, vector<256x1792xf32> -> vector<256x1792xf32>
    %c0_9 = arith.constant 0 : index
    %c0_10 = arith.constant 0 : index
    %16 = vector.load %arg5[%c0_9, %c0_10] : memref<1x1792xf32, #tpu.memory_space<vmem>>, vector<1x1792xf32>
    %17 = vector.broadcast %16 : vector<1x1792xf32> to vector<256x1792xf32>
    %18 = arith.addf %15, %17 : vector<256x1792xf32>
    %19 = arith.negf %18 : vector<256x1792xf32>
    %20 = math.exp %19 : vector<256x1792xf32>
    %cst_11 = arith.constant 1.000000e+00 : f32
    %21 = vector.broadcast %cst_11 : f32 to vector<256x1792xf32>
    %22 = arith.addf %21, %20 : vector<256x1792xf32>
    %23 = arith.divf %21, %22 : vector<256x1792xf32>
    %24 = arith.mulf %18, %23 : vector<256x1792xf32>
    %cst_12 = arith.constant 1.000000e+00 : f32
    %25 = vector.broadcast %cst_12 : f32 to vector<1x256xf32>
    %c0_13 = arith.constant 0 : index
    %c0_14 = arith.constant 0 : index
    %26 = vector.load %arg7[%c0_13, %c0_14] : memref<1x1792xf32, #tpu.memory_space<vmem>>, vector<1x1792xf32>
    %cst_15 = arith.constant dense<0.000000e+00> : vector<1x1792xf32>
    %27 = tpu.matmul %25, %24, %cst_15 {dimension_numbers = #tpu.dot_dimension_numbers<[1], [0], [0], [1], [0, 0, 1, 1], [], []>} : vector<1x256xf32>, vector<256x1792xf32>, vector<1x1792xf32> -> vector<1x1792xf32>
    %28 = arith.addf %26, %27 : vector<1x1792xf32>
    %c0_16 = arith.constant 0 : index
    %c0_17 = arith.constant 0 : index
    %29 = vector.load %arg7[%c0_16, %c0_17] : memref<1x1792xf32, #tpu.memory_space<vmem>>, vector<1x1792xf32>
    tpu.vector_store %arg7[%c0_16, %c0_17], %28 {strides = array<i32>} : memref<1x1792xf32, #tpu.memory_space<vmem>>, vector<1x1792xf32>,
    %c0_i32_18 = arith.constant 0 : i32
    %30 = arith.cmpi eq, %arg1, %c0_i32_18 : i32
    %31 = arith.extui %30 : i1 to i32
    %c0_i32_19 = arith.constant 0 : i32
    %32 = arith.cmpi ne, %31, %c0_i32_19 : i32
    scf.if %32 {
      %c0_20 = arith.constant 0 : index
      %c0_21 = arith.constant 0 : index
      %33 = vector.load %arg7[%c0_20, %c0_21] : memref<1x1792xf32, #tpu.memory_space<vmem>>, vector<1x1792xf32>
      %cst_22 = arith.constant 3.906250e-03 : f32
      %34 = vector.broadcast %cst_22 : f32 to vector<1x1792xf32>
      %35 = arith.mulf %33, %34 : vector<1x1792xf32>
      %36 = arith.truncf %35 : vector<1x1792xf32> to vector<1x1792xbf16>
      %c0_23 = arith.constant 0 : index
      %c0_24 = arith.constant 0 : index
      %c0_25 = arith.constant 0 : index
      %37 = vector.load %arg6[%c0_23, %c0_24, %c0_25] : memref<1x1x1792xbf16, #tpu.memory_space<vmem>>, vector<1x1x1792xbf16>
      %38 = vector.shape_cast %37 : vector<1x1x1792xbf16> to vector<1x1792xbf16>
      %39 = vector.shape_cast %36 : vector<1x1792xbf16> to vector<1x1x1792xbf16>
      tpu.vector_store %arg6[%c0_23, %c0_24, %c0_25], %39 {strides = array<i32>} : memref<1x1x1792xbf16, #tpu.memory_space<vmem>>, vector<1x1x1792xbf16>,
    } else {
    }
    return
  }
  func.func @transform_0(%arg0: i32, %arg1: i32) -> (i32, i32, i32) {
    %c0_i32 = arith.constant 0 : i32
    %c0_i32_0 = arith.constant 0 : i32
    return %arg0, %arg1, %c0_i32 : i32, i32, i32
  }
  func.func @transform_1(%arg0: i32, %arg1: i32) -> (i32, i32) {
    %c0_i32 = arith.constant 0 : i32
    %c0_i32_0 = arith.constant 0 : i32
    %c0_i32_1 = arith.constant 0 : i32
    return %c0_i32, %c0_i32_0 : i32, i32
  }
  func.func @transform_2(%arg0: i32, %arg1: i32) -> (i32, i32) {
    %c0_i32 = arith.constant 0 : i32
    %c0_i32_0 = arith.constant 0 : i32
    %c0_i32_1 = arith.constant 0 : i32
    return %c0_i32, %c0_i32_0 : i32, i32
  }
  func.func @transform_3(%arg0: i32, %arg1: i32) -> (i32, i32) {
    %c0_i32 = arith.constant 0 : i32
    %c0_i32_0 = arith.constant 0 : i32
    %c0_i32_1 = arith.constant 0 : i32
    return %c0_i32, %c0_i32_0 : i32, i32
  }
  func.func @transform_4(%arg0: i32, %arg1: i32) -> (i32, i32, i32) {
    %c0_i32 = arith.constant 0 : i32
    %c0_i32_0 = arith.constant 0 : i32
    %c0_i32_1 = arith.constant 0 : i32
    return %arg0, %c0_i32, %c0_i32_0 : i32, i32, i32
  }
}

module attributes {stable_mosaic.version = 11 : i64} {
  func.func @_classblock_kernel(%arg0: memref<2x1792xbf16, #tpu.memory_space<vmem>>, %arg1: memref<1792x512xbf16, #tpu.memory_space<vmem>>, %arg2: memref<1x512xf32, #tpu.memory_space<vmem>>, %arg3: memref<512x128xbf16, #tpu.memory_space<vmem>>, %arg4: memref<1x128xf32, #tpu.memory_space<vmem>>, %arg5: memref<2x128xf32, #tpu.memory_space<vmem>>) attributes {dimension_semantics = [], scalar_prefetch = 0 : i64, scratch_operands = 0 : i64, tpu.core_type = #tpu.core_type<tc>} {
    %c0 = arith.constant 0 : index
    %c0_0 = arith.constant 0 : index
    %0 = vector.load %arg0[%c0, %c0_0] : memref<2x1792xbf16, #tpu.memory_space<vmem>>, vector<2x1792xbf16>
    %c0_1 = arith.constant 0 : index
    %c0_2 = arith.constant 0 : index
    %1 = vector.load %arg1[%c0_1, %c0_2] : memref<1792x512xbf16, #tpu.memory_space<vmem>>, vector<1792x512xbf16>
    %cst = arith.constant dense<0.000000e+00> : vector<2x512xf32>
    %2 = tpu.matmul %0, %1, %cst {dimension_numbers = #tpu.dot_dimension_numbers<[1], [0], [0], [1], [0, 0, 1, 1], [], []>} : vector<2x1792xbf16>, vector<1792x512xbf16>, vector<2x512xf32> -> vector<2x512xf32>
    %c0_3 = arith.constant 0 : index
    %c0_4 = arith.constant 0 : index
    %3 = vector.load %arg2[%c0_3, %c0_4] : memref<1x512xf32, #tpu.memory_space<vmem>>, vector<1x512xf32>
    %4 = vector.broadcast %3 : vector<1x512xf32> to vector<2x512xf32>
    %5 = arith.addf %2, %4 : vector<2x512xf32>
    %6 = arith.truncf %5 : vector<2x512xf32> to vector<2x512xbf16>
    %c0_5 = arith.constant 0 : index
    %c0_6 = arith.constant 0 : index
    %7 = vector.load %arg3[%c0_5, %c0_6] : memref<512x128xbf16, #tpu.memory_space<vmem>>, vector<512x128xbf16>
    %cst_7 = arith.constant dense<0.000000e+00> : vector<2x128xf32>
    %8 = tpu.matmul %6, %7, %cst_7 {dimension_numbers = #tpu.dot_dimension_numbers<[1], [0], [0], [1], [0, 0, 1, 1], [], []>} : vector<2x512xbf16>, vector<512x128xbf16>, vector<2x128xf32> -> vector<2x128xf32>
    %c0_8 = arith.constant 0 : index
    %c0_9 = arith.constant 0 : index
    %9 = vector.load %arg4[%c0_8, %c0_9] : memref<1x128xf32, #tpu.memory_space<vmem>>, vector<1x128xf32>
    %10 = vector.broadcast %9 : vector<1x128xf32> to vector<2x128xf32>
    %11 = arith.addf %8, %10 : vector<2x128xf32>
    %c0_10 = arith.constant 0 : index
    %c0_11 = arith.constant 0 : index
    %12 = vector.load %arg5[%c0_10, %c0_11] : memref<2x128xf32, #tpu.memory_space<vmem>>, vector<2x128xf32>
    tpu.vector_store %arg5[%c0_10, %c0_11], %11 {strides = array<i32>} : memref<2x128xf32, #tpu.memory_space<vmem>>, vector<2x128xf32>,
    return
  }
}

</mosaic_0001>

<bundles_post_ra>
// kernel: _lambda_.3
= control target key start
LH: loop header
LB: loop body
LE: loop exit
PB: predicated region body
PF: predicated region fallthrough
CT: control target
= control target key end

     0   :  { %10 = vsyncpa [#allocation3], 0  ;;  %s6614_s0 = inlined_call_operand.vmem [shape: bf16[2,1792], index: 0, kind: input, shape index: {}]   ;;  %s6615_s1 = inlined_call_operand.vmem [shape: bf16[1792,512], index: 1, kind: input, shape index: {}]   ;;  %s6616_s2 = inlined_call_operand.vmem [shape: f32[1,512], index: 2, kind: input, shape index: {}]   ;;  %s6617_s3 = inlined_call_operand.hbm [shape: bf16[512,128], index: 3, kind: input, shape index: {}]   ;;  %s6618_s4 = inlined_call_operand.vmem [shape: f32[1,128], index: 4, kind: input, shape index: {}]   ;;  %s6619_s5 = inlined_call_operand.hbm [shape: f32[2,128], index: 5, kind: output, shape index: {}]  }
   0x1   :  { %11 = vsyncpa [#allocation4], 0  ;;  %s5078_s18 = smov [#allocation2]  }
   0x2   :  { %s23_s19 = sshll.u32 %s5078_s18, 4  ;;  %s24_s19 = int_to_ptr.vmem [resolvable:$true] %s23_s19 }
   0x3   :  { %s5042_s20 = scalar_lea.vmem %s24_s19, 4096  ;;  %p5047_p1 = scmp.lt.s32.totalorder %s24_s19, %s24_s19 }
   0x4   :  { %p5043_p0 = scmp.ne.s32.totalorder %s24_s19, %s5042_s20  ;;  %p5048_p2 = scmp.lt.s32.totalorder %s5042_s20, %s5042_s20 }
   0x6   :  { %p5049_p3 = por %p5048_p2, %p5047_p1 }
   0x8   :  { %p5050_p4 = pnand %p5049_p3, %p5043_p0 }
   0xa   :  { %5053 = shalt.err (!%p5050_p4)
}
   0xb   :  { %s5079_s21 = smov 64   ;;  %s5080_s22 = smov 4  }
   0xc   :  { %29 = dma.hbm_to_vmem [thread:$0]  %s6617_s3, 4096, %s24_s19, [#allocation3], %s5079_s21, %s5079_s21, %s5080_s22  }
   0xd   :  { %5074 = dma.done.wait [#allocation3], 4096  }
   0xe   :  { %5075 = vsyncadd [#allocation3], 4294963200  ;;  %v4327_v0 = vld [vmem:[%s6615_s1 + $0xe4] ss:$16 sps:$4 sm:$0xff]   ;;  %v4331_v2 = vld [vmem:[%s6615_s1 + $0xe0] ss:$16 sps:$4 sm:$0xff]   ;;  %v488_v36 = vlaneseq }
   0xf   :  { %v4329_v1 = vld [vmem:[%s6615_s1 + $0x2e4] ss:$16 sps:$4 sm:$0xff]   ;;  %2860 = vmatprep.subr.bf16.mxu0 %v4327_v0  ;;  %v4332_v3 = vld [vmem:[%s6615_s1 + $0x2e0] ss:$16 sps:$4 sm:$0xff]   ;;  %v5081_v37 = vmov 1966171168  }
  0x10   :  { %2901 = vmatprep.subr.bf16.mxu1 %v4329_v1  ;;  %v4333_v4 = vld [vmem:[%s6615_s1 + $0xc4] ss:$16 sps:$4 sm:$0xff]   ;;  %2861 = vmatpush1.bf16.msra.mxu0 %v4331_v2  ;;  %v4337_v6 = vld [vmem:[%s6615_s1 + $0xc0] ss:$16 sps:$4 sm:$0xff]   ;;  %v512_v38 = vunpack.c.l.s4 %v5081_v37  ;;  %v5233_v42 = vshrl.u32 %v488_v36, 7  ;;  %s5082_s21 = smov [#allocation5]  }
  0x11   :  { %2902 = vmatpush1.bf16.msra.mxu1 %v4332_v3  ;;  %v4335_v5 = vld [vmem:[%s6615_s1 + $0x2c4] ss:$16 sps:$4 sm:$0xff]   ;;  %2862 = vmatprep.subr.bf16.mxu0 %v4333_v4  ;;  %v4338_v7 = vld [vmem:[%s6615_s1 + $0x2c0] ss:$16 sps:$4 sm:$0xff]   ;;  %s3788_s22 = sshll.u32 %s5082_s21, 4  ;;  %s3789_s22 = int_to_ptr.vmem [resolvable:$true] %s3788_s22 }
  0x12   :  { %2903 = vmatprep.subr.bf16.mxu1 %v4335_v5  ;;  %v4339_v8 = vld [vmem:[%s6615_s1 + $0xa4] ss:$16 sps:$4 sm:$0xff]   ;;  %v4343_v10 = vld [vmem:[%s6615_s1 + $0xa0] ss:$16 sps:$4 sm:$0xff]   ;;  %v513_v43 = vunpack.c.0.s8 %v512_v38  ;;  %s5054_s23 = scalar_lea.vmem %s3789_s22, 32  ;;  %p5059_p6 = scmp.lt.s32.totalorder %s3789_s22, %s3789_s22 }
  0x13   :  { %v4341_v9 = vld [vmem:[%s6615_s1 + $0x2a4] ss:$16 sps:$4 sm:$0xff]   ;;  %v4344_v11 = vld [vmem:[%s6615_s1 + $0x2a0] ss:$16 sps:$4 sm:$0xff]   ;;  %p5055_p5 = scmp.ne.s32.totalorder %s3789_s22, %s5054_s23  ;;  %p5060_p7 = scmp.lt.s32.totalorder %s5054_s23, %s5054_s23 }
  0x14   :  { %2863 = vmatpush1.bf16.msra.mxu0 %v4337_v6  ;;  %v4345_v12 = vld [vmem:[%s6615_s1 + $0x84] ss:$16 sps:$4 sm:$0xff]   ;;  %v4349_v14 = vld [vmem:[%s6615_s1 + $0x80] ss:$16 sps:$4 sm:$0xff]   ;;  %v5251_v49 = vsub.s32 %v513_v43, %v5233_v42 }
  0x15   :  { %2904 = vmatpush1.bf16.msra.mxu1 %v4338_v7  ;;  %2864 = vmatprep.subr.bf16.mxu0 %v4339_v8  ;;  %v4347_v13 = vld [vmem:[%s6615_s1 + $0x284] ss:$16 sps:$4 sm:$0xff]   ;;  %v4350_v15 = vld [vmem:[%s6615_s1 + $0x280] ss:$16 sps:$4 sm:$0xff]   ;;  %p5061_p8 = por %p5060_p7, %p5059_p6 }
  0x16   :  { %2905 = vmatprep.subr.bf16.mxu1 %v4341_v9  ;;  %v4351_v16 = vld [vmem:[%s6615_s1 + $0x64] ss:$16 sps:$4 sm:$0xff]   ;;  %v4355_v18 = vld [vmem:[%s6615_s1 + $0x60] ss:$16 sps:$4 sm:$0xff]  }
  0x17   :  { %v4353_v17 = vld [vmem:[%s6615_s1 + $0x264] ss:$16 sps:$4 sm:$0xff]   ;;  %v4356_v19 = vld [vmem:[%s6615_s1 + $0x260] ss:$16 sps:$4 sm:$0xff]   ;;  %p5062_p9 = pnand %p5061_p8, %p5055_p5 }
  0x18   :  { %2865 = vmatpush1.bf16.msra.mxu0 %v4343_v10  ;;  %v4357_v20 = vld [vmem:[%s6615_s1 + $0x44] ss:$16 sps:$4 sm:$0xff]   ;;  %v4361_v22 = vld [vmem:[%s6615_s1 + $0x40] ss:$16 sps:$4 sm:$0xff]  }
  0x19   :  { %2906 = vmatpush1.bf16.msra.mxu1 %v4344_v11  ;;  %2866 = vmatprep.subr.bf16.mxu0 %v4345_v12  ;;  %v4359_v21 = vld [vmem:[%s6615_s1 + $0x244] ss:$16 sps:$4 sm:$0xff]   ;;  %v4362_v23 = vld [vmem:[%s6615_s1 + $0x240] ss:$16 sps:$4 sm:$0xff]  }
  0x1a   :  { %2907 = vmatprep.subr.bf16.mxu1 %v4347_v13  ;;  %v4363_v24 = vld [vmem:[%s6615_s1 + $0x24] ss:$16 sps:$4 sm:$0xff]   ;;  %v4367_v26 = vld [vmem:[%s6615_s1 + $0x20] ss:$16 sps:$4 sm:$0xff]  }
  0x1b   :  { %v4365_v25 = vld [vmem:[%s6615_s1 + $0x224] ss:$16 sps:$4 sm:$0xff]   ;;  %v4368_v27 = vld [vmem:[%s6615_s1 + $0x220] ss:$16 sps:$4 sm:$0xff]  }
  0x1c   :  { %2867 = vmatpush1.bf16.msra.mxu0 %v4349_v14  ;;  %v4369_v28 = vld [vmem:[%s6615_s1 + $0x4] ss:$16 sps:$4 sm:$0xff]   ;;  %v4373_v30 = vld [vmem:[%s6615_s1] ss:$16 sps:$4 sm:$0xff]  }
  0x1d   :  { %2908 = vmatpush1.bf16.msra.mxu1 %v4350_v15  ;;  %2868 = vmatprep.subr.bf16.mxu0 %v4351_v16  ;;  %v4371_v29 = vld [vmem:[%s6615_s1 + $0x204] ss:$16 sps:$4 sm:$0xff]   ;;  %v4374_v31 = vld [vmem:[%s6615_s1 + $0x200] ss:$16 sps:$4 sm:$0xff]  }
  0x1e   :  { %2909 = vmatprep.subr.bf16.mxu1 %v4353_v17  ;;  %v4375_v32 = vld [vmem:[%s6615_s1 + $0x1e4] ss:$16 sps:$4 sm:$0xff]   ;;  %v4379_v34 = vld [vmem:[%s6615_s1 + $0x1e0] ss:$16 sps:$4 sm:$0xff]  }
  0x1f   :  { %v4377_v33 = vld [vmem:[%s6615_s1 + $0x3e4] ss:$16 sps:$4 sm:$0xff]   ;;  %v4380_v35 = vld [vmem:[%s6615_s1 + $0x3e0] ss:$16 sps:$4 sm:$0xff]  }
  0x20   :  { %2869 = vmatpush1.bf16.msra.mxu0 %v4355_v18  ;;  %v4381_v39 = vld [vmem:[%s6615_s1 + $0x1c4] ss:$16 sps:$4 sm:$0xff]   ;;  %v4385_v41 = vld [vmem:[%s6615_s1 + $0x1c0] ss:$16 sps:$4 sm:$0xff]  }
  0x21   :  { %2910 = vmatpush1.bf16.msra.mxu1 %v4356_v19  ;;  %2870 = vmatprep.subr.bf16.mxu0 %v4357_v20  ;;  %v4383_v40 = vld [vmem:[%s6615_s1 + $0x3c4] ss:$16 sps:$4 sm:$0xff]   ;;  %v4386_v44 = vld [vmem:[%s6615_s1 + $0x3c0] ss:$16 sps:$4 sm:$0xff]  }
  0x22   :  { %2911 = vmatprep.subr.bf16.mxu1 %v4359_v21  ;;  %v4387_v45 = vld [vmem:[%s6615_s1 + $0x1a4] ss:$16 sps:$4 sm:$0xff]   ;;  %v4391_v47 = vld [vmem:[%s6615_s1 + $0x1a0] ss:$16 sps:$4 sm:$0xff]  }
  0x23   :  { %v4389_v46 = vld [vmem:[%s6615_s1 + $0x3a4] ss:$16 sps:$4 sm:$0xff]   ;;  %v4392_v48 = vld [vmem:[%s6615_s1 + $0x3a0] ss:$16 sps:$4 sm:$0xff]  }
  0x24   :  { %2871 = vmatpush1.bf16.msra.mxu0 %v4361_v22  ;;  %v4393_v50 = vld [vmem:[%s6615_s1 + $0x184] ss:$16 sps:$4 sm:$0xff]   ;;  %v4397_v53 = vld [vmem:[%s6615_s1 + $0x180] ss:$16 sps:$4 sm:$0xff]  }
  0x25   :  { %2912 = vmatpush1.bf16.msra.mxu1 %v4362_v23  ;;  %2872 = vmatprep.subr.bf16.mxu0 %v4363_v24  ;;  %v4395_v51 = vld [vmem:[%s6615_s1 + $0x384] ss:$16 sps:$4 sm:$0xff]   ;;  %v4398_v55 = vld [vmem:[%s6615_s1 + $0x380] ss:$16 sps:$4 sm:$0xff]  }
  0x26   :  { %2913 = vmatprep.subr.bf16.mxu1 %v4365_v25  ;;  %v36_v52 = vld [vmem:[%s6614_s0] sm:$0xff] }
  0x27   :  { %v517_v54 = vrot.slane %v36_v52, %v5251_v49  ;;  %v4399_v56 = vld [vmem:[%s6615_s1 + $0x164] ss:$16 sps:$4 sm:$0xff]   ;;  %v4403_v59 = vld [vmem:[%s6615_s1 + $0x160] ss:$16 sps:$4 sm:$0xff]   ;;  %v510_v1 = vcombine.high %v36_v52, %v36_v52 }
  0x28   :  { %2873 = vmatpush1.bf16.msra.mxu0 %v4367_v26  ;;  %v4401_v57 = vld [vmem:[%s6615_s1 + $0x364] ss:$16 sps:$4 sm:$0xff]   ;;  %v4404_v61 = vld [vmem:[%s6615_s1 + $0x360] ss:$16 sps:$4 sm:$0xff]  }
  0x29   :  { %2914 = vmatpush1.bf16.msra.mxu1 %v4368_v27  ;;  %2874 = vmatprep.subr.bf16.mxu0 %v4369_v28  ;;  %v525_v58 = vcombine.high %v517_v54, %v517_v54  ;;  %v4405_v62 = vld [vmem:[%s6615_s1 + $0x144] ss:$16 sps:$4 sm:$0xff]   ;;  %v4409_v2 = vld [vmem:[%s6615_s1 + $0x140] ss:$16 sps:$4 sm:$0xff]   ;;  %v5309_v6 = vrot.slane %v510_v1, %v5251_v49  ;;  %v5329_v13 = vrot.slane %v517_v54, %v5251_v49 }
  0x2a   :  { %2915 = vmatprep.subr.bf16.mxu1 %v4371_v29  ;;  %v4407_v63 = vld [vmem:[%s6615_s1 + $0x344] ss:$16 sps:$4 sm:$0xff]   ;;  %v4410_v3 = vld [vmem:[%s6615_s1 + $0x340] ss:$16 sps:$4 sm:$0xff]  }
  0x2b   :  { %v5279_v60 = vrot.slane %v525_v58, %v5251_v49  ;;  %v4411_v4 = vld [vmem:[%s6615_s1 + $0x124] ss:$16 sps:$4 sm:$0xff]   ;;  %v4415_v7 = vld [vmem:[%s6615_s1 + $0x120] ss:$16 sps:$4 sm:$0xff]   ;;  %v526_v11 = vcombine.high %v5309_v6, %v5309_v6  ;;  %v5345_v18 = vcombine.high %v5329_v13, %v5329_v13 }
  0x2c   :  { %2875 = vmatpush1.bf16.msra.mxu0 %v4373_v30  ;;  %v4413_v5 = vld [vmem:[%s6615_s1 + $0x324] ss:$16 sps:$4 sm:$0xff]   ;;  %v4416_v8 = vld [vmem:[%s6615_s1 + $0x320] ss:$16 sps:$4 sm:$0xff]  }
  0x2d   :  { %2916 = vmatpush1.bf16.msra.mxu1 %v4374_v31  ;;  %2876 = vmatprep.subr.bf16.mxu0 %v4375_v32  ;;  %v5292_v0 = vcombine.high %v5279_v60, %v5279_v60  ;;  %v4417_v9 = vld [vmem:[%s6615_s1 + $0x104] ss:$16 sps:$4 sm:$0xff]   ;;  %v4421_v12 = vld [vmem:[%s6615_s1 + $0x100] ss:$16 sps:$4 sm:$0xff]   ;;  %v5341_v17 = vrot.slane %v526_v11, %v5251_v49 }
  0x2e   :  { %2917 = vmatprep.subr.bf16.mxu1 %v4377_v33  ;;  %2892 = vmatprep.mubr.bf16.mxu0 %v5279_v60  ;;  %v4419_v10 = vld [vmem:[%s6615_s1 + $0x304] ss:$16 sps:$4 sm:$0xff]   ;;  %v4422_v14 = vld [vmem:[%s6615_s1 + $0x300] ss:$16 sps:$4 sm:$0xff]  }
  0x2f   :  { %2933 = vmatprep.mubr.bf16.mxu1 %v5292_v0  ;;  %v4425_v15 = vld [vmem:[%s6615_s1 + $0x4e4] ss:$16 sps:$4 sm:$0xff]   ;;  %v4423_v19 = vld [vmem:[%s6615_s1 + $0x4e0] ss:$16 sps:$4 sm:$0xff]   ;;  %v5361_v23 = vcombine.high %v5341_v17, %v5341_v17 }
  0x30   :  { %2877 = vmatpush2.bf16.msra.mxu0 %v4379_v34  ;;  %v4428_v16 = vld [vmem:[%s6615_s1 + $0x6e4] ss:$16 sps:$4 sm:$0xff]   ;;  %v4426_v20 = vld [vmem:[%s6615_s1 + $0x6e0] ss:$16 sps:$4 sm:$0xff]  }
  0x31   :  { %2918 = vmatpush2.bf16.msra.mxu1 %v4380_v35  ;;  %2878 = vmatprep.subr.bf16.mxu0 %v4381_v39  ;;  %v4431_v21 = vld [vmem:[%s6615_s1 + $0x4c4] ss:$16 sps:$4 sm:$0xff]   ;;  %v4429_v24 = vld [vmem:[%s6615_s1 + $0x4c0] ss:$16 sps:$4 sm:$0xff]  }
  0x32   :  { %2919 = vmatprep.subr.bf16.mxu1 %v4383_v40  ;;  %v4434_v22 = vld [vmem:[%s6615_s1 + $0x6c4] ss:$16 sps:$4 sm:$0xff]   ;;  %v4432_v25 = vld [vmem:[%s6615_s1 + $0x6c0] ss:$16 sps:$4 sm:$0xff]  }
  0x33   :  { %v4437_v26 = vld [vmem:[%s6615_s1 + $0x4a4] ss:$16 sps:$4 sm:$0xff]   ;;  %v4435_v28 = vld [vmem:[%s6615_s1 + $0x4a0] ss:$16 sps:$4 sm:$0xff]  }
  0x34   :  { %2879 = vmatpush2.bf16.msra.mxu0 %v4385_v41  ;;  %v4440_v27 = vld [vmem:[%s6615_s1 + $0x6a4] ss:$16 sps:$4 sm:$0xff]   ;;  %v4438_v29 = vld [vmem:[%s6615_s1 + $0x6a0] ss:$16 sps:$4 sm:$0xff]  }
  0x35   :  { %2920 = vmatpush2.bf16.msra.mxu1 %v4386_v44  ;;  %2880 = vmatprep.subr.bf16.mxu0 %v4387_v45  ;;  %v4443_v30 = vld [vmem:[%s6615_s1 + $0x484] ss:$16 sps:$4 sm:$0xff]   ;;  %v4441_v32 = vld [vmem:[%s6615_s1 + $0x480] ss:$16 sps:$4 sm:$0xff]  }
  0x36   :  { %2921 = vmatprep.subr.bf16.mxu1 %v4389_v46  ;;  %v4446_v31 = vld [vmem:[%s6615_s1 + $0x684] ss:$16 sps:$4 sm:$0xff]   ;;  %v4444_v33 = vld [vmem:[%s6615_s1 + $0x680] ss:$16 sps:$4 sm:$0xff]  }
  0x37   :  { %v4449_v34 = vld [vmem:[%s6615_s1 + $0x464] ss:$16 sps:$4 sm:$0xff]   ;;  %v4447_v36 = vld [vmem:[%s6615_s1 + $0x460] ss:$16 sps:$4 sm:$0xff]  }
  0x38   :  { %2881 = vmatpush2.bf16.msra.mxu0 %v4391_v47  ;;  %v4452_v35 = vld [vmem:[%s6615_s1 + $0x664] ss:$16 sps:$4 sm:$0xff]   ;;  %v4450_v37 = vld [vmem:[%s6615_s1 + $0x660] ss:$16 sps:$4 sm:$0xff]  }
  0x39   :  { %2922 = vmatpush2.bf16.msra.mxu1 %v4392_v48  ;;  %2882 = vmatprep.subr.bf16.mxu0 %v4393_v50  ;;  %v4455_v38 = vld [vmem:[%s6615_s1 + $0x444] ss:$16 sps:$4 sm:$0xff]   ;;  %v4453_v40 = vld [vmem:[%s6615_s1 + $0x440] ss:$16 sps:$4 sm:$0xff]  }
  0x3a   :  { %2923 = vmatprep.subr.bf16.mxu1 %v4395_v51  ;;  %v4458_v39 = vld [vmem:[%s6615_s1 + $0x644] ss:$16 sps:$4 sm:$0xff]   ;;  %v4456_v41 = vld [vmem:[%s6615_s1 + $0x640] ss:$16 sps:$4 sm:$0xff]  }
  0x3b   :  { %v4461_v43 = vld [vmem:[%s6615_s1 + $0x424] ss:$16 sps:$4 sm:$0xff]   ;;  %v4459_v45 = vld [vmem:[%s6615_s1 + $0x420] ss:$16 sps:$4 sm:$0xff]  }
  0x3c   :  { %2883 = vmatpush2.bf16.msra.mxu0 %v4397_v53  ;;  %v4464_v44 = vld [vmem:[%s6615_s1 + $0x624] ss:$16 sps:$4 sm:$0xff]   ;;  %v4462_v46 = vld [vmem:[%s6615_s1 + $0x620] ss:$16 sps:$4 sm:$0xff]  }
  0x3d   :  { %2924 = vmatpush2.bf16.msra.mxu1 %v4398_v55  ;;  %2884 = vmatprep.subr.bf16.mxu0 %v4399_v56  ;;  %v4467_v47 = vld [vmem:[%s6615_s1 + $0x404] ss:$16 sps:$4 sm:$0xff]   ;;  %v4465_v50 = vld [vmem:[%s6615_s1 + $0x400] ss:$16 sps:$4 sm:$0xff]  }
  0x3e   :  { %2925 = vmatprep.subr.bf16.mxu1 %v4401_v57  ;;  %v4470_v48 = vld [vmem:[%s6615_s1 + $0x604] ss:$16 sps:$4 sm:$0xff]   ;;  %v4468_v51 = vld [vmem:[%s6615_s1 + $0x600] ss:$16 sps:$4 sm:$0xff]  }
  0x3f   :  { %v4473_v52 = vld [vmem:[%s6615_s1 + $0x5e4] ss:$16 sps:$4 sm:$0xff]   ;;  %v4471_v54 = vld [vmem:[%s6615_s1 + $0x5e0] ss:$16 sps:$4 sm:$0xff]  }
  0x40   :  { %2885 = vmatpush2.bf16.msra.mxu0 %v4403_v59  ;;  %v4476_v53 = vld [vmem:[%s6615_s1 + $0x7e4] ss:$16 sps:$4 sm:$0xff]   ;;  %v4474_v55 = vld [vmem:[%s6615_s1 + $0x7e0] ss:$16 sps:$4 sm:$0xff]  }
  0x41   :  { %2926 = vmatpush2.bf16.msra.mxu1 %v4404_v61  ;;  %2886 = vmatprep.subr.bf16.mxu0 %v4405_v62  ;;  %v4479_v56 = vld [vmem:[%s6615_s1 + $0x5c4] ss:$16 sps:$4 sm:$0xff]   ;;  %v4477_v58 = vld [vmem:[%s6615_s1 + $0x5c0] ss:$16 sps:$4 sm:$0xff]  }
  0x42   :  { %2927 = vmatprep.subr.bf16.mxu1 %v4407_v63  ;;  %v4482_v57 = vld [vmem:[%s6615_s1 + $0x7c4] ss:$16 sps:$4 sm:$0xff]   ;;  %v4480_v59 = vld [vmem:[%s6615_s1 + $0x7c0] ss:$16 sps:$4 sm:$0xff]  }
  0x43   :  { %v4485_v61 = vld [vmem:[%s6615_s1 + $0x5a4] ss:$16 sps:$4 sm:$0xff]   ;;  %v4483_v63 = vld [vmem:[%s6615_s1 + $0x5a0] ss:$16 sps:$4 sm:$0xff]  }
  0x44   :  { %2887 = vmatpush2.bf16.msra.mxu0 %v4409_v2  ;;  %v4488_v62 = vld [vmem:[%s6615_s1 + $0x7a4] ss:$16 sps:$4 sm:$0xff]   ;;  %v4486_v1 = vld [vmem:[%s6615_s1 + $0x7a0] ss:$16 sps:$4 sm:$0xff]  }
  0x45   :  { %2928 = vmatpush2.bf16.msra.mxu1 %v4410_v3  ;;  %2888 = vmatprep.subr.bf16.mxu0 %v4411_v4  ;;  %v4491_v2 = vld [vmem:[%s6615_s1 + $0x584] ss:$16 sps:$4 sm:$0xff]   ;;  %v4489_v4 = vld [vmem:[%s6615_s1 + $0x580] ss:$16 sps:$4 sm:$0xff]  }
  0x46   :  { %2929 = vmatprep.subr.bf16.mxu1 %v4413_v5  ;;  %v4494_v3 = vld [vmem:[%s6615_s1 + $0x784] ss:$16 sps:$4 sm:$0xff]   ;;  %v4492_v5 = vld [vmem:[%s6615_s1 + $0x780] ss:$16 sps:$4 sm:$0xff]  }
  0x47   :  { %v4503_v11 = vld [vmem:[%s6615_s1 + $0x544] ss:$16 sps:$4 sm:$0xff]  }
  0x48   :  { %2889 = vmatpush2.bf16.msra.mxu0 %v4415_v7  ;;  %v4497_v7 = vld [vmem:[%s6615_s1 + $0x564] ss:$16 sps:$4 sm:$0xff]  }
  0x49   :  { %2930 = vmatpush2.bf16.msra.mxu1 %v4416_v8  ;;  %2890 = vmatprep.subr.bf16.mxu0 %v4417_v9  ;;  %v4500_v8 = vld [vmem:[%s6615_s1 + $0x764] ss:$16 sps:$4 sm:$0xff]   ;;  %v4495_v9 = vld [vmem:[%s6615_s1 + $0x560] ss:$16 sps:$4 sm:$0xff]  }
  0x4a   :  { %2931 = vmatprep.subr.bf16.mxu1 %v4419_v10  ;;  %v4498_v10 = vld [vmem:[%s6615_s1 + $0x760] ss:$16 sps:$4 sm:$0xff]  }
  0x4c   :  { %2891 = vmatpush2.bf16.msra.mxu0 %v4421_v12  ;;  %v4506_v12 = vld [vmem:[%s6615_s1 + $0x744] ss:$16 sps:$4 sm:$0xff]  }
  0x4d   :  { %2932 = vmatpush2.bf16.msra.mxu1 %v4422_v14  ;;  %2942 = vmatprep.subr.bf16.mxu0 %v4425_v15  ;;  %v4501_v14 = vld [vmem:[%s6615_s1 + $0x540] ss:$16 sps:$4 sm:$0xff]  }
  0x4e   :  { %2983 = vmatprep.subr.bf16.mxu1 %v4428_v16  ;;  %v4504_v15 = vld [vmem:[%s6615_s1 + $0x740] ss:$16 sps:$4 sm:$0xff]   ;;  %v4509_v16 = vld [vmem:[%s6615_s1 + $0x524] ss:$16 sps:$4 sm:$0xff]  }
  0x4f   :  { %2893 = vmatmul.mubr.bf16.vlgmr.msra.gmra.mxu0 %v5329_v13 }
  0x50   :  { %2934 = vmatmul.mubr.bf16.vlgmr.msra.gmra.mxu1 %v5345_v18  ;;  %2943 = vmatpush1.bf16.msra.mxu0 %v4423_v19  ;;  %v4512_v19 = vld [vmem:[%s6615_s1 + $0x724] ss:$16 sps:$4 sm:$0xff]  }
  0x51   :  { %2984 = vmatpush1.bf16.msra.mxu1 %v4426_v20  ;;  %2944 = vmatprep.subr.bf16.mxu0 %v4431_v21  ;;  %v4507_v20 = vld [vmem:[%s6615_s1 + $0x520] ss:$16 sps:$4 sm:$0xff]  }
  0x52   :  { %2985 = vmatprep.subr.bf16.mxu1 %v4434_v22  ;;  %2974 = vmatprep.mubr.bf16.mxu0 %v5341_v17  ;;  %v4510_v21 = vld [vmem:[%s6615_s1 + $0x720] ss:$16 sps:$4 sm:$0xff]   ;;  %v4515_v22 = vld [vmem:[%s6615_s1 + $0x504] ss:$16 sps:$4 sm:$0xff]  }
  0x53   :  { %3015 = vmatprep.mubr.bf16.mxu1 %v5361_v23 }
  0x54   :  { %2945 = vmatpush1.bf16.msra.mxu0 %v4429_v24  ;;  %v4518_v24 = vld [vmem:[%s6615_s1 + $0x704] ss:$16 sps:$4 sm:$0xff]  }
  0x55   :  { %2986 = vmatpush1.bf16.msra.mxu1 %v4432_v25  ;;  %2946 = vmatprep.subr.bf16.mxu0 %v4437_v26  ;;  %v4513_v25 = vld [vmem:[%s6615_s1 + $0x500] ss:$16 sps:$4 sm:$0xff]   ;;  %v5540_v26 = vrot.slane %v5309_v6, %v5251_v49 }
  0x56   :  { %2987 = vmatprep.subr.bf16.mxu1 %v4440_v27  ;;  %v4516_v27 = vld [vmem:[%s6615_s1 + $0x700] ss:$16 sps:$4 sm:$0xff]  }
  0x57   :  { %v5553_v6 = vcombine.high %v5540_v26, %v5540_v26 }
  0x58   :  { %2947 = vmatpush1.bf16.msra.mxu0 %v4435_v28  ;;  %v4522_v28 = vld [vmem:[%s6615_s1 + $0x8e4] ss:$16 sps:$4 sm:$0xff]  }
  0x59   :  { %2988 = vmatpush1.bf16.msra.mxu1 %v4438_v29  ;;  %2948 = vmatprep.subr.bf16.mxu0 %v4443_v30  ;;  %v4525_v29 = vld [vmem:[%s6615_s1 + $0xae4] ss:$16 sps:$4 sm:$0xff]   ;;  %v4520_v30 = vld [vmem:[%s6615_s1 + $0x8e0] ss:$16 sps:$4 sm:$0xff]  }
  0x5a   :  { %2989 = vmatprep.subr.bf16.mxu1 %v4446_v31  ;;  %v4523_v31 = vld [vmem:[%s6615_s1 + $0xae0] ss:$16 sps:$4 sm:$0xff]  }
  0x5c   :  { %2949 = vmatpush1.bf16.msra.mxu0 %v4441_v32  ;;  %v5564_v32 = vld [vmem:[%s6614_s0 + $0x8] sm:$0x3f] }
  0x5d   :  { %2990 = vmatpush1.bf16.msra.mxu1 %v4444_v33  ;;  %2950 = vmatprep.subr.bf16.mxu0 %v4449_v34  ;;  %v4528_v33 = vld [vmem:[%s6615_s1 + $0x8c4] ss:$16 sps:$4 sm:$0xff]  }
  0x5e   :  { %2991 = vmatprep.subr.bf16.mxu1 %v4452_v35  ;;  %v4531_v34 = vld [vmem:[%s6615_s1 + $0xac4] ss:$16 sps:$4 sm:$0xff]   ;;  %v5574_v35 = vrot.slane %v5564_v32, %v5251_v49 }
  0x60   :  { %2951 = vmatpush1.bf16.msra.mxu0 %v4447_v36  ;;  %v574_v36 = vcombine.high %v5574_v35, %v5574_v35 }
  0x61   :  { %2992 = vmatpush1.bf16.msra.mxu1 %v4450_v37  ;;  %2952 = vmatprep.subr.bf16.mxu0 %v4455_v38  ;;  %v4526_v37 = vld [vmem:[%s6615_s1 + $0x8c0] ss:$16 sps:$4 sm:$0xff]  }
  0x62   :  { %2993 = vmatprep.subr.bf16.mxu1 %v4458_v39  ;;  %v4529_v38 = vld [vmem:[%s6615_s1 + $0xac0] ss:$16 sps:$4 sm:$0xff]   ;;  %v4534_v39 = vld [vmem:[%s6615_s1 + $0x8a4] ss:$16 sps:$4 sm:$0xff]  }
  0x64   :  { %2953 = vmatpush1.bf16.msra.mxu0 %v4453_v40  ;;  %v4537_v40 = vld [vmem:[%s6615_s1 + $0xaa4] ss:$16 sps:$4 sm:$0xff]  }
  0x65   :  { %2994 = vmatpush1.bf16.msra.mxu1 %v4456_v41  ;;  %2954 = vmatprep.subr.bf16.mxu0 %v4461_v43  ;;  %v5593_v41 = vrot.slane %v574_v36, %v5251_v49  ;;  %v4601_v36 = vld [vmem:[%s6615_s1 + $0xb40] ss:$16 sps:$4 sm:$0xff]  }
  0x66   :  { %2995 = vmatprep.subr.bf16.mxu1 %v4464_v44  ;;  %v4532_v44 = vld [vmem:[%s6615_s1 + $0x8a0] ss:$16 sps:$4 sm:$0xff]  }
  0x67   :  { %v5598_v43 = vcombine.high %v5593_v41, %v5593_v41 }
  0x68   :  { %2955 = vmatpush1.bf16.msra.mxu0 %v4459_v45  ;;  %v4535_v45 = vld [vmem:[%s6615_s1 + $0xaa0] ss:$16 sps:$4 sm:$0xff]  }
  0x69   :  { %2996 = vmatpush1.bf16.msra.mxu1 %v4462_v46  ;;  %2956 = vmatprep.subr.bf16.mxu0 %v4467_v47  ;;  %v4540_v46 = vld [vmem:[%s6615_s1 + $0x884] ss:$16 sps:$4 sm:$0xff]  }
  0x6a   :  { %2997 = vmatprep.subr.bf16.mxu1 %v4470_v48  ;;  %v4543_v47 = vld [vmem:[%s6615_s1 + $0xa84] ss:$16 sps:$4 sm:$0xff]   ;;  %v4538_v48 = vld [vmem:[%s6615_s1 + $0x880] ss:$16 sps:$4 sm:$0xff]  }
  0x6c   :  { %2957 = vmatpush1.bf16.msra.mxu0 %v4465_v50  ;;  %v4541_v50 = vld [vmem:[%s6615_s1 + $0xa80] ss:$16 sps:$4 sm:$0xff]  }
  0x6d   :  { %2998 = vmatpush1.bf16.msra.mxu1 %v4468_v51  ;;  %2958 = vmatprep.subr.bf16.mxu0 %v4473_v52  ;;  %v4546_v51 = vld [vmem:[%s6615_s1 + $0x864] ss:$16 sps:$4 sm:$0xff]  }
  0x6e   :  { %2999 = vmatprep.subr.bf16.mxu1 %v4476_v53  ;;  %v4549_v52 = vld [vmem:[%s6615_s1 + $0xa64] ss:$16 sps:$4 sm:$0xff]   ;;  %v4544_v53 = vld [vmem:[%s6615_s1 + $0x860] ss:$16 sps:$4 sm:$0xff]  }
  0x70   :  { %2959 = vmatpush2.bf16.msra.mxu0 %v4471_v54  ;;  %v4547_v54 = vld [vmem:[%s6615_s1 + $0xa60] ss:$16 sps:$4 sm:$0xff]  }
  0x71   :  { %3000 = vmatpush2.bf16.msra.mxu1 %v4474_v55  ;;  %2960 = vmatprep.subr.bf16.mxu0 %v4479_v56  ;;  %v4552_v55 = vld [vmem:[%s6615_s1 + $0x844] ss:$16 sps:$4 sm:$0xff]  }
  0x72   :  { %3001 = vmatprep.subr.bf16.mxu1 %v4482_v57  ;;  %v4555_v56 = vld [vmem:[%s6615_s1 + $0xa44] ss:$16 sps:$4 sm:$0xff]   ;;  %v4550_v57 = vld [vmem:[%s6615_s1 + $0x840] ss:$16 sps:$4 sm:$0xff]  }
  0x74   :  { %2961 = vmatpush2.bf16.msra.mxu0 %v4477_v58  ;;  %v4553_v58 = vld [vmem:[%s6615_s1 + $0xa40] ss:$16 sps:$4 sm:$0xff]  }
  0x75   :  { %3002 = vmatpush2.bf16.msra.mxu1 %v4480_v59  ;;  %2962 = vmatprep.subr.bf16.mxu0 %v4485_v61  ;;  %v4558_v59 = vld [vmem:[%s6615_s1 + $0x824] ss:$16 sps:$4 sm:$0xff]  }
  0x76   :  { %3003 = vmatprep.subr.bf16.mxu1 %v4488_v62  ;;  %v4561_v61 = vld [vmem:[%s6615_s1 + $0xa24] ss:$16 sps:$4 sm:$0xff]   ;;  %v4556_v62 = vld [vmem:[%s6615_s1 + $0x820] ss:$16 sps:$4 sm:$0xff]  }
  0x78   :  { %2963 = vmatpush2.bf16.msra.mxu0 %v4483_v63  ;;  %v4559_v63 = vld [vmem:[%s6615_s1 + $0xa20] ss:$16 sps:$4 sm:$0xff]  }
  0x79   :  { %3004 = vmatpush2.bf16.msra.mxu1 %v4486_v1  ;;  %2964 = vmatprep.subr.bf16.mxu0 %v4491_v2  ;;  %v4564_v1 = vld [vmem:[%s6615_s1 + $0x804] ss:$16 sps:$4 sm:$0xff]  }
  0x7a   :  { %3005 = vmatprep.subr.bf16.mxu1 %v4494_v3  ;;  %v4567_v2 = vld [vmem:[%s6615_s1 + $0xa04] ss:$16 sps:$4 sm:$0xff]   ;;  %v4562_v3 = vld [vmem:[%s6615_s1 + $0x800] ss:$16 sps:$4 sm:$0xff]  }
  0x7c   :  { %2965 = vmatpush2.bf16.msra.mxu0 %v4489_v4  ;;  %v4565_v4 = vld [vmem:[%s6615_s1 + $0xa00] ss:$16 sps:$4 sm:$0xff]  }
  0x7d   :  { %3006 = vmatpush2.bf16.msra.mxu1 %v4492_v5  ;;  %2966 = vmatprep.subr.bf16.mxu0 %v4497_v7  ;;  %v4570_v5 = vld [vmem:[%s6615_s1 + $0x9e4] ss:$16 sps:$4 sm:$0xff]  }
  0x7e   :  { %3007 = vmatprep.subr.bf16.mxu1 %v4500_v8  ;;  %v4573_v7 = vld [vmem:[%s6615_s1 + $0xbe4] ss:$16 sps:$4 sm:$0xff]   ;;  %v4568_v8 = vld [vmem:[%s6615_s1 + $0x9e0] ss:$16 sps:$4 sm:$0xff]  }
  0x80   :  { %2967 = vmatpush2.bf16.msra.mxu0 %v4495_v9  ;;  %v4571_v9 = vld [vmem:[%s6615_s1 + $0xbe0] ss:$16 sps:$4 sm:$0xff]  }
  0x81   :  { %3008 = vmatpush2.bf16.msra.mxu1 %v4498_v10  ;;  %2968 = vmatprep.subr.bf16.mxu0 %v4503_v11  ;;  %v4576_v10 = vld [vmem:[%s6615_s1 + $0x9c4] ss:$16 sps:$4 sm:$0xff]  }
  0x82   :  { %3009 = vmatprep.subr.bf16.mxu1 %v4506_v12  ;;  %v4579_v11 = vld [vmem:[%s6615_s1 + $0xbc4] ss:$16 sps:$4 sm:$0xff]   ;;  %v4574_v12 = vld [vmem:[%s6615_s1 + $0x9c0] ss:$16 sps:$4 sm:$0xff]  }
  0x84   :  { %2969 = vmatpush2.bf16.msra.mxu0 %v4501_v14  ;;  %v4577_v14 = vld [vmem:[%s6615_s1 + $0xbc0] ss:$16 sps:$4 sm:$0xff]  }
  0x85   :  { %3010 = vmatpush2.bf16.msra.mxu1 %v4504_v15  ;;  %2970 = vmatprep.subr.bf16.mxu0 %v4509_v16  ;;  %v4582_v15 = vld [vmem:[%s6615_s1 + $0x9a4] ss:$16 sps:$4 sm:$0xff]  }
  0x86   :  { %3011 = vmatprep.subr.bf16.mxu1 %v4512_v19  ;;  %v4585_v16 = vld [vmem:[%s6615_s1 + $0xba4] ss:$16 sps:$4 sm:$0xff]   ;;  %v4580_v19 = vld [vmem:[%s6615_s1 + $0x9a0] ss:$16 sps:$4 sm:$0xff]  }
  0x88   :  { %2971 = vmatpush2.bf16.msra.mxu0 %v4507_v20  ;;  %v4583_v20 = vld [vmem:[%s6615_s1 + $0xba0] ss:$16 sps:$4 sm:$0xff]  }
  0x89   :  { %3012 = vmatpush2.bf16.msra.mxu1 %v4510_v21  ;;  %2972 = vmatprep.subr.bf16.mxu0 %v4515_v22  ;;  %v4588_v21 = vld [vmem:[%s6615_s1 + $0x984] ss:$16 sps:$4 sm:$0xff]  }
  0x8a   :  { %3013 = vmatprep.subr.bf16.mxu1 %v4518_v24  ;;  %v4591_v22 = vld [vmem:[%s6615_s1 + $0xb84] ss:$16 sps:$4 sm:$0xff]   ;;  %v4586_v24 = vld [vmem:[%s6615_s1 + $0x980] ss:$16 sps:$4 sm:$0xff]  }
  0x8c   :  { %2973 = vmatpush2.bf16.msra.mxu0 %v4513_v25  ;;  %v4589_v25 = vld [vmem:[%s6615_s1 + $0xb80] ss:$16 sps:$4 sm:$0xff]  }
  0x8d   :  { %3014 = vmatpush2.bf16.msra.mxu1 %v4516_v27  ;;  %3024 = vmatprep.subr.bf16.mxu0 %v4522_v28  ;;  %v4594_v27 = vld [vmem:[%s6615_s1 + $0x964] ss:$16 sps:$4 sm:$0xff]  }
  0x8e   :  { %3065 = vmatprep.subr.bf16.mxu1 %v4525_v29  ;;  %v4597_v28 = vld [vmem:[%s6615_s1 + $0xb64] ss:$16 sps:$4 sm:$0xff]   ;;  %v4592_v29 = vld [vmem:[%s6615_s1 + $0x960] ss:$16 sps:$4 sm:$0xff]  }
  0x8f   :  { %2975 = vmatmul.mubr.bf16.vlgmr.msra.gmra.mxu0 %v5540_v26 }
  0x90   :  { %3016 = vmatmul.mubr.bf16.vlgmr.msra.gmra.mxu1 %v5553_v6  ;;  %3025 = vmatpush1.bf16.msra.mxu0 %v4520_v30  ;;  %v4595_v30 = vld [vmem:[%s6615_s1 + $0xb60] ss:$16 sps:$4 sm:$0xff]  }
  0x91   :  { %3066 = vmatpush1.bf16.msra.mxu1 %v4523_v31  ;;  %3026 = vmatprep.subr.bf16.mxu0 %v4528_v33  ;;  %v4600_v31 = vld [vmem:[%s6615_s1 + $0x944] ss:$16 sps:$4 sm:$0xff]  }
  0x92   :  { %3067 = vmatprep.subr.bf16.mxu1 %v4531_v34  ;;  %3056 = vmatprep.mubr.bf16.mxu0 %v5593_v41  ;;  %v4603_v33 = vld [vmem:[%s6615_s1 + $0xb44] ss:$16 sps:$4 sm:$0xff]   ;;  %v4598_v34 = vld [vmem:[%s6615_s1 + $0x940] ss:$16 sps:$4 sm:$0xff]  }
  0x93   :  { %3097 = vmatprep.mubr.bf16.mxu1 %v5598_v43 }
  0x94   :  { %3027 = vmatpush1.bf16.msra.mxu0 %v4526_v37  ;;  %v4606_v37 = vld [vmem:[%s6615_s1 + $0x924] ss:$16 sps:$4 sm:$0xff]  }
  0x95   :  { %3068 = vmatpush1.bf16.msra.mxu1 %v4529_v38  ;;  %3028 = vmatprep.subr.bf16.mxu0 %v4534_v39  ;;  %v4609_v38 = vld [vmem:[%s6615_s1 + $0xb24] ss:$16 sps:$4 sm:$0xff]   ;;  %v559_v39 = vcombine.high %v5564_v32, %v5564_v32 }
  0x96   :  { %3069 = vmatprep.subr.bf16.mxu1 %v4537_v40  ;;  %v4604_v40 = vld [vmem:[%s6615_s1 + $0x920] ss:$16 sps:$4 sm:$0xff]   ;;  %v4615_v32 = vld [vmem:[%s6615_s1 + $0xb04] ss:$16 sps:$4 sm:$0xff]  }
  0x98   :  { %3029 = vmatpush1.bf16.msra.mxu0 %v4532_v44  ;;  %v4607_v44 = vld [vmem:[%s6615_s1 + $0xb20] ss:$16 sps:$4 sm:$0xff]  }
  0x99   :  { %3070 = vmatpush1.bf16.msra.mxu1 %v4535_v45  ;;  %3030 = vmatprep.subr.bf16.mxu0 %v4540_v46  ;;  %v4612_v45 = vld [vmem:[%s6615_s1 + $0x904] ss:$16 sps:$4 sm:$0xff]   ;;  %v5760_v46 = vrot.slane %v559_v39, %v5251_v49  ;;  %v4681_v39 = vld [vmem:[%s6615_s1 + $0x1ac] ss:$16 sps:$4 sm:$0xff]  }
  0x9a   :  { %3071 = vmatprep.subr.bf16.mxu1 %v4543_v47  ;;  %v4610_v47 = vld [vmem:[%s6615_s1 + $0x900] ss:$16 sps:$4 sm:$0xff]  }
  0x9c   :  { %3031 = vmatpush1.bf16.msra.mxu0 %v4538_v48  ;;  %v5767_v48 = vrot.slane %v5574_v35, %v5251_v49  ;;  %v575_v35 = vcombine.high %v5760_v46, %v5760_v46 }
  0x9d   :  { %3072 = vmatpush1.bf16.msra.mxu1 %v4541_v50  ;;  %3032 = vmatprep.subr.bf16.mxu0 %v4546_v51  ;;  %v4613_v50 = vld [vmem:[%s6615_s1 + $0xb00] ss:$16 sps:$4 sm:$0xff]   ;;  %v4618_v51 = vld [vmem:[%s6615_s1 + $0xce4] ss:$16 sps:$4 sm:$0xff]  }
  0x9e   :  { %3073 = vmatprep.subr.bf16.mxu1 %v4549_v52  ;;  %v4621_v52 = vld [vmem:[%s6615_s1 + $0xec] ss:$16 sps:$4 sm:$0xff]  }
  0xa0   :  { %3033 = vmatpush1.bf16.msra.mxu0 %v4544_v53  ;;  %v5782_v53 = vcombine.high %v5767_v48, %v5767_v48 }
  0xa1   :  { %3074 = vmatpush1.bf16.msra.mxu1 %v4547_v54  ;;  %3034 = vmatprep.subr.bf16.mxu0 %v4552_v55  ;;  %v4616_v54 = vld [vmem:[%s6615_s1 + $0xce0] ss:$16 sps:$4 sm:$0xff]   ;;  %v4619_v55 = vld [vmem:[%s6615_s1 + $0xe8] ss:$16 sps:$4 sm:$0xff]  }
  0xa2   :  { %3075 = vmatprep.subr.bf16.mxu1 %v4555_v56  ;;  %v4624_v56 = vld [vmem:[%s6615_s1 + $0xcc4] ss:$16 sps:$4 sm:$0xff]  }
  0xa4   :  { %3035 = vmatpush1.bf16.msra.mxu0 %v4550_v57  ;;  %v4627_v57 = vld [vmem:[%s6615_s1 + $0xcc] ss:$16 sps:$4 sm:$0xff]  }
  0xa5   :  { %3076 = vmatpush1.bf16.msra.mxu1 %v4553_v58  ;;  %3036 = vmatprep.subr.bf16.mxu0 %v4558_v59  ;;  %v5797_v58 = vrot.slane %v575_v35, %v5251_v49  ;;  %v4622_v59 = vld [vmem:[%s6615_s1 + $0xcc0] ss:$16 sps:$4 sm:$0xff]  }
  0xa6   :  { %3077 = vmatprep.subr.bf16.mxu1 %v4561_v61  ;;  %v4625_v61 = vld [vmem:[%s6615_s1 + $0xc8] ss:$16 sps:$4 sm:$0xff]   ;;  %v4688_v35 = vld [vmem:[%s6615_s1 + $0xd60] ss:$16 sps:$4 sm:$0xff]  }
  0xa8   :  { %3037 = vmatpush1.bf16.msra.mxu0 %v4556_v62  ;;  %v4630_v62 = vld [vmem:[%s6615_s1 + $0xca4] ss:$16 sps:$4 sm:$0xff]  }
  0xa9   :  { %3078 = vmatpush1.bf16.msra.mxu1 %v4559_v63  ;;  %3038 = vmatprep.subr.bf16.mxu0 %v4564_v1  ;;  %v4633_v63 = vld [vmem:[%s6615_s1 + $0xac] ss:$16 sps:$4 sm:$0xff]   ;;  %v4628_v1 = vld [vmem:[%s6615_s1 + $0xca0] ss:$16 sps:$4 sm:$0xff]  }
  0xaa   :  { %3079 = vmatprep.subr.bf16.mxu1 %v4567_v2  ;;  %v4631_v2 = vld [vmem:[%s6615_s1 + $0xa8] ss:$16 sps:$4 sm:$0xff]  }
  0xac   :  { %3039 = vmatpush1.bf16.msra.mxu0 %v4562_v3  ;;  %v4636_v3 = vld [vmem:[%s6615_s1 + $0xc84] ss:$16 sps:$4 sm:$0xff]  }
  0xad   :  { %3080 = vmatpush1.bf16.msra.mxu1 %v4565_v4  ;;  %3040 = vmatprep.subr.bf16.mxu0 %v4570_v5  ;;  %v4634_v4 = vld [vmem:[%s6615_s1 + $0xc80] ss:$16 sps:$4 sm:$0xff]   ;;  %v4637_v5 = vld [vmem:[%s6615_s1 + $0x88] ss:$16 sps:$4 sm:$0xff]  }
  0xae   :  { %3081 = vmatprep.subr.bf16.mxu1 %v4573_v7  ;;  %v4642_v7 = vld [vmem:[%s6615_s1 + $0xc64] ss:$16 sps:$4 sm:$0xff]  }
  0xb0   :  { %3041 = vmatpush2.bf16.msra.mxu0 %v4568_v8  ;;  %v4645_v8 = vld [vmem:[%s6615_s1 + $0x6c] ss:$16 sps:$4 sm:$0xff]  }
  0xb1   :  { %3082 = vmatpush2.bf16.msra.mxu1 %v4571_v9  ;;  %3042 = vmatprep.subr.bf16.mxu0 %v4576_v10  ;;  %v4640_v9 = vld [vmem:[%s6615_s1 + $0xc60] ss:$16 sps:$4 sm:$0xff]   ;;  %v4643_v10 = vld [vmem:[%s6615_s1 + $0x68] ss:$16 sps:$4 sm:$0xff]  }
  0xb2   :  { %3083 = vmatprep.subr.bf16.mxu1 %v4579_v11  ;;  %v4648_v11 = vld [vmem:[%s6615_s1 + $0xc44] ss:$16 sps:$4 sm:$0xff]  }
  0xb4   :  { %3043 = vmatpush2.bf16.msra.mxu0 %v4574_v12  ;;  %v4651_v12 = vld [vmem:[%s6615_s1 + $0x4c] ss:$16 sps:$4 sm:$0xff]  }
  0xb5   :  { %3084 = vmatpush2.bf16.msra.mxu1 %v4577_v14  ;;  %3044 = vmatprep.subr.bf16.mxu0 %v4582_v15  ;;  %v4646_v14 = vld [vmem:[%s6615_s1 + $0xc40] ss:$16 sps:$4 sm:$0xff]   ;;  %v4649_v15 = vld [vmem:[%s6615_s1 + $0x48] ss:$16 sps:$4 sm:$0xff]  }
  0xb6   :  { %3085 = vmatprep.subr.bf16.mxu1 %v4585_v16  ;;  %v4654_v16 = vld [vmem:[%s6615_s1 + $0xc24] ss:$16 sps:$4 sm:$0xff]  }
  0xb8   :  { %3045 = vmatpush2.bf16.msra.mxu0 %v4580_v19  ;;  %v4657_v19 = vld [vmem:[%s6615_s1 + $0x2c] ss:$16 sps:$4 sm:$0xff]  }
  0xb9   :  { %3086 = vmatpush2.bf16.msra.mxu1 %v4583_v20  ;;  %3046 = vmatprep.subr.bf16.mxu0 %v4588_v21  ;;  %v4652_v20 = vld [vmem:[%s6615_s1 + $0xc20] ss:$16 sps:$4 sm:$0xff]   ;;  %v4655_v21 = vld [vmem:[%s6615_s1 + $0x28] ss:$16 sps:$4 sm:$0xff]  }
  0xba   :  { %3087 = vmatprep.subr.bf16.mxu1 %v4591_v22  ;;  %v4660_v22 = vld [vmem:[%s6615_s1 + $0xc04] ss:$16 sps:$4 sm:$0xff]  }
  0xbc   :  { %3047 = vmatpush2.bf16.msra.mxu0 %v4586_v24  ;;  %v4663_v24 = vld [vmem:[%s6615_s1 + $0xc] ss:$16 sps:$4 sm:$0xff]  }
  0xbd   :  { %3088 = vmatpush2.bf16.msra.mxu1 %v4589_v25  ;;  %3048 = vmatprep.subr.bf16.mxu0 %v4594_v27  ;;  %v4658_v25 = vld [vmem:[%s6615_s1 + $0xc00] ss:$16 sps:$4 sm:$0xff]   ;;  %v4661_v27 = vld [vmem:[%s6615_s1 + $0x8] ss:$16 sps:$4 sm:$0xff]  }
  0xbe   :  { %3089 = vmatprep.subr.bf16.mxu1 %v4597_v28  ;;  %v4666_v28 = vld [vmem:[%s6615_s1 + $0xde4] ss:$16 sps:$4 sm:$0xff]  }
  0xc0   :  { %3049 = vmatpush2.bf16.msra.mxu0 %v4592_v29  ;;  %v4669_v29 = vld [vmem:[%s6615_s1 + $0x1ec] ss:$16 sps:$4 sm:$0xff]  }
  0xc1   :  { %3090 = vmatpush2.bf16.msra.mxu1 %v4595_v30  ;;  %3050 = vmatprep.subr.bf16.mxu0 %v4600_v31  ;;  %v4664_v30 = vld [vmem:[%s6615_s1 + $0xde0] ss:$16 sps:$4 sm:$0xff]   ;;  %v4667_v31 = vld [vmem:[%s6615_s1 + $0x1e8] ss:$16 sps:$4 sm:$0xff]  }
  0xc2   :  { %3091 = vmatprep.subr.bf16.mxu1 %v4603_v33  ;;  %v4672_v33 = vld [vmem:[%s6615_s1 + $0xdc4] ss:$16 sps:$4 sm:$0xff]  }
  0xc4   :  { %3051 = vmatpush2.bf16.msra.mxu0 %v4598_v34  ;;  %v4675_v34 = vld [vmem:[%s6615_s1 + $0x1cc] ss:$16 sps:$4 sm:$0xff]  }
  0xc5   :  { %3092 = vmatpush2.bf16.msra.mxu1 %v4601_v36  ;;  %3052 = vmatprep.subr.bf16.mxu0 %v4606_v37  ;;  %v4670_v36 = vld [vmem:[%s6615_s1 + $0xdc0] ss:$16 sps:$4 sm:$0xff]   ;;  %v4673_v37 = vld [vmem:[%s6615_s1 + $0x1c8] ss:$16 sps:$4 sm:$0xff]  }
  0xc6   :  { %3093 = vmatprep.subr.bf16.mxu1 %v4609_v38  ;;  %v4678_v38 = vld [vmem:[%s6615_s1 + $0xda4] ss:$16 sps:$4 sm:$0xff]  }
  0xc8   :  { %3053 = vmatpush2.bf16.msra.mxu0 %v4604_v40  ;;  %v4676_v40 = vld [vmem:[%s6615_s1 + $0xda0] ss:$16 sps:$4 sm:$0xff]  }
  0xc9   :  { %3094 = vmatpush2.bf16.msra.mxu1 %v4607_v44  ;;  %3054 = vmatprep.subr.bf16.mxu0 %v4612_v45  ;;  %v4679_v44 = vld [vmem:[%s6615_s1 + $0x1a8] ss:$16 sps:$4 sm:$0xff]   ;;  %v4684_v45 = vld [vmem:[%s6615_s1 + $0xd84] ss:$16 sps:$4 sm:$0xff]  }
  0xca   :  { %3095 = vmatprep.subr.bf16.mxu1 %v4615_v32  ;;  %v4687_v32 = vld [vmem:[%s6615_s1 + $0x18c] ss:$16 sps:$4 sm:$0xff]  }
  0xcc   :  { %3055 = vmatpush2.bf16.msra.mxu0 %v4610_v47  ;;  %v4682_v47 = vld [vmem:[%s6615_s1 + $0xd80] ss:$16 sps:$4 sm:$0xff]  }
  0xcd   :  { %3096 = vmatpush2.bf16.msra.mxu1 %v4613_v50  ;;  %3106 = vmatprep.subr.bf16.mxu0 %v4618_v51  ;;  %v4685_v50 = vld [vmem:[%s6615_s1 + $0x188] ss:$16 sps:$4 sm:$0xff]   ;;  %v4690_v51 = vld [vmem:[%s6615_s1 + $0xd64] ss:$16 sps:$4 sm:$0xff]  }
  0xce   :  { %3147 = vmatprep.subr.bf16.mxu1 %v4621_v52  ;;  %v4693_v52 = vld [vmem:[%s6615_s1 + $0x16c] ss:$16 sps:$4 sm:$0xff]  }
  0xcf   :  { %3057 = vmatmul.mubr.bf16.vlgmr.msra.gmra.mxu0 %v5767_v48 }
  0xd0   :  { %3098 = vmatmul.mubr.bf16.vlgmr.msra.gmra.mxu1 %v5782_v53  ;;  %3107 = vmatpush1.bf16.msra.mxu0 %v4616_v54  ;;  %v4691_v54 = vld [vmem:[%s6615_s1 + $0x168] ss:$16 sps:$4 sm:$0xff]  }
  0xd1   :  { %3148 = vmatpush1.bf16.msra.mxu1 %v4619_v55  ;;  %3108 = vmatprep.subr.bf16.mxu0 %v4624_v56  ;;  %v4696_v55 = vld [vmem:[%s6615_s1 + $0xd44] ss:$16 sps:$4 sm:$0xff]   ;;  %v4699_v56 = vld [vmem:[%s6615_s1 + $0x14c] ss:$16 sps:$4 sm:$0xff]  }
  0xd2   :  { %3149 = vmatprep.subr.bf16.mxu1 %v4627_v57  ;;  %3138 = vmatprep.mubr.bf16.mxu0 %v5797_v58  ;;  %v4694_v57 = vld [vmem:[%s6615_s1 + $0xd40] ss:$16 sps:$4 sm:$0xff]  }
  0xd3   :  { %3179 = vmatprep.mubr.bf16.mxu1 %v5279_v60  ;;  %v4639_v60 = vld [vmem:[%s6615_s1 + $0x8c] ss:$16 sps:$4 sm:$0xff]  }
  0xd4   :  { %3109 = vmatpush1.bf16.msra.mxu0 %v4622_v59  ;;  %v4697_v59 = vld [vmem:[%s6615_s1 + $0x148] ss:$16 sps:$4 sm:$0xff]  }
  0xd5   :  { %3150 = vmatpush1.bf16.msra.mxu1 %v4625_v61  ;;  %3110 = vmatprep.subr.bf16.mxu0 %v4630_v62  ;;  %v4702_v61 = vld [vmem:[%s6615_s1 + $0xd24] ss:$16 sps:$4 sm:$0xff]   ;;  %v4705_v62 = vld [vmem:[%s6615_s1 + $0x12c] ss:$16 sps:$4 sm:$0xff]  }
  0xd6   :  { %3151 = vmatprep.subr.bf16.mxu1 %v4633_v63  ;;  %v4700_v63 = vld [vmem:[%s6615_s1 + $0xd20] ss:$16 sps:$4 sm:$0xff]  }
  0xd8   :  { %3111 = vmatpush1.bf16.msra.mxu0 %v4628_v1  ;;  %v4703_v1 = vld [vmem:[%s6615_s1 + $0x128] ss:$16 sps:$4 sm:$0xff]  }
  0xd9   :  { %3152 = vmatpush1.bf16.msra.mxu1 %v4631_v2  ;;  %3112 = vmatprep.subr.bf16.mxu0 %v4636_v3  ;;  %v4708_v2 = vld [vmem:[%s6615_s1 + $0xd04] ss:$16 sps:$4 sm:$0xff]   ;;  %v4711_v3 = vld [vmem:[%s6615_s1 + $0x10c] ss:$16 sps:$4 sm:$0xff]  }
  0xda   :  { %3153 = vmatprep.subr.bf16.mxu1 %v4639_v60  ;;  %v4706_v60 = vld [vmem:[%s6615_s1 + $0xd00] ss:$16 sps:$4 sm:$0xff]  }
  0xdc   :  { %3113 = vmatpush1.bf16.msra.mxu0 %v4634_v4  ;;  %v4709_v4 = vld [vmem:[%s6615_s1 + $0x108] ss:$16 sps:$4 sm:$0xff]  }
  0xdd   :  { %3154 = vmatpush1.bf16.msra.mxu1 %v4637_v5  ;;  %3114 = vmatprep.subr.bf16.mxu0 %v4642_v7  ;;  %v486_v5 = vld [vmem:[%s6616_s2] sm:$0xf]  ;;  %v490_v7 = vsub.s32 0, %v5233_v42 }
  0xde   :  { %3155 = vmatprep.subr.bf16.mxu1 %v4645_v8  ;;  %v4715_v8 = vld [vmem:[%s6615_s1 + $0x2ec] ss:$16 sps:$4 sm:$0xff]  }
  0xe0   :  { %3115 = vmatpush1.bf16.msra.mxu0 %v4640_v9  ;;  %v4718_v9 = vld [vmem:[%s6615_s1 + $0x4ec] ss:$16 sps:$4 sm:$0xff]  }
  0xe1   :  { %3156 = vmatpush1.bf16.msra.mxu1 %v4643_v10  ;;  %3116 = vmatprep.subr.bf16.mxu0 %v4648_v11  ;;  %v494_v10 = vsub.s32 1, %v5233_v42  ;;  %v5990_v11 = vrot.slane %v5760_v46, %v5251_v49  ;;  %v4724_v49 = vld [vmem:[%s6615_s1 + $0x4cc] ss:$16 sps:$4 sm:$0xff]  }
  0xe2   :  { %3157 = vmatprep.subr.bf16.mxu1 %v4651_v12  ;;  %v4713_v12 = vld [vmem:[%s6615_s1 + $0x2e8] ss:$16 sps:$4 sm:$0xff]  }
  0xe3   :  { %v495_v46 = vrot.slane %v486_v5, %v494_v10  ;;  %v4775_v10 = vld [vmem:[%s6615_s1 + $0x3ac] ss:$16 sps:$4 sm:$0xff]  }
  0xe4   :  { %3117 = vmatpush1.bf16.msra.mxu0 %v4646_v14  ;;  %v491_v14 = vrot.slane %v486_v5, %v490_v7  ;;  %v4769_v5 = vld [vmem:[%s6615_s1 + $0x3cc] ss:$16 sps:$4 sm:$0xff]  }
  0xe5   :  { %3158 = vmatpush1.bf16.msra.mxu1 %v4649_v15  ;;  %3118 = vmatprep.subr.bf16.mxu0 %v4654_v16  ;;  %v4716_v15 = vld [vmem:[%s6615_s1 + $0x4e8] ss:$16 sps:$4 sm:$0xff]   ;;  %v4721_v16 = vld [vmem:[%s6615_s1 + $0x2cc] ss:$16 sps:$4 sm:$0xff]  }
  0xe6   :  { %3159 = vmatprep.subr.bf16.mxu1 %v4657_v19  ;;  %v4772_v7 = vld [vmem:[%s6615_s1 + $0x5cc] ss:$16 sps:$4 sm:$0xff]  }
  0xe8   :  { %3119 = vmatpush1.bf16.msra.mxu0 %v4652_v20 }
  0xe9   :  { %3160 = vmatpush1.bf16.msra.mxu1 %v4655_v21  ;;  %3120 = vmatprep.subr.bf16.mxu0 %v4660_v22  ;;  %v4719_v21 = vld [vmem:[%s6615_s1 + $0x2c8] ss:$16 sps:$4 sm:$0xff]  }
  0xea   :  { %3161 = vmatprep.subr.bf16.mxu1 %v4663_v24  ;;  %v4722_v22 = vld [vmem:[%s6615_s1 + $0x4c8] ss:$16 sps:$4 sm:$0xff]  }
  0xec   :  { %3121 = vmatpush1.bf16.msra.mxu0 %v4658_v25 }
  0xed   :  { %3162 = vmatpush1.bf16.msra.mxu1 %v4661_v27  ;;  %3122 = vmatprep.subr.bf16.mxu0 %v4666_v28  ;;  %v4727_v28 = vld [vmem:[%s6615_s1 + $0x2ac] ss:$16 sps:$4 sm:$0xff]  }
  0xee   :  { %3163 = vmatprep.subr.bf16.mxu1 %v4669_v29 }
  0xf0   :  { %3123 = vmatpush2.bf16.msra.mxu0 %v4664_v30 }
  0xf1   :  { %3164 = vmatpush2.bf16.msra.mxu1 %v4667_v31  ;;  %3124 = vmatprep.subr.bf16.mxu0 %v4672_v33  ;;  %v4725_v31 = vld [vmem:[%s6615_s1 + $0x2a8] ss:$16 sps:$4 sm:$0xff]  }
  0xf2   :  { %3165 = vmatprep.subr.bf16.mxu1 %v4675_v34  ;;  %v4728_v33 = vld [vmem:[%s6615_s1 + $0x4a8] ss:$16 sps:$4 sm:$0xff]  }
  0xf4   :  { %3125 = vmatpush2.bf16.msra.mxu0 %v4670_v36 }
  0xf5   :  { %3166 = vmatpush2.bf16.msra.mxu1 %v4673_v37  ;;  %3126 = vmatprep.subr.bf16.mxu0 %v4678_v38 }
  0xf6   :  { %3167 = vmatprep.subr.bf16.mxu1 %v4681_v39 }
  0xf8   :  { %3127 = vmatpush2.bf16.msra.mxu0 %v4676_v40  ;;  %v4733_v40 = vld [vmem:[%s6615_s1 + $0x28c] ss:$16 sps:$4 sm:$0xff]  }
  0xf9   :  { %3168 = vmatpush2.bf16.msra.mxu1 %v4679_v44  ;;  %3128 = vmatprep.subr.bf16.mxu0 %v4684_v45  ;;  %v4734_v44 = vld [vmem:[%s6615_s1 + $0x488] ss:$16 sps:$4 sm:$0xff]   ;;  %v4739_v45 = vld [vmem:[%s6615_s1 + $0x26c] ss:$16 sps:$4 sm:$0xff]  }
  0xfa   :  { %3169 = vmatprep.subr.bf16.mxu1 %v4687_v32  ;;  %v4742_v32 = vld [vmem:[%s6615_s1 + $0x46c] ss:$16 sps:$4 sm:$0xff]  }
  0xfc   :  { %3129 = vmatpush2.bf16.msra.mxu0 %v4682_v47  ;;  %v4737_v47 = vld [vmem:[%s6615_s1 + $0x268] ss:$16 sps:$4 sm:$0xff]  }
  0xfd   :  { %3170 = vmatpush2.bf16.msra.mxu1 %v4685_v50  ;;  %3130 = vmatprep.subr.bf16.mxu0 %v4690_v51  ;;  %v4740_v50 = vld [vmem:[%s6615_s1 + $0x468] ss:$16 sps:$4 sm:$0xff]   ;;  %v4745_v51 = vld [vmem:[%s6615_s1 + $0x24c] ss:$16 sps:$4 sm:$0xff]  }
  0xfe   :  { %3171 = vmatprep.subr.bf16.mxu1 %v4693_v52  ;;  %v4748_v52 = vld [vmem:[%s6615_s1 + $0x44c] ss:$16 sps:$4 sm:$0xff]  }
 0x100   :  { %3131 = vmatpush2.bf16.msra.mxu0 %v4688_v35  ;;  %v4743_v35 = vld [vmem:[%s6615_s1 + $0x248] ss:$16 sps:$4 sm:$0xff]  }
 0x101   :  { %3172 = vmatpush2.bf16.msra.mxu1 %v4691_v54  ;;  %3132 = vmatprep.subr.bf16.mxu0 %v4696_v55  ;;  %v4746_v54 = vld [vmem:[%s6615_s1 + $0x448] ss:$16 sps:$4 sm:$0xff]   ;;  %v4751_v55 = vld [vmem:[%s6615_s1 + $0x22c] ss:$16 sps:$4 sm:$0xff]  }
 0x102   :  { %3173 = vmatprep.subr.bf16.mxu1 %v4699_v56  ;;  %v4754_v56 = vld [vmem:[%s6615_s1 + $0x42c] ss:$16 sps:$4 sm:$0xff]  }
 0x104   :  { %3133 = vmatpush2.bf16.msra.mxu0 %v4694_v57  ;;  %v4749_v57 = vld [vmem:[%s6615_s1 + $0x228] ss:$16 sps:$4 sm:$0xff]  }
 0x105   :  { %3174 = vmatpush2.bf16.msra.mxu1 %v4697_v59  ;;  %3134 = vmatprep.subr.bf16.mxu0 %v4702_v61  ;;  %v4752_v59 = vld [vmem:[%s6615_s1 + $0x428] ss:$16 sps:$4 sm:$0xff]   ;;  %v4757_v61 = vld [vmem:[%s6615_s1 + $0x20c] ss:$16 sps:$4 sm:$0xff]  }
 0x106   :  { %3175 = vmatprep.subr.bf16.mxu1 %v4705_v62  ;;  %v4760_v62 = vld [vmem:[%s6615_s1 + $0x40c] ss:$16 sps:$4 sm:$0xff]  }
 0x108   :  { %3135 = vmatpush2.bf16.msra.mxu0 %v4700_v63  ;;  %v4755_v63 = vld [vmem:[%s6615_s1 + $0x208] ss:$16 sps:$4 sm:$0xff]  }
 0x109   :  { %3176 = vmatpush2.bf16.msra.mxu1 %v4703_v1  ;;  %3136 = vmatprep.subr.bf16.mxu0 %v4708_v2  ;;  %v4758_v1 = vld [vmem:[%s6615_s1 + $0x408] ss:$16 sps:$4 sm:$0xff]   ;;  %v4763_v2 = vld [vmem:[%s6615_s1 + $0x3ec] ss:$16 sps:$4 sm:$0xff]  }
 0x10a   :  { %3177 = vmatprep.subr.bf16.mxu1 %v4711_v3  ;;  %v4766_v3 = vld [vmem:[%s6615_s1 + $0x5ec] ss:$16 sps:$4 sm:$0xff]  }
 0x10c   :  { %3137 = vmatpush2.bf16.msra.mxu0 %v4706_v60  ;;  %v4761_v60 = vld [vmem:[%s6615_s1 + $0x3e8] ss:$16 sps:$4 sm:$0xff]  }
 0x10d   :  { %3178 = vmatpush2.bf16.msra.mxu1 %v4709_v4  ;;  %3188 = vmatprep.subr.bf16.mxu0 %v4715_v8  ;;  %v4764_v4 = vld [vmem:[%s6615_s1 + $0x5e8] ss:$16 sps:$4 sm:$0xff]  }
 0x10e   :  { %3229 = vmatprep.subr.bf16.mxu1 %v4718_v9  ;;  %v4767_v8 = vld [vmem:[%s6615_s1 + $0x3c8] ss:$16 sps:$4 sm:$0xff]  }
 0x10f   :  { %v2894_v19 = vpop.f32.mrf.mxu0  ;;  %3139 = vmatmul.mubr.bf16.vlgmr.msra.gmra.mxu0 %v5990_v11  ;;  %v4770_v9 = vld [vmem:[%s6615_s1 + $0x5c8] ss:$16 sps:$4 sm:$0xff]  }
 0x110   :  { %v2935_v20 = vpop.f32.mrf.mxu1  ;;  %3180 = vmatmul.mubr.bf16.vlgmr.msra.gmra.mxu1 %v5329_v13  ;;  %v2895_v24 = vadd.f32 %v2894_v19, %v491_v14  ;;  %3189 = vmatpush1.bf16.msra.mxu0 %v4713_v12  ;;  %v4730_v13 = vld [vmem:[%s6615_s1 + $0x4ac] ss:$16 sps:$4 sm:$0xff]   ;;  %v4773_v14 = vld [vmem:[%s6615_s1 + $0x3a8] ss:$16 sps:$4 sm:$0xff]  }
 0x111   :  { %3230 = vmatpush1.bf16.msra.mxu1 %v4716_v15  ;;  %v2896_v25 = vpop.f32.mrf.mxu0  ;;  %3190 = vmatprep.subr.bf16.mxu0 %v4721_v16  ;;  %v4778_v12 = vld [vmem:[%s6615_s1 + $0x5ac] ss:$16 sps:$4 sm:$0xff]   ;;  %v4776_v15 = vld [vmem:[%s6615_s1 + $0x5a8] ss:$16 sps:$4 sm:$0xff]  }
 0x112   :  { %v2937_v27 = vpop.f32.mrf.mxu1  ;;  %3231 = vmatprep.subr.bf16.mxu1 %v4724_v49  ;;  %v6018_v29 = vadd.f32 %v2935_v20, %v2895_v24  ;;  %v2897_v30 = vadd.f32 %v2896_v25, %v495_v46  ;;  %3220 = vmatprep.mubr.bf16.mxu0 %v5292_v0  ;;  %v4736_v0 = vld [vmem:[%s6615_s1 + $0x48c] ss:$16 sps:$4 sm:$0xff]   ;;  %v4779_v46 = vld [vmem:[%s6615_s1 + $0x388] ss:$16 sps:$4 sm:$0xff]  }
 0x113   :  { %3261 = vmatprep.mubr.bf16.mxu1 %v5341_v17  ;;  %v2898_v34 = vpop.f32.mrf.mxu0  ;;  %v4731_v17 = vld [vmem:[%s6615_s1 + $0x288] ss:$16 sps:$4 sm:$0xff]   ;;  %v4781_v16 = vld [vmem:[%s6615_s1 + $0x38c] ss:$16 sps:$4 sm:$0xff]  }
 0x114   :  { %v2939_v36 = vpop.f32.mrf.mxu1  ;;  %v6028_v37 = vadd.f32 %v2937_v27, %v2897_v30  ;;  %3191 = vmatpush1.bf16.msra.mxu0 %v4719_v21  ;;  %v4784_v49 = vld [vmem:[%s6615_s1 + $0x58c] ss:$16 sps:$4 sm:$0xff]   ;;  %v4782_v19 = vld [vmem:[%s6615_s1 + $0x588] ss:$16 sps:$4 sm:$0xff]  }
 0x115   :  { %3232 = vmatpush1.bf16.msra.mxu1 %v4722_v22  ;;  %v2899_v38 = vpop.f32.mrf.mxu0  ;;  %3192 = vmatprep.subr.bf16.mxu0 %v4727_v28  ;;  %v4787_v20 = vld [vmem:[%s6615_s1 + $0x36c] ss:$16 sps:$4 sm:$0xff]   ;;  %v4785_v22 = vld [vmem:[%s6615_s1 + $0x368] ss:$16 sps:$4 sm:$0xff]  }
 0x116   :  { %v2940_v39 = vpop.f32.mrf.mxu1  ;;  %3233 = vmatprep.subr.bf16.mxu1 %v4730_v13  ;;  %v4790_v21 = vld [vmem:[%s6615_s1 + $0x56c] ss:$16 sps:$4 sm:$0xff]   ;;  %v4788_v24 = vld [vmem:[%s6615_s1 + $0x568] ss:$16 sps:$4 sm:$0xff]  }
 0x117   :  { %v4793_v25 = vld [vmem:[%s6615_s1 + $0x34c] ss:$16 sps:$4 sm:$0xff]   ;;  %v4791_v28 = vld [vmem:[%s6615_s1 + $0x348] ss:$16 sps:$4 sm:$0xff]  }
 0x118   :  { %3193 = vmatpush1.bf16.msra.mxu0 %v4725_v31  ;;  %v4796_v27 = vld [vmem:[%s6615_s1 + $0x54c] ss:$16 sps:$4 sm:$0xff]   ;;  %v4794_v13 = vld [vmem:[%s6615_s1 + $0x548] ss:$16 sps:$4 sm:$0xff]  }
 0x119   :  { %3234 = vmatpush1.bf16.msra.mxu1 %v4728_v33  ;;  %3194 = vmatprep.subr.bf16.mxu0 %v4733_v40  ;;  %v4799_v30 = vld [vmem:[%s6615_s1 + $0x32c] ss:$16 sps:$4 sm:$0xff]   ;;  %v4797_v33 = vld [vmem:[%s6615_s1 + $0x328] ss:$16 sps:$4 sm:$0xff]  }
 0x11a   :  { %3235 = vmatprep.subr.bf16.mxu1 %v4736_v0  ;;  %v4802_v31 = vld [vmem:[%s6615_s1 + $0x52c] ss:$16 sps:$4 sm:$0xff]   ;;  %v4800_v34 = vld [vmem:[%s6615_s1 + $0x528] ss:$16 sps:$4 sm:$0xff]  }
 0x11b   :  { %v4805_v36 = vld [vmem:[%s6615_s1 + $0x30c] ss:$16 sps:$4 sm:$0xff]   ;;  %v4803_v39 = vld [vmem:[%s6615_s1 + $0x308] ss:$16 sps:$4 sm:$0xff]  }
 0x11c   :  { %3195 = vmatpush1.bf16.msra.mxu0 %v4731_v17  ;;  %v4808_v38 = vld [vmem:[%s6615_s1 + $0x50c] ss:$16 sps:$4 sm:$0xff]   ;;  %v4806_v40 = vld [vmem:[%s6615_s1 + $0x508] ss:$16 sps:$4 sm:$0xff]  }
 0x11d   :  { %3236 = vmatpush1.bf16.msra.mxu1 %v4734_v44  ;;  %3196 = vmatprep.subr.bf16.mxu0 %v4739_v45  ;;  %v4811_v0 = vld [vmem:[%s6615_s1 + $0x6ec] ss:$16 sps:$4 sm:$0xff]   ;;  %v4809_v44 = vld [vmem:[%s6615_s1 + $0x6e8] ss:$16 sps:$4 sm:$0xff]  }
 0x11e   :  { %3237 = vmatprep.subr.bf16.mxu1 %v4742_v32  ;;  %v4814_v17 = vld [vmem:[%s6615_s1 + $0x8ec] ss:$16 sps:$4 sm:$0xff]   ;;  %v4812_v45 = vld [vmem:[%s6615_s1 + $0x8e8] ss:$16 sps:$4 sm:$0xff]  }
 0x11f   :  { %v4817_v32 = vld [vmem:[%s6615_s1 + $0x6cc] ss:$16 sps:$4 sm:$0xff]  }
 0x120   :  { %3197 = vmatpush1.bf16.msra.mxu0 %v4737_v47  ;;  %v4820_v47 = vld [vmem:[%s6615_s1 + $0x8cc] ss:$16 sps:$4 sm:$0xff]  }
 0x121   :  { %3238 = vmatpush1.bf16.msra.mxu1 %v4740_v50  ;;  %3198 = vmatprep.subr.bf16.mxu0 %v4745_v51 }
 0x122   :  { %3239 = vmatprep.subr.bf16.mxu1 %v4748_v52 }
 0x124   :  { %3199 = vmatpush1.bf16.msra.mxu0 %v4743_v35  ;;  %v4815_v35 = vld [vmem:[%s6615_s1 + $0x6c8] ss:$16 sps:$4 sm:$0xff]  }
 0x125   :  { %3240 = vmatpush1.bf16.msra.mxu1 %v4746_v54  ;;  %3200 = vmatprep.subr.bf16.mxu0 %v4751_v55  ;;  %v4818_v54 = vld [vmem:[%s6615_s1 + $0x8c8] ss:$16 sps:$4 sm:$0xff]  }
 0x126   :  { %3241 = vmatprep.subr.bf16.mxu1 %v4754_v56 }
 0x128   :  { %3201 = vmatpush1.bf16.msra.mxu0 %v4749_v57 }
 0x129   :  { %3242 = vmatpush1.bf16.msra.mxu1 %v4752_v59  ;;  %3202 = vmatprep.subr.bf16.mxu0 %v4757_v61 }
 0x12a   :  { %3243 = vmatprep.subr.bf16.mxu1 %v4760_v62 }
 0x12c   :  { %3203 = vmatpush1.bf16.msra.mxu0 %v4755_v63  ;;  %v4821_v63 = vld [vmem:[%s6615_s1 + $0x6a8] ss:$16 sps:$4 sm:$0xff]  }
 0x12d   :  { %3244 = vmatpush1.bf16.msra.mxu1 %v4758_v1  ;;  %3204 = vmatprep.subr.bf16.mxu0 %v4763_v2  ;;  %v4824_v1 = vld [vmem:[%s6615_s1 + $0x8a8] ss:$16 sps:$4 sm:$0xff]  }
 0x12e   :  { %3245 = vmatprep.subr.bf16.mxu1 %v4766_v3  ;;  %v4827_v3 = vld [vmem:[%s6615_s1 + $0x688] ss:$16 sps:$4 sm:$0xff]  }
 0x130   :  { %3205 = vmatpush2.bf16.msra.mxu0 %v4761_v60  ;;  %v4830_v60 = vld [vmem:[%s6615_s1 + $0x888] ss:$16 sps:$4 sm:$0xff]  }
 0x131   :  { %3246 = vmatpush2.bf16.msra.mxu1 %v4764_v4  ;;  %3206 = vmatprep.subr.bf16.mxu0 %v4769_v5  ;;  %v4835_v4 = vld [vmem:[%s6615_s1 + $0x66c] ss:$16 sps:$4 sm:$0xff]  }
 0x132   :  { %3247 = vmatprep.subr.bf16.mxu1 %v4772_v7  ;;  %v4838_v5 = vld [vmem:[%s6615_s1 + $0x86c] ss:$16 sps:$4 sm:$0xff]   ;;  %v4833_v7 = vld [vmem:[%s6615_s1 + $0x668] ss:$16 sps:$4 sm:$0xff]  }
 0x134   :  { %3207 = vmatpush2.bf16.msra.mxu0 %v4767_v8  ;;  %v4836_v8 = vld [vmem:[%s6615_s1 + $0x868] ss:$16 sps:$4 sm:$0xff]  }
 0x135   :  { %3248 = vmatpush2.bf16.msra.mxu1 %v4770_v9  ;;  %3208 = vmatprep.subr.bf16.mxu0 %v4775_v10  ;;  %v4841_v9 = vld [vmem:[%s6615_s1 + $0x64c] ss:$16 sps:$4 sm:$0xff]  }
 0x136   :  { %3249 = vmatprep.subr.bf16.mxu1 %v4778_v12  ;;  %v4844_v10 = vld [vmem:[%s6615_s1 + $0x84c] ss:$16 sps:$4 sm:$0xff]   ;;  %v4839_v12 = vld [vmem:[%s6615_s1 + $0x648] ss:$16 sps:$4 sm:$0xff]  }
 0x138   :  { %3209 = vmatpush2.bf16.msra.mxu0 %v4773_v14  ;;  %v4842_v14 = vld [vmem:[%s6615_s1 + $0x848] ss:$16 sps:$4 sm:$0xff]  }
 0x139   :  { %3250 = vmatpush2.bf16.msra.mxu1 %v4776_v15  ;;  %3210 = vmatprep.subr.bf16.mxu0 %v4781_v16  ;;  %v4847_v15 = vld [vmem:[%s6615_s1 + $0x62c] ss:$16 sps:$4 sm:$0xff]  }
 0x13a   :  { %3251 = vmatprep.subr.bf16.mxu1 %v4784_v49  ;;  %v4850_v16 = vld [vmem:[%s6615_s1 + $0x82c] ss:$16 sps:$4 sm:$0xff]   ;;  %v4845_v49 = vld [vmem:[%s6615_s1 + $0x628] ss:$16 sps:$4 sm:$0xff]  }
 0x13c   :  { %3211 = vmatpush2.bf16.msra.mxu0 %v4779_v46  ;;  %v4848_v46 = vld [vmem:[%s6615_s1 + $0x828] ss:$16 sps:$4 sm:$0xff]  }
 0x13d   :  { %3252 = vmatpush2.bf16.msra.mxu1 %v4782_v19  ;;  %3212 = vmatprep.subr.bf16.mxu0 %v4787_v20  ;;  %v4853_v19 = vld [vmem:[%s6615_s1 + $0x60c] ss:$16 sps:$4 sm:$0xff]  }
 0x13e   :  { %3253 = vmatprep.subr.bf16.mxu1 %v4790_v21  ;;  %v4856_v20 = vld [vmem:[%s6615_s1 + $0x80c] ss:$16 sps:$4 sm:$0xff]   ;;  %v4851_v21 = vld [vmem:[%s6615_s1 + $0x608] ss:$16 sps:$4 sm:$0xff]  }
 0x140   :  { %3213 = vmatpush2.bf16.msra.mxu0 %v4785_v22  ;;  %v4854_v22 = vld [vmem:[%s6615_s1 + $0x808] ss:$16 sps:$4 sm:$0xff]  }
 0x141   :  { %3254 = vmatpush2.bf16.msra.mxu1 %v4788_v24  ;;  %3214 = vmatprep.subr.bf16.mxu0 %v4793_v25  ;;  %v4859_v24 = vld [vmem:[%s6615_s1 + $0x7ec] ss:$16 sps:$4 sm:$0xff]  }
 0x142   :  { %3255 = vmatprep.subr.bf16.mxu1 %v4796_v27  ;;  %v4862_v25 = vld [vmem:[%s6615_s1 + $0x9ec] ss:$16 sps:$4 sm:$0xff]   ;;  %v4857_v27 = vld [vmem:[%s6615_s1 + $0x7e8] ss:$16 sps:$4 sm:$0xff]  }
 0x144   :  { %3215 = vmatpush2.bf16.msra.mxu0 %v4791_v28  ;;  %v4860_v28 = vld [vmem:[%s6615_s1 + $0x9e8] ss:$16 sps:$4 sm:$0xff]  }
 0x145   :  { %3256 = vmatpush2.bf16.msra.mxu1 %v4794_v13  ;;  %3216 = vmatprep.subr.bf16.mxu0 %v4799_v30  ;;  %v4865_v13 = vld [vmem:[%s6615_s1 + $0x7cc] ss:$16 sps:$4 sm:$0xff]  }
 0x146   :  { %3257 = vmatprep.subr.bf16.mxu1 %v4802_v31  ;;  %v4868_v30 = vld [vmem:[%s6615_s1 + $0x9cc] ss:$16 sps:$4 sm:$0xff]   ;;  %v4863_v31 = vld [vmem:[%s6615_s1 + $0x7c8] ss:$16 sps:$4 sm:$0xff]  }
 0x148   :  { %3217 = vmatpush2.bf16.msra.mxu0 %v4797_v33  ;;  %v4866_v33 = vld [vmem:[%s6615_s1 + $0x9c8] ss:$16 sps:$4 sm:$0xff]  }
 0x149   :  { %3258 = vmatpush2.bf16.msra.mxu1 %v4800_v34  ;;  %3218 = vmatprep.subr.bf16.mxu0 %v4805_v36  ;;  %v4871_v34 = vld [vmem:[%s6615_s1 + $0x7ac] ss:$16 sps:$4 sm:$0xff]  }
 0x14a   :  { %3259 = vmatprep.subr.bf16.mxu1 %v4808_v38  ;;  %v4874_v36 = vld [vmem:[%s6615_s1 + $0x9ac] ss:$16 sps:$4 sm:$0xff]   ;;  %v4869_v38 = vld [vmem:[%s6615_s1 + $0x7a8] ss:$16 sps:$4 sm:$0xff]  }
 0x14c   :  { %3219 = vmatpush2.bf16.msra.mxu0 %v4803_v39  ;;  %v4872_v39 = vld [vmem:[%s6615_s1 + $0x9a8] ss:$16 sps:$4 sm:$0xff]  }
 0x14d   :  { %3260 = vmatpush2.bf16.msra.mxu1 %v4806_v40  ;;  %3270 = vmatprep.subr.bf16.mxu0 %v4811_v0  ;;  %v4877_v40 = vld [vmem:[%s6615_s1 + $0x78c] ss:$16 sps:$4 sm:$0xff]  }
 0x14e   :  { %3311 = vmatprep.subr.bf16.mxu1 %v4814_v17  ;;  %v4880_v0 = vld [vmem:[%s6615_s1 + $0x98c] ss:$16 sps:$4 sm:$0xff]   ;;  %v4875_v17 = vld [vmem:[%s6615_s1 + $0x788] ss:$16 sps:$4 sm:$0xff]  }
 0x14f   :  { %v2976_v50 = vpop.f32.mrf.mxu0  ;;  %3221 = vmatmul.mubr.bf16.vlgmr.msra.gmra.mxu0 %v5345_v18  ;;  %v4823_v18 = vld [vmem:[%s6615_s1 + $0x6ac] ss:$16 sps:$4 sm:$0xff]  }
 0x150   :  { %v3017_v51 = vpop.f32.mrf.mxu1  ;;  %3262 = vmatmul.mubr.bf16.vlgmr.msra.gmra.mxu1 %v5540_v26  ;;  %v2977_v52 = vadd.f32 %v2976_v50, %v6018_v29  ;;  %3271 = vmatpush1.bf16.msra.mxu0 %v4809_v44  ;;  %v4826_v26 = vld [vmem:[%s6615_s1 + $0x8ac] ss:$16 sps:$4 sm:$0xff]   ;;  %v4878_v44 = vld [vmem:[%s6615_s1 + $0x988] ss:$16 sps:$4 sm:$0xff]  }
 0x151   :  { %3312 = vmatpush1.bf16.msra.mxu1 %v4812_v45  ;;  %v2978_v55 = vpop.f32.mrf.mxu0  ;;  %3272 = vmatprep.subr.bf16.mxu0 %v4817_v32  ;;  %v4883_v45 = vld [vmem:[%s6615_s1 + $0x76c] ss:$16 sps:$4 sm:$0xff]   ;;  %v4884_v50 = vld [vmem:[%s6615_s1 + $0x968] ss:$16 sps:$4 sm:$0xff]  }
 0x152   :  { %v3019_v56 = vpop.f32.mrf.mxu1  ;;  %3313 = vmatprep.subr.bf16.mxu1 %v4820_v47  ;;  %v6219_v29 = vadd.f32 %v3017_v51, %v2977_v52  ;;  %v2979_v57 = vadd.f32 %v2978_v55, %v6028_v37  ;;  %3302 = vmatprep.mubr.bf16.mxu0 %v5361_v23  ;;  %v4829_v23 = vld [vmem:[%s6615_s1 + $0x68c] ss:$16 sps:$4 sm:$0xff]   ;;  %v4881_v47 = vld [vmem:[%s6615_s1 + $0x768] ss:$16 sps:$4 sm:$0xff]  }
 0x153   :  { %3343 = vmatprep.mubr.bf16.mxu1 %v5593_v41  ;;  %v2980_v59 = vpop.f32.mrf.mxu0  ;;  %v4832_v41 = vld [vmem:[%s6615_s1 + $0x88c] ss:$16 sps:$4 sm:$0xff]  }
 0x154   :  { %v3021_v61 = vpop.f32.mrf.mxu1  ;;  %v6224_v62 = vadd.f32 %v3019_v56, %v2979_v57  ;;  %3273 = vmatpush1.bf16.msra.mxu0 %v4815_v35  ;;  %v4886_v32 = vld [vmem:[%s6615_s1 + $0x96c] ss:$16 sps:$4 sm:$0xff]   ;;  %v4887_v35 = vld [vmem:[%s6615_s1 + $0x748] ss:$16 sps:$4 sm:$0xff]  }
 0x155   :  { %3314 = vmatpush1.bf16.msra.mxu1 %v4818_v54  ;;  %v2981_v2 = vpop.f32.mrf.mxu0  ;;  %3274 = vmatprep.subr.bf16.mxu0 %v4823_v18  ;;  %v4889_v51 = vld [vmem:[%s6615_s1 + $0x74c] ss:$16 sps:$4 sm:$0xff]   ;;  %v4890_v54 = vld [vmem:[%s6615_s1 + $0x948] ss:$16 sps:$4 sm:$0xff]  }
 0x156   :  { %v3022_v37 = vpop.f32.mrf.mxu1  ;;  %3315 = vmatprep.subr.bf16.mxu1 %v4826_v26  ;;  %v4892_v52 = vld [vmem:[%s6615_s1 + $0x94c] ss:$16 sps:$4 sm:$0xff]   ;;  %v4893_v18 = vld [vmem:[%s6615_s1 + $0x728] ss:$16 sps:$4 sm:$0xff]  }
 0x157   :  { %v4895_v55 = vld [vmem:[%s6615_s1 + $0x72c] ss:$16 sps:$4 sm:$0xff]   ;;  %v4896_v26 = vld [vmem:[%s6615_s1 + $0x928] ss:$16 sps:$4 sm:$0xff]  }
 0x158   :  { %3275 = vmatpush1.bf16.msra.mxu0 %v4821_v63  ;;  %v4898_v56 = vld [vmem:[%s6615_s1 + $0x92c] ss:$16 sps:$4 sm:$0xff]   ;;  %v4899_v61 = vld [vmem:[%s6615_s1 + $0x708] ss:$16 sps:$4 sm:$0xff]  }
 0x159   :  { %3316 = vmatpush1.bf16.msra.mxu1 %v4824_v1  ;;  %3276 = vmatprep.subr.bf16.mxu0 %v4829_v23  ;;  %v4901_v57 = vld [vmem:[%s6615_s1 + $0x70c] ss:$16 sps:$4 sm:$0xff]   ;;  %v4902_v63 = vld [vmem:[%s6615_s1 + $0x908] ss:$16 sps:$4 sm:$0xff]  }
 0x15a   :  { %3317 = vmatprep.subr.bf16.mxu1 %v4832_v41  ;;  %v4904_v59 = vld [vmem:[%s6615_s1 + $0x90c] ss:$16 sps:$4 sm:$0xff]   ;;  %v4905_v37 = vld [vmem:[%s6615_s1 + $0xae8] ss:$16 sps:$4 sm:$0xff]  }
 0x15b   :  { %v4907_v1 = vld [vmem:[%s6615_s1 + $0xaec] ss:$16 sps:$4 sm:$0xff]   ;;  %v4908_v23 = vld [vmem:[%s6615_s1 + $0xce8] ss:$16 sps:$4 sm:$0xff]  }
 0x15c   :  { %3277 = vmatpush1.bf16.msra.mxu0 %v4827_v3  ;;  %v4910_v2 = vld [vmem:[%s6615_s1 + $0xcec] ss:$16 sps:$4 sm:$0xff]  }
 0x15d   :  { %3318 = vmatpush1.bf16.msra.mxu1 %v4830_v60  ;;  %3278 = vmatprep.subr.bf16.mxu0 %v4835_v4  ;;  %v4913_v41 = vld [vmem:[%s6615_s1 + $0xacc] ss:$16 sps:$4 sm:$0xff]  }
 0x15e   :  { %3319 = vmatprep.subr.bf16.mxu1 %v4838_v5  ;;  %v4916_v3 = vld [vmem:[%s6615_s1 + $0xccc] ss:$16 sps:$4 sm:$0xff]  }
 0x160   :  { %3279 = vmatpush1.bf16.msra.mxu0 %v4833_v7  ;;  %v4911_v7 = vld [vmem:[%s6615_s1 + $0xac8] ss:$16 sps:$4 sm:$0xff]  }
 0x161   :  { %3320 = vmatpush1.bf16.msra.mxu1 %v4836_v8  ;;  %3280 = vmatprep.subr.bf16.mxu0 %v4841_v9  ;;  %v4914_v8 = vld [vmem:[%s6615_s1 + $0xcc8] ss:$16 sps:$4 sm:$0xff]  }
 0x162   :  { %3321 = vmatprep.subr.bf16.mxu1 %v4844_v10 }
 0x164   :  { %3281 = vmatpush1.bf16.msra.mxu0 %v4839_v12 }
 0x165   :  { %3322 = vmatpush1.bf16.msra.mxu1 %v4842_v14  ;;  %3282 = vmatprep.subr.bf16.mxu0 %v4847_v15  ;;  %v4917_v15 = vld [vmem:[%s6615_s1 + $0xaa8] ss:$16 sps:$4 sm:$0xff]  }
 0x166   :  { %3323 = vmatprep.subr.bf16.mxu1 %v4850_v16  ;;  %v4920_v16 = vld [vmem:[%s6615_s1 + $0xca8] ss:$16 sps:$4 sm:$0xff]  }
 0x168   :  { %3283 = vmatpush1.bf16.msra.mxu0 %v4845_v49 }
 0x169   :  { %3324 = vmatpush1.bf16.msra.mxu1 %v4848_v46  ;;  %3284 = vmatprep.subr.bf16.mxu0 %v4853_v19  ;;  %v4923_v19 = vld [vmem:[%s6615_s1 + $0xa88] ss:$16 sps:$4 sm:$0xff]  }
 0x16a   :  { %3325 = vmatprep.subr.bf16.mxu1 %v4856_v20  ;;  %v4926_v20 = vld [vmem:[%s6615_s1 + $0xc88] ss:$16 sps:$4 sm:$0xff]  }
 0x16c   :  { %3285 = vmatpush1.bf16.msra.mxu0 %v4851_v21  ;;  %v4931_v21 = vld [vmem:[%s6615_s1 + $0xa6c] ss:$16 sps:$4 sm:$0xff]  }
 0x16d   :  { %3326 = vmatpush1.bf16.msra.mxu1 %v4854_v22  ;;  %3286 = vmatprep.subr.bf16.mxu0 %v4859_v24  ;;  %v4934_v22 = vld [vmem:[%s6615_s1 + $0xc6c] ss:$16 sps:$4 sm:$0xff]   ;;  %v4929_v24 = vld [vmem:[%s6615_s1 + $0xa68] ss:$16 sps:$4 sm:$0xff]  }
 0x16e   :  { %3327 = vmatprep.subr.bf16.mxu1 %v4862_v25  ;;  %v4932_v25 = vld [vmem:[%s6615_s1 + $0xc68] ss:$16 sps:$4 sm:$0xff]  }
 0x170   :  { %3287 = vmatpush2.bf16.msra.mxu0 %v4857_v27  ;;  %v4937_v27 = vld [vmem:[%s6615_s1 + $0xa4c] ss:$16 sps:$4 sm:$0xff]  }
 0x171   :  { %3328 = vmatpush2.bf16.msra.mxu1 %v4860_v28  ;;  %3288 = vmatprep.subr.bf16.mxu0 %v4865_v13  ;;  %v4940_v28 = vld [vmem:[%s6615_s1 + $0xc4c] ss:$16 sps:$4 sm:$0xff]   ;;  %v4935_v13 = vld [vmem:[%s6615_s1 + $0xa48] ss:$16 sps:$4 sm:$0xff]  }
 0x172   :  { %3329 = vmatprep.subr.bf16.mxu1 %v4868_v30  ;;  %v4938_v30 = vld [vmem:[%s6615_s1 + $0xc48] ss:$16 sps:$4 sm:$0xff]  }
 0x174   :  { %3289 = vmatpush2.bf16.msra.mxu0 %v4863_v31  ;;  %v4943_v31 = vld [vmem:[%s6615_s1 + $0xa2c] ss:$16 sps:$4 sm:$0xff]  }
 0x175   :  { %3330 = vmatpush2.bf16.msra.mxu1 %v4866_v33  ;;  %3290 = vmatprep.subr.bf16.mxu0 %v4871_v34  ;;  %v4946_v33 = vld [vmem:[%s6615_s1 + $0xc2c] ss:$16 sps:$4 sm:$0xff]   ;;  %v4941_v34 = vld [vmem:[%s6615_s1 + $0xa28] ss:$16 sps:$4 sm:$0xff]  }
 0x176   :  { %3331 = vmatprep.subr.bf16.mxu1 %v4874_v36  ;;  %v4944_v36 = vld [vmem:[%s6615_s1 + $0xc28] ss:$16 sps:$4 sm:$0xff]  }
 0x178   :  { %3291 = vmatpush2.bf16.msra.mxu0 %v4869_v38  ;;  %v4949_v38 = vld [vmem:[%s6615_s1 + $0xa0c] ss:$16 sps:$4 sm:$0xff]  }
 0x179   :  { %3332 = vmatpush2.bf16.msra.mxu1 %v4872_v39  ;;  %3292 = vmatprep.subr.bf16.mxu0 %v4877_v40  ;;  %v4952_v39 = vld [vmem:[%s6615_s1 + $0xc0c] ss:$16 sps:$4 sm:$0xff]   ;;  %v4947_v40 = vld [vmem:[%s6615_s1 + $0xa08] ss:$16 sps:$4 sm:$0xff]  }
 0x17a   :  { %3333 = vmatprep.subr.bf16.mxu1 %v4880_v0  ;;  %v4950_v0 = vld [vmem:[%s6615_s1 + $0xc08] ss:$16 sps:$4 sm:$0xff]  }
 0x17c   :  { %3293 = vmatpush2.bf16.msra.mxu0 %v4875_v17  ;;  %v4955_v17 = vld [vmem:[%s6615_s1 + $0xbec] ss:$16 sps:$4 sm:$0xff]  }
 0x17d   :  { %3334 = vmatpush2.bf16.msra.mxu1 %v4878_v44  ;;  %3294 = vmatprep.subr.bf16.mxu0 %v4883_v45  ;;  %v4958_v44 = vld [vmem:[%s6615_s1 + $0xdec] ss:$16 sps:$4 sm:$0xff]   ;;  %v4953_v45 = vld [vmem:[%s6615_s1 + $0xbe8] ss:$16 sps:$4 sm:$0xff]  }
 0x17e   :  { %3335 = vmatprep.subr.bf16.mxu1 %v4886_v32  ;;  %v4956_v32 = vld [vmem:[%s6615_s1 + $0xde8] ss:$16 sps:$4 sm:$0xff]  }
 0x180   :  { %3295 = vmatpush2.bf16.msra.mxu0 %v4881_v47  ;;  %v4961_v47 = vld [vmem:[%s6615_s1 + $0xbcc] ss:$16 sps:$4 sm:$0xff]  }
 0x181   :  { %3336 = vmatpush2.bf16.msra.mxu1 %v4884_v50  ;;  %3296 = vmatprep.subr.bf16.mxu0 %v4889_v51  ;;  %v4964_v50 = vld [vmem:[%s6615_s1 + $0xdcc] ss:$16 sps:$4 sm:$0xff]   ;;  %v4959_v51 = vld [vmem:[%s6615_s1 + $0xbc8] ss:$16 sps:$4 sm:$0xff]  }
 0x182   :  { %3337 = vmatprep.subr.bf16.mxu1 %v4892_v52  ;;  %v4962_v52 = vld [vmem:[%s6615_s1 + $0xdc8] ss:$16 sps:$4 sm:$0xff]  }
 0x184   :  { %3297 = vmatpush2.bf16.msra.mxu0 %v4887_v35  ;;  %v4967_v35 = vld [vmem:[%s6615_s1 + $0xbac] ss:$16 sps:$4 sm:$0xff]  }
 0x185   :  { %3338 = vmatpush2.bf16.msra.mxu1 %v4890_v54  ;;  %3298 = vmatprep.subr.bf16.mxu0 %v4895_v55  ;;  %v4970_v54 = vld [vmem:[%s6615_s1 + $0xdac] ss:$16 sps:$4 sm:$0xff]   ;;  %v4965_v55 = vld [vmem:[%s6615_s1 + $0xba8] ss:$16 sps:$4 sm:$0xff]  }
 0x186   :  { %3339 = vmatprep.subr.bf16.mxu1 %v4898_v56  ;;  %v4968_v56 = vld [vmem:[%s6615_s1 + $0xda8] ss:$16 sps:$4 sm:$0xff]  }
 0x188   :  { %3299 = vmatpush2.bf16.msra.mxu0 %v4893_v18  ;;  %v4973_v18 = vld [vmem:[%s6615_s1 + $0xb8c] ss:$16 sps:$4 sm:$0xff]  }
 0x189   :  { %3340 = vmatpush2.bf16.msra.mxu1 %v4896_v26  ;;  %3300 = vmatprep.subr.bf16.mxu0 %v4901_v57  ;;  %v4976_v26 = vld [vmem:[%s6615_s1 + $0xd8c] ss:$16 sps:$4 sm:$0xff]   ;;  %v4971_v57 = vld [vmem:[%s6615_s1 + $0xb88] ss:$16 sps:$4 sm:$0xff]  }
 0x18a   :  { %3341 = vmatprep.subr.bf16.mxu1 %v4904_v59  ;;  %v4974_v59 = vld [vmem:[%s6615_s1 + $0xd88] ss:$16 sps:$4 sm:$0xff]  }
 0x18c   :  { %3301 = vmatpush2.bf16.msra.mxu0 %v4899_v61  ;;  %v4979_v61 = vld [vmem:[%s6615_s1 + $0xb6c] ss:$16 sps:$4 sm:$0xff]  }
 0x18d   :  { %3342 = vmatpush2.bf16.msra.mxu1 %v4902_v63  ;;  %3352 = vmatprep.subr.bf16.mxu0 %v4907_v1  ;;  %v4982_v63 = vld [vmem:[%s6615_s1 + $0xd6c] ss:$16 sps:$4 sm:$0xff]   ;;  %v4977_v1 = vld [vmem:[%s6615_s1 + $0xb68] ss:$16 sps:$4 sm:$0xff]  }
 0x18e   :  { %3393 = vmatprep.subr.bf16.mxu1 %v4910_v2  ;;  %v4980_v2 = vld [vmem:[%s6615_s1 + $0xd68] ss:$16 sps:$4 sm:$0xff]  }
 0x18f   :  { %v3058_v60 = vpop.f32.mrf.mxu0  ;;  %3303 = vmatmul.mubr.bf16.vlgmr.msra.gmra.mxu0 %v5553_v6  ;;  %v4919_v6 = vld [vmem:[%s6615_s1 + $0xaac] ss:$16 sps:$4 sm:$0xff]  }
 0x190   :  { %v3099_v4 = vpop.f32.mrf.mxu1  ;;  %3344 = vmatmul.mubr.bf16.vlgmr.msra.gmra.mxu1 %v5767_v48  ;;  %v3059_v5 = vadd.f32 %v3058_v60, %v6219_v29  ;;  %3353 = vmatpush1.bf16.msra.mxu0 %v4905_v37  ;;  %v4922_v48 = vld [vmem:[%s6615_s1 + $0xcac] ss:$16 sps:$4 sm:$0xff]  }
 0x191   :  { %3394 = vmatpush1.bf16.msra.mxu1 %v4908_v23  ;;  %v6415_v9 = vpop.f32.mrf.mxu0  ;;  %3354 = vmatprep.subr.bf16.mxu0 %v4913_v41  ;;  %v4985_v37 = vld [vmem:[%s6615_s1 + $0xb4c] ss:$16 sps:$4 sm:$0xff]   ;;  %v4983_v41 = vld [vmem:[%s6615_s1 + $0xb48] ss:$16 sps:$4 sm:$0xff]  }
 0x192   :  { %v6417_v10 = vpop.f32.mrf.mxu1  ;;  %3395 = vmatprep.subr.bf16.mxu1 %v4916_v3  ;;  %v6425_v29 = vadd.f32 %v3099_v4, %v3059_v5  ;;  %3384 = vmatprep.mubr.bf16.mxu0 %v5598_v43  ;;  %v4925_v43 = vld [vmem:[%s6615_s1 + $0xa8c] ss:$16 sps:$4 sm:$0xff]   ;;  %v4986_v3 = vld [vmem:[%s6615_s1 + $0xd48] ss:$16 sps:$4 sm:$0xff]  }
 0x193   :  { %3425 = vmatprep.mubr.bf16.mxu1 %v5797_v58  ;;  %v3062_v12 = vpop.f32.mrf.mxu0  ;;  %v4928_v58 = vld [vmem:[%s6615_s1 + $0xc8c] ss:$16 sps:$4 sm:$0xff]   ;;  %v4989_v5 = vld [vmem:[%s6615_s1 + $0xb28] ss:$16 sps:$4 sm:$0xff]  }
 0x194   :  { %v3103_v14 = vpop.f32.mrf.mxu1  ;;  %3355 = vmatpush1.bf16.msra.mxu0 %v4911_v7  ;;  %v4988_v23 = vld [vmem:[%s6615_s1 + $0xd4c] ss:$16 sps:$4 sm:$0xff]   ;;  %v4992_v7 = vld [vmem:[%s6615_s1 + $0xd28] ss:$16 sps:$4 sm:$0xff]  }
 0x195   :  { %3396 = vmatpush1.bf16.msra.mxu1 %v4914_v8  ;;  %v3063_v49 = vpop.f32.mrf.mxu0  ;;  %3356 = vmatprep.subr.bf16.mxu0 %v4919_v6  ;;  %v4991_v60 = vld [vmem:[%s6615_s1 + $0xb2c] ss:$16 sps:$4 sm:$0xff]   ;;  %v4998_v12 = vld [vmem:[%s6615_s1 + $0xd08] ss:$16 sps:$4 sm:$0xff]  }
 0x196   :  { %v3104_v46 = vpop.f32.mrf.mxu1  ;;  %3397 = vmatprep.subr.bf16.mxu1 %v4922_v48  ;;  %v4994_v4 = vld [vmem:[%s6615_s1 + $0xd2c] ss:$16 sps:$4 sm:$0xff]   ;;  %v4995_v48 = vld [vmem:[%s6615_s1 + $0xb08] ss:$16 sps:$4 sm:$0xff]   ;;  %v5003_v49 = vld [vmem:[#allocation2 + $0x70] sm:$0xff]  }
 0x197   :  { %v4997_v8 = vld [vmem:[%s6615_s1 + $0xb0c] ss:$16 sps:$4 sm:$0xff]  }
 0x198   :  { %3357 = vmatpush1.bf16.msra.mxu0 %v4917_v15  ;;  %v5000_v6 = vld [vmem:[%s6615_s1 + $0xd0c] ss:$16 sps:$4 sm:$0xff]   ;;  %v3061_v15 = vadd.f32 %v6415_v9, %v6224_v62 }
 0x199   :  { %3398 = vmatpush1.bf16.msra.mxu1 %v4920_v16  ;;  %3358 = vmatprep.subr.bf16.mxu0 %v4925_v43  ;;  %v5001_v14 = vld [vmem:[#allocation2 + $0x78] sm:$0xff]   ;;  %v5005_v62 = vld [vmem:[#allocation2 + $0x68] sm:$0xff]  }
 0x19a   :  { %3399 = vmatprep.subr.bf16.mxu1 %v4928_v58  ;;  %v5002_v16 = vld [vmem:[#allocation2 + $0x38] sm:$0xff]   ;;  %v3102_v58 = vadd.f32 %v6417_v10, %v3061_v15  ;;  %v5019_v10 = vld [vmem:[#allocation2 + $0xf0] sm:$0xff]  }
 0x19c   :  { %3359 = vmatpush1.bf16.msra.mxu0 %v4923_v19  ;;  %v5004_v19 = vld [vmem:[#allocation2 + $0x30] sm:$0xff]  }
 0x19d   :  { %3400 = vmatpush1.bf16.msra.mxu1 %v4926_v20  ;;  %3360 = vmatprep.subr.bf16.mxu0 %v4931_v21 }
 0x19e   :  { %3401 = vmatprep.subr.bf16.mxu1 %v4934_v22 }
 0x1a0   :  { %3361 = vmatpush1.bf16.msra.mxu0 %v4929_v24 }
 0x1a1   :  { %3402 = vmatpush1.bf16.msra.mxu1 %v4932_v25  ;;  %3362 = vmatprep.subr.bf16.mxu0 %v4937_v27  ;;  %v5006_v27 = vld [vmem:[#allocation2 + $0x28] sm:$0xff]  }
 0x1a2   :  { %3403 = vmatprep.subr.bf16.mxu1 %v4940_v28  ;;  %v5007_v28 = vld [vmem:[#allocation2 + $0x60] sm:$0xff]  }
 0x1a4   :  { %3363 = vmatpush1.bf16.msra.mxu0 %v4935_v13 }
 0x1a5   :  { %3404 = vmatpush1.bf16.msra.mxu1 %v4938_v30  ;;  %3364 = vmatprep.subr.bf16.mxu0 %v4943_v31  ;;  %v5018_v30 = vld [vmem:[#allocation2 + $0xb8] sm:$0xff]   ;;  %v5008_v31 = vld [vmem:[#allocation2 + $0x20] sm:$0xff]  }
 0x1a6   :  { %3405 = vmatprep.subr.bf16.mxu1 %v4946_v33  ;;  %v5020_v33 = vld [vmem:[#allocation2 + $0xb0] sm:$0xff]  }
 0x1a8   :  { %3365 = vmatpush1.bf16.msra.mxu0 %v4941_v34  ;;  %v5009_v34 = vld [vmem:[#allocation2 + $0x58] sm:$0xff]  }
 0x1a9   :  { %3406 = vmatpush1.bf16.msra.mxu1 %v4944_v36  ;;  %3366 = vmatprep.subr.bf16.mxu0 %v4949_v38  ;;  %v5021_v36 = vld [vmem:[#allocation2 + $0xe8] sm:$0xff]   ;;  %v5010_v38 = vld [vmem:[#allocation2 + $0x18] sm:$0xff]  }
 0x1aa   :  { %3407 = vmatprep.subr.bf16.mxu1 %v4952_v39  ;;  %v5022_v39 = vld [vmem:[#allocation2 + $0xa8] sm:$0xff]  }
 0x1ac   :  { %3367 = vmatpush1.bf16.msra.mxu0 %v4947_v40  ;;  %v5011_v40 = vld [vmem:[#allocation2 + $0x50] sm:$0xff]  }
 0x1ad   :  { %3408 = vmatpush1.bf16.msra.mxu1 %v4950_v0  ;;  %3368 = vmatprep.subr.bf16.mxu0 %v4955_v17  ;;  %v5023_v0 = vld [vmem:[#allocation2 + $0xe0] sm:$0xff]   ;;  %v5012_v17 = vld [vmem:[#allocation2 + $0x10] sm:$0xff]  }
 0x1ae   :  { %3409 = vmatprep.subr.bf16.mxu1 %v4958_v44  ;;  %v5024_v44 = vld [vmem:[#allocation2 + $0xa0] sm:$0xff]  }
 0x1b0   :  { %3369 = vmatpush2.bf16.msra.mxu0 %v4953_v45  ;;  %v5013_v45 = vld [vmem:[#allocation2 + $0x48] sm:$0xff]  }
 0x1b1   :  { %3410 = vmatpush2.bf16.msra.mxu1 %v4956_v32  ;;  %3370 = vmatprep.subr.bf16.mxu0 %v4961_v47  ;;  %v5025_v32 = vld [vmem:[#allocation2 + $0xd8] sm:$0xff]   ;;  %v5014_v47 = vld [vmem:[#allocation2 + $0x8] sm:$0xff]  }
 0x1b2   :  { %3411 = vmatprep.subr.bf16.mxu1 %v4964_v50  ;;  %v5026_v50 = vld [vmem:[#allocation2 + $0x98] sm:$0xff]  }
 0x1b4   :  { %3371 = vmatpush2.bf16.msra.mxu0 %v4959_v51  ;;  %v5015_v51 = vld [vmem:[#allocation2 + $0x40] sm:$0xff]  }
 0x1b5   :  { %3412 = vmatpush2.bf16.msra.mxu1 %v4962_v52  ;;  %3372 = vmatprep.subr.bf16.mxu0 %v4967_v35  ;;  %v5027_v52 = vld [vmem:[#allocation2 + $0xd0] sm:$0xff]   ;;  %v5016_v35 = vld [vmem:[#allocation2] sm:$0xff]  }
 0x1b6   :  { %3413 = vmatprep.subr.bf16.mxu1 %v4970_v54  ;;  %v5028_v54 = vld [vmem:[#allocation2 + $0x90] sm:$0xff]  }
 0x1b8   :  { %3373 = vmatpush2.bf16.msra.mxu0 %v4965_v55 }
 0x1b9   :  { %3414 = vmatpush2.bf16.msra.mxu1 %v4968_v56  ;;  %3374 = vmatprep.subr.bf16.mxu0 %v4973_v18  ;;  %v498_v18 = vsub.s32 2, %v5233_v42 }
 0x1ba   :  { %3415 = vmatprep.subr.bf16.mxu1 %v4976_v26  ;;  %v502_v26 = vsub.s32 3, %v5233_v42 }
 0x1bc   :  { %3375 = vmatpush2.bf16.msra.mxu0 %v4971_v57  ;;  %v5033_v57 = vld [vmem:[%s6616_s2] sm:$0xf] }
 0x1bd   :  { %3416 = vmatpush2.bf16.msra.mxu1 %v4974_v59  ;;  %3376 = vmatprep.subr.bf16.mxu0 %v4979_v61  ;;  %v499_v59 = vrot.slane %v5033_v57, %v498_v18  ;;  %v503_v61 = vrot.slane %v5033_v57, %v502_v26 }
 0x1be   :  { %3417 = vmatprep.subr.bf16.mxu1 %v4982_v63 }
 0x1c0   :  { %3377 = vmatpush2.bf16.msra.mxu0 %v4977_v1 }
 0x1c1   :  { %3418 = vmatpush2.bf16.msra.mxu1 %v4980_v2  ;;  %3378 = vmatprep.subr.bf16.mxu0 %v4985_v37  ;;  %v5029_v2 = vld [vmem:[#allocation2 + $0xc8] sm:$0xff]  }
 0x1c2   :  { %3419 = vmatprep.subr.bf16.mxu1 %v4988_v23 }
 0x1c4   :  { %3379 = vmatpush2.bf16.msra.mxu0 %v4983_v41  ;;  %v5030_v41 = vld [vmem:[#allocation2 + $0x88] sm:$0xff]  }
 0x1c5   :  { %3420 = vmatpush2.bf16.msra.mxu1 %v4986_v3  ;;  %3380 = vmatprep.subr.bf16.mxu0 %v4991_v60 }
 0x1c6   :  { %3421 = vmatprep.subr.bf16.mxu1 %v4994_v4 }
 0x1c8   :  { %3381 = vmatpush2.bf16.msra.mxu0 %v4989_v5 }
 0x1c9   :  { %3422 = vmatpush2.bf16.msra.mxu1 %v4992_v7  ;;  %3382 = vmatprep.subr.bf16.mxu0 %v4997_v8  ;;  %v5031_v8 = vld [vmem:[#allocation2 + $0xc0] sm:$0xff]  }
 0x1ca   :  { %3423 = vmatprep.subr.bf16.mxu1 %v5000_v6 }
 0x1cc   :  { %3383 = vmatpush2.bf16.msra.mxu0 %v4995_v48  ;;  %v5032_v48 = vld [vmem:[#allocation2 + $0x80] sm:$0xff]  }
 0x1cd   :  { %3424 = vmatpush2.bf16.msra.mxu1 %v4998_v12  ;;  %4278 = vmatprep.subr.bf16.mxu0 %v5001_v14 }
 0x1cf   :  { %v3140_v46 = vpop.f32.mrf.mxu0  ;;  %3385 = vmatmul.mubr.bf16.vlgmr.msra.gmra.mxu0 %v5782_v53 }
 0x1d0   :  { %v6593_v43 = vpop.f32.mrf.mxu1  ;;  %3426 = vmatmul.mubr.bf16.vlgmr.msra.gmra.mxu1 %v5990_v11  ;;  %4279 = vmatpush3.bf16.msra.mxu0 %v5002_v16  ;;  %v5017_v11 = vld [vmem:[#allocation2 + $0xf8] sm:$0xff]   ;;  %v3141_v55 = vadd.f32 %v3140_v46, %v6425_v29 }
 0x1d1   :  { %v3142_v20 = vpop.f32.mrf.mxu0  ;;  %4280 = vmatprep.subr.bf16.mxu0 %v5003_v49  ;;  %4300 = vmatprep.subr.bf16.mxu1 %v5017_v11  ;;  %v3182_v63 = vadd.f32 %v6593_v43, %v499_v59 }
 0x1d2   :  { %v6598_v21 = vpop.f32.mrf.mxu1  ;;  %v3143_v9 = vadd.f32 %v3142_v20, %v3102_v58  ;;  %4301 = vmatpush3.bf16.msra.mxu1 %v5018_v30  ;;  %v3434_v56 = vpack.c.bf16 %v3141_v55, %v3141_v55 }
 0x1d3   :  { %v3144_v22 = vpop.f32.mrf.mxu0  ;;  %4302 = vmatprep.subr.bf16.mxu1 %v5019_v10  ;;  %v3184_v37 = vadd.f32 %v6598_v21, %v503_v61 }
 0x1d4   :  { %v3185_v24 = vpop.f32.mrf.mxu1  ;;  %v3435_v25 = vpack.c.bf16 %v3143_v9, %v3143_v9  ;;  %4281 = vmatpush3.bf16.msra.mxu0 %v5004_v19 }
 0x1d5   :  { %v3145_v13 = vpop.f32.mrf.mxu0  ;;  %4282 = vmatprep.subr.bf16.mxu0 %v5005_v62 }
 0x1d6   :  { %v3186_v53 = vpop.f32.mrf.mxu1  ;;  %3733 = vmatprep.mubr.bf16.mxu0 %v3435_v25  ;;  %4303 = vmatpush3.bf16.msra.mxu1 %v5020_v33 }
 0x1d7   :  { %4304 = vmatprep.subr.bf16.mxu1 %v5021_v36 }
 0x1d8   :  { %4283 = vmatpush3.bf16.msra.mxu0 %v5006_v27 }
 0x1d9   :  { %4284 = vmatprep.subr.bf16.mxu0 %v5007_v28 }
 0x1da   :  { %4305 = vmatpush3.bf16.msra.mxu1 %v5022_v39 }
 0x1db   :  { %4306 = vmatprep.subr.bf16.mxu1 %v5023_v0 }
 0x1dc   :  { %4285 = vmatpush3.bf16.msra.mxu0 %v5008_v31 }
 0x1dd   :  { %4286 = vmatprep.subr.bf16.mxu0 %v5009_v34 }
 0x1de   :  { %4307 = vmatpush3.bf16.msra.mxu1 %v5024_v44 }
 0x1df   :  { %4308 = vmatprep.subr.bf16.mxu1 %v5025_v32 }
 0x1e0   :  { %4287 = vmatpush3.bf16.msra.mxu0 %v5010_v38 }
 0x1e1   :  { %4288 = vmatprep.subr.bf16.mxu0 %v5011_v40 }
 0x1e2   :  { %4309 = vmatpush3.bf16.msra.mxu1 %v5026_v50 }
 0x1e3   :  { %4310 = vmatprep.subr.bf16.mxu1 %v5027_v52 }
 0x1e4   :  { %4289 = vmatpush3.bf16.msra.mxu0 %v5012_v17 }
 0x1e5   :  { %4290 = vmatprep.subr.bf16.mxu0 %v5013_v45  ;;  %v4245_v45 = vld [vmem:[%s6618_s4] ss:$0 sm:$0xff] }
 0x1e6   :  { %4311 = vmatpush3.bf16.msra.mxu1 %v5028_v54 }
 0x1e7   :  { %4312 = vmatprep.subr.bf16.mxu1 %v5029_v2 }
 0x1e8   :  { %4291 = vmatpush3.bf16.msra.mxu0 %v5014_v47 }
 0x1e9   :  { %4292 = vmatprep.subr.bf16.mxu0 %v5015_v51 }
 0x1ea   :  { %4313 = vmatpush3.bf16.msra.mxu1 %v5030_v41 }
 0x1eb   :  { %4314 = vmatprep.subr.bf16.mxu1 %v5031_v8 }
 0x1ec   :  { %4293 = vmatpush3.bf16.msra.mxu0 %v5016_v35 }
 0x1ee   :  { %4315 = vmatpush3.bf16.msra.mxu1 %v5032_v48 }
 0x1ef   :  { %3734 = vmatmul.mubr.bf16.vlgmr.msra.gmra.mxu0 %v3434_v56 }
 0x20f   :  { %v3222_v1 = vpop.f32.mrf.mxu0 }
 0x210   :  { %v3263_v29 = vpop.f32.mrf.mxu1  ;;  %v3223_v23 = vadd.f32 %v3222_v1, %v3182_v63 }
 0x211   :  { %v3224_v3 = vpop.f32.mrf.mxu0 }
 0x212   :  { %v3265_v60 = vpop.f32.mrf.mxu1  ;;  %v3264_v4 = vadd.f32 %v3263_v29, %v3223_v23  ;;  %v3225_v42 = vadd.f32 %v3224_v3, %v3184_v37 }
 0x213   :  { %v3226_v5 = vpop.f32.mrf.mxu0 }
 0x214   :  { %v3267_v7 = vpop.f32.mrf.mxu1  ;;  %v3266_v6 = vadd.f32 %v3265_v60, %v3225_v42 }
 0x215   :  { %v3227_v12 = vpop.f32.mrf.mxu0 }
 0x216   :  { %v3268_v14 = vpop.f32.mrf.mxu1 }
 0x24f   :  { %v3304_v15 = vpop.f32.mrf.mxu0 }
 0x250   :  { %v3345_v16 = vpop.f32.mrf.mxu1  ;;  %v3305_v49 = vadd.f32 %v3304_v15, %v3264_v4 }
 0x251   :  { %v3306_v46 = vpop.f32.mrf.mxu0 }
 0x252   :  { %v3347_v43 = vpop.f32.mrf.mxu1  ;;  %v3346_v58 = vadd.f32 %v3345_v16, %v3305_v49  ;;  %v3307_v9 = vadd.f32 %v3306_v46, %v3266_v6 }
 0x253   :  { %v3308_v19 = vpop.f32.mrf.mxu0 }
 0x254   :  { %v3349_v20 = vpop.f32.mrf.mxu1  ;;  %v3348_v25 = vadd.f32 %v3347_v43, %v3307_v9 }
 0x255   :  { %v3309_v21 = vpop.f32.mrf.mxu0 }
 0x256   :  { %v3350_v62 = vpop.f32.mrf.mxu1 }
 0x28f   :  { %v3386_v22 = vpop.f32.mrf.mxu0 }
 0x290   :  { %v3427_v24 = vpop.f32.mrf.mxu1  ;;  %v3387_v27 = vadd.f32 %v3386_v22, %v3346_v58 }
 0x291   :  { %v3388_v28 = vpop.f32.mrf.mxu0 }
 0x292   :  { %v3429_v13 = vpop.f32.mrf.mxu1  ;;  %v3389_v53 = vadd.f32 %v3388_v28, %v3348_v25  ;;  %v3428_v11 = vadd.f32 %v3427_v24, %v3387_v27 }
 0x293   :  { %v3390_v30 = vpop.f32.mrf.mxu0 }
 0x294   :  { %v3431_v10 = vpop.f32.mrf.mxu1  ;;  %v3430_v31 = vadd.f32 %v3429_v13, %v3389_v53  ;;  %v3436_v38 = vpack.c.bf16 %v3428_v11, %v3428_v11 }
 0x295   :  { %v3391_v33 = vpop.f32.mrf.mxu0 }
 0x296   :  { %v3432_v34 = vpop.f32.mrf.mxu1  ;;  %v3437_v36 = vpack.c.bf16 %v3430_v31, %v3430_v31 }
 0x298   :  { %3773 = vmatprep.mubr.bf16.mxu1 %v3437_v36 }
 0x299   :  { %3774 = vmatmul.mubr.bf16.vlgmr.msra.gmra.mxu1 %v3436_v38 }
 0x2af   :  { %v4294_v39 = vpop.f32.mrf.mxu0 }
 0x2b1   :  { %v4295_v40 = vpop.f32.mrf.mxu0 }
 0x2b2   :  { %v4296_v0 = vadd.f32 %v4295_v40, %v4294_v39 }
 0x2b3   :  { %v4297_v17 = vpop.f32.mrf.mxu0 }
 0x2b4   :  { %v3736_v50 = vadd.f32 %v4296_v0, %v4245_v45 }
 0x2b5   :  { %v4298_v44 = vpop.f32.mrf.mxu0 }
 0x359   :  { %v4316_v32 = vpop.f32.mrf.mxu1 }
 0x35b   :  { %v4317_v47 = vpop.f32.mrf.mxu1 }
 0x35c   :  { %v4318_v51 = vadd.f32 %v4317_v47, %v4316_v32 }
 0x35d   :  { %v4319_v52 = vpop.f32.mrf.mxu1 }
 0x35e   :  { %v3776_v35 = vadd.f32 %v4318_v51, %v3736_v50 }
 0x35f   :  { %v4320_v54 = vpop.f32.mrf.mxu1 }
 0x360   :  { %3781 = vst [vmem:[#allocation5] sm:$0x3] %v3776_v35 }
 0x361   :  { %5065 = shalt.err (!%p5062_p9)
}
 0x362   :  { %3791 = dma.vmem_to_hbm [thread:$0]  %s3789_s22, 32, %s6619_s5, [#allocation4]  }
 0x363   :  { %5076 = dma.done.wait [#allocation4], 32  }
 0x364   :  { %5077 = vsyncadd [#allocation4], 4294967264 }
 0x365   :  { %3795 = vsyncpa [#allocation3], 1 }
 0x366   :  { %3796 = vsyncpa [#allocation4], 1 }

// kernel: _lambda_.2
= control target key start
LH: loop header
LB: loop body
LE: loop exit
PB: predicated region body
PF: predicated region fallthrough
CT: control target
= control target key end

     0   :  { %9 = vsyncpa [#allocation4], 0  ;;  %s15749_s0 = inlined_call_operand.vmem [shape: bf16[2,256,32], index: 0, kind: input, shape index: {}]   ;;  %s15750_s1 = inlined_call_operand.hbm [shape: bf16[32,128], index: 1, kind: input, shape index: {}]   ;;  %s15751_s2 = inlined_call_operand.vmem [shape: bf16[128,1792], index: 2, kind: input, shape index: {}]   ;;  %s15752_s3 = inlined_call_operand.hbm [shape: f32[1,1792], index: 3, kind: input, shape index: {}]   ;;  %s15753_s4 = inlined_call_operand.vmem [shape: bf16[2,1,1792], index: 4, kind: output, shape index: {}]  }
   0x1   :  { %10 = vsyncpa [#allocation6], 0  ;;  %s9989_s15 = smov 0   ;;  %s9991_s16 = smov 0  }
   0x2   :  { %s9993_s17 = smov 0  }
   0x3 LB: > { %s7011_s18 = sadd.s32 4294967295, %s9954_s17   ;;  %s28_s19 = sadd.s32 1, %s9950_s16  ;;  %s9954_s17 = sphi %s9993_s17, %s16_s17   ;;  %s9950_s16 = sphi %s9991_s16, %s17729_s16   ;;  %s9946_s15 = sphi %s9989_s15, %s17728_s15  }
   0x4   : > { %p30_p0 = scmp.ge.s32.totalorder %s28_s19, 2  ;;  %p7013_p1 = scmp.ge.s32.totalorder %s9954_s17, 1 }
   0x5   : > { %p150_p2 = scmp.lt.s32.totalorder %s9954_s17, 3  ;;  %p10014_p4 = scmp.eq.s32.totalorder %s7011_s18, 0 }
   0x6   : > { %s17731_s19 = smov (%p30_p0, %s28_s19), 0  ;;  %s9956_s22 = smov [#allocation3]  }
   0x7   : > { %p10010_p3 = pnand %p7013_p1, %p150_p2  ;;  %s162_s23 = sshll.u32 %s9956_s22, 4  ;;  %s163_s23 = int_to_ptr.vmem [resolvable:$true] %s162_s23 }
   0x8   : > { %s9957_s25 = smov [#allocation5]   ;;  %s9883_s27 = scalar_lea.vmem %s163_s23, 256 }
   0x9   : > { %p7721_p5 = pneg %p10010_p3  ;;  %s179_s26 = sshll.u32 %s9957_s25, 4  ;;  %s180_s26 = int_to_ptr.vmem [resolvable:$true] %s179_s26 }
   0xa   : > { %p9884_p8 = scmp.ne.s32.totalorder %s163_s23, %s9883_s27  ;;  %p9891_p11 = scmp.lt.s32.totalorder %s163_s23, %s163_s23 }
   0xb   : > { %p10022_p6 = pnand %p10014_p4, %p7721_p5  ;;  %p9892_p12 = scmp.lt.s32.totalorder %s9883_s27, %s9883_s27 }
   0xd   : > { %p9874_p7 = pneg %p10022_p6  ;;  %p9893_p13 = por %p9892_p12, %p9891_p11 }
   0xf   : > { %p9886_p9 = pnand %p9884_p8, %p9874_p7 }
  0x11   : > { %p9887_p10 = pneg %p9886_p9 }
  0x13   : > { %p9894_p0 = pnand %p9893_p13, %p9887_p10 }
  0x15   : > { %9897 = shalt.err (!%p9894_p0)
}
  0x16   : > { %s9958_s28 = smov 64   ;;  %s9959_s29 = smov 4  }
  0x17   : > { %7724 = dma.hbm_to_vmem [thread:$0]  (!%p10022_p6), %s15750_s1, 256, %s163_s23, [#allocation4], %s9958_s28, %s9958_s28, %s9959_s29  }
  0x18   : > { %s9909_s6 = scalar_lea.vmem %s180_s26, 224  ;;  %p9917_p8 = scmp.lt.s32.totalorder %s180_s26, %s180_s26 }
  0x19   : > { %p9910_p1 = scmp.ne.s32.totalorder %s180_s26, %s9909_s6  ;;  %p9918_p9 = scmp.lt.s32.totalorder %s9909_s6, %s9909_s6 }
  0x1b   : > { %p9912_p2 = pnand %p9910_p1, %p9874_p7  ;;  %p9919_p11 = por %p9918_p9, %p9917_p8 }
  0x1d   : > { %p9913_p5 = pneg %p9912_p2 }
  0x1f   : > { %p9920_p10 = pnand %p9919_p11, %p9913_p5 }
  0x21   : > { %9923 = shalt.err (!%p9920_p10)
}
  0x22   : > { %7727 = dma.hbm_to_vmem [thread:$0]  (!%p10022_p6), %s15752_s3, 224, %s180_s26, [#allocation6]  }
  0x23   : > { %205 = sbr.rel (%p10010_p3) target bundleno = 1662 (0x67e), region = 36 }
  0x28   : > { %9937 = dma.done.wait (%p10014_p4), [#allocation4], 256  }
  0x29   : > { %9939 = vsyncadd (%p10014_p4), [#allocation4], 4294967040 }
  0x2a   : > { %9941 = dma.done.wait (%p10014_p4), [#allocation6], 224  }
  0x2b   : > { %9943 = vsyncadd (%p10014_p4), [#allocation6], 4294967072  ;;  %p239_p7 = scmp.lt.s32.totalorder %s9946_s15, 1  ;;  %v7764_v0 = vld [vmem:[#allocation3 + $0x8] sm:$0xff]   ;;  %v7765_v1 = vld [vmem:[#allocation3] sm:$0xff]   ;;  %vm391_vm0 = vcmask 261120  }
  0x2c   : > { %7676 = vmatprep.subr.bf16.mxu0 %v7764_v0  ;;  %v7782_v18 = vld [vmem:[%s15751_s2 + $0x314] ss:$56 sps:$4 sm:$0xff]   ;;  %v7784_v20 = vld [vmem:[%s15751_s2 + $0x310] ss:$56 sps:$4 sm:$0xff]   ;;  %v7788_v22 = vld [vmem:[%s15751_s2 + $0x2a4] ss:$56 sps:$4 sm:$0xff]  }
  0x2d   : > { %s17733_s15 = smov (!%p239_p7, %s9946_s15), 1  ;;  %7677 = vmatpush3.bf16.msra.mxu0 %v7764_v0  ;;  %v7787_v19 = vld [vmem:[%s15751_s2 + $0x31c] ss:$56 sps:$4 sm:$0xff]   ;;  %v7785_v21 = vld [vmem:[%s15751_s2 + $0x318] ss:$56 sps:$4 sm:$0xff]   ;;  %1587 = vmatprep.subr.bf16.mxu1 %v7782_v18  ;;  %v15755_v50 = vmov 0  }
  0x2e   : > { %s7657_s9 = sshll.u32 %s17733_s15, 7  ;;  %7678 = vmatprep.subr.bf16.mxu0 %v7765_v1  ;;  %1588 = vmatpush1.bf16.msra.mxu1 %v7784_v20  ;;  %v7793_v23 = vld [vmem:[%s15751_s2 + $0x2ac] ss:$56 sps:$4 sm:$0xff]   ;;  %v7790_v24 = vld [vmem:[%s15751_s2 + $0x2a0] ss:$56 sps:$4 sm:$0xff]   ;;  %vm6884_vm1 = vcmask 1040384  }
  0x2f   : > { %s10062_s12 = scalar_lea.vmem %s15749_s0, %s7657_s9  ;;  %v7791_v25 = vld [vmem:[%s15751_s2 + $0x2a8] ss:$56 sps:$4 sm:$0xff]   ;;  %1589 = vmatprep.subr.bf16.mxu1 %v7788_v22  ;;  %v7794_v26 = vld [vmem:[%s15751_s2 + $0x234] ss:$56 sps:$4 sm:$0xff]   ;;  %v7797_v29 = vld [vmem:[%s15751_s2 + $0x238] ss:$56 sps:$4 sm:$0xff]   ;;  %1619 = vmatprep.mubr.bf16.mxu1 %v15755_v50 }
  0x30   : > { %v7766_v2 = vld [vmem:[%s10062_s12] sm:$0xff]   ;;  %v7767_v3 = vld [vmem:[%s10062_s12 + $0x8] sm:$0xff]   ;;  %v7768_v4 = vld [vmem:[%s10062_s12 + $0x10] sm:$0xff]   ;;  %vm6885_vm2 = vsmask.f32 256  ;;  %vm6887_vm4 = vcmask 1041409  }
  0x31   : > { %7680 = vmatprep.mubr.msk.bf16.mxu0 %vm391_vm0, %v7766_v2  ;;  %7679 = vmatpush3.bf16.msra.mxu0 %v7765_v1  ;;  %v7769_v5 = vld [vmem:[%s10062_s12 + $0x18] sm:$0xff]   ;;  %v7770_v6 = vld [vmem:[%s10062_s12 + $0x20] sm:$0xff]   ;;  %v7771_v7 = vld [vmem:[%s10062_s12 + $0x28] sm:$0xff]   ;;  %vm6888_vm5 = vsmask.f32 1280  ;;  %vm6891_vm7 = vcmask 1042434  }
  0x32   : > { %v7772_v8 = vld [vmem:[%s10062_s12 + $0x30] sm:$0xff]   ;;  %v7773_v9 = vld [vmem:[%s10062_s12 + $0x38] sm:$0xff]   ;;  %v7774_v10 = vld [vmem:[%s10062_s12 + $0x40] sm:$0xff]   ;;  %1780 = vmatprep.subr.bf16.mxu0 %v7787_v19  ;;  %1590 = vmatpush1.bf16.msra.mxu1 %v7790_v24  ;;  %vm6892_vm8 = vsmask.f32 2304  ;;  %vm6895_vm10 = vcmask 1043459  }
  0x33   : > { %v7775_v11 = vld [vmem:[%s10062_s12 + $0x48] sm:$0xff]   ;;  %v7776_v12 = vld [vmem:[%s10062_s12 + $0x50] sm:$0xff]   ;;  %v7777_v13 = vld [vmem:[%s10062_s12 + $0x58] sm:$0xff]   ;;  %1591 = vmatprep.subr.bf16.mxu1 %v7794_v26  ;;  %vm6896_vm11 = vsmask.f32 3328  ;;  %vm6899_vm14 = vcmask 1044484  }
  0x34   : > { %7681 = vmatmul.mubr.msk.bf16.vlgmr.msra.gmra.mxu0 %vm391_vm0, %v7767_v3  ;;  %v7778_v14 = vld [vmem:[%s10062_s12 + $0x60] sm:$0xff]   ;;  %v7779_v15 = vld [vmem:[%s10062_s12 + $0x68] sm:$0xff]   ;;  %v7780_v16 = vld [vmem:[%s10062_s12 + $0x70] sm:$0xff]   ;;  %vm6900_vm15 = vsmask.f32 4352  ;;  %s7712_s21 = smul.u32 14, %s17733_s15 }
  0x35   : > { %7684 = vmatprep.mubr.msk.bf16.mxu0 %vm391_vm0, %v7768_v4  ;;  %v7781_v17 = vld [vmem:[%s10062_s12 + $0x78] sm:$0xff]   ;;  %1781 = vmatpush1.bf16.msra.mxu0 %v7785_v21  ;;  %v7796_v28 = vld [vmem:[%s15751_s2 + $0x230] ss:$56 sps:$4 sm:$0xff]   ;;  %v7805_v31 = vld [vmem:[%s15751_s2 + $0x1cc] ss:$56 sps:$4 sm:$0xff]  }
  0x36   : > { %1782 = vmatprep.subr.bf16.mxu0 %v7793_v23  ;;  %v7799_v27 = vld [vmem:[%s15751_s2 + $0x23c] ss:$56 sps:$4 sm:$0xff]   ;;  %1592 = vmatpush1.bf16.msra.mxu1 %v7796_v28  ;;  %v7802_v32 = vld [vmem:[%s15751_s2 + $0x1c0] ss:$56 sps:$4 sm:$0xff]   ;;  %v7808_v36 = vld [vmem:[%s15751_s2 + $0x150] ss:$56 sps:$4 sm:$0xff]   ;;  %s15455_s24 = scalar_lea.vmem %s15753_s4, %s7712_s21 }
  0x37   : > { %v7800_v30 = vld [vmem:[%s15751_s2 + $0x1c4] ss:$56 sps:$4 sm:$0xff]   ;;  %v7803_v33 = vld [vmem:[%s15751_s2 + $0x1c8] ss:$56 sps:$4 sm:$0xff]   ;;  %v7806_v34 = vld [vmem:[%s15751_s2 + $0x154] ss:$56 sps:$4 sm:$0xff]  }
  0x38   : > { %1593 = vmatprep.subr.bf16.mxu1 %v7800_v30  ;;  %v7811_v35 = vld [vmem:[%s15751_s2 + $0x15c] ss:$56 sps:$4 sm:$0xff]   ;;  %v7809_v37 = vld [vmem:[%s15751_s2 + $0x158] ss:$56 sps:$4 sm:$0xff]   ;;  %v7817_v39 = vld [vmem:[%s15751_s2 + $0xec] ss:$56 sps:$4 sm:$0xff]  }
  0x39   : > { %1783 = vmatpush1.bf16.msra.mxu0 %v7791_v25  ;;  %v7812_v38 = vld [vmem:[%s15751_s2 + $0xe4] ss:$56 sps:$4 sm:$0xff]   ;;  %v7814_v40 = vld [vmem:[%s15751_s2 + $0xe0] ss:$56 sps:$4 sm:$0xff]   ;;  %v7818_v42 = vld [vmem:[%s15751_s2 + $0x74] ss:$56 sps:$4 sm:$0xff]  }
  0x3a   : > { %1784 = vmatprep.subr.bf16.mxu0 %v7799_v27  ;;  %1594 = vmatpush1.bf16.msra.mxu1 %v7802_v32  ;;  %v7815_v41 = vld [vmem:[%s15751_s2 + $0xe8] ss:$56 sps:$4 sm:$0xff]   ;;  %v7823_v43 = vld [vmem:[%s15751_s2 + $0x7c] ss:$56 sps:$4 sm:$0xff]   ;;  %v7821_v45 = vld [vmem:[%s15751_s2 + $0x78] ss:$56 sps:$4 sm:$0xff]  }
  0x3b   : > { %1595 = vmatprep.subr.bf16.mxu1 %v7806_v34  ;;  %v7820_v44 = vld [vmem:[%s15751_s2 + $0x70] ss:$56 sps:$4 sm:$0xff]   ;;  %v7824_v46 = vld [vmem:[%s15751_s2 + $0x4] ss:$56 sps:$4 sm:$0xff]   ;;  %v7826_v48 = vld [vmem:[%s15751_s2] ss:$56 sps:$4 sm:$0xff]  }
  0x3c   : > { %7685 = vmatmul.mubr.msk.bf16.gmra.mxu0 %vm391_vm0, %v7769_v5  ;;  %v7829_v47 = vld [vmem:[%s15751_s2 + $0xc] ss:$56 sps:$4 sm:$0xff]   ;;  %v7827_v49 = vld [vmem:[%s15751_s2 + $0x8] ss:$56 sps:$4 sm:$0xff]   ;;  %vm15392_vm3 = vmand %vm6884_vm1, %vm6885_vm2  ;;  %vm6903_vm2 = vcmask 1045509  }
  0x3d   : > { %7688 = vmatprep.mubr.msk.bf16.mxu0 %vm391_vm0, %v7770_v6  ;;  %1785 = vmatpush1.bf16.msra.mxu0 %v7797_v29  ;;  %v7832_v51 = vld [vmem:[%s15751_s2 + $0x324] ss:$56 sps:$4 sm:$0xff]   ;;  %v7830_v34 = vld [vmem:[%s15751_s2 + $0x320] ss:$56 sps:$4 sm:$0xff]   ;;  %vm15397_vm6 = vmand %vm6887_vm4, %vm6888_vm5 }
  0x3e   : > { %1786 = vmatprep.subr.bf16.mxu0 %v7805_v31  ;;  %1596 = vmatpush1.bf16.msra.mxu1 %v7808_v36  ;;  %v7853_v62 = vld [vmem:[%s15751_s2 + $0x32c] ss:$56 sps:$4 sm:$0xff]   ;;  %vm6890_vm9 = vmor %vm15397_vm6, %vm15392_vm3  ;;  %vm6904_vm3 = vsmask.f32 5376  ;;  %vm6907_vm6 = vcmask 1046534  }
  0x3f   : > { %1597 = vmatprep.subr.bf16.mxu1 %v7812_v38  ;;  %vm6893_vm12 = vmand %vm6891_vm7, %vm6892_vm8  ;;  %vm6908_vm7 = vsmask.f32 6400 }
  0x40   : > { %vm15408_vm13 = vmor %vm6893_vm12, %vm6890_vm9 }
  0x41   : > { %1787 = vmatpush1.bf16.msra.mxu0 %v7803_v33  ;;  %vm6901_vm4 = vmand %vm6899_vm14, %vm6900_vm15 }
  0x42   : > { %1788 = vmatprep.subr.bf16.mxu0 %v7811_v35  ;;  %1598 = vmatpush1.bf16.msra.mxu1 %v7814_v40  ;;  %v7851_v40 = vld [vmem:[%s15751_s2 + $0x328] ss:$56 sps:$4 sm:$0xff]   ;;  %vm15459_vm8 = vmand %vm6903_vm2, %vm6904_vm3 }
  0x43   : > { %1599 = vmatprep.subr.bf16.mxu1 %v7818_v42  ;;  %v7856_v42 = vld [vmem:[%s15751_s2 + $0x2bc] ss:$56 sps:$4 sm:$0xff]   ;;  %vm6909_vm12 = vmand %vm6907_vm6, %vm6908_vm7 }
  0x44   : > { %7689 = vmatmul.mubr.msk.bf16.gmra.mxu0 %vm391_vm0, %v7771_v7 }
  0x45   : > { %7692 = vmatprep.mubr.msk.bf16.mxu0 %vm391_vm0, %v7772_v8  ;;  %1789 = vmatpush1.bf16.msra.mxu0 %v7809_v37  ;;  %v7835_v37 = vld [vmem:[%s15751_s2 + $0x2b4] ss:$56 sps:$4 sm:$0xff]  }
  0x46   : > { %1790 = vmatprep.subr.bf16.mxu0 %v7817_v39  ;;  %1600 = vmatpush1.bf16.msra.mxu1 %v7820_v44  ;;  %v7833_v44 = vld [vmem:[%s15751_s2 + $0x2b0] ss:$56 sps:$4 sm:$0xff]  }
  0x47   : > { %1601 = vmatprep.subr.bf16.mxu1 %v7824_v46 }
  0x49   : > { %1791 = vmatpush1.bf16.msra.mxu0 %v7815_v41 }
  0x4a   : > { %1792 = vmatprep.subr.bf16.mxu0 %v7823_v43  ;;  %1602 = vmatpush1.bf16.msra.mxu1 %v7826_v48 }
  0x4b   : > { %1973 = vmatprep.subr.bf16.mxu1 %v7832_v51  ;;  %v7854_v51 = vld [vmem:[%s15751_s2 + $0x2b8] ss:$56 sps:$4 sm:$0xff]  }
  0x4c   : > { %7693 = vmatmul.mubr.msk.bf16.gmra.mxu0 %vm391_vm0, %v7773_v9 }
  0x4d   : > { %7696 = vmatprep.mubr.msk.bf16.mxu0 %vm391_vm0, %v7774_v10  ;;  %1793 = vmatpush1.bf16.msra.mxu0 %v7821_v45 }
  0x4e   : > { %1794 = vmatprep.subr.bf16.mxu0 %v7829_v47  ;;  %v7838_v47 = vld [vmem:[%s15751_s2 + $0x244] ss:$56 sps:$4 sm:$0xff]  }
  0x51   : > { %1795 = vmatpush1.bf16.msra.mxu0 %v7827_v49 }
  0x52   : > { %2166 = vmatprep.subr.bf16.mxu0 %v7853_v62 }
  0x54   : > { %7697 = vmatmul.mubr.msk.bf16.gmra.mxu0 %vm391_vm0, %v7775_v11 }
  0x55   : > { %7700 = vmatprep.mubr.msk.bf16.mxu0 %vm391_vm0, %v7776_v12 }
  0x5c   : > { %7701 = vmatmul.mubr.msk.bf16.gmra.mxu0 %vm391_vm0, %v7777_v13 }
  0x5d   : > { %7704 = vmatprep.mubr.msk.bf16.mxu0 %vm391_vm0, %v7778_v14 }
  0x64   : > { %7705 = vmatmul.mubr.msk.bf16.gmra.mxu0 %vm391_vm0, %v7779_v15 }
  0x65   : > { %7708 = vmatprep.mubr.msk.bf16.mxu0 %vm391_vm0, %v7780_v16 }
  0x6c   : > { %7709 = vmatmul.mubr.msk.bf16.gmra.mxu0 %vm391_vm0, %v7781_v17  ;;  %vm15418_vm0 = vmand %vm6895_vm10, %vm6896_vm11  ;;  %vm6911_vm10 = vcmask 1047559   ;;  %vm6912_vm11 = vsmask.f32 7424 }
  0x6d   : > { %1812 = vmatprep.mubr.bf16.mxu0 %v15755_v50  ;;  %vm6898_vm1 = vmor %vm15418_vm0, %vm15408_vm13 }
  0x6e   : > { %vm15437_vm5 = vmor %vm6901_vm4, %vm6898_vm1 }
  0x6f   : > { %vm6906_vm9 = vmor %vm15459_vm8, %vm15437_vm5 }
  0x70   : > { %vm15485_vm13 = vmor %vm6909_vm12, %vm6906_vm9 }
  0x71   : > { %vm6913_vm14 = vmand %vm6911_vm10, %vm6912_vm11 }
  0x72   : > { %vm6914_vm15 = vmor %vm6913_vm14, %vm15485_vm13 }
  0xf4   : > { %v10197_v52 = vpop.f32.mrf.mxu0 }
  0xf5   : > { %v7058_v58 = vmul.f32 -1.442695, %v10197_v52 }
  0xf6   : > { %v474_v53 = vpop.f32.mrf.mxu0 }
  0xf7   : > { %v7056_v54 = vmul.f32 -1.442695, %v474_v53 }
  0xf8   : > { %v10199_v55 = vpop.f32.mrf.mxu0 }
  0xf9   : > { %7950 = vpow2.f32 %v7056_v54  ;;  %v7059_v56 = vmul.f32 -1.442695, %v10199_v55 }
  0xfa   : > { %v477_v57 = vpop.f32.mrf.mxu0 }
  0xfb   : > { %v7057_v59 = vmul.f32 -1.442695, %v477_v57  ;;  %7952 = vpow2.f32 %v7059_v56 }
  0xfc   : > { %v10203_v60 = vpop.f32.mrf.mxu0 }
  0xfd   : > { %7954 = vpow2.f32 %v7057_v59  ;;  %v7062_v12 = vmul.f32 -1.442695, %v10203_v60  ;;  %v7859_v59 = vld [vmem:[%s15751_s2 + $0x24c] ss:$56 sps:$4 sm:$0xff]  }
  0xfe   : > { %v10205_v61 = vpop.f32.mrf.mxu0  ;;  %7956 = vpow2.f32 %v7058_v58  ;;  %v7836_v58 = vld [vmem:[%s15751_s2 + $0x240] ss:$56 sps:$4 sm:$0xff]  }
  0xff   : > { %v7060_v1 = vmul.f32 -1.442695, %v10205_v61 }
 0x100   : > { %v10210_v63 = vpop.f32.mrf.mxu0 }
 0x101   : > { %v7063_v7 = vmul.f32 -1.442695, %v10210_v63 }
 0x102   : > { %v10212_v0 = vpop.f32.mrf.mxu0 }
 0x103   : > { %v7061_v2 = vmul.f32 -1.442695, %v10212_v0 }
 0x104   : > { %v10216_v3 = vpop.f32.mrf.mxu0 }
 0x105   : > { %7958 = vpow2.f32 %v7061_v2  ;;  %v7066_v32 = vmul.f32 -1.442695, %v10216_v3  ;;  %v7857_v2 = vld [vmem:[%s15751_s2 + $0x248] ss:$56 sps:$4 sm:$0xff]  }
 0x106   : > { %v7951_v4 = vpop.eup %7950  ;;  %v10218_v5 = vpop.f32.mrf.mxu0  ;;  %7960 = vpow2.f32 %v7060_v1  ;;  %v7841_v1 = vld [vmem:[%s15751_s2 + $0x1d4] ss:$56 sps:$4 sm:$0xff]  }
 0x107   : > { %v697_v6 = vadd.f32 1.0, %v7951_v4  ;;  %v7064_v20 = vmul.f32 -1.442695, %v10218_v5 }
 0x108   : > { %v7953_v8 = vpop.eup %7952  ;;  %v10221_v10 = vpop.f32.mrf.mxu0 }
 0x109   : > { %7962 = vrcp.f32 %v697_v6  ;;  %v700_v14 = vadd.f32 1.0, %v7953_v8  ;;  %v7067_v27 = vmul.f32 -1.442695, %v10221_v10  ;;  %v7862_v6 = vld [vmem:[%s15751_s2 + $0x1dc] ss:$56 sps:$4 sm:$0xff]  }
 0x10a   : > { %v7955_v9 = vpop.eup %7954  ;;  %7964 = vpow2.f32 %v7063_v7  ;;  %v10224_v15 = vpop.f32.mrf.mxu0 }
 0x10b   : > { %v698_v11 = vadd.f32 1.0, %v7955_v9  ;;  %v7957_v13 = vpop.eup %7956  ;;  %v7065_v17 = vmul.f32 -1.442695, %v10224_v15 }
 0x10c   : > { %v699_v16 = vadd.f32 1.0, %v7957_v13  ;;  %v10227_v19 = vpop.f32.mrf.mxu0 }
 0x10d   : > { %7966 = vrcp.f32 %v698_v11  ;;  %v7839_v11 = vld [vmem:[%s15751_s2 + $0x1d0] ss:$56 sps:$4 sm:$0xff]  }
 0x10e   : > { %7968 = vpow2.f32 %v7062_v12  ;;  %v10230_v23 = vpop.f32.mrf.mxu0 }
 0x10f   : > { %7970 = vrcp.f32 %v700_v14  ;;  %v7068_v54 = vmul.f32 -1.442695, %v10230_v23  ;;  %v7844_v14 = vld [vmem:[%s15751_s2 + $0x164] ss:$56 sps:$4 sm:$0xff]  }
 0x110   : > { %7972 = vrcp.f32 %v699_v16  ;;  %v10233_v29 = vpop.f32.mrf.mxu0 }
 0x111   : > { %7974 = vpow2.f32 %v7065_v17  ;;  %v7071_v9 = vmul.f32 -1.442695, %v10233_v29  ;;  %v7070_v17 = vmul.f32 -1.442695, %v10227_v19 }
 0x112   : > { %v7959_v18 = vpop.eup %7958  ;;  %7976 = vpow2.f32 %v7064_v20  ;;  %v10244_v39 = vpop.f32.mrf.mxu0 }
 0x113   : > { %v7961_v21 = vpop.eup %7960  ;;  %v702_v22 = vadd.f32 1.0, %v7959_v18  ;;  %v7069_v46 = vmul.f32 -1.442695, %v10244_v39 }
 0x114   : > { %v701_v24 = vadd.f32 1.0, %v7961_v21  ;;  %v10264_v49 = vpop.f32.mrf.mxu0 }
 0x115   : > { %7978 = vrcp.f32 %v702_v22  ;;  %v7842_v22 = vld [vmem:[%s15751_s2 + $0x160] ss:$56 sps:$4 sm:$0xff]  }
 0x116   : > { %v7963_v25 = vpop.eup %7962  ;;  %7980 = vrcp.f32 %v701_v24  ;;  %v10279_v62 = vpop.f32.mrf.mxu0  ;;  %v7868_v24 = vld [vmem:[%s15751_s2 + $0x16c] ss:$56 sps:$4 sm:$0xff]  }
 0x117   : > { %v7965_v26 = vpop.eup %7964  ;;  %v793_v30 = vmul.f32 %v7963_v25, %v474_v53  ;;  %7982 = vpow2.f32 %v7067_v27  ;;  %v7866_v27 = vld [vmem:[%s15751_s2 + $0x168] ss:$56 sps:$4 sm:$0xff]  }
 0x118   : > { %v704_v36 = vadd.f32 1.0, %v7965_v26  ;;  %7984 = vpow2.f32 %v7066_v32  ;;  %v10299_v13 = vpop.f32.mrf.mxu0  ;;  %v7847_v26 = vld [vmem:[%s15751_s2 + $0xf4] ss:$56 sps:$4 sm:$0xff]  }
 0x11a   : > { %v7967_v28 = vpop.eup %7966  ;;  %7986 = vrcp.f32 %v704_v36 }
 0x11b   : > { %v794_v31 = vmul.f32 %v7967_v28, %v477_v57  ;;  %v7969_v33 = vpop.eup %7968 }
 0x11c   : > { %v7971_v38 = vpop.eup %7970  ;;  %v703_v41 = vadd.f32 1.0, %v7969_v33 }
 0x11d   : > { %v10239_v35 = vpack.c.bf16 %v794_v31, %v793_v30  ;;  %v7973_v43 = vpop.eup %7972  ;;  %v796_v45 = vmul.f32 %v7971_v38, %v10199_v55  ;;  %v7871_v30 = vld [vmem:[%s15751_s2 + $0xfc] ss:$56 sps:$4 sm:$0xff]  }
 0x11e   : > { %v7975_v48 = vpop.eup %7974  ;;  %v795_v53 = vmul.f32 %v7973_v43, %v10197_v52  ;;  %7988 = vrcp.f32 %v703_v41  ;;  %v7850_v38 = vld [vmem:[%s15751_s2 + $0x84] ss:$56 sps:$4 sm:$0xff]   ;;  %v7072_v41 = vmul.f32 -1.442695, %v10279_v62 }
 0x11f   : > { %16110 = vst [vmem:[#allocation9_spill] sm:$0xff] %v10239_v35  ;;  %1620 = vmatmul.mubr.bf16.vlgmr.msra.gmra.mxu1 %v10239_v35  ;;  %1813 = vmatmul.mubr.bf16.vlgmr.msra.gmra.mxu0 %v10239_v35  ;;  %v7977_v55 = vpop.eup %7976  ;;  %v706_v57 = vadd.f32 1.0, %v7975_v48  ;;  %7990 = vpow2.f32 %v7069_v46  ;;  %v7874_v46 = vld [vmem:[%s15751_s2 + $0x8c] ss:$56 sps:$4 sm:$0xff]  }
 0x120   : > { %1974 = vmatpush1.bf16.msra.mxu1 %v7830_v34  ;;  %1629 = vmatprep.mubr.bf16.mxu1 %v15755_v50  ;;  %v10271_v56 = vpack.c.bf16 %v796_v45, %v795_v53  ;;  %v705_v4 = vadd.f32 1.0, %v7977_v55  ;;  %7992 = vpow2.f32 %v7068_v54  ;;  %v7845_v34 = vld [vmem:[%s15751_s2 + $0xf0] ss:$56 sps:$4 sm:$0xff]   ;;  %v7848_v45 = vld [vmem:[%s15751_s2 + $0x80] ss:$56 sps:$4 sm:$0xff]  }
 0x121   : > { %1822 = vmatprep.mubr.bf16.mxu0 %v15755_v50  ;;  %1975 = vmatprep.subr.bf16.mxu1 %v7835_v37  ;;  %7994 = vrcp.f32 %v706_v57  ;;  %v7865_v48 = vld [vmem:[%s15751_s2 + $0x14] ss:$56 sps:$4 sm:$0xff]  }
 0x122   : > { %2167 = vmatpush1.bf16.msra.mxu0 %v7851_v40  ;;  %16111 = vst [vmem:[#allocation10_spill] sm:$0xff] %v10271_v56  ;;  %v7979_v52 = vpop.eup %7978  ;;  %7996 = vrcp.f32 %v705_v4  ;;  %v7877_v54 = vld [vmem:[%s15751_s2 + $0x1c] ss:$56 sps:$4 sm:$0xff]  }
 0x123   : > { %2168 = vmatprep.subr.bf16.mxu0 %v7856_v42  ;;  %v7981_v7 = vpop.eup %7980  ;;  %v798_v8 = vmul.f32 %v7979_v52, %v10212_v0  ;;  %v7860_v0 = vld [vmem:[%s15751_s2 + $0x1d8] ss:$56 sps:$4 sm:$0xff]   ;;  %7998 = vpow2.f32 %v7071_v9 }
 0x124   : > { %1976 = vmatpush1.bf16.msra.mxu1 %v7833_v44  ;;  %v7983_v12 = vpop.eup %7982  ;;  %v797_v16 = vmul.f32 %v7981_v7, %v10205_v61  ;;  %v10317_v61 = vpop.f32.mrf.mxu0  ;;  %8000 = vpow2.f32 %v7070_v17 }
 0x125   : > { %1977 = vmatprep.subr.bf16.mxu1 %v7838_v47  ;;  %v7985_v18 = vpop.eup %7984  ;;  %v708_v21 = vadd.f32 1.0, %v7983_v12  ;;  %v7073_v33 = vmul.f32 -1.442695, %v10317_v61 }
 0x126   : > { %2169 = vmatpush1.bf16.msra.mxu0 %v7854_v51  ;;  %v10309_v20 = vpack.c.bf16 %v798_v8, %v797_v16  ;;  %v707_v28 = vadd.f32 1.0, %v7985_v18  ;;  %v10337_v37 = vpop.f32.mrf.mxu0  ;;  %v7872_v51 = vld [vmem:[%s15751_s2 + $0x88] ss:$56 sps:$4 sm:$0xff]  }
 0x127   : > { %1630 = vmatmul.mubr.bf16.gmra.mxu1 %v10271_v56  ;;  %1823 = vmatmul.mubr.bf16.gmra.mxu0 %v10271_v56  ;;  %v7987_v25 = vpop.eup %7986  ;;  %8002 = vrcp.f32 %v708_v21 }
 0x128   : > { %1639 = vmatprep.mubr.bf16.mxu1 %v15755_v50  ;;  %1832 = vmatprep.mubr.bf16.mxu0 %v15755_v50  ;;  %16112 = vst [vmem:[#allocation11_spill] sm:$0xff] %v10309_v20  ;;  %v800_v32 = vmul.f32 %v7987_v25, %v10210_v63  ;;  %v7869_v63 = vld [vmem:[%s15751_s2 + $0xf8] ss:$56 sps:$4 sm:$0xff]   ;;  %8004 = vrcp.f32 %v707_v28 }
 0x129   : > { %1978 = vmatpush1.bf16.msra.mxu1 %v7836_v58  ;;  %2170 = vmatprep.subr.bf16.mxu0 %v7859_v59  ;;  %8006 = vpow2.f32 %v7073_v33  ;;  %v7075_v58 = vmul.f32 -1.442695, %v10299_v13  ;;  %v7863_v59 = vld [vmem:[%s15751_s2 + $0x10] ss:$56 sps:$4 sm:$0xff]  }
 0x12a   : > { %1979 = vmatprep.subr.bf16.mxu1 %v7841_v1  ;;  %2171 = vmatpush1.bf16.msra.mxu0 %v7857_v2  ;;  %8008 = vpow2.f32 %v7072_v41  ;;  %v7875_v2 = vld [vmem:[%s15751_s2 + $0x18] ss:$56 sps:$4 sm:$0xff]  }
 0x12b   : > { %2172 = vmatprep.subr.bf16.mxu0 %v7862_v6  ;;  %v7989_v31 = vpop.eup %7988  ;;  %v7074_v6 = vmul.f32 -1.442695, %v10264_v49 }
 0x12c   : > { %v7991_v36 = vpop.eup %7990  ;;  %v799_v40 = vmul.f32 %v7989_v31, %v10203_v60  ;;  %v10355_v60 = vpop.f32.mrf.mxu0  ;;  %v7078_v31 = vmul.f32 -1.442695, %v10337_v37 }
 0x12d   : > { %1980 = vmatpush1.bf16.msra.mxu1 %v7839_v11  ;;  %v7993_v42 = vpop.eup %7992  ;;  %v710_v44 = vadd.f32 1.0, %v7991_v36 }
 0x12e   : > { %1981 = vmatprep.subr.bf16.mxu1 %v7844_v14  ;;  %2173 = vmatpush1.bf16.msra.mxu0 %v7860_v0  ;;  %v10347_v43 = vpack.c.bf16 %v800_v32, %v799_v40  ;;  %v7995_v47 = vpop.eup %7994  ;;  %v709_v53 = vadd.f32 1.0, %v7993_v42  ;;  %v10375_v1 = vpop.f32.mrf.mxu0  ;;  %v7076_v0 = vmul.f32 -1.442695, %v10355_v60 }
 0x12f   : > { %1640 = vmatmul.mubr.bf16.gmra.mxu1 %v10309_v20  ;;  %1833 = vmatmul.mubr.bf16.gmra.mxu0 %v10309_v20  ;;  %v7997_v55 = vpop.eup %7996  ;;  %v802_v57 = vmul.f32 %v7995_v47, %v10224_v15  ;;  %8010 = vrcp.f32 %v710_v44  ;;  %v7880_v15 = vld [vmem:[%s15751_s2 + $0x334] ss:$56 sps:$4 sm:$0xff]   ;;  %v7079_v32 = vmul.f32 -1.442695, %v10375_v1 }
 0x130   : > { %1649 = vmatprep.mubr.bf16.mxu1 %v15755_v50  ;;  %1842 = vmatprep.mubr.bf16.mxu0 %v15755_v50  ;;  %16113 = vst [vmem:[#allocation12_spill] sm:$0xff] %v10347_v43  ;;  %v7999_v52 = vpop.eup %7998  ;;  %v801_v4 = vmul.f32 %v7997_v55, %v10218_v5  ;;  %8012 = vrcp.f32 %v709_v53  ;;  %v10387_v12 = vpop.f32.mrf.mxu0 }
 0x131   : > { %1982 = vmatpush1.bf16.msra.mxu1 %v7842_v22  ;;  %2174 = vmatprep.subr.bf16.mxu0 %v7868_v24  ;;  %v8001_v7 = vpop.eup %8000  ;;  %v712_v9 = vadd.f32 1.0, %v7999_v52  ;;  %8014 = vpow2.f32 %v7075_v58  ;;  %v7077_v17 = vmul.f32 -1.442695, %v10387_v12 }
 0x132   : > { %1983 = vmatprep.subr.bf16.mxu1 %v7847_v26  ;;  %2175 = vmatpush1.bf16.msra.mxu0 %v7866_v27  ;;  %v10385_v8 = vpack.c.bf16 %v802_v57, %v801_v4  ;;  %v711_v14 = vadd.f32 1.0, %v8001_v7  ;;  %8016 = vpow2.f32 %v7074_v6  ;;  %v10396_v21 = vpop.f32.mrf.mxu0 }
 0x133   : > { %2176 = vmatprep.subr.bf16.mxu0 %v7871_v30  ;;  %8018 = vrcp.f32 %v712_v9  ;;  %v7082_v52 = vmul.f32 -1.442695, %v10396_v21 }
 0x134   : > { %16114 = vst [vmem:[#allocation13_spill] sm:$0xff] %v10385_v8  ;;  %v8003_v11 = vpop.eup %8002  ;;  %8020 = vrcp.f32 %v711_v14  ;;  %v10401_v28 = vpop.f32.mrf.mxu0 }
 0x135   : > { %1984 = vmatpush1.bf16.msra.mxu1 %v7845_v34  ;;  %v8005_v5 = vpop.eup %8004  ;;  %v804_v16 = vmul.f32 %v8003_v11, %v10221_v10  ;;  %8022 = vpow2.f32 %v7076_v0 }
 0x136   : > { %1985 = vmatprep.subr.bf16.mxu1 %v7850_v38  ;;  %2177 = vmatpush1.bf16.msra.mxu0 %v7869_v63  ;;  %v8007_v18 = vpop.eup %8006  ;;  %v803_v22 = vmul.f32 %v8005_v5, %v10216_v3  ;;  %8024 = vpow2.f32 %v7077_v17  ;;  %v10410_v34 = vpop.f32.mrf.mxu0 }
 0x137   : > { %1650 = vmatmul.mubr.bf16.gmra.mxu1 %v10347_v43  ;;  %1843 = vmatmul.mubr.bf16.gmra.mxu0 %v10347_v43  ;;  %v8009_v24 = vpop.eup %8008  ;;  %v714_v26 = vadd.f32 1.0, %v8007_v18 }
 0x138   : > { %1659 = vmatprep.mubr.bf16.mxu1 %v15755_v50  ;;  %1852 = vmatprep.mubr.bf16.mxu0 %v15755_v50  ;;  %v10399_v25 = vpack.c.bf16 %v804_v16, %v803_v22  ;;  %v713_v30 = vadd.f32 1.0, %v8009_v24  ;;  %v10415_v42 = vpop.f32.mrf.mxu0 }
 0x139   : > { %1986 = vmatpush1.bf16.msra.mxu1 %v7848_v45  ;;  %2178 = vmatprep.subr.bf16.mxu0 %v7874_v46  ;;  %8026 = vrcp.f32 %v714_v26  ;;  %v7080_v45 = vmul.f32 -1.442695, %v10401_v28  ;;  %v7081_v47 = vmul.f32 -1.442695, %v10415_v42 }
 0x13a   : > { %1987 = vmatprep.subr.bf16.mxu1 %v7865_v48  ;;  %2179 = vmatpush1.bf16.msra.mxu0 %v7872_v51  ;;  %16115 = vst [vmem:[#allocation14_spill] sm:$0xff] %v10399_v25  ;;  %8028 = vrcp.f32 %v713_v30  ;;  %v10424_v51 = vpop.f32.mrf.mxu0 }
 0x13b   : > { %2180 = vmatprep.subr.bf16.mxu0 %v7877_v54  ;;  %8030 = vpow2.f32 %v7078_v31 }
 0x13c   : > { %v8011_v27 = vpop.eup %8010  ;;  %8032 = vpow2.f32 %v7079_v32 }
 0x13d   : > { %1988 = vmatpush1.bf16.msra.mxu1 %v7863_v59  ;;  %v8013_v10 = vpop.eup %8012  ;;  %v806_v3 = vmul.f32 %v8011_v27, %v10244_v39  ;;  %v10429_v59 = vpop.f32.mrf.mxu0 }
 0x13e   : > { %2181 = vmatpush1.bf16.msra.mxu0 %v7875_v2  ;;  %2359 = vmatprep.subr.bf16.mxu1 %v7880_v15  ;;  %v8015_v33 = vpop.eup %8014  ;;  %v805_v36 = vmul.f32 %v8013_v10, %v10230_v23  ;;  %v7083_v15 = vmul.f32 -1.442695, %v10410_v34  ;;  %v7084_v16 = vmul.f32 -1.442695, %v10429_v59 }
 0x13f   : > { %1660 = vmatmul.mubr.bf16.gmra.mxu1 %v10385_v8  ;;  %1853 = vmatmul.mubr.bf16.gmra.mxu0 %v10385_v8  ;;  %v8017_v38 = vpop.eup %8016  ;;  %v716_v40 = vadd.f32 1.0, %v8015_v33  ;;  %v10438_v6 = vpop.f32.mrf.mxu0 }
 0x140   : > { %1669 = vmatprep.mubr.bf16.mxu1 %v15755_v50  ;;  %1862 = vmatprep.mubr.bf16.mxu0 %v15755_v50  ;;  %v10413_v63 = vpack.c.bf16 %v806_v3, %v805_v36  ;;  %v8019_v41 = vpop.eup %8018  ;;  %v715_v44 = vadd.f32 1.0, %v8017_v38  ;;  %v7087_v33 = vmul.f32 -1.442695, %v10438_v6 }
 0x141   : > { %v8021_v39 = vpop.eup %8020  ;;  %v808_v46 = vmul.f32 %v8019_v41, %v10233_v29  ;;  %8034 = vrcp.f32 %v716_v40  ;;  %v10443_v0 = vpop.f32.mrf.mxu0 }
 0x142   : > { %16116 = vst [vmem:[#allocation15_spill] sm:$0xff] %v10413_v63  ;;  %v8023_v23 = vpop.eup %8022  ;;  %v807_v53 = vmul.f32 %v8021_v39, %v10227_v19  ;;  %8036 = vrcp.f32 %v715_v44  ;;  %v7085_v18 = vmul.f32 -1.442695, %v10443_v0 }
 0x143   : > { %v8025_v48 = vpop.eup %8024  ;;  %v717_v54 = vadd.f32 1.0, %v8023_v23  ;;  %8038 = vpow2.f32 %v7080_v45 }
 0x144   : > { %v10427_v55 = vpack.c.bf16 %v808_v46, %v807_v53  ;;  %v718_v57 = vadd.f32 1.0, %v8025_v48  ;;  %8040 = vpow2.f32 %v7081_v47 }
 0x145   : > { %8042 = vrcp.f32 %v717_v54 }
 0x146   : > { %16117 = vst [vmem:[#allocation16_spill] sm:$0xff] %v10427_v55  ;;  %v8027_v58 = vpop.eup %8026  ;;  %8044 = vrcp.f32 %v718_v57 }
 0x147   : > { %1670 = vmatmul.mubr.bf16.gmra.mxu1 %v10399_v25  ;;  %1863 = vmatmul.mubr.bf16.gmra.mxu0 %v10399_v25  ;;  %v8029_v29 = vpop.eup %8028  ;;  %v810_v2 = vmul.f32 %v8027_v58, %v10317_v61  ;;  %8046 = vpow2.f32 %v7082_v52 }
 0x148   : > { %1679 = vmatprep.mubr.bf16.mxu1 %v15755_v50  ;;  %1872 = vmatprep.mubr.bf16.mxu0 %v15755_v50  ;;  %v8031_v19 = vpop.eup %8030  ;;  %v809_v7 = vmul.f32 %v8029_v29, %v10279_v62  ;;  %8048 = vpow2.f32 %v7083_v15 }
 0x149   : > { %v8033_v4 = vpop.eup %8032  ;;  %v719_v9 = vadd.f32 1.0, %v8031_v19 }
 0x14a   : > { %v10441_v11 = vpack.c.bf16 %v810_v2, %v809_v7  ;;  %v720_v14 = vadd.f32 1.0, %v8033_v4 }
 0x14b   : > { %8050 = vrcp.f32 %v719_v9 }
 0x14c   : > { %16118 = vst [vmem:[#allocation17_spill] sm:$0xff] %v10441_v11  ;;  %8052 = vrcp.f32 %v720_v14 }
 0x14d   : > { %8054 = vpow2.f32 %v7084_v16 }
 0x14e   : > { %v8035_v5 = vpop.eup %8034  ;;  %8056 = vpow2.f32 %v7085_v18  ;;  %v7881_v18 = vld [vmem:[%s15751_s2 + $0x2c0] ss:$56 sps:$4 sm:$0xff]  }
 0x14f   : > { %1680 = vmatmul.mubr.bf16.gmra.mxu1 %v10413_v63  ;;  %1873 = vmatmul.mubr.bf16.gmra.mxu0 %v10413_v63  ;;  %v8037_v61 = vpop.eup %8036  ;;  %v812_v17 = vmul.f32 %v8035_v5, %v10299_v13  ;;  %v7086_v13 = vmul.f32 -1.442695, %v10424_v51 }
 0x150   : > { %1689 = vmatprep.mubr.bf16.mxu1 %v15755_v50  ;;  %1882 = vmatprep.mubr.bf16.mxu0 %v15755_v50  ;;  %v8039_v62 = vpop.eup %8038  ;;  %v811_v24 = vmul.f32 %v8037_v61, %v10264_v49 }
 0x151   : > { %v8041_v22 = vpop.eup %8040  ;;  %v721_v26 = vadd.f32 1.0, %v8039_v62 }
 0x152   : > { %v8043_v27 = vpop.eup %8042  ;;  %v10453_v30 = vpack.c.bf16 %v812_v17, %v811_v24  ;;  %v722_v10 = vadd.f32 1.0, %v8041_v22  ;;  %v7886_v22 = vld [vmem:[%s15751_s2 + $0x254] ss:$56 sps:$4 sm:$0xff]  }
 0x153   : > { %v8045_v31 = vpop.eup %8044  ;;  %8058 = vrcp.f32 %v721_v26  ;;  %v813_v3 = vmul.f32 %v8043_v27, %v10355_v60  ;;  %v7904_v24 = vld [vmem:[%s15751_s2 + $0x2cc] ss:$56 sps:$4 sm:$0xff]   ;;  %v7884_v26 = vld [vmem:[%s15751_s2 + $0x250] ss:$56 sps:$4 sm:$0xff]  }
 0x154   : > { %16119 = vst [vmem:[#allocation18_spill] sm:$0xff] %v10453_v30  ;;  %v8047_v49 = vpop.eup %8046  ;;  %v814_v32 = vmul.f32 %v8045_v31, %v10387_v12  ;;  %8060 = vrcp.f32 %v722_v10  ;;  %v7902_v27 = vld [vmem:[%s15751_s2 + $0x2c8] ss:$56 sps:$4 sm:$0xff]   ;;  %v7889_v10 = vld [vmem:[%s15751_s2 + $0x1e4] ss:$56 sps:$4 sm:$0xff]  }
 0x155   : > { %v8049_v36 = vpop.eup %8048  ;;  %v723_v38 = vadd.f32 1.0, %v8047_v49  ;;  %8062 = vpow2.f32 %v7086_v13  ;;  %v7907_v31 = vld [vmem:[%s15751_s2 + $0x25c] ss:$56 sps:$4 sm:$0xff]   ;;  %v7887_v13 = vld [vmem:[%s15751_s2 + $0x1e0] ss:$56 sps:$4 sm:$0xff]  }
 0x156   : > { %v10463_v41 = vpack.c.bf16 %v814_v32, %v813_v3  ;;  %v724_v44 = vadd.f32 1.0, %v8049_v36  ;;  %8064 = vpow2.f32 %v7087_v33  ;;  %v7905_v49 = vld [vmem:[%s15751_s2 + $0x258] ss:$56 sps:$4 sm:$0xff]   ;;  %v7892_v3 = vld [vmem:[%s15751_s2 + $0x174] ss:$56 sps:$4 sm:$0xff]  }
 0x157   : > { %1690 = vmatmul.mubr.bf16.gmra.mxu1 %v10427_v55  ;;  %1883 = vmatmul.mubr.bf16.gmra.mxu0 %v10427_v55  ;;  %8066 = vrcp.f32 %v723_v38  ;;  %v7910_v32 = vld [vmem:[%s15751_s2 + $0x1ec] ss:$56 sps:$4 sm:$0xff]   ;;  %v7890_v33 = vld [vmem:[%s15751_s2 + $0x170] ss:$56 sps:$4 sm:$0xff]  }
 0x158   : > { %1699 = vmatprep.mubr.bf16.mxu1 %v15755_v50  ;;  %1892 = vmatprep.mubr.bf16.mxu0 %v15755_v50  ;;  %v8051_v40 = vpop.eup %8050  ;;  %16120 = vst [vmem:[#allocation19_spill] sm:$0xff] %v10463_v41  ;;  %8068 = vrcp.f32 %v724_v44  ;;  %v7908_v36 = vld [vmem:[%s15751_s2 + $0x1e8] ss:$56 sps:$4 sm:$0xff]   ;;  %v7895_v38 = vld [vmem:[%s15751_s2 + $0x104] ss:$56 sps:$4 sm:$0xff]  }
 0x159   : > { %v8053_v39 = vpop.eup %8052  ;;  %v815_v12 = vmul.f32 %v8051_v40, %v10337_v37  ;;  %v7893_v40 = vld [vmem:[%s15751_s2 + $0x100] ss:$56 sps:$4 sm:$0xff]   ;;  %v7898_v44 = vld [vmem:[%s15751_s2 + $0x94] ss:$56 sps:$4 sm:$0xff]  }
 0x15a   : > { %v8055_v60 = vpop.eup %8054  ;;  %v816_v45 = vmul.f32 %v8053_v39, %v10375_v1  ;;  %v7896_v39 = vld [vmem:[%s15751_s2 + $0x90] ss:$56 sps:$4 sm:$0xff]  }
 0x15b   : > { %v8057_v23 = vpop.eup %8056  ;;  %v725_v46 = vadd.f32 1.0, %v8055_v60  ;;  %v7913_v60 = vld [vmem:[%s15751_s2 + $0x24] ss:$56 sps:$4 sm:$0xff]  }
 0x15c   : > { %v10471_v48 = vpack.c.bf16 %v816_v45, %v815_v12  ;;  %v726_v53 = vadd.f32 1.0, %v8057_v23  ;;  %v7911_v12 = vld [vmem:[%s15751_s2 + $0x20] ss:$56 sps:$4 sm:$0xff]   ;;  %v7916_v45 = vld [vmem:[%s15751_s2 + $0x17c] ss:$56 sps:$4 sm:$0xff]  }
 0x15d   : > { %8070 = vrcp.f32 %v725_v46  ;;  %v7914_v23 = vld [vmem:[%s15751_s2 + $0x178] ss:$56 sps:$4 sm:$0xff]   ;;  %v7919_v46 = vld [vmem:[%s15751_s2 + $0x10c] ss:$56 sps:$4 sm:$0xff]  }
 0x15e   : > { %16121 = vst [vmem:[#allocation20_spill] sm:$0xff] %v10471_v48  ;;  %8072 = vrcp.f32 %v726_v53  ;;  %v7922_v53 = vld [vmem:[%s15751_s2 + $0x9c] ss:$56 sps:$4 sm:$0xff]  }
 0x15f   : > { %1700 = vmatmul.mubr.bf16.gmra.mxu1 %v10441_v11  ;;  %1893 = vmatmul.mubr.bf16.gmra.mxu0 %v10441_v11 }
 0x160   : > { %1709 = vmatprep.mubr.bf16.mxu1 %v15755_v50  ;;  %1902 = vmatprep.mubr.bf16.mxu0 %v15755_v50  ;;  %v8059_v47 = vpop.eup %8058 }
 0x161   : > { %v8061_v54 = vpop.eup %8060  ;;  %v817_v1 = vmul.f32 %v8059_v47, %v10401_v28  ;;  %v7917_v47 = vld [vmem:[%s15751_s2 + $0x108] ss:$56 sps:$4 sm:$0xff]  }
 0x162   : > { %v8063_v37 = vpop.eup %8062  ;;  %v818_v57 = vmul.f32 %v8061_v54, %v10415_v42  ;;  %v7920_v54 = vld [vmem:[%s15751_s2 + $0x98] ss:$56 sps:$4 sm:$0xff]  }
 0x163   : > { %v8065_v58 = vpop.eup %8064  ;;  %v727_v29 = vadd.f32 1.0, %v8063_v37  ;;  %v7925_v37 = vld [vmem:[%s15751_s2 + $0x2c] ss:$56 sps:$4 sm:$0xff]  }
 0x164   : > { %v8067_v52 = vpop.eup %8066  ;;  %v10479_v19 = vpack.c.bf16 %v818_v57, %v817_v1  ;;  %v728_v2 = vadd.f32 1.0, %v8065_v58  ;;  %v7923_v1 = vld [vmem:[%s15751_s2 + $0x28] ss:$56 sps:$4 sm:$0xff]   ;;  %v15754_v57 = vlaneseq }
 0x165   : > { %v8069_v15 = vpop.eup %8068  ;;  %8074 = vrcp.f32 %v727_v29  ;;  %v819_v28 = vmul.f32 %v8067_v52, %v10396_v21 }
 0x166   : > { %16122 = vst [vmem:[#allocation21_spill] sm:$0xff] %v10479_v19  ;;  %v820_v42 = vmul.f32 %v8069_v15, %v10410_v34  ;;  %8076 = vrcp.f32 %v728_v2  ;;  %v10635_v58 = vshrl.u32 %v15754_v57, 7  ;;  %v953_v15 = vld [vmem:[#allocation5] sm:$0xff] }
 0x167   : > { %1710 = vmatmul.mubr.bf16.gmra.mxu1 %v10453_v30  ;;  %1903 = vmatmul.mubr.bf16.gmra.mxu0 %v10453_v30 }
 0x168   : > { %1719 = vmatprep.mubr.bf16.mxu1 %v15755_v50  ;;  %1912 = vmatprep.mubr.bf16.mxu0 %v15755_v50  ;;  %v10487_v7 = vpack.c.bf16 %v820_v42, %v819_v28  ;;  %16126 = vst [vmem:[#allocation25_spill] sm:$0xff] %v10635_v58  ;;  %v10640_v2 = vsub.s32 0, %v10635_v58  ;;  %v10645_v28 = vsub.s32 2, %v10635_v58 }
 0x16a   : > { %v8071_v4 = vpop.eup %8070  ;;  %16123 = vst [vmem:[#allocation22_spill] sm:$0xff] %v10487_v7  ;;  %16127 = vst [vmem:[#allocation26_spill] sm:$0xff] %v10640_v2 }
 0x16b   : > { %v8073_v9 = vpop.eup %8072  ;;  %v821_v14 = vmul.f32 %v8071_v4, %v10429_v59  ;;  %v7878_v59 = vld [vmem:[%s15751_s2 + $0x330] ss:$56 sps:$4 sm:$0xff]   ;;  %16128 = vst [vmem:[#allocation27_spill] sm:$0xff] %v10645_v28 }
 0x16c   : > { %v822_v5 = vmul.f32 %v8073_v9, %v10443_v0  ;;  %v7899_v0 = vld [vmem:[%s15751_s2 + $0x338] ss:$56 sps:$4 sm:$0xff]   ;;  %v10648_v9 = vsub.s32 1, %v10635_v58 }
 0x16e   : > { %v10495_v61 = vpack.c.bf16 %v822_v5, %v821_v14  ;;  %16129 = vst [vmem:[#allocation28_spill] sm:$0xff] %v10648_v9  ;;  %v10651_v14 = vsub.s32 3, %v10635_v58 }
 0x16f   : > { %1720 = vmatmul.mubr.bf16.gmra.mxu1 %v10463_v41  ;;  %1913 = vmatmul.mubr.bf16.gmra.mxu0 %v10463_v41 }
 0x170   : > { %1729 = vmatprep.mubr.bf16.mxu1 %v15755_v50  ;;  %1922 = vmatprep.mubr.bf16.mxu0 %v15755_v50  ;;  %16124 = vst [vmem:[#allocation23_spill] sm:$0xff] %v10495_v61  ;;  %16130 = vst [vmem:[#allocation29_spill] sm:$0xff] %v10651_v14 }
 0x172   : > { %v8075_v21 = vpop.eup %8074 }
 0x173   : > { %v8077_v34 = vpop.eup %8076  ;;  %v823_v16 = vmul.f32 %v8075_v21, %v10424_v51  ;;  %v7883_v51 = vld [vmem:[%s15751_s2 + $0x2c4] ss:$56 sps:$4 sm:$0xff]  }
 0x174   : > { %v824_v62 = vmul.f32 %v8077_v34, %v10438_v6  ;;  %v7901_v6 = vld [vmem:[%s15751_s2 + $0x33c] ss:$56 sps:$4 sm:$0xff]   ;;  %v10654_v34 = vrot.slane %v953_v15, %v10640_v2 }
 0x175   : > { %2552 = vmatprep.subr.bf16.mxu0 %v7901_v6  ;;  %v10663_v6 = vrot.slane %v953_v15, %v10651_v14 }
 0x176   : > { %v10503_v17 = vpack.c.bf16 %v824_v62, %v823_v16  ;;  %v10657_v16 = vrot.slane %v953_v15, %v10645_v28 }
 0x177   : > { %1730 = vmatmul.mubr.bf16.gmra.mxu1 %v10471_v48  ;;  %1923 = vmatmul.mubr.bf16.gmra.mxu0 %v10471_v48 }
 0x178   : > { %1739 = vmatprep.mubr.bf16.mxu1 %v15755_v50  ;;  %1932 = vmatprep.mubr.bf16.mxu0 %v15755_v50  ;;  %16125 = vst [vmem:[#allocation24_spill] sm:$0xff] %v10503_v17 }
 0x17f   : > { %1740 = vmatmul.mubr.bf16.gmra.mxu1 %v10479_v19  ;;  %1933 = vmatmul.mubr.bf16.gmra.mxu0 %v10479_v19 }
 0x180   : > { %1749 = vmatprep.mubr.bf16.mxu1 %v15755_v50  ;;  %1942 = vmatprep.mubr.bf16.mxu0 %v15755_v50 }
 0x187   : > { %1750 = vmatmul.mubr.bf16.gmra.mxu1 %v10487_v7  ;;  %1943 = vmatmul.mubr.bf16.gmra.mxu0 %v10487_v7 }
 0x188   : > { %1759 = vmatprep.mubr.bf16.mxu1 %v15755_v50  ;;  %1952 = vmatprep.mubr.bf16.mxu0 %v15755_v50 }
 0x18f   : > { %1760 = vmatmul.mubr.bf16.gmra.mxu1 %v10495_v61  ;;  %1953 = vmatmul.mubr.bf16.gmra.mxu0 %v10495_v61 }
 0x190   : > { %1769 = vmatprep.mubr.bf16.mxu1 %v15755_v50  ;;  %1962 = vmatprep.mubr.bf16.mxu0 %v15755_v50 }
 0x197   : > { %1770 = vmatmul.mubr.bf16.gmra.mxu1 %v10503_v17  ;;  %1963 = vmatmul.mubr.bf16.gmra.mxu0 %v10503_v17 }
 0x198   : > { %2005 = vmatprep.mubr.bf16.mxu1 %v15755_v50  ;;  %2198 = vmatprep.mubr.bf16.mxu0 %v15755_v50 }
 0x19f   : > { %2006 = vmatmul.mubr.bf16.vlgmr.msra.gmra.mxu1 %v10239_v35  ;;  %2199 = vmatmul.mubr.bf16.vlgmr.msra.gmra.mxu0 %v10239_v35 }
 0x1a0   : > { %2360 = vmatpush1.bf16.msra.mxu1 %v7878_v59  ;;  %2015 = vmatprep.mubr.bf16.mxu1 %v15755_v50 }
 0x1a1   : > { %2208 = vmatprep.mubr.bf16.mxu0 %v15755_v50  ;;  %2361 = vmatprep.subr.bf16.mxu1 %v7883_v51  ;;  %v10660_v51 = vrot.slane %v953_v15, %v10648_v9 }
 0x1a2   : > { %2553 = vmatpush1.bf16.msra.mxu0 %v7899_v0 }
 0x1a3   : > { %2554 = vmatprep.subr.bf16.mxu0 %v7904_v24 }
 0x1a4   : > { %2362 = vmatpush1.bf16.msra.mxu1 %v7881_v18 }
 0x1a5   : > { %2363 = vmatprep.subr.bf16.mxu1 %v7886_v22 }
 0x1a6   : > { %2555 = vmatpush1.bf16.msra.mxu0 %v7902_v27 }
 0x1a7   : > { %2016 = vmatmul.mubr.bf16.gmra.mxu1 %v10271_v56  ;;  %2209 = vmatmul.mubr.bf16.gmra.mxu0 %v10271_v56 }
 0x1a8   : > { %2025 = vmatprep.mubr.bf16.mxu1 %v15755_v50  ;;  %2218 = vmatprep.mubr.bf16.mxu0 %v15755_v50 }
 0x1a9   : > { %2364 = vmatpush1.bf16.msra.mxu1 %v7884_v26  ;;  %2556 = vmatprep.subr.bf16.mxu0 %v7907_v31 }
 0x1aa   : > { %2365 = vmatprep.subr.bf16.mxu1 %v7889_v10  ;;  %2557 = vmatpush1.bf16.msra.mxu0 %v7905_v49 }
 0x1ab   : > { %2558 = vmatprep.subr.bf16.mxu0 %v7910_v32 }
 0x1ad   : > { %2366 = vmatpush1.bf16.msra.mxu1 %v7887_v13 }
 0x1ae   : > { %2367 = vmatprep.subr.bf16.mxu1 %v7892_v3  ;;  %2559 = vmatpush1.bf16.msra.mxu0 %v7908_v36 }
 0x1af   : > { %2026 = vmatmul.mubr.bf16.gmra.mxu1 %v10309_v20  ;;  %2219 = vmatmul.mubr.bf16.gmra.mxu0 %v10309_v20 }
 0x1b0   : > { %2035 = vmatprep.mubr.bf16.mxu1 %v15755_v50  ;;  %2228 = vmatprep.mubr.bf16.mxu0 %v15755_v50 }
 0x1b1   : > { %2368 = vmatpush1.bf16.msra.mxu1 %v7890_v33  ;;  %2560 = vmatprep.subr.bf16.mxu0 %v7916_v45 }
 0x1b2   : > { %2369 = vmatprep.subr.bf16.mxu1 %v7895_v38  ;;  %2561 = vmatpush1.bf16.msra.mxu0 %v7914_v23 }
 0x1b3   : > { %2562 = vmatprep.subr.bf16.mxu0 %v7919_v46 }
 0x1b5   : > { %2370 = vmatpush1.bf16.msra.mxu1 %v7893_v40 }
 0x1b6   : > { %2371 = vmatprep.subr.bf16.mxu1 %v7898_v44  ;;  %2563 = vmatpush1.bf16.msra.mxu0 %v7917_v47 }
 0x1b7   : > { %2036 = vmatmul.mubr.bf16.gmra.mxu1 %v10347_v43  ;;  %2229 = vmatmul.mubr.bf16.gmra.mxu0 %v10347_v43 }
 0x1b8   : > { %2045 = vmatprep.mubr.bf16.mxu1 %v15755_v50  ;;  %2238 = vmatprep.mubr.bf16.mxu0 %v15755_v50 }
 0x1b9   : > { %2372 = vmatpush1.bf16.msra.mxu1 %v7896_v39  ;;  %2564 = vmatprep.subr.bf16.mxu0 %v7922_v53 }
 0x1ba   : > { %2373 = vmatprep.subr.bf16.mxu1 %v7913_v60  ;;  %2565 = vmatpush1.bf16.msra.mxu0 %v7920_v54 }
 0x1bb   : > { %2566 = vmatprep.subr.bf16.mxu0 %v7925_v37 }
 0x1bd   : > { %2374 = vmatpush1.bf16.msra.mxu1 %v7911_v12 }
 0x1be   : > { %2567 = vmatpush1.bf16.msra.mxu0 %v7923_v1 }
 0x1bf   : > { %2046 = vmatmul.mubr.bf16.gmra.mxu1 %v10385_v8  ;;  %2239 = vmatmul.mubr.bf16.gmra.mxu0 %v10385_v8 }
 0x1c0   : > { %2055 = vmatprep.mubr.bf16.mxu1 %v15755_v50  ;;  %2248 = vmatprep.mubr.bf16.mxu0 %v15755_v50 }
 0x1c7   : > { %2056 = vmatmul.mubr.bf16.gmra.mxu1 %v10399_v25  ;;  %2249 = vmatmul.mubr.bf16.gmra.mxu0 %v10399_v25 }
 0x1c8   : > { %2065 = vmatprep.mubr.bf16.mxu1 %v15755_v50  ;;  %2258 = vmatprep.mubr.bf16.mxu0 %v15755_v50 }
 0x1cf   : > { %2066 = vmatmul.mubr.bf16.gmra.mxu1 %v10413_v63  ;;  %2259 = vmatmul.mubr.bf16.gmra.mxu0 %v10413_v63 }
 0x1d0   : > { %2075 = vmatprep.mubr.bf16.mxu1 %v15755_v50  ;;  %2268 = vmatprep.mubr.bf16.mxu0 %v15755_v50 }
 0x1d7   : > { %2076 = vmatmul.mubr.bf16.gmra.mxu1 %v10427_v55  ;;  %2269 = vmatmul.mubr.bf16.gmra.mxu0 %v10427_v55 }
 0x1d8   : > { %2085 = vmatprep.mubr.bf16.mxu1 %v15755_v50  ;;  %2278 = vmatprep.mubr.bf16.mxu0 %v15755_v50 }
 0x1df   : > { %v1621_v29 = vpop.f32.mrf.mxu1  ;;  %v1814_v52 = vpop.f32.mrf.mxu0  ;;  %2086 = vmatmul.mubr.bf16.gmra.mxu1 %v10441_v11  ;;  %2279 = vmatmul.mubr.bf16.gmra.mxu0 %v10441_v11 }
 0x1e0   : > { %2095 = vmatprep.mubr.bf16.mxu1 %v15755_v50  ;;  %2288 = vmatprep.mubr.bf16.mxu0 %v15755_v50  ;;  %v10668_v22 = vadd.f32 %v1621_v29, %v10654_v34  ;;  %v10673_v24 = vadd.f32 %v1814_v52, %v10657_v16  ;;  %v7928_v29 = vld [vmem:[%s15751_s2 + $0x344] ss:$56 sps:$4 sm:$0xff]  }
 0x1e1   : > { %v1623_v42 = vpop.f32.mrf.mxu1  ;;  %v1816_v4 = vpop.f32.mrf.mxu0  ;;  %2745 = vmatprep.subr.bf16.mxu1 %v7928_v29 }
 0x1e2   : > { %16131 = vst [vmem:[#allocation30_spill] sm:$0xff] %v10668_v22  ;;  %16132 = vst [vmem:[#allocation31_spill] sm:$0xff] %v10673_v24  ;;  %v10676_v10 = vadd.f32 %v1623_v42, %v10660_v51  ;;  %v10679_v31 = vadd.f32 %v1816_v4, %v10663_v6  ;;  %v7200_v3 = vmul.f32 -1.442695, %v10668_v22  ;;  %v7202_v33 = vmul.f32 -1.442695, %v10673_v24 }
 0x1e3   : > { %v1625_v5 = vpop.f32.mrf.mxu1  ;;  %v1818_v21 = vpop.f32.mrf.mxu0  ;;  %v16147_v24 = vmov 0  }
 0x1e4   : > { %16133 = vst [vmem:[#allocation32_spill] sm:$0xff] %v10676_v10  ;;  %16134 = vst [vmem:[#allocation33_spill] sm:$0xff] %v10679_v31  ;;  %v10683_v32 = vadd.f32 %v1625_v5, %v10654_v34  ;;  %v10687_v36 = vadd.f32 %v1818_v21, %v10657_v16  ;;  %v7201_v44 = vmul.f32 -1.442695, %v10676_v10  ;;  %v7203_v60 = vmul.f32 -1.442695, %v10679_v31 }
 0x1e5   : > { %v1627_v62 = vpop.f32.mrf.mxu1  ;;  %v1820_v59 = vpop.f32.mrf.mxu0  ;;  %8078 = vpow2.f32 %v7200_v3 }
 0x1e6   : > { %16135 = vst [vmem:[#allocation34_spill] sm:$0xff] %v10683_v32  ;;  %16136 = vst [vmem:[#allocation35_spill] sm:$0xff] %v10687_v36  ;;  %v10691_v39 = vadd.f32 %v1627_v62, %v10660_v51  ;;  %v10695_v12 = vadd.f32 %v1820_v59, %v10663_v6  ;;  %v7214_v46 = vmul.f32 -1.442695, %v10683_v32  ;;  %8080 = vpow2.f32 %v7202_v33 }
 0x1e7   : > { %v1631_v0 = vpop.f32.mrf.mxu1  ;;  %v1824_v18 = vpop.f32.mrf.mxu0  ;;  %2096 = vmatmul.mubr.bf16.gmra.mxu1 %v10453_v30  ;;  %2289 = vmatmul.mubr.bf16.gmra.mxu0 %v10453_v30  ;;  %v7216_v53 = vmul.f32 -1.442695, %v10687_v36  ;;  %8082 = vpow2.f32 %v7201_v44 }
 0x1e8   : > { %2105 = vmatprep.mubr.bf16.mxu1 %v15755_v50  ;;  %2298 = vmatprep.mubr.bf16.mxu0 %v15755_v50  ;;  %16137 = vst [vmem:[#allocation36_spill] sm:$0xff] %v10691_v39  ;;  %16138 = vst [vmem:[#allocation37_spill] sm:$0xff] %v10695_v12  ;;  %v10705_v47 = vadd.f32 %v1631_v0, %v10654_v34  ;;  %v10711_v54 = vadd.f32 %v1824_v18, %v10657_v16  ;;  %v7215_v52 = vmul.f32 -1.442695, %v10691_v39 }
 0x1e9   : > { %v1633_v26 = vpop.f32.mrf.mxu1  ;;  %v1826_v27 = vpop.f32.mrf.mxu0  ;;  %8084 = vpow2.f32 %v7203_v60  ;;  %v7217_v42 = vmul.f32 -1.442695, %v10695_v12 }
 0x1ea   : > { %16139 = vst [vmem:[#allocation38_spill] sm:$0xff] %v10705_v47  ;;  %16140 = vst [vmem:[#allocation39_spill] sm:$0xff] %v10711_v54  ;;  %v10722_v15 = vadd.f32 %v1633_v26, %v10660_v51  ;;  %v10726_v4 = vadd.f32 %v1826_v27, %v10663_v6  ;;  %8086 = vpow2.f32 %v7214_v46  ;;  %v7228_v62 = vmul.f32 -1.442695, %v10705_v47 }
 0x1eb   : > { %v1635_v13 = vpop.f32.mrf.mxu1  ;;  %v1828_v49 = vpop.f32.mrf.mxu0  ;;  %8088 = vpow2.f32 %v7216_v53  ;;  %v7230_v59 = vmul.f32 -1.442695, %v10711_v54 }
 0x1ec   : > { %16141 = vst [vmem:[#allocation40_spill] sm:$0xff] %v10722_v15  ;;  %16142 = vst [vmem:[#allocation41_spill] sm:$0xff] %v10726_v4  ;;  %8090 = vpow2.f32 %v7215_v52  ;;  %v7229_v26 = vmul.f32 -1.442695, %v10722_v15  ;;  %v7231_v27 = vmul.f32 -1.442695, %v10726_v4  ;;  %v10747_v44 = vadd.f32 %v1635_v13, %v10654_v34 }
 0x1ed   : > { %v1637_v38 = vpop.f32.mrf.mxu1  ;;  %v1830_v40 = vpop.f32.mrf.mxu0  ;;  %8092 = vpow2.f32 %v7217_v42  ;;  %v10752_v60 = vadd.f32 %v1828_v49, %v10657_v16 }
 0x1ee   : > { %8094 = vpow2.f32 %v7228_v62  ;;  %16143 = vst [vmem:[#allocation42_spill] sm:$0xff] %v10747_v44  ;;  %v10759_v29 = vadd.f32 %v1637_v38, %v10660_v51  ;;  %v10762_v13 = vadd.f32 %v1830_v40, %v10663_v6  ;;  %v7242_v62 = vmul.f32 -1.442695, %v10747_v44 }
 0x1ef   : > { %v10697_v45 = vpop.f32.mrf.mxu1  ;;  %v10699_v23 = vpop.f32.mrf.mxu0  ;;  %2106 = vmatmul.mubr.bf16.gmra.mxu1 %v10463_v41  ;;  %2299 = vmatmul.mubr.bf16.gmra.mxu0 %v10463_v41  ;;  %8096 = vpow2.f32 %v7230_v59  ;;  %16144 = vst [vmem:[#allocation43_spill] sm:$0xff] %v10752_v60  ;;  %v7244_v59 = vmul.f32 -1.442695, %v10752_v60 }
 0x1f0   : > { %2115 = vmatprep.mubr.bf16.mxu1 %v15755_v50  ;;  %2308 = vmatprep.mubr.bf16.mxu0 %v15755_v50  ;;  %8098 = vpow2.f32 %v7229_v26  ;;  %16145 = vst [vmem:[#allocation44_spill] sm:$0xff] %v10759_v29  ;;  %16146 = vst [vmem:[#allocation45_spill] sm:$0xff] %v10762_v13  ;;  %v7243_v38 = vmul.f32 -1.442695, %v10759_v29  ;;  %v7245_v40 = vmul.f32 -1.442695, %v10762_v13 }
 0x1f1   : > { %v10713_v37 = vpop.f32.mrf.mxu1  ;;  %v10715_v1 = vpop.f32.mrf.mxu0  ;;  %8100 = vpow2.f32 %v7231_v27 }
 0x1f2   : > { %v8079_v49 = vpop.eup %8078  ;;  %8102 = vpow2.f32 %v7242_v62 }
 0x1f3   : > { %v10728_v5 = vpop.f32.mrf.mxu1  ;;  %v10730_v21 = vpop.f32.mrf.mxu0  ;;  %v4282_v2 = vadd.f32 1.0, %v8079_v49  ;;  %8104 = vpow2.f32 %v7244_v59 }
 0x1f4   : > { %v8081_v26 = vpop.eup %8080  ;;  %8106 = vpow2.f32 %v7243_v38 }
 0x1f5   : > { %v10734_v0 = vpop.f32.mrf.mxu1  ;;  %v10736_v18 = vpop.f32.mrf.mxu0  ;;  %v4284_v36 = vadd.f32 1.0, %v8081_v26  ;;  %8108 = vpow2.f32 %v7245_v40 }
 0x1f6   : > { %v8083_v27 = vpop.eup %8082  ;;  %8110 = vrcp.f32 %v4282_v2 }
 0x1f7   : > { %v10740_v3 = vpop.f32.mrf.mxu1  ;;  %v10742_v33 = vpop.f32.mrf.mxu0  ;;  %2116 = vmatmul.mubr.bf16.gmra.mxu1 %v10471_v48  ;;  %2309 = vmatmul.mubr.bf16.gmra.mxu0 %v10471_v48  ;;  %v4283_v60 = vadd.f32 1.0, %v8083_v27  ;;  %8112 = vrcp.f32 %v4284_v36  ;;  %v10804_v36 = vadd.f32 %v10697_v45, %v10654_v34 }
 0x1f8   : > { %2125 = vmatprep.mubr.bf16.mxu1 %v15755_v50  ;;  %2318 = vmatprep.mubr.bf16.mxu0 %v15755_v50  ;;  %v8085_v28 = vpop.eup %8084 }
 0x1f9   : > { %v10754_v46 = vpop.f32.mrf.mxu1  ;;  %v10756_v53 = vpop.f32.mrf.mxu0  ;;  %v4285_v58 = vadd.f32 1.0, %v8085_v28  ;;  %8114 = vrcp.f32 %v4283_v60  ;;  %16148 = vst [vmem:[#allocation46_spill] sm:$0xff] %v10804_v36 }
 0x1fa   : > { %v8087_v31 = vpop.eup %8086 }
 0x1fb   : > { %v10764_v52 = vpop.f32.mrf.mxu1  ;;  %v10766_v42 = vpop.f32.mrf.mxu0  ;;  %v4296_v10 = vadd.f32 1.0, %v8087_v31  ;;  %8116 = vrcp.f32 %v4285_v58 }
 0x1fc   : > { %v8089_v4 = vpop.eup %8088 }
 0x1fd   : > { %v10770_v57 = vpop.f32.mrf.mxu1  ;;  %v10772_v50 = vpop.f32.mrf.mxu0  ;;  %v4298_v59 = vadd.f32 1.0, %v8089_v4  ;;  %8118 = vrcp.f32 %v4296_v10  ;;  %v10810_v4 = vadd.f32 %v10699_v23, %v10657_v16 }
 0x1fe   : > { %v8091_v13 = vpop.eup %8090 }
 0x1ff   : > { %v10776_v14 = vpop.f32.mrf.mxu1  ;;  %v10778_v9 = vpop.f32.mrf.mxu0  ;;  %2126 = vmatmul.mubr.bf16.gmra.mxu1 %v10479_v19  ;;  %2319 = vmatmul.mubr.bf16.gmra.mxu0 %v10479_v19  ;;  %v4297_v38 = vadd.f32 1.0, %v8091_v13  ;;  %8120 = vrcp.f32 %v4298_v59  ;;  %16149 = vst [vmem:[#allocation47_spill] sm:$0xff] %v10810_v4  ;;  %v7256_v59 = vmul.f32 -1.442695, %v10804_v36 }
 0x200   : > { %2135 = vmatprep.mubr.bf16.mxu1 %v16147_v24  ;;  %2328 = vmatprep.mubr.bf16.mxu0 %v16147_v24  ;;  %v8093_v49 = vpop.eup %8092 }
 0x201   : > { %v10784_v12 = vpop.f32.mrf.mxu1  ;;  %v10786_v54 = vpop.f32.mrf.mxu0  ;;  %v4299_v28 = vadd.f32 1.0, %v8093_v49  ;;  %8122 = vrcp.f32 %v4297_v38  ;;  %v10822_v49 = vadd.f32 %v10715_v1, %v10663_v6  ;;  %v10831_v38 = vadd.f32 %v10728_v5, %v10654_v34 }
 0x202   : > { %v8095_v32 = vpop.eup %8094  ;;  %v10845_v5 = vadd.f32 %v10734_v0, %v10660_v51 }
 0x203   : > { %v10788_v22 = vpop.f32.mrf.mxu1  ;;  %v10790_v62 = vpop.f32.mrf.mxu0  ;;  %v4310_v31 = vadd.f32 1.0, %v8095_v32  ;;  %v10818_v32 = vadd.f32 %v10713_v37, %v10660_v51  ;;  %8124 = vrcp.f32 %v4299_v28  ;;  %16151 = vst [vmem:[#allocation49_spill] sm:$0xff] %v10822_v49  ;;  %16152 = vst [vmem:[#allocation50_spill] sm:$0xff] %v10831_v38  ;;  %v7258_v37 = vmul.f32 -1.442695, %v10810_v4 }
 0x204   : > { %v8097_v47 = vpop.eup %8096  ;;  %v10836_v28 = vadd.f32 %v10730_v21, %v10657_v16  ;;  %16154 = vst [vmem:[#allocation52_spill] sm:$0xff] %v10845_v5  ;;  %v10850_v21 = vadd.f32 %v10736_v18, %v10663_v6  ;;  %v7270_v0 = vmul.f32 -1.442695, %v10831_v38  ;;  %v10881_v38 = vadd.f32 %v10754_v46, %v10660_v51 }
 0x205   : > { %v10792_v26 = vpop.f32.mrf.mxu1  ;;  %v10794_v39 = vpop.f32.mrf.mxu0  ;;  %v4312_v58 = vadd.f32 1.0, %v8097_v47  ;;  %16150 = vst [vmem:[#allocation48_spill] sm:$0xff] %v10818_v32  ;;  %8126 = vrcp.f32 %v4310_v31  ;;  %v7257_v31 = vmul.f32 -1.442695, %v10818_v32 }
 0x206   : > { %v8099_v27 = vpop.eup %8098  ;;  %16153 = vst [vmem:[#allocation51_spill] sm:$0xff] %v10836_v28  ;;  %16155 = vst [vmem:[#allocation53_spill] sm:$0xff] %v10850_v21 }
 0x207   : > { %v10796_v40 = vpop.f32.mrf.mxu1  ;;  %v10798_v15 = vpop.f32.mrf.mxu0  ;;  %2136 = vmatmul.mubr.bf16.gmra.mxu1 %v10487_v7  ;;  %2329 = vmatmul.mubr.bf16.gmra.mxu0 %v10487_v7  ;;  %v4311_v10 = vadd.f32 1.0, %v8099_v27  ;;  %8128 = vrcp.f32 %v4312_v58  ;;  %v7259_v58 = vmul.f32 -1.442695, %v10822_v49  ;;  %v7272_v49 = vmul.f32 -1.442695, %v10836_v28  ;;  %16160 = vst [vmem:[#allocation58_spill] sm:$0xff] %v10881_v38 }
 0x208   : > { %v8101_v2 = vpop.eup %8100  ;;  %2145 = vmatprep.mubr.bf16.mxu1 %v16147_v24  ;;  %2338 = vmatprep.mubr.bf16.mxu0 %v16147_v24  ;;  %v7273_v28 = vmul.f32 -1.442695, %v10850_v21 }
 0x209   : > { %v10812_v60 = vpop.f32.mrf.mxu1  ;;  %v10814_v13 = vpop.f32.mrf.mxu0  ;;  %v4313_v45 = vadd.f32 1.0, %v8101_v2  ;;  %8130 = vrcp.f32 %v4311_v10 }
 0x20a   : > { %v8103_v27 = vpop.eup %8102 }
 0x20b   : > { %v10824_v47 = vpop.f32.mrf.mxu1  ;;  %v10826_v23 = vpop.f32.mrf.mxu0  ;;  %8132 = vrcp.f32 %v4313_v45  ;;  %v10861_v45 = vadd.f32 %v10740_v3, %v10654_v34  ;;  %v7271_v3 = vmul.f32 -1.442695, %v10845_v5  ;;  %v7285_v5 = vmul.f32 -1.442695, %v10881_v38 }
 0x20c   : > { %v8105_v44 = vpop.eup %8104  ;;  %8134 = vpow2.f32 %v7256_v59 }
 0x20d   : > { %v10838_v1 = vpop.f32.mrf.mxu1  ;;  %v10840_v2 = vpop.f32.mrf.mxu0  ;;  %16156 = vst [vmem:[#allocation54_spill] sm:$0xff] %v10861_v45  ;;  %8136 = vpow2.f32 %v7258_v37 }
 0x20e   : > { %v8107_v29 = vpop.eup %8106  ;;  %8138 = vpow2.f32 %v7257_v31 }
 0x20f   : > { %v10852_v4 = vpop.f32.mrf.mxu1  ;;  %v10854_v7 = vpop.f32.mrf.mxu0  ;;  %2146 = vmatmul.mubr.bf16.gmra.mxu1 %v10495_v61  ;;  %2339 = vmatmul.mubr.bf16.gmra.mxu0 %v10495_v61  ;;  %v10870_v61 = vadd.f32 %v10742_v33, %v10657_v16  ;;  %v10888_v33 = vadd.f32 %v10756_v53, %v10663_v6 }
 0x210   : > { %v8109_v10 = vpop.eup %8108  ;;  %2155 = vmatprep.mubr.bf16.mxu1 %v16147_v24  ;;  %2348 = vmatprep.mubr.bf16.mxu0 %v16147_v24  ;;  %8140 = vpow2.f32 %v7259_v58 }
 0x211   : > { %v10865_v18 = vpop.eup %8110  ;;  %16158 = vst [vmem:[#allocation56_spill] sm:$0xff] %v10870_v61  ;;  %v10872_v59 = vpop.f32.mrf.mxu1  ;;  %16162 = vst [vmem:[#allocation60_spill] sm:$0xff] %v10888_v33  ;;  %8142 = vpow2.f32 %v7270_v0  ;;  %v7286_v58 = vmul.f32 -1.442695, %v10870_v61  ;;  %v7287_v0 = vmul.f32 -1.442695, %v10888_v33  ;;  %v10928_v33 = vadd.f32 %v10766_v42, %v10657_v16 }
 0x212   : > { %16157 = vst [vmem:[#allocation55_spill] sm:$0xff] %v10865_v18  ;;  %v10874_v36 = vpop.f32.mrf.mxu0  ;;  %v10876_v32 = vpop.eup %8112  ;;  %8144 = vpow2.f32 %v7272_v49  ;;  %v4324_v61 = vadd.f32 1.0, %v8103_v27  ;;  %v10944_v42 = vadd.f32 %v10772_v50, %v10663_v6 }
 0x213   : > { %16159 = vst [vmem:[#allocation57_spill] sm:$0xff] %v10876_v32  ;;  %v10883_v37 = vpop.eup %8114  ;;  %v10890_v18 = vpop.f32.mrf.mxu1  ;;  %v7284_v32 = vmul.f32 -1.442695, %v10861_v45  ;;  %8146 = vpow2.f32 %v7271_v3  ;;  %v10920_v3 = vadd.f32 %v10764_v52, %v10654_v34  ;;  %16170 = vst [vmem:[#allocation68_spill] sm:$0xff] %v10928_v33  ;;  %v4325_v52 = vadd.f32 1.0, %v8107_v29 }
 0x214   : > { %16161 = vst [vmem:[#allocation59_spill] sm:$0xff] %v10883_v37  ;;  %v10892_v19 = vpop.f32.mrf.mxu0  ;;  %v10894_v31 = vpop.eup %8116  ;;  %8148 = vpow2.f32 %v7273_v28  ;;  %16174 = vst [vmem:[#allocation72_spill] sm:$0xff] %v10944_v42  ;;  %v7301_v38 = vmul.f32 -1.442695, %v10944_v42 }
 0x215   : > { %16163 = vst [vmem:[#allocation61_spill] sm:$0xff] %v10894_v31  ;;  %v10897_v46 = vpop.eup %8118  ;;  %v10900_v37 = vpop.f32.mrf.mxu1  ;;  %8150 = vpow2.f32 %v7284_v32  ;;  %16168 = vst [vmem:[#allocation66_spill] sm:$0xff] %v10920_v3  ;;  %v7298_v29 = vmul.f32 -1.442695, %v10920_v3 }
 0x216   : > { %16164 = vst [vmem:[#allocation62_spill] sm:$0xff] %v10897_v46  ;;  %v10902_v21 = vpop.f32.mrf.mxu0  ;;  %v10904_v53 = vpop.eup %8120  ;;  %8152 = vpow2.f32 %v7286_v58 }
 0x217   : > { %16165 = vst [vmem:[#allocation63_spill] sm:$0xff] %v10904_v53  ;;  %v10907_v48 = vpop.eup %8122  ;;  %v10910_v31 = vpop.f32.mrf.mxu1  ;;  %2156 = vmatmul.mubr.bf16.gmra.mxu1 %v10503_v17  ;;  %2349 = vmatmul.mubr.bf16.gmra.mxu0 %v10503_v17  ;;  %v4326_v53 = vadd.f32 1.0, %v8105_v44  ;;  %8154 = vpow2.f32 %v7285_v5  ;;  %v4327_v44 = vadd.f32 1.0, %v8109_v10  ;;  %v7300_v10 = vmul.f32 -1.442695, %v10928_v33 }
 0x218   : > { %16166 = vst [vmem:[#allocation64_spill] sm:$0xff] %v10907_v48  ;;  %v10912_v46 = vpop.f32.mrf.mxu0  ;;  %v10916_v49 = vpop.eup %8124  ;;  %2391 = vmatprep.mubr.bf16.mxu1 %v16147_v24  ;;  %2584 = vmatprep.mubr.bf16.mxu0 %v16147_v24  ;;  %8156 = vpow2.f32 %v7287_v0 }
 0x219   : > { %16167 = vst [vmem:[#allocation65_spill] sm:$0xff] %v10916_v49  ;;  %v10924_v28 = vpop.eup %8126  ;;  %v10930_v17 = vpop.f32.mrf.mxu1  ;;  %v10938_v49 = vadd.f32 %v10770_v57, %v10660_v51  ;;  %8158 = vrcp.f32 %v4324_v61  ;;  %v7926_v57 = vld [vmem:[%s15751_s2 + $0x340] ss:$56 sps:$4 sm:$0xff]  }
 0x21a   : > { %16169 = vst [vmem:[#allocation67_spill] sm:$0xff] %v10924_v28  ;;  %v10932_v27 = vpop.f32.mrf.mxu0  ;;  %v10934_v32 = vpop.eup %8128  ;;  %8160 = vrcp.f32 %v4326_v53 }
 0x21b   : > { %16171 = vst [vmem:[#allocation69_spill] sm:$0xff] %v10934_v32  ;;  %16172 = vst [vmem:[#allocation70_spill] sm:$0xff] %v10938_v49  ;;  %v10940_v48 = vpop.eup %8130  ;;  %v10946_v58 = vpop.f32.mrf.mxu1  ;;  %v7931_v32 = vld [vmem:[%s15751_s2 + $0x2d4] ss:$56 sps:$4 sm:$0xff]   ;;  %8162 = vrcp.f32 %v4325_v52  ;;  %v7299_v61 = vmul.f32 -1.442695, %v10938_v49 }
 0x21c   : > { %16173 = vst [vmem:[#allocation71_spill] sm:$0xff] %v10940_v48  ;;  %v10948_v28 = vpop.f32.mrf.mxu0  ;;  %v10950_v45 = vpop.eup %8132  ;;  %8164 = vrcp.f32 %v4327_v44  ;;  %v7929_v52 = vld [vmem:[%s15751_s2 + $0x2d0] ss:$56 sps:$4 sm:$0xff]  }
 0x21d   : > { %16175 = vst [vmem:[#allocation73_spill] sm:$0xff] %v10950_v45  ;;  %v8135_v5 = vpop.eup %8134  ;;  %v10957_v0 = vpop.f32.mrf.mxu1  ;;  %8166 = vpow2.f32 %v7298_v29 }
 0x21e   : > { %v10959_v50 = vpop.f32.mrf.mxu0  ;;  %v8137_v45 = vpop.eup %8136  ;;  %v4338_v41 = vadd.f32 1.0, %v8135_v5  ;;  %8168 = vpow2.f32 %v7300_v10 }
 0x21f   : > { %16176 = vst [vmem:[#allocation74_spill] sm:$0xff] %v10959_v50  ;;  %v8139_v48 = vpop.eup %8138  ;;  %v10966_v3 = vpop.f32.mrf.mxu1  ;;  %2392 = vmatmul.mubr.bf16.vlgmr.msra.gmra.mxu1 %v10239_v35  ;;  %2585 = vmatmul.mubr.bf16.vlgmr.msra.gmra.mxu0 %v10239_v35  ;;  %v4340_v42 = vadd.f32 1.0, %v8137_v45  ;;  %8170 = vpow2.f32 %v7299_v61 }
 0x220   : > { %16177 = vst [vmem:[#allocation75_spill] sm:$0xff] %v10966_v3  ;;  %v10968_v53 = vpop.f32.mrf.mxu0  ;;  %v8141_v33 = vpop.eup %8140  ;;  %2746 = vmatpush1.bf16.msra.mxu1 %v7926_v57  ;;  %2401 = vmatprep.mubr.bf16.mxu1 %v16147_v24  ;;  %v4339_v5 = vadd.f32 1.0, %v8139_v48  ;;  %8172 = vpow2.f32 %v7301_v38 }
 0x221   : > { %16178 = vst [vmem:[#allocation76_spill] sm:$0xff] %v10968_v53  ;;  %v8143_v44 = vpop.eup %8142  ;;  %v10976_v49 = vpop.f32.mrf.mxu1  ;;  %2594 = vmatprep.mubr.bf16.mxu0 %v16147_v24  ;;  %2747 = vmatprep.subr.bf16.mxu1 %v7931_v32  ;;  %v4341_v57 = vadd.f32 1.0, %v8141_v33  ;;  %8174 = vrcp.f32 %v4338_v41 }
 0x222   : > { %16179 = vst [vmem:[#allocation77_spill] sm:$0xff] %v10976_v49  ;;  %v10978_v53 = vpop.f32.mrf.mxu0  ;;  %v8145_v35 = vpop.eup %8144  ;;  %v4352_v45 = vadd.f32 1.0, %v8143_v44  ;;  %8176 = vrcp.f32 %v4340_v42  ;;  %v10997_v42 = vadd.f32 %v10776_v14, %v10654_v34  ;;  %v11005_v44 = vadd.f32 %v10778_v9, %v10657_v16 }
 0x223   : > { %16180 = vst [vmem:[#allocation78_spill] sm:$0xff] %v10978_v53  ;;  %v8147_v29 = vpop.eup %8146  ;;  %v10981_v3 = vpop.f32.mrf.mxu1  ;;  %v4354_v53 = vadd.f32 1.0, %v8145_v35  ;;  %8178 = vrcp.f32 %v4339_v5  ;;  %v11021_v9 = vadd.f32 %v10786_v54, %v10663_v6  ;;  %v11037_v54 = vadd.f32 %v10790_v62, %v10657_v16 }
 0x224   : > { %16181 = vst [vmem:[#allocation79_spill] sm:$0xff] %v10981_v3  ;;  %v10983_v30 = vpop.f32.mrf.mxu0  ;;  %v8149_v50 = vpop.eup %8148  ;;  %2748 = vmatpush1.bf16.msra.mxu1 %v7929_v52  ;;  %v4353_v61 = vadd.f32 1.0, %v8147_v29  ;;  %8180 = vrcp.f32 %v4341_v57  ;;  %16183 = vst [vmem:[#allocation81_spill] sm:$0xff] %v10997_v42  ;;  %v11051_v62 = vadd.f32 %v10794_v39, %v10663_v6 }
 0x225   : > { %16182 = vst [vmem:[#allocation80_spill] sm:$0xff] %v10983_v30  ;;  %v8151_v10 = vpop.eup %8150  ;;  %v10985_v49 = vpop.f32.mrf.mxu1  ;;  %v4355_v38 = vadd.f32 1.0, %v8149_v50  ;;  %8182 = vrcp.f32 %v4352_v45  ;;  %16185 = vst [vmem:[#allocation83_spill] sm:$0xff] %v11005_v44  ;;  %v11015_v45 = vadd.f32 %v10784_v12, %v10660_v51  ;;  %v11032_v12 = vadd.f32 %v10788_v22, %v10654_v34 }
 0x226   : > { %v10987_v32 = vpop.f32.mrf.mxu0  ;;  %v8153_v48 = vpop.eup %8152  ;;  %v4366_v35 = vadd.f32 1.0, %v8151_v10  ;;  %8184 = vrcp.f32 %v4354_v53  ;;  %16189 = vst [vmem:[#allocation87_spill] sm:$0xff] %v11021_v9  ;;  %16192 = vst [vmem:[#allocation90_spill] sm:$0xff] %v11037_v54  ;;  %v11046_v22 = vadd.f32 %v10792_v26, %v10660_v51  ;;  %v7328_v39 = vmul.f32 -1.442695, %v11037_v54 }
 0x227   : > { %v8155_v33 = vpop.eup %8154  ;;  %v10989_v3 = vpop.f32.mrf.mxu1  ;;  %2402 = vmatmul.mubr.bf16.gmra.mxu1 %v10271_v56  ;;  %2595 = vmatmul.mubr.bf16.gmra.mxu0 %v10271_v56  ;;  %v4368_v52 = vadd.f32 1.0, %v8153_v48  ;;  %8186 = vrcp.f32 %v4353_v61  ;;  %16187 = vst [vmem:[#allocation85_spill] sm:$0xff] %v11015_v45  ;;  %v7312_v61 = vmul.f32 -1.442695, %v10997_v42  ;;  %16191 = vst [vmem:[#allocation89_spill] sm:$0xff] %v11032_v12 }
 0x228   : > { %v10991_v30 = vpop.f32.mrf.mxu0  ;;  %v8157_v41 = vpop.eup %8156  ;;  %2411 = vmatprep.mubr.bf16.mxu1 %v16147_v24  ;;  %2604 = vmatprep.mubr.bf16.mxu0 %v16147_v24  ;;  %v4367_v14 = vadd.f32 1.0, %v8155_v33  ;;  %8188 = vrcp.f32 %v4355_v38  ;;  %v7314_v38 = vmul.f32 -1.442695, %v11005_v44  ;;  %16193 = vst [vmem:[#allocation91_spill] sm:$0xff] %v11051_v62  ;;  %v7326_v26 = vmul.f32 -1.442695, %v11032_v12 }
 0x229   : > { %v11001_v50 = vpop.eup %8158  ;;  %v11007_v5 = vpop.f32.mrf.mxu1  ;;  %v4369_v53 = vadd.f32 1.0, %v8157_v41  ;;  %8190 = vrcp.f32 %v4366_v35  ;;  %v7313_v35 = vmul.f32 -1.442695, %v11015_v45  ;;  %v7329_v54 = vmul.f32 -1.442695, %v11051_v62 }
 0x22a   : > { %16184 = vst [vmem:[#allocation82_spill] sm:$0xff] %v11001_v50  ;;  %v11009_v29 = vpop.f32.mrf.mxu0  ;;  %v11011_v57 = vpop.eup %8160  ;;  %8192 = vrcp.f32 %v4368_v52  ;;  %v7315_v52 = vmul.f32 -1.442695, %v11021_v9 }
 0x22b   : > { %16186 = vst [vmem:[#allocation84_spill] sm:$0xff] %v11011_v57  ;;  %v11017_v10 = vpop.eup %8162  ;;  %v11023_v48 = vpop.f32.mrf.mxu1  ;;  %8194 = vrcp.f32 %v4367_v14 }
 0x22c   : > { %16188 = vst [vmem:[#allocation86_spill] sm:$0xff] %v11017_v10  ;;  %v11025_v56 = vpop.f32.mrf.mxu0  ;;  %v11027_v50 = vpop.eup %8164  ;;  %8196 = vrcp.f32 %v4369_v53 }
 0x22d   : > { %16190 = vst [vmem:[#allocation88_spill] sm:$0xff] %v11027_v50  ;;  %v8167_v33 = vpop.eup %8166  ;;  %v11039_v41 = vpop.f32.mrf.mxu1  ;;  %8198 = vpow2.f32 %v7312_v61  ;;  %v7934_v61 = vld [vmem:[%s15751_s2 + $0x264] ss:$56 sps:$4 sm:$0xff]  }
 0x22e   : > { %v11041_v57 = vpop.f32.mrf.mxu0  ;;  %v8169_v50 = vpop.eup %8168  ;;  %8200 = vpow2.f32 %v7314_v38  ;;  %2749 = vmatprep.subr.bf16.mxu1 %v7934_v61  ;;  %v4380_v12 = vadd.f32 1.0, %v8167_v33 }
 0x22f   : > { %v8171_v10 = vpop.eup %8170  ;;  %v11053_v44 = vpop.f32.mrf.mxu1  ;;  %2412 = vmatmul.mubr.bf16.gmra.mxu1 %v10309_v20  ;;  %2605 = vmatmul.mubr.bf16.gmra.mxu0 %v10309_v20  ;;  %v7932_v20 = vld [vmem:[%s15751_s2 + $0x260] ss:$56 sps:$4 sm:$0xff]   ;;  %8202 = vpow2.f32 %v7313_v35 }
 0x230   : > { %16194 = vst [vmem:[#allocation92_spill] sm:$0xff] %v11053_v44  ;;  %v11055_v42 = vpop.f32.mrf.mxu0  ;;  %v8173_v14 = vpop.eup %8172  ;;  %2421 = vmatprep.mubr.bf16.mxu1 %v16147_v24  ;;  %2614 = vmatprep.mubr.bf16.mxu0 %v16147_v24  ;;  %8204 = vpow2.f32 %v7315_v52  ;;  %v11095_v52 = vadd.f32 %v10798_v15, %v10657_v16  ;;  %v4381_v33 = vadd.f32 1.0, %v8171_v10  ;;  %v11111_v15 = vadd.f32 %v10814_v13, %v10663_v6 }
 0x231   : > { %16195 = vst [vmem:[#allocation93_spill] sm:$0xff] %v11055_v42  ;;  %v11062_v53 = vpop.eup %8174  ;;  %v11065_v9 = vpop.f32.mrf.mxu1  ;;  %8206 = vpow2.f32 %v7326_v26  ;;  %2750 = vmatpush1.bf16.msra.mxu1 %v7932_v20 }
 0x232   : > { %16196 = vst [vmem:[#allocation94_spill] sm:$0xff] %v11062_v53  ;;  %16197 = vst [vmem:[#allocation95_spill] sm:$0xff] %v11065_v9  ;;  %v11067_v42 = vpop.f32.mrf.mxu0  ;;  %v11075_v44 = vpop.eup %8176  ;;  %v7327_v53 = vmul.f32 -1.442695, %v11046_v22  ;;  %8208 = vpow2.f32 %v7328_v39 }
 0x233   : > { %16198 = vst [vmem:[#allocation96_spill] sm:$0xff] %v11067_v42  ;;  %16199 = vst [vmem:[#allocation97_spill] sm:$0xff] %v11075_v44  ;;  %v11078_v38 = vpop.eup %8178  ;;  %v11081_v9 = vpop.f32.mrf.mxu1  ;;  %v11089_v44 = vadd.f32 %v10796_v40, %v10654_v34  ;;  %v11105_v40 = vadd.f32 %v10812_v60, %v10660_v51 }
 0x234   : > { %16200 = vst [vmem:[#allocation98_spill] sm:$0xff] %v11078_v38  ;;  %16201 = vst [vmem:[#allocation99_spill] sm:$0xff] %v11081_v9  ;;  %v11083_v42 = vpop.f32.mrf.mxu0  ;;  %v11085_v45 = vpop.eup %8180  ;;  %v4382_v38 = vadd.f32 1.0, %v8169_v50  ;;  %8210 = vpow2.f32 %v7327_v53  ;;  %v4383_v50 = vadd.f32 1.0, %v8173_v14  ;;  %v7342_v14 = vmul.f32 -1.442695, %v11095_v52 }
 0x235   : > { %16202 = vst [vmem:[#allocation100_spill] sm:$0xff] %v11083_v42  ;;  %16203 = vst [vmem:[#allocation101_spill] sm:$0xff] %v11085_v45  ;;  %v11091_v35 = vpop.eup %8182  ;;  %v11097_v62 = vpop.f32.mrf.mxu1  ;;  %8212 = vpow2.f32 %v7329_v54  ;;  %v7340_v60 = vmul.f32 -1.442695, %v11089_v44  ;;  %v11124_v54 = vadd.f32 %v10824_v47, %v10654_v34  ;;  %v11133_v53 = vadd.f32 %v10826_v23, %v10657_v16 }
 0x236   : > { %16204 = vst [vmem:[#allocation102_spill] sm:$0xff] %v11095_v52  ;;  %16205 = vst [vmem:[#allocation103_spill] sm:$0xff] %v11097_v62  ;;  %v11099_v61 = vpop.f32.mrf.mxu0  ;;  %v11101_v45 = vpop.eup %8184  ;;  %8214 = vrcp.f32 %v4380_v12  ;;  %v7341_v47 = vmul.f32 -1.442695, %v11105_v40  ;;  %v7343_v52 = vmul.f32 -1.442695, %v11111_v15  ;;  %v11151_v23 = vadd.f32 %v10840_v2, %v10663_v6 }
 0x237   : > { %16206 = vst [vmem:[#allocation104_spill] sm:$0xff] %v11099_v61  ;;  %16207 = vst [vmem:[#allocation105_spill] sm:$0xff] %v11101_v45  ;;  %v11107_v20 = vpop.eup %8186  ;;  %v11113_v26 = vpop.f32.mrf.mxu1  ;;  %2422 = vmatmul.mubr.bf16.gmra.mxu1 %v10347_v43  ;;  %2615 = vmatmul.mubr.bf16.gmra.mxu0 %v10347_v43  ;;  %8216 = vrcp.f32 %v4382_v38  ;;  %v11144_v43 = vadd.f32 %v10838_v1, %v10660_v51  ;;  %v11293_v9 = vadd.f32 %v10902_v21, %v10663_v6 }
 0x238   : > { %16208 = vst [vmem:[#allocation106_spill] sm:$0xff] %v11111_v15  ;;  %16209 = vst [vmem:[#allocation107_spill] sm:$0xff] %v11113_v26  ;;  %v11115_v39 = vpop.f32.mrf.mxu0  ;;  %v11119_v10 = vpop.eup %8188  ;;  %2431 = vmatprep.mubr.bf16.mxu1 %v16147_v24  ;;  %2624 = vmatprep.mubr.bf16.mxu0 %v16147_v24  ;;  %8218 = vrcp.f32 %v4381_v33 }
 0x239   : > { %16210 = vst [vmem:[#allocation108_spill] sm:$0xff] %v11115_v39  ;;  %16211 = vst [vmem:[#allocation109_spill] sm:$0xff] %v11119_v10  ;;  %v11128_v13 = vpop.eup %8190  ;;  %v11135_v12 = vpop.f32.mrf.mxu1  ;;  %8220 = vrcp.f32 %v4383_v50  ;;  %v7356_v39 = vmul.f32 -1.442695, %v11133_v53  ;;  %v7355_v2 = vmul.f32 -1.442695, %v11144_v43 }
 0x23a   : > { %16212 = vst [vmem:[#allocation110_spill] sm:$0xff] %v11133_v53  ;;  %16213 = vst [vmem:[#allocation111_spill] sm:$0xff] %v11135_v12  ;;  %v11137_v45 = vpop.f32.mrf.mxu0  ;;  %v11139_v10 = vpop.eup %8192  ;;  %8222 = vpow2.f32 %v7340_v60 }
 0x23b   : > { %16214 = vst [vmem:[#allocation112_spill] sm:$0xff] %v11137_v45  ;;  %16215 = vst [vmem:[#allocation113_spill] sm:$0xff] %v11139_v10  ;;  %v11146_v38 = vpop.eup %8194  ;;  %v11153_v12 = vpop.f32.mrf.mxu1  ;;  %v7354_v10 = vmul.f32 -1.442695, %v11124_v54  ;;  %8224 = vpow2.f32 %v7342_v14 }
 0x23c   : > { %16216 = vst [vmem:[#allocation114_spill] sm:$0xff] %v11151_v23  ;;  %16217 = vst [vmem:[#allocation115_spill] sm:$0xff] %v11153_v12  ;;  %v11155_v45 = vpop.f32.mrf.mxu0  ;;  %v11157_v33 = vpop.eup %8196  ;;  %8226 = vpow2.f32 %v7341_v47 }
 0x23d   : > { %16218 = vst [vmem:[#allocation116_spill] sm:$0xff] %v11155_v45  ;;  %16219 = vst [vmem:[#allocation117_spill] sm:$0xff] %v11157_v33  ;;  %v8199_v1 = vpop.eup %8198  ;;  %v11161_v50 = vpop.f32.mrf.mxu1  ;;  %8228 = vpow2.f32 %v7343_v52  ;;  %v7357_v45 = vmul.f32 -1.442695, %v11151_v23 }
 0x23e   : > { %16220 = vst [vmem:[#allocation118_spill] sm:$0xff] %v11161_v50  ;;  %v11163_v15 = vpop.f32.mrf.mxu0  ;;  %v8201_v26 = vpop.eup %8200  ;;  %v4394_v53 = vadd.f32 1.0, %v8199_v1  ;;  %8230 = vpow2.f32 %v7354_v10  ;;  %16248 = vst [vmem:[#allocation146_spill] sm:$0xff] %v11293_v9 }
 0x23f   : > { %16221 = vst [vmem:[#allocation119_spill] sm:$0xff] %v11163_v15  ;;  %v8203_v12 = vpop.eup %8202  ;;  %v11167_v33 = vpop.f32.mrf.mxu1  ;;  %2432 = vmatmul.mubr.bf16.gmra.mxu1 %v10385_v8  ;;  %2625 = vmatmul.mubr.bf16.gmra.mxu0 %v10385_v8  ;;  %v4396_v15 = vadd.f32 1.0, %v8201_v26  ;;  %8232 = vpow2.f32 %v7356_v39  ;;  %v11185_v26 = vadd.f32 %v10872_v59, %v10660_v51  ;;  %v11201_v59 = vadd.f32 %v10930_v17, %v10660_v51 }
 0x240   : > { %16222 = vst [vmem:[#allocation120_spill] sm:$0xff] %v11167_v33  ;;  %v11169_v60 = vpop.f32.mrf.mxu0  ;;  %v8205_v14 = vpop.eup %8204  ;;  %2441 = vmatprep.mubr.bf16.mxu1 %v16147_v24  ;;  %2634 = vmatprep.mubr.bf16.mxu0 %v16147_v24  ;;  %8234 = vpow2.f32 %v7355_v2 }
 0x241   : > { %16223 = vst [vmem:[#allocation121_spill] sm:$0xff] %v11169_v60  ;;  %v8207_v47 = vpop.eup %8206  ;;  %v11175_v52 = vpop.f32.mrf.mxu1  ;;  %v4395_v60 = vadd.f32 1.0, %v8203_v12  ;;  %v4397_v61 = vadd.f32 1.0, %v8205_v14  ;;  %8236 = vpow2.f32 %v7357_v45  ;;  %v11191_v12 = vadd.f32 %v10900_v37, %v10660_v51 }
 0x242   : > { %16224 = vst [vmem:[#allocation122_spill] sm:$0xff] %v11175_v52  ;;  %v11177_v23 = vpop.f32.mrf.mxu0  ;;  %v8209_v33 = vpop.eup %8208  ;;  %8238 = vrcp.f32 %v4394_v53  ;;  %v4408_v62 = vadd.f32 1.0, %v8207_v47  ;;  %v11207_v37 = vadd.f32 %v10910_v31, %v10654_v34  ;;  %v7369_v17 = vmul.f32 -1.442695, %v11185_v26 }
 0x243   : > { %16225 = vst [vmem:[#allocation123_spill] sm:$0xff] %v11177_v23  ;;  %v8211_v50 = vpop.eup %8210  ;;  %v11179_v8 = vpop.f32.mrf.mxu1  ;;  %8240 = vrcp.f32 %v4396_v15  ;;  %v4410_v23 = vadd.f32 1.0, %v8209_v33 }
 0x244   : > { %16226 = vst [vmem:[#allocation124_spill] sm:$0xff] %v11179_v8  ;;  %v11181_v10 = vpop.f32.mrf.mxu0  ;;  %v8213_v1 = vpop.eup %8212  ;;  %8242 = vrcp.f32 %v4395_v60  ;;  %v4409_v53 = vadd.f32 1.0, %v8211_v50  ;;  %v11226_v60 = vadd.f32 %v10890_v18, %v10654_v34  ;;  %v11240_v18 = vadd.f32 %v10852_v4, %v10654_v34 }
 0x245   : > { %16227 = vst [vmem:[#allocation125_spill] sm:$0xff] %v11181_v10  ;;  %v11187_v39 = vpop.eup %8214  ;;  %v11193_v45 = vpop.f32.mrf.mxu1  ;;  %8244 = vrcp.f32 %v4397_v61  ;;  %v4411_v15 = vadd.f32 1.0, %v8213_v1  ;;  %v11220_v61 = vadd.f32 %v10946_v58, %v10654_v34  ;;  %v7383_v1 = vmul.f32 -1.442695, %v11191_v12 }
 0x246   : > { %16228 = vst [vmem:[#allocation126_spill] sm:$0xff] %v11193_v45  ;;  %v11195_v2 = vpop.f32.mrf.mxu0  ;;  %v11197_v14 = vpop.eup %8216  ;;  %8246 = vrcp.f32 %v4408_v62  ;;  %v7397_v58 = vmul.f32 -1.442695, %v11201_v59 }
 0x247   : > { %16229 = vst [vmem:[#allocation127_spill] sm:$0xff] %v11195_v2  ;;  %16230 = vst [vmem:[#allocation128_spill] sm:$0xff] %v11197_v14  ;;  %v11203_v47 = vpop.eup %8218  ;;  %v11209_v33 = vpop.f32.mrf.mxu1  ;;  %2442 = vmatmul.mubr.bf16.gmra.mxu1 %v10399_v25  ;;  %2635 = vmatmul.mubr.bf16.gmra.mxu0 %v10399_v25  ;;  %8248 = vrcp.f32 %v4410_v23  ;;  %v11236_v25 = vadd.f32 %v10957_v0, %v10660_v51  ;;  %v7396_v23 = vmul.f32 -1.442695, %v11207_v37  ;;  %v7382_v0 = vmul.f32 -1.442695, %v11226_v60 }
 0x248   : > { %16231 = vst [vmem:[#allocation129_spill] sm:$0xff] %v11209_v33  ;;  %v11211_v45 = vpop.f32.mrf.mxu0  ;;  %v11215_v50 = vpop.eup %8220  ;;  %2451 = vmatprep.mubr.bf16.mxu1 %v16147_v24  ;;  %2644 = vmatprep.mubr.bf16.mxu0 %v16147_v24  ;;  %8250 = vrcp.f32 %v4409_v53  ;;  %v7410_v53 = vmul.f32 -1.442695, %v11220_v61 }
 0x249   : > { %16232 = vst [vmem:[#allocation130_spill] sm:$0xff] %v11211_v45  ;;  %16233 = vst [vmem:[#allocation131_spill] sm:$0xff] %v11215_v50  ;;  %v8223_v31 = vpop.eup %8222  ;;  %v11229_v14 = vpop.f32.mrf.mxu1  ;;  %8252 = vrcp.f32 %v4411_v15  ;;  %v7411_v8 = vmul.f32 -1.442695, %v11236_v25 }
 0x24a   : > { %16234 = vst [vmem:[#allocation132_spill] sm:$0xff] %v11229_v14  ;;  %v11231_v62 = vpop.f32.mrf.mxu0  ;;  %v8225_v50 = vpop.eup %8224  ;;  %8254 = vpow2.f32 %v7369_v17 }
 0x24b   : > { %16235 = vst [vmem:[#allocation133_spill] sm:$0xff] %v11231_v62  ;;  %v8227_v45 = vpop.eup %8226  ;;  %v11243_v33 = vpop.f32.mrf.mxu1  ;;  %8256 = vpow2.f32 %v7383_v1 }
 0x24c   : > { %16236 = vst [vmem:[#allocation134_spill] sm:$0xff] %v11243_v33  ;;  %v11245_v14 = vpop.f32.mrf.mxu0  ;;  %v8229_v62 = vpop.eup %8228  ;;  %8258 = vpow2.f32 %v7397_v58  ;;  %v7368_v33 = vmul.f32 -1.442695, %v11240_v18 }
 0x24d   : > { %16237 = vst [vmem:[#allocation135_spill] sm:$0xff] %v11245_v14  ;;  %v8231_v2 = vpop.eup %8230  ;;  %v11249_v10 = vpop.f32.mrf.mxu1  ;;  %8260 = vpow2.f32 %v7396_v23  ;;  %v4424_v23 = vadd.f32 1.0, %v8225_v50  ;;  %v4423_v50 = vadd.f32 1.0, %v8227_v45  ;;  %v4425_v42 = vadd.f32 1.0, %v8229_v62 }
 0x24e   : > { %16238 = vst [vmem:[#allocation136_spill] sm:$0xff] %v11249_v10  ;;  %v11251_v15 = vpop.f32.mrf.mxu0  ;;  %v8233_v4 = vpop.eup %8232  ;;  %v4422_v10 = vadd.f32 1.0, %v8223_v31  ;;  %8262 = vpow2.f32 %v7410_v53  ;;  %v7935_v31 = vld [vmem:[%s15751_s2 + $0x1f0] ss:$56 sps:$4 sm:$0xff]  }
 0x24f   : > { %16239 = vst [vmem:[#allocation137_spill] sm:$0xff] %v11251_v15  ;;  %v8235_v52 = vpop.eup %8234  ;;  %v11255_v14 = vpop.f32.mrf.mxu1  ;;  %2452 = vmatmul.mubr.bf16.gmra.mxu1 %v10413_v63  ;;  %2645 = vmatmul.mubr.bf16.gmra.mxu0 %v10413_v63  ;;  %v11263_v15 = vadd.f32 %v10854_v7, %v10657_v16  ;;  %8264 = vpow2.f32 %v7382_v0  ;;  %v7937_v7 = vld [vmem:[%s15751_s2 + $0x1f4] ss:$56 sps:$4 sm:$0xff]  }
 0x250   : > { %16240 = vst [vmem:[#allocation138_spill] sm:$0xff] %v11255_v14  ;;  %v11257_v17 = vpop.f32.mrf.mxu0  ;;  %v8237_v1 = vpop.eup %8236  ;;  %2461 = vmatprep.mubr.bf16.mxu1 %v16147_v24  ;;  %2654 = vmatprep.mubr.bf16.mxu0 %v16147_v24  ;;  %8266 = vpow2.f32 %v7411_v8 }
 0x251   : > { %16241 = vst [vmem:[#allocation139_spill] sm:$0xff] %v11257_v17  ;;  %16242 = vst [vmem:[#allocation140_spill] sm:$0xff] %v11263_v15  ;;  %v11267_v58 = vpop.eup %8238  ;;  %v11271_v17 = vadd.f32 %v10874_v36, %v10663_v6  ;;  %v11279_v53 = vpop.f32.mrf.mxu1  ;;  %v11287_v36 = vadd.f32 %v10892_v19, %v10657_v16  ;;  %8268 = vpow2.f32 %v7368_v33  ;;  %2751 = vmatprep.subr.bf16.mxu1 %v7937_v7  ;;  %v7370_v19 = vmul.f32 -1.442695, %v11263_v15 }
 0x252   : > { %16244 = vst [vmem:[#allocation142_spill] sm:$0xff] %v11279_v53  ;;  %v11281_v63 = vpop.f32.mrf.mxu0  ;;  %v11283_v14 = vpop.eup %8240  ;;  %8270 = vrcp.f32 %v4422_v10  ;;  %2752 = vmatpush1.bf16.msra.mxu1 %v7935_v31  ;;  %v7385_v10 = vmul.f32 -1.442695, %v11293_v9  ;;  %v4436_v15 = vadd.f32 1.0, %v8231_v2  ;;  %v4437_v9 = vadd.f32 1.0, %v8235_v52 }
 0x253   : > { %16243 = vst [vmem:[#allocation141_spill] sm:$0xff] %v11271_v17  ;;  %16245 = vst [vmem:[#allocation143_spill] sm:$0xff] %v11281_v63  ;;  %v11289_v0 = vpop.eup %8242  ;;  %v11295_v53 = vpop.f32.mrf.mxu1  ;;  %8272 = vrcp.f32 %v4424_v23  ;;  %v7371_v45 = vmul.f32 -1.442695, %v11271_v17  ;;  %v7384_v7 = vmul.f32 -1.442695, %v11287_v36 }
 0x254   : > { %16246 = vst [vmem:[#allocation144_spill] sm:$0xff] %v11283_v14  ;;  %16247 = vst [vmem:[#allocation145_spill] sm:$0xff] %v11287_v36  ;;  %v11297_v63 = vpop.f32.mrf.mxu0  ;;  %v11299_v14 = vpop.eup %8244  ;;  %8274 = vrcp.f32 %v4423_v50 }
 0x255   : > { %16249 = vst [vmem:[#allocation147_spill] sm:$0xff] %v11295_v53  ;;  %16250 = vst [vmem:[#allocation148_spill] sm:$0xff] %v11297_v63  ;;  %v11302_v8 = vpop.eup %8246  ;;  %v11305_v33 = vpop.f32.mrf.mxu1  ;;  %8276 = vrcp.f32 %v4425_v42  ;;  %v4438_v42 = vadd.f32 1.0, %v8233_v4 }
 0x256   : > { %16251 = vst [vmem:[#allocation149_spill] sm:$0xff] %v11299_v14  ;;  %v11307_v21 = vpop.f32.mrf.mxu0  ;;  %v11309_v62 = vpop.eup %8248  ;;  %8278 = vpow2.f32 %v7370_v19 }
 0x257   : > { %16252 = vst [vmem:[#allocation150_spill] sm:$0xff] %v11307_v21  ;;  %16253 = vst [vmem:[#allocation151_spill] sm:$0xff] %v11309_v62  ;;  %v11312_v63 = vpop.eup %8250  ;;  %v11315_v31 = vpop.f32.mrf.mxu1  ;;  %2462 = vmatmul.mubr.bf16.gmra.mxu1 %v10427_v55  ;;  %2655 = vmatmul.mubr.bf16.gmra.mxu0 %v10427_v55  ;;  %8280 = vpow2.f32 %v7371_v45  ;;  %v4439_v55 = vadd.f32 1.0, %v8237_v1 }
 0x258   : > { %v11317_v14 = vpop.f32.mrf.mxu0  ;;  %v11321_v23 = vpop.eup %8252  ;;  %2471 = vmatprep.mubr.bf16.mxu1 %v16147_v24  ;;  %2664 = vmatprep.mubr.bf16.mxu0 %v16147_v24  ;;  %8282 = vpow2.f32 %v7384_v7 }
 0x259   : > { %16254 = vst [vmem:[#allocation152_spill] sm:$0xff] %v11317_v14  ;;  %16255 = vst [vmem:[#allocation153_spill] sm:$0xff] %v11321_v23  ;;  %v8255_v50 = vpop.eup %8254  ;;  %v11325_v62 = vpop.f32.mrf.mxu1  ;;  %8284 = vpow2.f32 %v7385_v10 }
 0x25a   : > { %v11327_v17 = vpop.f32.mrf.mxu0  ;;  %v8257_v36 = vpop.eup %8256  ;;  %8286 = vrcp.f32 %v4436_v15 }
 0x25b   : > { %16256 = vst [vmem:[#allocation154_spill] sm:$0xff] %v11327_v17  ;;  %v8259_v14 = vpop.eup %8258  ;;  %v11329_v23 = vpop.f32.mrf.mxu1  ;;  %8288 = vrcp.f32 %v4438_v42  ;;  %v4465_v15 = vadd.f32 1.0, %v8257_v36  ;;  %v11345_v42 = vadd.f32 %v10912_v46, %v10657_v16  ;;  %v4451_v36 = vadd.f32 1.0, %v8255_v50 }
 0x25c   : > { %16257 = vst [vmem:[#allocation155_spill] sm:$0xff] %v11329_v23  ;;  %v11331_v2 = vpop.f32.mrf.mxu0  ;;  %v8261_v19 = vpop.eup %8260  ;;  %v4479_v21 = vadd.f32 1.0, %v8259_v14  ;;  %8290 = vrcp.f32 %v4437_v9  ;;  %v11359_v46 = vadd.f32 %v10948_v28, %v10657_v16 }
 0x25d   : > { %16258 = vst [vmem:[#allocation156_spill] sm:$0xff] %v11331_v2  ;;  %v8263_v53 = vpop.eup %8262  ;;  %v11333_v4 = vpop.f32.mrf.mxu1  ;;  %8292 = vrcp.f32 %v4439_v55  ;;  %v4478_v1 = vadd.f32 1.0, %v8261_v19  ;;  %16262 = vst [vmem:[#allocation160_spill] sm:$0xff] %v11345_v42  ;;  %v11353_v19 = vadd.f32 %v10932_v27, %v10663_v6  ;;  %v7398_v50 = vmul.f32 -1.442695, %v11345_v42  ;;  %v16274_v42 = vld [vmem:[#allocation75_spill] sm:$0xff] }
 0x25e   : > { %v11335_v45 = vpop.f32.mrf.mxu0  ;;  %v8265_v17 = vpop.eup %8264  ;;  %v4492_v52 = vadd.f32 1.0, %v8263_v53  ;;  %8294 = vrcp.f32 %v4479_v21  ;;  %16265 = vst [vmem:[#allocation163_spill] sm:$0xff] %v11359_v46 }
 0x25f   : > { %16259 = vst [vmem:[#allocation157_spill] sm:$0xff] %v11335_v45  ;;  %v8267_v7 = vpop.eup %8266  ;;  %v11337_v10 = vpop.f32.mrf.mxu1  ;;  %2472 = vmatmul.mubr.bf16.gmra.mxu1 %v10441_v11  ;;  %2665 = vmatmul.mubr.bf16.gmra.mxu0 %v10441_v11  ;;  %v4464_v53 = vadd.f32 1.0, %v8265_v17  ;;  %16263 = vst [vmem:[#allocation161_spill] sm:$0xff] %v11353_v19  ;;  %v16267_v17 = vld [vmem:[#allocation74_spill] sm:$0xff] }
 0x260   : > { %16260 = vst [vmem:[#allocation158_spill] sm:$0xff] %v11337_v10  ;;  %v11339_v23 = vpop.f32.mrf.mxu0  ;;  %v8269_v14 = vpop.eup %8268  ;;  %v4493_v9 = vadd.f32 1.0, %v8267_v7  ;;  %2481 = vmatprep.mubr.bf16.mxu1 %v16147_v24  ;;  %2674 = vmatprep.mubr.bf16.mxu0 %v16147_v24  ;;  %8296 = vrcp.f32 %v4492_v52  ;;  %v11367_v10 = vadd.f32 %v16267_v17, %v10663_v6 }
 0x261   : > { %16261 = vst [vmem:[#allocation159_spill] sm:$0xff] %v11339_v23  ;;  %v11349_v55 = vpop.eup %8270  ;;  %v11361_v21 = vpop.f32.mrf.mxu1  ;;  %v4450_v23 = vadd.f32 1.0, %v8269_v14  ;;  %v7412_v14 = vmul.f32 -1.442695, %v11359_v46  ;;  %v16276_v46 = vld [vmem:[#allocation76_spill] sm:$0xff] }
 0x262   : > { %v11355_v11 = vpop.eup %8272  ;;  %8298 = vrcp.f32 %v4493_v9  ;;  %16266 = vst [vmem:[#allocation164_spill] sm:$0xff] %v11361_v21  ;;  %16268 = vst [vmem:[#allocation74_spill] sm:$0xff] %v11367_v10  ;;  %v11369_v27 = vpop.f32.mrf.mxu0  ;;  %v7399_v9 = vmul.f32 -1.442695, %v11353_v19  ;;  %v7413_v17 = vmul.f32 -1.442695, %v11367_v10  ;;  %v11393_v10 = vadd.f32 %v16276_v46, %v10657_v16 }
 0x263   : > { %16264 = vst [vmem:[#allocation162_spill] sm:$0xff] %v11355_v11  ;;  %v11363_v7 = vpop.eup %8274  ;;  %8300 = vrcp.f32 %v4478_v1  ;;  %16269 = vst [vmem:[#allocation165_spill] sm:$0xff] %v11369_v27  ;;  %v11376_v1 = vpop.f32.mrf.mxu1 }
 0x264   : > { %v11371_v52 = vpop.eup %8276  ;;  %8302 = vrcp.f32 %v4465_v15  ;;  %16271 = vst [vmem:[#allocation167_spill] sm:$0xff] %v11376_v1  ;;  %v11379_v27 = vpop.f32.mrf.mxu0  ;;  %16277 = vst [vmem:[#allocation76_spill] sm:$0xff] %v11393_v10 }
 0x265   : > { %16270 = vst [vmem:[#allocation166_spill] sm:$0xff] %v11371_v52  ;;  %v8279_v28 = vpop.eup %8278  ;;  %8304 = vrcp.f32 %v4464_v53  ;;  %16272 = vst [vmem:[#allocation168_spill] sm:$0xff] %v11379_v27  ;;  %v16273_v52 = vld [vmem:[#allocation18_spill] sm:$0xff]  ;;  %v11401_v27 = vpop.f32.mrf.mxu1 }
 0x266   : > { %v8281_v11 = vpop.eup %8280  ;;  %8306 = vrcp.f32 %v4451_v36  ;;  %v4452_v53 = vadd.f32 1.0, %v8279_v28  ;;  %v11385_v36 = vadd.f32 %v16274_v42, %v10654_v34  ;;  %16281 = vst [vmem:[#allocation170_spill] sm:$0xff] %v11401_v27  ;;  %v11409_v46 = vpop.f32.mrf.mxu0 }
 0x267   : > { %v8283_v21 = vpop.eup %8282  ;;  %8308 = vrcp.f32 %v4450_v23  ;;  %2482 = vmatmul.mubr.bf16.gmra.mxu1 %v16273_v52  ;;  %2675 = vmatmul.mubr.bf16.gmra.mxu0 %v16273_v52  ;;  %v4453_v19 = vadd.f32 1.0, %v8281_v11  ;;  %v16282_v11 = vld [vmem:[#allocation78_spill] sm:$0xff]  ;;  %16284 = vst [vmem:[#allocation171_spill] sm:$0xff] %v11409_v46 }
 0x268   : > { %v8285_v15 = vpop.eup %8284  ;;  %8310 = vpow2.f32 %v7398_v50  ;;  %16275 = vst [vmem:[#allocation75_spill] sm:$0xff] %v11385_v36  ;;  %2491 = vmatprep.mubr.bf16.mxu1 %v16147_v24  ;;  %2684 = vmatprep.mubr.bf16.mxu0 %v16147_v24  ;;  %v4466_v28 = vadd.f32 1.0, %v8283_v21  ;;  %v16279_v50 = vld [vmem:[#allocation77_spill] sm:$0xff]  ;;  %v7424_v21 = vmul.f32 -1.442695, %v11385_v36  ;;  %v16294_v36 = vld [vmem:[#allocation19_spill] sm:$0xff] }
 0x269   : > { %v11389_v23 = vpop.eup %8286  ;;  %8312 = vpow2.f32 %v7399_v9  ;;  %v11399_v42 = vadd.f32 %v16279_v50, %v10660_v51  ;;  %v4467_v45 = vadd.f32 1.0, %v8285_v15  ;;  %v11407_v9 = vadd.f32 %v16282_v11, %v10663_v6 }
 0x26a   : > { %v11395_v52 = vpop.eup %8288  ;;  %8314 = vpow2.f32 %v7412_v14  ;;  %v16286_v14 = vld [vmem:[#allocation79_spill] sm:$0xff]  ;;  %v7426_v15 = vmul.f32 -1.442695, %v11393_v10  ;;  %v11433_v10 = vadd.f32 %v10987_v32, %v10663_v6 }
 0x26b   : > { %16278 = vst [vmem:[#allocation169_spill] sm:$0xff] %v11395_v52  ;;  %16280 = vst [vmem:[#allocation77_spill] sm:$0xff] %v11399_v42  ;;  %v11403_v1 = vpop.eup %8290  ;;  %8316 = vpow2.f32 %v7413_v17  ;;  %v11416_v50 = vadd.f32 %v16286_v14, %v10654_v34  ;;  %v16288_v17 = vld [vmem:[#allocation80_spill] sm:$0xff]  ;;  %v7425_v46 = vmul.f32 -1.442695, %v11399_v42 }
 0x26c   : > { %16283 = vst [vmem:[#allocation78_spill] sm:$0xff] %v11407_v9  ;;  %v11411_v2 = vpop.eup %8292  ;;  %8318 = vrcp.f32 %v4452_v53  ;;  %v11421_v27 = vadd.f32 %v16288_v17, %v10657_v16  ;;  %v11426_v53 = vadd.f32 %v10985_v49, %v10660_v51  ;;  %16292 = vst [vmem:[#allocation175_spill] sm:$0xff] %v11433_v10  ;;  %v11435_v17 = vpop.f32.mrf.mxu0 }
 0x26d   : > { %16285 = vst [vmem:[#allocation172_spill] sm:$0xff] %v11411_v2  ;;  %16287 = vst [vmem:[#allocation79_spill] sm:$0xff] %v11416_v50  ;;  %v8295_v52 = vpop.eup %8294  ;;  %8320 = vrcp.f32 %v4453_v19  ;;  %v11428_v2 = vpop.f32.mrf.mxu1  ;;  %v7427_v19 = vmul.f32 -1.442695, %v11407_v9  ;;  %v7438_v42 = vmul.f32 -1.442695, %v11416_v50 }
 0x26e   : > { %16289 = vst [vmem:[#allocation80_spill] sm:$0xff] %v11421_v27  ;;  %v8297_v11 = vpop.eup %8296  ;;  %8322 = vrcp.f32 %v4466_v28  ;;  %16290 = vst [vmem:[#allocation173_spill] sm:$0xff] %v11426_v53  ;;  %v5823_v50 = vmul.f32 %v8295_v52, %v11201_v59  ;;  %v11473_v59 = vpop.f32.mrf.mxu0 }
 0x26f   : > { %16291 = vst [vmem:[#allocation174_spill] sm:$0xff] %v11428_v2  ;;  %v8299_v14 = vpop.eup %8298  ;;  %8324 = vrcp.f32 %v4467_v45  ;;  %16293 = vst [vmem:[#allocation176_spill] sm:$0xff] %v11435_v17  ;;  %2492 = vmatmul.mubr.bf16.gmra.mxu1 %v16294_v36  ;;  %2685 = vmatmul.mubr.bf16.gmra.mxu0 %v16294_v36  ;;  %v11443_v45 = vadd.f32 %v10989_v3, %v10654_v34  ;;  %v5836_v9 = vmul.f32 %v8297_v11, %v11220_v61  ;;  %v7940_v3 = vld [vmem:[%s15751_s2 + $0x184] ss:$56 sps:$4 sm:$0xff]  }
 0x270   : > { %v8301_v28 = vpop.eup %8300  ;;  %v5837_v49 = vmul.f32 %v8299_v14, %v11236_v25  ;;  %8326 = vpow2.f32 %v7424_v21  ;;  %2501 = vmatprep.mubr.bf16.mxu1 %v16147_v24  ;;  %2694 = vmatprep.mubr.bf16.mxu0 %v16147_v24  ;;  %v7440_v36 = vmul.f32 -1.442695, %v11421_v27  ;;  %v11451_v25 = vadd.f32 %v10991_v30, %v10657_v16  ;;  %v7938_v21 = vld [vmem:[%s15751_s2 + $0x180] ss:$56 sps:$4 sm:$0xff]   ;;  %v11465_v30 = vpop.f32.mrf.mxu1 }
 0x271   : > { %16295 = vst [vmem:[#allocation177_spill] sm:$0xff] %v11443_v45  ;;  %v8303_v32 = vpop.eup %8302  ;;  %8328 = vpow2.f32 %v7426_v15  ;;  %v7439_v61 = vmul.f32 -1.442695, %v11426_v53  ;;  %v11463_v15 = vadd.f32 %v11007_v5, %v10660_v51  ;;  %v5822_v27 = vmul.f32 %v8301_v28, %v11207_v37  ;;  %2753 = vmatprep.subr.bf16.mxu1 %v7940_v3 }
 0x272   : > { %16296 = vst [vmem:[#allocation178_spill] sm:$0xff] %v11451_v25  ;;  %v8305_v14 = vpop.eup %8304  ;;  %8330 = vpow2.f32 %v7425_v46  ;;  %6076 = vmatprep.subr.mxu0 %v5837_v49  ;;  %v7441_v17 = vmul.f32 -1.442695, %v11433_v10  ;;  %v11471_v2 = vadd.f32 %v11009_v29, %v10663_v6  ;;  %v5809_v5 = vmul.f32 %v8303_v32, %v11191_v12  ;;  %2754 = vmatpush1.bf16.msra.mxu1 %v7938_v21  ;;  %v11481_v12 = vpop.f32.mrf.mxu1  ;;  %v16359_v10 = vld [vmem:[#allocation100_spill] sm:$0xff] }
 0x273   : > { %16297 = vst [vmem:[#allocation179_spill] sm:$0xff] %v11463_v15  ;;  %v8307_v11 = vpop.eup %8306  ;;  %8332 = vpow2.f32 %v7427_v19  ;;  %6077 = vmatpush1.msra.mxu0 %v5836_v9  ;;  %v7452_v46 = vmul.f32 -1.442695, %v11443_v45  ;;  %v5808_v19 = vmul.f32 %v8305_v14, %v11226_v60  ;;  %v7454_v28 = vmul.f32 -1.442695, %v11451_v25  ;;  %v11485_v60 = vpop.f32.mrf.mxu0 }
 0x274   : > { %16298 = vst [vmem:[#allocation180_spill] sm:$0xff] %v11471_v2  ;;  %v8309_v52 = vpop.eup %8308  ;;  %8334 = vpow2.f32 %v7438_v42  ;;  %6078 = vmatprep.subr.mxu0 %v5823_v50  ;;  %v5795_v9 = vmul.f32 %v8307_v11, %v11185_v26  ;;  %v7453_v49 = vmul.f32 -1.442695, %v11463_v15  ;;  %v7455_v32 = vmul.f32 -1.442695, %v11471_v2  ;;  %v16363_v2 = vld [vmem:[#allocation103_spill] sm:$0xff] }
 0x275   : > { %v8311_v37 = vpop.eup %8310  ;;  %8336 = vpow2.f32 %v7440_v36  ;;  %6079 = vmatpush1.msra.mxu0 %v5822_v27  ;;  %v5794_v50 = vmul.f32 %v8309_v52, %v11240_v18  ;;  %v16299_v36 = vld [vmem:[#allocation20_spill] sm:$0xff]  ;;  %v5781_v26 = vmul.f32 %v11403_v1, %v11144_v43  ;;  %v11492_v3 = vadd.f32 %v11023_v48, %v10654_v34  ;;  %v16450_v15 = vld [vmem:[#allocation9_spill] sm:$0xff] }
 0x276   : > { %v8313_v29 = vpop.eup %8312  ;;  %8338 = vpow2.f32 %v7439_v61  ;;  %6080 = vmatprep.subr.mxu0 %v5809_v5  ;;  %v4480_v21 = vadd.f32 1.0, %v8311_v37  ;;  %v11501_v61 = vadd.f32 %v11025_v56, %v10657_v16  ;;  %v5767_v48 = vmul.f32 %v11363_v7, %v11105_v40  ;;  %v11523_v7 = vpop.f32.mrf.mxu0 }
 0x277   : > { %v8315_v42 = vpop.eup %8314  ;;  %8340 = vpow2.f32 %v7441_v17  ;;  %6081 = vmatpush1.msra.mxu0 %v5808_v19  ;;  %2502 = vmatmul.mubr.bf16.gmra.mxu1 %v16299_v36  ;;  %16300 = vst [vmem:[#allocation181_spill] sm:$0xff] %v11492_v3  ;;  %v5780_v17 = vmul.f32 %v11389_v23, %v11124_v54  ;;  %v4481_v14 = vadd.f32 1.0, %v8313_v29  ;;  %v11510_v11 = vadd.f32 %v11039_v41, %v10660_v51  ;;  %v11512_v54 = vpop.f32.mrf.mxu1 }
 0x278   : > { %v8317_v27 = vpop.eup %8316  ;;  %8342 = vpow2.f32 %v7452_v46  ;;  %6082 = vmatprep.subr.mxu0 %v5795_v9  ;;  %2695 = vmatmul.mubr.bf16.gmra.mxu0 %v16299_v36  ;;  %16302 = vst [vmem:[#allocation183_spill] sm:$0xff] %v11501_v61  ;;  %v4494_v1 = vadd.f32 1.0, %v8315_v42  ;;  %v5766_v23 = vmul.f32 %v11349_v55, %v11089_v44  ;;  %v11521_v40 = vadd.f32 %v11041_v57, %v10663_v6  ;;  %v16308_v44 = vld [vmem:[#allocation89_spill] sm:$0xff] }
 0x279   : > { %v11495_v18 = vpop.eup %8318  ;;  %8344 = vpow2.f32 %v7454_v28  ;;  %6083 = vmatpush1.msra.mxu0 %v5794_v50  ;;  %2511 = vmatprep.mubr.bf16.mxu1 %v16147_v24  ;;  %16304 = vst [vmem:[#allocation185_spill] sm:$0xff] %v11510_v11  ;;  %v4495_v52 = vadd.f32 1.0, %v8317_v27  ;;  %v5753_v5 = vmul.f32 %v11312_v63, %v11046_v22  ;;  %v7466_v46 = vmul.f32 -1.442695, %v11492_v3  ;;  %v16309_v28 = vld [vmem:[#allocation85_spill] sm:$0xff]  ;;  %v11536_v63 = vpop.f32.mrf.mxu1 }
 0x27a   : > { %16301 = vst [vmem:[#allocation182_spill] sm:$0xff] %v11495_v18  ;;  %v11504_v43 = vpop.eup %8320  ;;  %8346 = vpow2.f32 %v7453_v49  ;;  %6084 = vmatprep.subr.mxu0 %v5781_v26  ;;  %2704 = vmatprep.mubr.bf16.mxu0 %v16147_v24  ;;  %16306 = vst [vmem:[#allocation187_spill] sm:$0xff] %v11521_v40  ;;  %v5752_v55 = vmul.f32 %v11302_v8, %v16308_v44  ;;  %v7468_v57 = vmul.f32 -1.442695, %v11501_v61  ;;  %v7467_v9 = vmul.f32 -1.442695, %v11510_v11  ;;  %v11541_v50 = vpop.f32.mrf.mxu0 }
 0x27b   : > { %16303 = vst [vmem:[#allocation184_spill] sm:$0xff] %v11504_v43  ;;  %v11515_v56 = vpop.eup %8322  ;;  %8348 = vpow2.f32 %v7455_v32  ;;  %6085 = vmatpush1.msra.mxu0 %v5780_v17  ;;  %v5739_v29 = vmul.f32 %v11289_v0, %v16309_v28  ;;  %16310 = vst [vmem:[#allocation89_spill] sm:$0xff] %v11536_v63  ;;  %v16311_v49 = vld [vmem:[#allocation81_spill] sm:$0xff]  ;;  %v7469_v8 = vmul.f32 -1.442695, %v11521_v40  ;;  %v16314_v0 = vld [vmem:[#allocation70_spill] sm:$0xff]  ;;  %v11636_v61 = vadd.f32 %v16363_v2, %v10660_v51 }
 0x27c   : > { %16305 = vst [vmem:[#allocation186_spill] sm:$0xff] %v11515_v56  ;;  %v11525_v41 = vpop.eup %8324  ;;  %8350 = vrcp.f32 %v4480_v21  ;;  %6086 = vmatprep.subr.mxu0 %v5767_v48  ;;  %v5738_v42 = vmul.f32 %v11267_v58, %v16311_v49  ;;  %16312 = vst [vmem:[#allocation85_spill] sm:$0xff] %v11541_v50  ;;  %v16313_v32 = vld [vmem:[#allocation21_spill] sm:$0xff]  ;;  %v5725_v26 = vmul.f32 %v11203_v47, %v16314_v0  ;;  %v11552_v47 = vpop.f32.mrf.mxu1  ;;  %v16323_v49 = vld [vmem:[#allocation50_spill] sm:$0xff] }
 0x27d   : > { %16307 = vst [vmem:[#allocation188_spill] sm:$0xff] %v11525_v41  ;;  %v8327_v37 = vpop.eup %8326  ;;  %8352 = vrcp.f32 %v4481_v14  ;;  %6087 = vmatpush1.msra.mxu0 %v5766_v23  ;;  %v16315_v14 = vld [vmem:[#allocation66_spill] sm:$0xff]  ;;  %16317 = vst [vmem:[#allocation81_spill] sm:$0xff] %v11552_v47  ;;  %v16466_v47 = vld [vmem:[#allocation143_spill] sm:$0xff] }
 0x27e   : > { %v8329_v19 = vpop.eup %8328  ;;  %8354 = vrcp.f32 %v4494_v1  ;;  %6088 = vmatprep.subr.mxu0 %v5753_v5  ;;  %v4506_v21 = vadd.f32 1.0, %v8327_v37  ;;  %v5724_v58 = vmul.f32 %v11187_v39, %v16315_v14  ;;  %v16316_v23 = vld [vmem:[#allocation58_spill] sm:$0xff] }
 0x27f   : > { %v8331_v22 = vpop.eup %8330  ;;  %8356 = vrcp.f32 %v4495_v52  ;;  %6089 = vmatpush1.msra.mxu0 %v5752_v55  ;;  %2512 = vmatmul.mubr.bf16.gmra.mxu1 %v16313_v32  ;;  %v4508_v48 = vadd.f32 1.0, %v8329_v19  ;;  %v5711_v52 = vmul.f32 %v11146_v38, %v16316_v23  ;;  %v16319_v39 = vld [vmem:[#allocation54_spill] sm:$0xff]  ;;  %v16320_v19 = vld [vmem:[#allocation52_spill] sm:$0xff] }
 0x280   : > { %v8333_v27 = vpop.eup %8332  ;;  %8358 = vpow2.f32 %v7466_v46  ;;  %6090 = vmatprep.subr.mxu0 %v5739_v29  ;;  %2705 = vmatmul.mubr.bf16.gmra.mxu0 %v16313_v32  ;;  %v4507_v5 = vadd.f32 1.0, %v8331_v22  ;;  %v11554_v46 = vpop.f32.mrf.mxu0  ;;  %v5710_v44 = vmul.f32 %v11128_v13, %v16319_v39  ;;  %v5697_v38 = vmul.f32 %v11107_v20, %v16320_v19  ;;  %v16325_v0 = vld [vmem:[#allocation98_spill] sm:$0xff]  ;;  %v16354_v32 = vld [vmem:[#allocation99_spill] sm:$0xff] }
 0x281   : > { %v8335_v17 = vpop.eup %8334  ;;  %8360 = vpow2.f32 %v7468_v57  ;;  %6091 = vmatpush1.msra.mxu0 %v5738_v42  ;;  %2521 = vmatprep.mubr.bf16.mxu1 %v16147_v24  ;;  %16318 = vst [vmem:[#allocation70_spill] sm:$0xff] %v11554_v46  ;;  %v4509_v55 = vadd.f32 1.0, %v8333_v27  ;;  %v11561_v29 = vpop.f32.mrf.mxu1  ;;  %v5696_v42 = vmul.f32 %v11091_v35, %v16323_v49  ;;  %v16324_v27 = vld [vmem:[#allocation48_spill] sm:$0xff]  ;;  %v16327_v14 = vld [vmem:[#allocation94_spill] sm:$0xff]  ;;  %v16462_v46 = vld [vmem:[#allocation139_spill] sm:$0xff] }
 0x282   : > { %v8337_v1 = vpop.eup %8336  ;;  %8362 = vpow2.f32 %v7467_v9  ;;  %6092 = vmatprep.subr.mxu0 %v5725_v26  ;;  %2714 = vmatprep.mubr.bf16.mxu0 %v16147_v24  ;;  %v4520_v28 = vadd.f32 1.0, %v8335_v17  ;;  %16321 = vst [vmem:[#allocation66_spill] sm:$0xff] %v11561_v29  ;;  %v11563_v9 = vpop.f32.mrf.mxu0  ;;  %v5683_v26 = vmul.f32 %v16325_v0, %v16324_v27  ;;  %v16326_v17 = vld [vmem:[#allocation46_spill] sm:$0xff]  ;;  %v16338_v0 = vld [vmem:[#allocation93_spill] sm:$0xff] }
 0x283   : > { %v8339_v37 = vpop.eup %8338  ;;  %8364 = vpow2.f32 %v7469_v8  ;;  %6093 = vmatpush1.msra.mxu0 %v5724_v58  ;;  %16322 = vst [vmem:[#allocation58_spill] sm:$0xff] %v11563_v9  ;;  %v4522_v13 = vadd.f32 1.0, %v8337_v1  ;;  %v5682_v58 = vmul.f32 %v16327_v14, %v16326_v17  ;;  %v16329_v35 = vld [vmem:[#allocation22_spill] sm:$0xff]  ;;  %v16330_v1 = vld [vmem:[#allocation44_spill] sm:$0xff]  ;;  %v16342_v17 = vld [vmem:[#allocation71_spill] sm:$0xff] }
 0x284   : > { %v8341_v57 = vpop.eup %8340  ;;  %8366 = vrcp.f32 %v4506_v21  ;;  %6094 = vmatprep.subr.mxu0 %v5711_v52  ;;  %v4521_v20 = vadd.f32 1.0, %v8339_v37  ;;  %v11571_v52 = vpop.f32.mrf.mxu1  ;;  %v16331_v39 = vld [vmem:[#allocation86_spill] sm:$0xff]  ;;  %16364 = vst [vmem:[#allocation71_spill] sm:$0xff] %v11636_v61 }
 0x285   : > { %v8343_v22 = vpop.eup %8342  ;;  %8368 = vrcp.f32 %v4508_v48  ;;  %6095 = vmatpush1.msra.mxu0 %v5710_v44  ;;  %v4523_v23 = vadd.f32 1.0, %v8341_v57  ;;  %16328 = vst [vmem:[#allocation54_spill] sm:$0xff] %v11571_v52  ;;  %v5669_v44 = vmul.f32 %v16331_v39, %v16330_v1  ;;  %v16336_v57 = vld [vmem:[#allocation42_spill] sm:$0xff]  ;;  %v16343_v39 = vld [vmem:[#allocation95_spill] sm:$0xff] }
 0x286   : > { %v8345_v8 = vpop.eup %8344  ;;  %8370 = vrcp.f32 %v4507_v5  ;;  %6096 = vmatprep.subr.mxu0 %v5697_v38  ;;  %v4534_v19 = vadd.f32 1.0, %v8343_v22  ;;  %v16332_v5 = vld [vmem:[#allocation92_spill] sm:$0xff]  ;;  %v11580_v38 = vpop.f32.mrf.mxu0  ;;  %v16337_v49 = vld [vmem:[#allocation82_spill] sm:$0xff] }
 0x287   : > { %v8347_v21 = vpop.eup %8346  ;;  %8372 = vrcp.f32 %v4509_v55  ;;  %6097 = vmatpush1.msra.mxu0 %v5696_v42  ;;  %2522 = vmatmul.mubr.bf16.gmra.mxu1 %v16329_v35  ;;  %v11578_v37 = vadd.f32 %v16332_v5, %v10654_v34  ;;  %16334 = vst [vmem:[#allocation50_spill] sm:$0xff] %v11580_v38  ;;  %v5668_v42 = vmul.f32 %v16337_v49, %v16336_v57  ;;  %v4536_v27 = vadd.f32 1.0, %v8345_v8  ;;  %v16346_v8 = vld [vmem:[#allocation38_spill] sm:$0xff] }
 0x288   : > { %v8349_v48 = vpop.eup %8348  ;;  %8374 = vrcp.f32 %v4520_v28  ;;  %6098 = vmatprep.subr.mxu0 %v5683_v26  ;;  %2715 = vmatmul.mubr.bf16.gmra.mxu0 %v16329_v35  ;;  %v11589_v28 = vadd.f32 %v16338_v0, %v10657_v16  ;;  %v16341_v26 = vld [vmem:[#allocation40_spill] sm:$0xff]  ;;  %v4535_v1 = vadd.f32 1.0, %v8347_v21  ;;  %v11598_v5 = vadd.f32 %v16343_v39, %v10660_v51 }
 0x289   : > { %16333 = vst [vmem:[#allocation52_spill] sm:$0xff] %v11578_v37  ;;  %v11583_v55 = vpop.eup %8350  ;;  %8376 = vrcp.f32 %v4522_v13  ;;  %6099 = vmatpush1.msra.mxu0 %v5682_v58  ;;  %2531 = vmatprep.mubr.bf16.mxu1 %v16147_v24  ;;  %v5655_v14 = vmul.f32 %v16342_v17, %v16341_v26  ;;  %v16347_v58 = vld [vmem:[#allocation67_spill] sm:$0xff]  ;;  %v4537_v49 = vadd.f32 1.0, %v8349_v48  ;;  %v16348_v0 = vld [vmem:[#allocation96_spill] sm:$0xff]  ;;  %v7480_v39 = vmul.f32 -1.442695, %v11578_v37 }
 0x28a   : > { %16335 = vst [vmem:[#allocation48_spill] sm:$0xff] %v11583_v55  ;;  %16339 = vst [vmem:[#allocation98_spill] sm:$0xff] %v11589_v28  ;;  %v11592_v22 = vpop.eup %8352  ;;  %8378 = vrcp.f32 %v4521_v20  ;;  %6100 = vmatprep.subr.mxu0 %v5669_v44  ;;  %2724 = vmatprep.mubr.bf16.mxu0 %v16147_v24  ;;  %v5654_v57 = vmul.f32 %v16347_v58, %v16346_v8  ;;  %v11607_v35 = vadd.f32 %v16348_v0, %v10663_v6  ;;  %v11609_v20 = vpop.f32.mrf.mxu1  ;;  %v16352_v26 = vld [vmem:[#allocation36_spill] sm:$0xff]  ;;  %v16357_v58 = vld [vmem:[#allocation34_spill] sm:$0xff] }
 0x28b   : > { %16340 = vst [vmem:[#allocation46_spill] sm:$0xff] %v11592_v22  ;;  %16344 = vst [vmem:[#allocation94_spill] sm:$0xff] %v11598_v5  ;;  %v11601_v13 = vpop.eup %8354  ;;  %8380 = vrcp.f32 %v4523_v23  ;;  %6101 = vmatpush1.msra.mxu0 %v5668_v42  ;;  %v16353_v44 = vld [vmem:[#allocation64_spill] sm:$0xff]  ;;  %v11618_v8 = vadd.f32 %v16354_v32, %v10654_v34  ;;  %v11620_v23 = vpop.f32.mrf.mxu0  ;;  %v16358_v42 = vld [vmem:[#allocation62_spill] sm:$0xff]  ;;  %v7482_v36 = vmul.f32 -1.442695, %v11589_v28 }
 0x28c   : > { %16345 = vst [vmem:[#allocation44_spill] sm:$0xff] %v11601_v13  ;;  %16349 = vst [vmem:[#allocation86_spill] sm:$0xff] %v11607_v35  ;;  %v11611_v21 = vpop.eup %8356  ;;  %v5641_v17 = vmul.f32 %v16353_v44, %v16352_v26  ;;  %8382 = vrcp.f32 %v4534_v19  ;;  %6102 = vmatprep.subr.mxu0 %v5655_v14  ;;  %v5640_v0 = vmul.f32 %v16358_v42, %v16357_v58  ;;  %v16361_v44 = vld [vmem:[#allocation32_spill] sm:$0xff]  ;;  %v16362_v32 = vld [vmem:[#allocation59_spill] sm:$0xff]  ;;  %v7481_v14 = vmul.f32 -1.442695, %v11598_v5 }
 0x28d   : > { %16350 = vst [vmem:[#allocation92_spill] sm:$0xff] %v11609_v20  ;;  %16351 = vst [vmem:[#allocation42_spill] sm:$0xff] %v11611_v21  ;;  %v8359_v48 = vpop.eup %8358  ;;  %8384 = vrcp.f32 %v4536_v27  ;;  %v11627_v26 = vadd.f32 %v16359_v10, %v10657_v16  ;;  %6103 = vmatpush1.msra.mxu0 %v5654_v57  ;;  %v5627_v25 = vmul.f32 %v16362_v32, %v16361_v44  ;;  %v16365_v58 = vld [vmem:[#allocation30_spill] sm:$0xff]  ;;  %v16366_v42 = vld [vmem:[#allocation55_spill] sm:$0xff]  ;;  %v7483_v10 = vmul.f32 -1.442695, %v11607_v35 }
 0x28e   : > { %16355 = vst [vmem:[#allocation82_spill] sm:$0xff] %v11618_v8  ;;  %16356 = vst [vmem:[#allocation93_spill] sm:$0xff] %v11620_v23  ;;  %v11629_v19 = vpop.eup %8360  ;;  %8386 = vrcp.f32 %v4535_v1  ;;  %6104 = vmatprep.subr.mxu0 %v5641_v17  ;;  %v5626_v40 = vmul.f32 %v16366_v42, %v16365_v58  ;;  %v16367_v57 = vld [vmem:[#allocation104_spill] sm:$0xff]  ;;  %v11645_v1 = vpop.f32.mrf.mxu1  ;;  %v16370_v44 = vld [vmem:[#allocation23_spill] sm:$0xff]  ;;  %v7494_v2 = vmul.f32 -1.442695, %v11618_v8 }
 0x28f   : > { %16360 = vst [vmem:[#allocation40_spill] sm:$0xff] %v11627_v26  ;;  %v8363_v27 = vpop.eup %8362  ;;  %8388 = vrcp.f32 %v4537_v49  ;;  %v11643_v28 = vadd.f32 %v16367_v57, %v10663_v6  ;;  %6105 = vmatpush1.msra.mxu0 %v5640_v0  ;;  %16369 = vst [vmem:[#allocation38_spill] sm:$0xff] %v11645_v1  ;;  %2532 = vmatmul.mubr.bf16.gmra.mxu1 %v16370_v44  ;;  %v16371_v17 = vld [vmem:[#allocation107_spill] sm:$0xff]  ;;  %v11653_v49 = vpop.f32.mrf.mxu0  ;;  %v7496_v0 = vmul.f32 -1.442695, %v11627_v26  ;;  %v16375_v42 = vld [vmem:[#allocation108_spill] sm:$0xff] }
 0x290   : > { %v8365_v32 = vpop.eup %8364  ;;  %8390 = vpow2.f32 %v7480_v39  ;;  %v11651_v18 = vadd.f32 %v16371_v17, %v10654_v34  ;;  %6106 = vmatprep.subr.mxu0 %v5627_v25  ;;  %16373 = vst [vmem:[#allocation96_spill] sm:$0xff] %v11653_v49  ;;  %2725 = vmatmul.mubr.bf16.gmra.mxu0 %v16370_v44  ;;  %v11661_v57 = vadd.f32 %v16375_v42, %v10657_v16  ;;  %v7941_v39 = vld [vmem:[%s15751_s2 + $0x110] ss:$56 sps:$4 sm:$0xff]   ;;  %v7943_v25 = vld [vmem:[%s15751_s2 + $0x114] ss:$56 sps:$4 sm:$0xff]   ;;  %v16378_v44 = vld [vmem:[#allocation111_spill] sm:$0xff] }
 0x291   : > { %16368 = vst [vmem:[#allocation95_spill] sm:$0xff] %v11643_v28  ;;  %v11656_v58 = vpop.eup %8366  ;;  %8392 = vpow2.f32 %v7482_v36  ;;  %6107 = vmatpush1.msra.mxu0 %v5626_v40  ;;  %2541 = vmatprep.mubr.bf16.mxu1 %v16147_v24  ;;  %v7495_v36 = vmul.f32 -1.442695, %v11636_v61  ;;  %v11675_v42 = vadd.f32 %v16378_v44, %v10660_v51  ;;  %v7497_v35 = vmul.f32 -1.442695, %v11643_v28  ;;  %v16380_v26 = vld [vmem:[#allocation112_spill] sm:$0xff]  ;;  %v11690_v56 = vpop.f32.mrf.mxu0 }
 0x292   : > { %16372 = vst [vmem:[#allocation67_spill] sm:$0xff] %v11651_v18  ;;  %16374 = vst [vmem:[#allocation36_spill] sm:$0xff] %v11656_v58  ;;  %v11670_v17 = vpop.eup %8368  ;;  %8394 = vpow2.f32 %v7481_v14  ;;  %2734 = vmatprep.mubr.bf16.mxu0 %v16147_v24  ;;  %v11683_v43 = vadd.f32 %v16380_v26, %v10663_v6  ;;  %2755 = vmatprep.subr.bf16.mxu1 %v7943_v25  ;;  %v7508_v44 = vmul.f32 -1.442695, %v11651_v18  ;;  %v16399_v55 = vld [vmem:[#allocation119_spill] sm:$0xff]  ;;  %v16517_v61 = vld [vmem:[#allocation14_spill] sm:$0xff] }
 0x293   : > { %16376 = vst [vmem:[#allocation64_spill] sm:$0xff] %v11661_v57  ;;  %16377 = vst [vmem:[#allocation99_spill] sm:$0xff] %v11670_v17  ;;  %v11678_v40 = vpop.eup %8370  ;;  %8396 = vpow2.f32 %v7483_v10  ;;  %v11685_v17 = vpop.f32.mrf.mxu1  ;;  %2756 = vmatpush1.bf16.msra.mxu1 %v7941_v39  ;;  %v7510_v10 = vmul.f32 -1.442695, %v11661_v57  ;;  %v7509_v26 = vmul.f32 -1.442695, %v11675_v42 }
 0x294   : > { %16379 = vst [vmem:[#allocation34_spill] sm:$0xff] %v11678_v40  ;;  %16381 = vst [vmem:[#allocation62_spill] sm:$0xff] %v11683_v43  ;;  %v11687_v14 = vpop.eup %8372  ;;  %8398 = vpow2.f32 %v7494_v2  ;;  %v7511_v2 = vmul.f32 -1.442695, %v11683_v43  ;;  %v16389_v39 = vld [vmem:[#allocation24_spill] sm:$0xff] }
 0x295   : > { %16382 = vst [vmem:[#allocation100_spill] sm:$0xff] %v11685_v17  ;;  %16383 = vst [vmem:[#allocation32_spill] sm:$0xff] %v11687_v14  ;;  %v11692_v41 = vpop.eup %8374  ;;  %8400 = vpow2.f32 %v7496_v0  ;;  %v11701_v14 = vpop.f32.mrf.mxu1  ;;  %v4548_v17 = vadd.f32 1.0, %v8359_v48  ;;  %v16391_v0 = vld [vmem:[#allocation115_spill] sm:$0xff]  ;;  %v16394_v43 = vld [vmem:[#allocation116_spill] sm:$0xff] }
 0x296   : > { %16384 = vst [vmem:[#allocation59_spill] sm:$0xff] %v11690_v56  ;;  %16385 = vst [vmem:[#allocation103_spill] sm:$0xff] %v11692_v41  ;;  %v11695_v28 = vpop.eup %8376  ;;  %8402 = vpow2.f32 %v7495_v36  ;;  %v11708_v57 = vadd.f32 %v16391_v0, %v10654_v34  ;;  %v11710_v36 = vpop.f32.mrf.mxu0  ;;  %v16397_v0 = vld [vmem:[#allocation118_spill] sm:$0xff] }
 0x297   : > { %16386 = vst [vmem:[#allocation30_spill] sm:$0xff] %v11695_v28  ;;  %v11698_v25 = vpop.eup %8378  ;;  %8404 = vpow2.f32 %v7497_v35  ;;  %16388 = vst [vmem:[#allocation104_spill] sm:$0xff] %v11701_v14  ;;  %2542 = vmatmul.mubr.bf16.gmra.mxu1 %v16389_v39  ;;  %v4550_v28 = vadd.f32 1.0, %v11629_v19  ;;  %v4551_v14 = vadd.f32 1.0, %v8365_v32  ;;  %v11731_v19 = vadd.f32 %v16399_v55, %v10663_v6  ;;  %v11738_v22 = vpop.f32.mrf.mxu1 }
 0x298   : > { %16387 = vst [vmem:[#allocation55_spill] sm:$0xff] %v11698_v25  ;;  %v11704_v56 = vpop.eup %8380  ;;  %8406 = vpow2.f32 %v7508_v44  ;;  %16392 = vst [vmem:[#allocation108_spill] sm:$0xff] %v11710_v36  ;;  %2735 = vmatmul.mubr.bf16.gmra.mxu0 %v16389_v39  ;;  %2777 = vmatprep.mubr.bf16.mxu1 %v16147_v24  ;;  %v4549_v44 = vadd.f32 1.0, %v8363_v27  ;;  %v11725_v36 = vadd.f32 %v16397_v0, %v10660_v51 }
 0x299   : > { %16390 = vst [vmem:[#allocation107_spill] sm:$0xff] %v11704_v56  ;;  %v11714_v35 = vpop.eup %8382  ;;  %8408 = vpow2.f32 %v7510_v10  ;;  %v11719_v56 = vadd.f32 %v16394_v43, %v10657_v16  ;;  %16400 = vst [vmem:[#allocation118_spill] sm:$0xff] %v11731_v19  ;;  %v7522_v43 = vmul.f32 -1.442695, %v11708_v57  ;;  %v7525_v55 = vmul.f32 -1.442695, %v11731_v19 }
 0x29a   : > { %16393 = vst [vmem:[#allocation111_spill] sm:$0xff] %v11714_v35  ;;  %v11721_v48 = vpop.eup %8384  ;;  %8410 = vpow2.f32 %v7509_v26  ;;  %v7523_v0 = vmul.f32 -1.442695, %v11725_v36  ;;  %16402 = vst [vmem:[#allocation189_spill] sm:$0xff] %v11738_v22 }
 0x29b   : > { %16395 = vst [vmem:[#allocation112_spill] sm:$0xff] %v11719_v56  ;;  %16396 = vst [vmem:[#allocation115_spill] sm:$0xff] %v11721_v48  ;;  %v11727_v39 = vpop.eup %8386  ;;  %8412 = vpow2.f32 %v7511_v2  ;;  %v7524_v27 = vmul.f32 -1.442695, %v11719_v56  ;;  %v11741_v56 = vpop.f32.mrf.mxu1 }
 0x29c   : > { %16398 = vst [vmem:[#allocation116_spill] sm:$0xff] %v11727_v39  ;;  %v11733_v10 = vpop.eup %8388  ;;  %8414 = vrcp.f32 %v4548_v17  ;;  %16403 = vst [vmem:[#allocation190_spill] sm:$0xff] %v11741_v56 }
 0x29d   : > { %16401 = vst [vmem:[#allocation119_spill] sm:$0xff] %v11733_v10  ;;  %v8391_v48 = vpop.eup %8390  ;;  %8416 = vrcp.f32 %v4550_v28 }
 0x29e   : > { %v8393_v26 = vpop.eup %8392  ;;  %8418 = vrcp.f32 %v4549_v44  ;;  %v4562_v13 = vadd.f32 1.0, %v8391_v48 }
 0x29f   : > { %v8395_v32 = vpop.eup %8394  ;;  %8420 = vrcp.f32 %v4551_v14  ;;  %v4564_v10 = vadd.f32 1.0, %v8393_v26 }
 0x2a0   : > { %v8397_v2 = vpop.eup %8396  ;;  %8422 = vpow2.f32 %v7522_v43  ;;  %v4563_v28 = vadd.f32 1.0, %v8395_v32  ;;  %v7946_v43 = vld [vmem:[%s15751_s2 + $0xa4] ss:$56 sps:$4 sm:$0xff]  }
 0x2a1   : > { %v8399_v17 = vpop.eup %8398  ;;  %8424 = vpow2.f32 %v7524_v27  ;;  %v4565_v21 = vadd.f32 1.0, %v8397_v2  ;;  %v11746_v27 = vpop.f32.mrf.mxu1  ;;  %2757 = vmatprep.subr.bf16.mxu1 %v7946_v43 }
 0x2a2   : > { %v8401_v49 = vpop.eup %8400  ;;  %8426 = vpow2.f32 %v7523_v0  ;;  %v4576_v22 = vadd.f32 1.0, %v8399_v17  ;;  %16404 = vst [vmem:[#allocation191_spill] sm:$0xff] %v11746_v27 }
 0x2a3   : > { %v8403_v44 = vpop.eup %8402  ;;  %8428 = vpow2.f32 %v7525_v55  ;;  %v4578_v19 = vadd.f32 1.0, %v8401_v49  ;;  %v16405_v49 = vld [vmem:[#allocation120_spill] sm:$0xff] }
 0x2a4   : > { %v8405_v1 = vpop.eup %8404  ;;  %8430 = vrcp.f32 %v4562_v13  ;;  %v4577_v48 = vadd.f32 1.0, %v8403_v44  ;;  %v7944_v13 = vld [vmem:[%s15751_s2 + $0xa0] ss:$56 sps:$4 sm:$0xff]   ;;  %v11753_v55 = vadd.f32 %v16405_v49, %v10654_v34  ;;  %v11767_v49 = vpop.f32.mrf.mxu1 }
 0x2a5   : > { %v8407_v14 = vpop.eup %8406  ;;  %8432 = vrcp.f32 %v4564_v10  ;;  %v4579_v0 = vadd.f32 1.0, %v8405_v1  ;;  %2758 = vmatpush1.bf16.msra.mxu1 %v7944_v13 }
 0x2a6   : > { %v8409_v58 = vpop.eup %8408  ;;  %8434 = vrcp.f32 %v4563_v28  ;;  %v4590_v10 = vadd.f32 1.0, %v8407_v14  ;;  %v16407_v28 = vld [vmem:[#allocation121_spill] sm:$0xff]  ;;  %v11792_v56 = vpop.f32.mrf.mxu1 }
 0x2a7   : > { %v8411_v26 = vpop.eup %8410  ;;  %8436 = vrcp.f32 %v4565_v21  ;;  %v4592_v17 = vadd.f32 1.0, %v8409_v58  ;;  %v11759_v21 = vadd.f32 %v16407_v28, %v10657_v16  ;;  %v16413_v58 = vld [vmem:[#allocation123_spill] sm:$0xff] }
 0x2a8   : > { %v8413_v32 = vpop.eup %8412  ;;  %8438 = vrcp.f32 %v4576_v22  ;;  %v4591_v44 = vadd.f32 1.0, %v8411_v26  ;;  %v16410_v22 = vld [vmem:[#allocation122_spill] sm:$0xff]  ;;  %v11773_v27 = vadd.f32 %v16413_v58, %v10663_v6  ;;  %v16416_v26 = vld [vmem:[#allocation124_spill] sm:$0xff] }
 0x2a9   : > { %v11755_v2 = vpop.eup %8414  ;;  %8440 = vrcp.f32 %v4578_v19  ;;  %16408 = vst [vmem:[#allocation121_spill] sm:$0xff] %v11759_v21  ;;  %v11765_v14 = vadd.f32 %v16410_v22, %v10660_v51  ;;  %16411 = vst [vmem:[#allocation122_spill] sm:$0xff] %v11767_v49  ;;  %v4593_v19 = vadd.f32 1.0, %v8413_v32  ;;  %v11780_v13 = vadd.f32 %v16416_v26, %v10654_v34 }
 0x2aa   : > { %16406 = vst [vmem:[#allocation120_spill] sm:$0xff] %v11755_v2  ;;  %v11761_v1 = vpop.eup %8416  ;;  %8442 = vrcp.f32 %v4577_v48  ;;  %16414 = vst [vmem:[#allocation123_spill] sm:$0xff] %v11773_v27  ;;  %v7536_v48 = vmul.f32 -1.442695, %v11753_v55 }
 0x2ab   : > { %16409 = vst [vmem:[#allocation192_spill] sm:$0xff] %v11761_v1  ;;  %v11769_v43 = vpop.eup %8418  ;;  %8444 = vrcp.f32 %v4579_v0  ;;  %v7538_v1 = vmul.f32 -1.442695, %v11759_v21  ;;  %v16417_v0 = vld [vmem:[#allocation125_spill] sm:$0xff]  ;;  %v7537_v58 = vmul.f32 -1.442695, %v11765_v14 }
 0x2ac   : > { %16412 = vst [vmem:[#allocation193_spill] sm:$0xff] %v11769_v43  ;;  %v11775_v28 = vpop.eup %8420  ;;  %8446 = vrcp.f32 %v4590_v10  ;;  %v11785_v32 = vadd.f32 %v16417_v0, %v10657_v16  ;;  %v16419_v10 = vld [vmem:[#allocation126_spill] sm:$0xff]  ;;  %16420 = vst [vmem:[#allocation125_spill] sm:$0xff] %v11792_v56  ;;  %v16421_v21 = vld [vmem:[#allocation127_spill] sm:$0xff]  ;;  %v11806_v56 = vpop.f32.mrf.mxu1 }
 0x2ad   : > { %16415 = vst [vmem:[#allocation194_spill] sm:$0xff] %v11775_v28  ;;  %v8423_v22 = vpop.eup %8422  ;;  %8448 = vrcp.f32 %v4592_v17  ;;  %v11790_v28 = vadd.f32 %v16419_v10, %v10660_v51  ;;  %v7539_v17 = vmul.f32 -1.442695, %v11773_v27  ;;  %v11797_v23 = vadd.f32 %v16421_v21, %v10663_v6  ;;  %16425 = vst [vmem:[#allocation196_spill] sm:$0xff] %v11806_v56 }
 0x2ae   : > { %16418 = vst [vmem:[#allocation124_spill] sm:$0xff] %v11785_v32  ;;  %v8425_v49 = vpop.eup %8424  ;;  %8450 = vrcp.f32 %v4591_v44  ;;  %v7550_v44 = vmul.f32 -1.442695, %v11780_v13  ;;  %v7552_v10 = vmul.f32 -1.442695, %v11785_v32  ;;  %v4604_v41 = vadd.f32 1.0, %v8423_v22 }
 0x2af   : > { %v8427_v26 = vpop.eup %8426  ;;  %8452 = vrcp.f32 %v4593_v19  ;;  %16422 = vst [vmem:[#allocation126_spill] sm:$0xff] %v11797_v23  ;;  %v7551_v19 = vmul.f32 -1.442695, %v11790_v28  ;;  %v7553_v21 = vmul.f32 -1.442695, %v11797_v23 }
 0x2b0   : > { %v8429_v0 = vpop.eup %8428  ;;  %8454 = vpow2.f32 %v7536_v48 }
 0x2b1   : > { %v11800_v40 = vpop.eup %8430  ;;  %8456 = vpow2.f32 %v7538_v1  ;;  %v16428_v1 = vld [vmem:[#allocation129_spill] sm:$0xff]  ;;  %v4607_v23 = vadd.f32 1.0, %v8429_v0  ;;  %v16441_v0 = vld [vmem:[#allocation135_spill] sm:$0xff] }
 0x2b2   : > { %16423 = vst [vmem:[#allocation127_spill] sm:$0xff] %v11800_v40  ;;  %v11803_v20 = vpop.eup %8432  ;;  %8458 = vpow2.f32 %v7537_v58  ;;  %v11815_v38 = vadd.f32 %v16428_v1, %v10654_v34  ;;  %v4606_v58 = vadd.f32 1.0, %v8425_v49  ;;  %v16436_v49 = vld [vmem:[#allocation133_spill] sm:$0xff]  ;;  %v11958_v40 = vadd.f32 %v16466_v47, %v10663_v6 }
 0x2b3   : > { %16424 = vst [vmem:[#allocation195_spill] sm:$0xff] %v11803_v20  ;;  %v11808_v27 = vpop.eup %8434  ;;  %8460 = vpow2.f32 %v7539_v17  ;;  %v16430_v20 = vld [vmem:[#allocation130_spill] sm:$0xff]  ;;  %v4605_v17 = vadd.f32 1.0, %v8427_v26 }
 0x2b4   : > { %16426 = vst [vmem:[#allocation197_spill] sm:$0xff] %v11808_v27  ;;  %v11811_v48 = vpop.eup %8436  ;;  %8462 = vpow2.f32 %v7550_v44  ;;  %v11821_v56 = vadd.f32 %v16430_v20, %v10657_v16  ;;  %v11829_v44 = vpop.f32.mrf.mxu1  ;;  %v7564_v26 = vmul.f32 -1.442695, %v11815_v38  ;;  %16467 = vst [vmem:[#allocation139_spill] sm:$0xff] %v11958_v40 }
 0x2b5   : > { %16427 = vst [vmem:[#allocation198_spill] sm:$0xff] %v11811_v48  ;;  %v11817_v32 = vpop.eup %8438  ;;  %8464 = vpow2.f32 %v7552_v10  ;;  %v16433_v48 = vld [vmem:[#allocation132_spill] sm:$0xff]  ;;  %v11835_v10 = vadd.f32 %v16436_v49, %v10663_v6 }
 0x2b6   : > { %16429 = vst [vmem:[#allocation129_spill] sm:$0xff] %v11817_v32  ;;  %16431 = vst [vmem:[#allocation130_spill] sm:$0xff] %v11821_v56  ;;  %v11823_v25 = vpop.eup %8440  ;;  %8466 = vpow2.f32 %v7551_v19  ;;  %v11827_v22 = vadd.f32 %v16433_v48, %v10660_v51  ;;  %v16439_v19 = vld [vmem:[#allocation134_spill] sm:$0xff]  ;;  %v16507_v32 = vld [vmem:[#allocation165_spill] sm:$0xff] }
 0x2b7   : > { %16432 = vst [vmem:[#allocation199_spill] sm:$0xff] %v11823_v25  ;;  %16434 = vst [vmem:[#allocation132_spill] sm:$0xff] %v11829_v44  ;;  %v11831_v1 = vpop.eup %8442  ;;  %8468 = vpow2.f32 %v7553_v21  ;;  %v11842_v25 = vadd.f32 %v16439_v19, %v10654_v34  ;;  %v7566_v44 = vmul.f32 -1.442695, %v11821_v56  ;;  %v11849_v21 = vadd.f32 %v16441_v0, %v10657_v16  ;;  %v11858_v19 = vpop.f32.mrf.mxu1 }
 0x2b8   : > { %16435 = vst [vmem:[#allocation200_spill] sm:$0xff] %v11831_v1  ;;  %16437 = vst [vmem:[#allocation133_spill] sm:$0xff] %v11835_v10  ;;  %v11837_v20 = vpop.eup %8444  ;;  %8470 = vrcp.f32 %v4604_v41  ;;  %v7565_v41 = vmul.f32 -1.442695, %v11827_v22  ;;  %v7567_v0 = vmul.f32 -1.442695, %v11835_v10 }
 0x2b9   : > { %16438 = vst [vmem:[#allocation201_spill] sm:$0xff] %v11837_v20  ;;  %v11844_v48 = vpop.eup %8446  ;;  %8472 = vrcp.f32 %v4606_v58  ;;  %16442 = vst [vmem:[#allocation135_spill] sm:$0xff] %v11849_v21  ;;  %v16444_v20 = vld [vmem:[#allocation136_spill] sm:$0xff]  ;;  %v7949_v58 = vld [vmem:[%s15751_s2 + $0x34] ss:$56 sps:$4 sm:$0xff]   ;;  %v11878_v45 = vpop.f32.mrf.mxu1 }
 0x2ba   : > { %16440 = vst [vmem:[#allocation134_spill] sm:$0xff] %v11844_v48  ;;  %v11851_v49 = vpop.eup %8448  ;;  %8474 = vrcp.f32 %v4605_v17  ;;  %v11856_v53 = vadd.f32 %v16444_v20, %v10660_v51  ;;  %16445 = vst [vmem:[#allocation136_spill] sm:$0xff] %v11858_v19  ;;  %v7947_v20 = vld [vmem:[%s15751_s2 + $0x30] ss:$56 sps:$4 sm:$0xff]   ;;  %v7578_v19 = vmul.f32 -1.442695, %v11842_v25  ;;  %2759 = vmatprep.subr.bf16.mxu1 %v7949_v58 }
 0x2bb   : > { %16443 = vst [vmem:[#allocation202_spill] sm:$0xff] %v11851_v49  ;;  %v11863_v56 = vpop.eup %8450  ;;  %8476 = vrcp.f32 %v4607_v23  ;;  %v16446_v49 = vld [vmem:[#allocation137_spill] sm:$0xff]  ;;  %v7580_v23 = vmul.f32 -1.442695, %v11849_v21  ;;  %2760 = vmatpush1.bf16.msra.mxu1 %v7947_v20  ;;  %16449 = vst [vmem:[#allocation204_spill] sm:$0xff] %v11878_v45  ;;  %v11883_v21 = vpop.f32.mrf.mxu1 }
 0x2bc   : > { %v11868_v17 = vadd.f32 %v16446_v49, %v10663_v6  ;;  %v11873_v52 = vpop.eup %8452  ;;  %8478 = vpow2.f32 %v7564_v26  ;;  %v7579_v49 = vmul.f32 -1.442695, %v11856_v53  ;;  %16451 = vst [vmem:[#allocation9_spill] sm:$0xff] %v11883_v21 }
 0x2bd   : > { %16448 = vst [vmem:[#allocation203_spill] sm:$0xff] %v11873_v52  ;;  %v8455_v35 = vpop.eup %8454  ;;  %8480 = vpow2.f32 %v7566_v44 }
 0x2be   : > { %16447 = vst [vmem:[#allocation137_spill] sm:$0xff] %v11868_v17  ;;  %v8457_v10 = vpop.eup %8456  ;;  %8482 = vpow2.f32 %v7565_v41  ;;  %v7581_v39 = vmul.f32 -1.442695, %v11868_v17  ;;  %v4618_v26 = vadd.f32 1.0, %v8455_v35  ;;  %2778 = vmatmul.mubr.bf16.vlgmr.msra.gmra.mxu1 %v16450_v15  ;;  %v16452_v35 = vld [vmem:[#allocation142_spill] sm:$0xff]  ;;  %v11889_v15 = vpop.f32.mrf.mxu1 }
 0x2bf   : > { %v8459_v9 = vpop.eup %8458  ;;  %8484 = vpow2.f32 %v7567_v0  ;;  %v4620_v44 = vadd.f32 1.0, %v8457_v10  ;;  %2787 = vmatprep.mubr.bf16.mxu1 %v16147_v24  ;;  %16453 = vst [vmem:[#allocation142_spill] sm:$0xff] %v11889_v15 }
 0x2c0   : > { %v8461_v52 = vpop.eup %8460  ;;  %8486 = vpow2.f32 %v7578_v19  ;;  %v4619_v41 = vadd.f32 1.0, %v8459_v9  ;;  %v11887_v19 = vadd.f32 %v16452_v35, %v10660_v51  ;;  %v11895_v9 = vadd.f32 %v11305_v33, %v10660_v51  ;;  %v11916_v35 = vpop.f32.mrf.mxu1 }
 0x2c1   : > { %v8463_v58 = vpop.eup %8462  ;;  %8488 = vpow2.f32 %v7580_v23  ;;  %v4621_v29 = vadd.f32 1.0, %v8461_v52 }
 0x2c2   : > { %v8465_v20 = vpop.eup %8464  ;;  %8490 = vpow2.f32 %v7579_v49  ;;  %v4632_v17 = vadd.f32 1.0, %v8463_v58  ;;  %v7593_v33 = vmul.f32 -1.442695, %v11887_v19  ;;  %v11936_v2 = vpop.f32.mrf.mxu1 }
 0x2c3   : > { %v8467_v45 = vpop.eup %8466  ;;  %8492 = vpow2.f32 %v7581_v39  ;;  %v4634_v23 = vadd.f32 1.0, %v8465_v20  ;;  %v11901_v39 = vadd.f32 %v11325_v62, %v10660_v51  ;;  %v16458_v62 = vld [vmem:[#allocation10_spill] sm:$0xff] }
 0x2c4   : > { %v8469_v0 = vpop.eup %8468  ;;  %8494 = vrcp.f32 %v4618_v26  ;;  %v4633_v52 = vadd.f32 1.0, %v8467_v45  ;;  %16461 = vst [vmem:[#allocation10_spill] sm:$0xff] %v11936_v2  ;;  %v11949_v2 = vadd.f32 %v16462_v46, %v10657_v16  ;;  %v11951_v43 = vpop.f32.mrf.mxu1  ;;  %v16469_v46 = vld [vmem:[#allocation148_spill] sm:$0xff] }
 0x2c5   : > { %v11891_v10 = vpop.eup %8470  ;;  %8496 = vrcp.f32 %v4620_v44  ;;  %v4635_v58 = vadd.f32 1.0, %v8469_v0  ;;  %v11907_v44 = vadd.f32 %v11315_v31, %v10654_v34  ;;  %v7607_v31 = vmul.f32 -1.442695, %v11895_v9 }
 0x2c6   : > { %v11897_v49 = vpop.eup %8472  ;;  %8498 = vrcp.f32 %v4619_v41  ;;  %v16456_v41 = vld [vmem:[#allocation155_spill] sm:$0xff]  ;;  %2788 = vmatmul.mubr.bf16.gmra.mxu1 %v16458_v62  ;;  %v7621_v15 = vmul.f32 -1.442695, %v11901_v39 }
 0x2c7   : > { %16454 = vst [vmem:[#allocation205_spill] sm:$0xff] %v11897_v49  ;;  %v11903_v26 = vpop.eup %8474  ;;  %8500 = vrcp.f32 %v4621_v29  ;;  %v11914_v45 = vadd.f32 %v16456_v41, %v10654_v34  ;;  %16457 = vst [vmem:[#allocation155_spill] sm:$0xff] %v11916_v35  ;;  %v16459_v29 = vld [vmem:[#allocation147_spill] sm:$0xff]  ;;  %2797 = vmatprep.mubr.bf16.mxu1 %v16147_v24  ;;  %v11928_v41 = vadd.f32 %v11333_v4, %v10660_v51 }
 0x2c8   : > { %v11909_v20 = vpop.eup %8476  ;;  %8502 = vrcp.f32 %v4632_v17  ;;  %v11921_v0 = vadd.f32 %v16459_v29, %v10654_v34  ;;  %v7620_v29 = vmul.f32 -1.442695, %v11907_v44  ;;  %16463 = vst [vmem:[#allocation147_spill] sm:$0xff] %v11949_v2 }
 0x2c9   : > { %16455 = vst [vmem:[#allocation206_spill] sm:$0xff] %v11909_v20  ;;  %v8479_v49 = vpop.eup %8478  ;;  %8504 = vrcp.f32 %v4634_v23  ;;  %v16460_v23 = vld [vmem:[#allocation138_spill] sm:$0xff]  ;;  %v7634_v21 = vmul.f32 -1.442695, %v11914_v45  ;;  %v7635_v4 = vmul.f32 -1.442695, %v11928_v41 }
 0x2ca   : > { %v8481_v17 = vpop.eup %8480  ;;  %8506 = vrcp.f32 %v4633_v52  ;;  %v11932_v62 = vadd.f32 %v16460_v23, %v10654_v34  ;;  %v7606_v3 = vmul.f32 -1.442695, %v11921_v0  ;;  %16464 = vst [vmem:[#allocation138_spill] sm:$0xff] %v11951_v43 }
 0x2cb   : > { %v8483_v35 = vpop.eup %8482  ;;  %8508 = vrcp.f32 %v4635_v58 }
 0x2cc   : > { %v8485_v20 = vpop.eup %8484  ;;  %8510 = vpow2.f32 %v7593_v33  ;;  %v7592_v58 = vmul.f32 -1.442695, %v11932_v62  ;;  %v4646_v33 = vadd.f32 1.0, %v8479_v49 }
 0x2cd   : > { %v11938_v52 = vpop.eup %8486  ;;  %8512 = vpow2.f32 %v7607_v31  ;;  %v16465_v31 = vld [vmem:[#allocation11_spill] sm:$0xff] }
 0x2ce   : > { %v11941_v51 = vpop.eup %8488  ;;  %8514 = vpow2.f32 %v7621_v15  ;;  %2798 = vmatmul.mubr.bf16.gmra.mxu1 %v16465_v31  ;;  %v4648_v15 = vadd.f32 1.0, %v8481_v17  ;;  %v4649_v31 = vadd.f32 1.0, %v8485_v20  ;;  %v16471_v17 = vld [vmem:[#allocation150_spill] sm:$0xff] }
 0x2cf   : > { %v8491_v34 = vpop.eup %8490  ;;  %8516 = vpow2.f32 %v7620_v29  ;;  %2807 = vmatprep.mubr.bf16.mxu1 %v16147_v24  ;;  %v4647_v29 = vadd.f32 1.0, %v8483_v35  ;;  %v11971_v37 = vadd.f32 %v16471_v17, %v10663_v6 }
 0x2d0   : > { %v11945_v23 = vpop.eup %8492  ;;  %8518 = vpow2.f32 %v7634_v21  ;;  %v11965_v21 = vadd.f32 %v16469_v46, %v10657_v16  ;;  %v16475_v46 = vld [vmem:[#allocation152_spill] sm:$0xff]  ;;  %v4661_v50 = vadd.f32 1.0, %v8491_v34 }
 0x2d1   : > { %v11954_v11 = vpop.eup %8494  ;;  %8520 = vpow2.f32 %v7606_v3  ;;  %16472 = vst [vmem:[#allocation148_spill] sm:$0xff] %v11971_v37  ;;  %v7594_v3 = vmul.f32 -1.442695, %v11949_v2  ;;  %v11983_v20 = vadd.f32 %v16475_v46, %v10657_v16 }
 0x2d2   : > { %v11961_v49 = vpop.eup %8496  ;;  %16470 = vst [vmem:[#allocation143_spill] sm:$0xff] %v11965_v21  ;;  %8522 = vpow2.f32 %v7635_v4  ;;  %v7595_v4 = vmul.f32 -1.442695, %v11958_v40  ;;  %v7608_v17 = vmul.f32 -1.442695, %v11965_v21 }
 0x2d3   : > { %16468 = vst [vmem:[#allocation11_spill] sm:$0xff] %v11961_v49  ;;  %v11967_v43 = vpop.eup %8498  ;;  %8524 = vpow2.f32 %v7592_v58  ;;  %v11976_v49 = vpop.f32.mrf.mxu1  ;;  %16476 = vst [vmem:[#allocation152_spill] sm:$0xff] %v11983_v20 }
 0x2d4   : > { %v11973_v47 = vpop.eup %8500  ;;  %8526 = vrcp.f32 %v4646_v33  ;;  %16474 = vst [vmem:[#allocation207_spill] sm:$0xff] %v11976_v49  ;;  %v16478_v33 = vld [vmem:[#allocation154_spill] sm:$0xff]  ;;  %v16480_v49 = vld [vmem:[#allocation156_spill] sm:$0xff] }
 0x2d5   : > { %16473 = vst [vmem:[#allocation150_spill] sm:$0xff] %v11973_v47  ;;  %v11978_v35 = vpop.eup %8502  ;;  %8528 = vrcp.f32 %v4648_v15  ;;  %v11990_v47 = vadd.f32 %v16478_v33, %v10663_v6  ;;  %v7609_v15 = vmul.f32 -1.442695, %v11971_v37  ;;  %v11997_v40 = vadd.f32 %v16480_v49, %v10657_v16 }
 0x2d6   : > { %v11985_v58 = vpop.eup %8504  ;;  %8530 = vrcp.f32 %v4647_v29  ;;  %v12001_v29 = vpop.f32.mrf.mxu1  ;;  %v7622_v33 = vmul.f32 -1.442695, %v11983_v20 }
 0x2d7   : > { %16477 = vst [vmem:[#allocation208_spill] sm:$0xff] %v11985_v58  ;;  %16479 = vst [vmem:[#allocation154_spill] sm:$0xff] %v11990_v47  ;;  %v11992_v2 = vpop.eup %8506  ;;  %8532 = vrcp.f32 %v4649_v31  ;;  %v16484_v58 = vld [vmem:[#allocation12_spill] sm:$0xff]  ;;  %v7623_v37 = vmul.f32 -1.442695, %v11990_v47 }
 0x2d8   : > { %16481 = vst [vmem:[#allocation156_spill] sm:$0xff] %v11997_v40  ;;  %v11999_v46 = vpop.eup %8508  ;;  %8534 = vpow2.f32 %v7594_v3  ;;  %16483 = vst [vmem:[#allocation210_spill] sm:$0xff] %v12001_v29  ;;  %2808 = vmatmul.mubr.bf16.gmra.mxu1 %v16484_v58  ;;  %v7636_v49 = vmul.f32 -1.442695, %v11997_v40 }
 0x2d9   : > { %16482 = vst [vmem:[#allocation209_spill] sm:$0xff] %v11999_v46  ;;  %v8511_v21 = vpop.eup %8510  ;;  %8536 = vpow2.f32 %v7595_v4  ;;  %2817 = vmatprep.mubr.bf16.mxu1 %v16147_v24  ;;  %v12008_v46 = vpop.f32.mrf.mxu1 }
 0x2da   : > { %v8513_v31 = vpop.eup %8512  ;;  %8538 = vpow2.f32 %v7608_v17  ;;  %16485 = vst [vmem:[#allocation12_spill] sm:$0xff] %v12008_v46  ;;  %v16486_v17 = vld [vmem:[#allocation157_spill] sm:$0xff] }
 0x2db   : > { %v8515_v16 = vpop.eup %8514  ;;  %8540 = vpow2.f32 %v7609_v15  ;;  %v12012_v47 = vadd.f32 %v16486_v17, %v10663_v6  ;;  %v4689_v5 = vadd.f32 1.0, %v8513_v31  ;;  %v15889_v17 = vmov 1.0  }
 0x2dc   : > { %v8517_v34 = vpop.eup %8516  ;;  %8542 = vrcp.f32 %v4661_v50  ;;  %v4703_v3 = vadd.f32 1.0, %v8515_v16  ;;  %v16488_v50 = vld [vmem:[#allocation25_spill] sm:$0xff]  ;;  %6140 = vmatprep.mubr.f32.mxu0 %v15889_v17 }
 0x2dd   : > { %v8519_v29 = vpop.eup %8518  ;;  %8544 = vpow2.f32 %v7622_v33  ;;  %v4702_v27 = vadd.f32 1.0, %v8517_v34  ;;  %16487 = vst [vmem:[#allocation157_spill] sm:$0xff] %v12012_v47  ;;  %v12015_v16 = vsub.s32 4, %v16488_v50  ;;  %v12023_v6 = vsub.s32 5, %v16488_v50  ;;  %v12025_v34 = vpop.f32.mrf.mxu1 }
 0x2de   : > { %v8521_v58 = vpop.eup %8520  ;;  %8546 = vpow2.f32 %v7623_v37  ;;  %v4716_v4 = vadd.f32 1.0, %v8519_v29  ;;  %16492 = vst [vmem:[#allocation214_spill] sm:$0xff] %v12025_v34 }
 0x2df   : > { %v8523_v20 = vpop.eup %8522  ;;  %8548 = vpow2.f32 %v7636_v49  ;;  %16489 = vst [vmem:[#allocation211_spill] sm:$0xff] %v12015_v16  ;;  %v4688_v37 = vadd.f32 1.0, %v8521_v58  ;;  %v4675_v49 = vadd.f32 1.0, %v8511_v21  ;;  %16491 = vst [vmem:[#allocation213_spill] sm:$0xff] %v12023_v6  ;;  %v7637_v21 = vmul.f32 -1.442695, %v12012_v47  ;;  %v12037_v29 = vpop.f32.mrf.mxu1 }
 0x2e0   : > { %v8525_v15 = vpop.eup %8524  ;;  %8550 = vrcp.f32 %v4703_v3  ;;  %v4717_v40 = vadd.f32 1.0, %v8523_v20  ;;  %16494 = vst [vmem:[#allocation216_spill] sm:$0xff] %v12037_v29  ;;  %v4663_v47 = vadd.f32 1.0, %v11945_v23 }
 0x2e1   : > { %v12017_v33 = vpop.eup %8526  ;;  %8552 = vrcp.f32 %v4716_v4  ;;  %v4674_v20 = vadd.f32 1.0, %v8525_v15  ;;  %v4660_v15 = vadd.f32 1.0, %v11938_v52  ;;  %v16498_v52 = vsub.s32 7, %v16488_v50 }
 0x2e2   : > { %v12020_v46 = vpop.eup %8528  ;;  %8554 = vrcp.f32 %v4717_v40  ;;  %v9870_v40 = vld [vmem:[#allocation5] sm:$0xff] }
 0x2e3   : > { %16490 = vst [vmem:[#allocation212_spill] sm:$0xff] %v12020_v46  ;;  %v12027_v31 = vpop.eup %8530  ;;  %8556 = vrcp.f32 %v4702_v27  ;;  %v12035_v4 = vrot.slane %v9870_v40, %v12015_v16  ;;  %v16495_v27 = vsub.s32 6, %v16488_v50  ;;  %v4662_v46 = vadd.f32 1.0, %v11941_v51  ;;  %v16497_v16 = vld [vmem:[#allocation13_spill] sm:$0xff] }
 0x2e4   : > { %v12031_v58 = vpop.eup %8532  ;;  %8558 = vrcp.f32 %v4689_v5  ;;  %v12046_v5 = vrot.slane %v9870_v40, %v12023_v6 }
 0x2e5   : > { %16493 = vst [vmem:[#allocation215_spill] sm:$0xff] %v12031_v58  ;;  %v8535_v34 = vpop.eup %8534  ;;  %8560 = vrcp.f32 %v4688_v37  ;;  %v12042_v3 = vrot.slane %v9870_v40, %v16495_v27  ;;  %v12048_v58 = vpop.f32.mrf.mxu1  ;;  %2818 = vmatmul.mubr.bf16.gmra.mxu1 %v16497_v16  ;;  %v12054_v37 = vrot.slane %v9870_v40, %v16498_v52 }
 0x2e6   : > { %v8537_v17 = vpop.eup %8536  ;;  %8562 = vrcp.f32 %v4675_v49  ;;  %16496 = vst [vmem:[#allocation217_spill] sm:$0xff] %v12048_v58  ;;  %2827 = vmatprep.mubr.bf16.mxu1 %v16147_v24  ;;  %v4676_v51 = vadd.f32 1.0, %v8535_v34  ;;  %v16499_v49 = vld [vmem:[#allocation158_spill] sm:$0xff]  ;;  %v16504_v34 = vld [vmem:[#allocation164_spill] sm:$0xff] }
 0x2e7   : > { %v8539_v29 = vpop.eup %8538  ;;  %8564 = vrcp.f32 %v4674_v20  ;;  %v12059_v6 = vadd.f32 %v16499_v49, %v12035_v4  ;;  %v12061_v58 = vpop.f32.mrf.mxu1  ;;  %v4677_v23 = vadd.f32 1.0, %v8537_v17  ;;  %v16502_v20 = vld [vmem:[#allocation159_spill] sm:$0xff] }
 0x2e8   : > { %v8541_v27 = vpop.eup %8540  ;;  %8566 = vpow2.f32 %v7637_v21  ;;  %16501 = vst [vmem:[#allocation158_spill] sm:$0xff] %v12061_v58  ;;  %v12067_v50 = vadd.f32 %v16502_v20, %v12042_v3  ;;  %v4690_v52 = vadd.f32 1.0, %v8539_v29  ;;  %v12071_v21 = vadd.f32 %v16504_v34, %v12046_v5 }
 0x2e9   : > { %16500 = vst [vmem:[#allocation13_spill] sm:$0xff] %v12059_v6  ;;  %v12063_v16 = vpop.eup %8542  ;;  %8568 = vrcp.f32 %v4660_v15  ;;  %v12073_v63 = vpop.f32.mrf.mxu1  ;;  %v4691_v58 = vadd.f32 1.0, %v8541_v27  ;;  %v12077_v15 = vadd.f32 %v16507_v32, %v12054_v37  ;;  %v7204_v20 = vmul.f32 -1.442695, %v12059_v6  ;;  %v16514_v6 = vld [vmem:[#allocation170_spill] sm:$0xff] }
 0x2ea   : > { %16503 = vst [vmem:[#allocation159_spill] sm:$0xff] %v12067_v50  ;;  %v8545_v40 = vpop.eup %8544  ;;  %8570 = vrcp.f32 %v4662_v46  ;;  %16505 = vst [vmem:[#allocation164_spill] sm:$0xff] %v12071_v21  ;;  %v16509_v46 = vld [vmem:[#allocation167_spill] sm:$0xff]  ;;  %v12094_v1 = vadd.f32 %v16514_v6, %v12046_v5 }
 0x2eb   : > { %16506 = vst [vmem:[#allocation218_spill] sm:$0xff] %v12073_v63  ;;  %v8547_v49 = vpop.eup %8546  ;;  %8572 = vrcp.f32 %v4663_v47  ;;  %16508 = vst [vmem:[#allocation165_spill] sm:$0xff] %v12077_v15  ;;  %v12082_v29 = vadd.f32 %v16509_v46, %v12035_v4  ;;  %v12084_v8 = vpop.f32.mrf.mxu1  ;;  %v7206_v63 = vmul.f32 -1.442695, %v12067_v50  ;;  %v16512_v47 = vld [vmem:[#allocation168_spill] sm:$0xff]  ;;  %v16518_v50 = vld [vmem:[#allocation171_spill] sm:$0xff] }
 0x2ec   : > { %v8549_v17 = vpop.eup %8548  ;;  %8574 = vrcp.f32 %v4676_v51  ;;  %16511 = vst [vmem:[#allocation219_spill] sm:$0xff] %v12084_v8  ;;  %v12089_v27 = vadd.f32 %v16512_v47, %v12042_v3  ;;  %v7205_v51 = vmul.f32 -1.442695, %v12071_v21  ;;  %16515 = vst [vmem:[#allocation170_spill] sm:$0xff] %v12094_v1  ;;  %v12102_v47 = vadd.f32 %v16518_v50, %v12054_v37 }
 0x2ed   : > { %16510 = vst [vmem:[#allocation167_spill] sm:$0xff] %v12082_v29  ;;  %v8551_v34 = vpop.eup %8550  ;;  %8576 = vrcp.f32 %v4677_v23  ;;  %v12096_v46 = vpop.f32.mrf.mxu1  ;;  %2828 = vmatmul.mubr.bf16.gmra.mxu1 %v16517_v61  ;;  %v7207_v23 = vmul.f32 -1.442695, %v12077_v15  ;;  %v7218_v6 = vmul.f32 -1.442695, %v12082_v29 }
 0x2ee   : > { %16513 = vst [vmem:[#allocation168_spill] sm:$0xff] %v12089_v27  ;;  %v8553_v32 = vpop.eup %8552  ;;  %8578 = vrcp.f32 %v4690_v52  ;;  %16516 = vst [vmem:[#allocation220_spill] sm:$0xff] %v12096_v46  ;;  %2837 = vmatprep.mubr.bf16.mxu1 %v16147_v24  ;;  %v16520_v46 = vld [vmem:[#allocation174_spill] sm:$0xff]  ;;  %v7220_v15 = vmul.f32 -1.442695, %v12089_v27  ;;  %v6047_v18 = vmul.f32 %v8551_v34, %v11901_v39  ;;  %v4704_v34 = vadd.f32 1.0, %v8545_v40 }
 0x2ef   : > { %v8555_v8 = vpop.eup %8554  ;;  %8580 = vrcp.f32 %v4691_v58  ;;  %16519 = vst [vmem:[#allocation14_spill] sm:$0xff] %v12102_v47  ;;  %v12109_v48 = vadd.f32 %v16520_v46, %v12035_v4  ;;  %v6060_v58 = vmul.f32 %v8553_v32, %v11914_v45  ;;  %v7219_v24 = vmul.f32 -1.442695, %v12094_v1 }
 0x2f0   : > { %v8557_v52 = vpop.eup %8556  ;;  %v6061_v21 = vmul.f32 %v8555_v8, %v11928_v41  ;;  %8582 = vpow2.f32 %v7204_v20  ;;  %v7221_v20 = vmul.f32 -1.442695, %v12102_v47  ;;  %v4718_v40 = vadd.f32 1.0, %v8549_v17  ;;  %v16590_v47 = vld [vmem:[#allocation96_spill] sm:$0xff] }
 0x2f1   : > { %16521 = vst [vmem:[#allocation171_spill] sm:$0xff] %v12109_v48  ;;  %v8559_v61 = vpop.eup %8558  ;;  %8584 = vpow2.f32 %v7206_v63  ;;  %v6046_v41 = vmul.f32 %v8557_v52, %v11907_v44  ;;  %v7232_v63 = vmul.f32 -1.442695, %v12109_v48  ;;  %v4705_v52 = vadd.f32 1.0, %v8547_v49  ;;  %v16601_v48 = vld [vmem:[#allocation48_spill] sm:$0xff] }
 0x2f2   : > { %v8561_v50 = vpop.eup %8560  ;;  %8586 = vpow2.f32 %v7205_v51  ;;  %6108 = vmatprep.subr.mxu0 %v6061_v21  ;;  %v6033_v45 = vmul.f32 %v8559_v61, %v11895_v9  ;;  %v16522_v21 = vld [vmem:[#allocation176_spill] sm:$0xff]  ;;  %v12127_v9 = vadd.f32 %v11465_v30, %v12046_v5  ;;  %v12142_v30 = vadd.f32 %v11481_v12, %v12035_v4 }
 0x2f3   : > { %v8563_v8 = vpop.eup %8562  ;;  %8588 = vpow2.f32 %v7207_v23  ;;  %6109 = vmatpush2.msra.mxu0 %v6060_v58  ;;  %v6032_v39 = vmul.f32 %v8561_v50, %v11921_v0  ;;  %v12122_v51 = vadd.f32 %v16522_v21, %v12042_v3  ;;  %v12150_v17 = vadd.f32 %v11485_v60, %v12042_v3  ;;  %v16532_v21 = vld [vmem:[#allocation134_spill] sm:$0xff] }
 0x2f4   : > { %v8565_v46 = vpop.eup %8564  ;;  %8590 = vpow2.f32 %v7218_v6  ;;  %6110 = vmatprep.subr.mxu0 %v6047_v18  ;;  %v6019_v23 = vmul.f32 %v8563_v8, %v11887_v19  ;;  %16524 = vst [vmem:[#allocation176_spill] sm:$0xff] %v12127_v9  ;;  %16526 = vst [vmem:[#allocation222_spill] sm:$0xff] %v12142_v30  ;;  %v7233_v12 = vmul.f32 -1.442695, %v12127_v9  ;;  %v12159_v61 = vadd.f32 %v11512_v54, %v12046_v5 }
 0x2f5   : > { %v8567_v32 = vpop.eup %8566  ;;  %8592 = vpow2.f32 %v7220_v15  ;;  %16523 = vst [vmem:[#allocation174_spill] sm:$0xff] %v12122_v51  ;;  %6111 = vmatpush2.msra.mxu0 %v6046_v41  ;;  %v6018_v0 = vmul.f32 %v8565_v46, %v11932_v62  ;;  %v12134_v15 = vadd.f32 %v11473_v59, %v12054_v37  ;;  %v7234_v59 = vmul.f32 -1.442695, %v12122_v51  ;;  %16527 = vst [vmem:[#allocation223_spill] sm:$0xff] %v12150_v17 }
 0x2f6   : > { %v8569_v44 = vpop.eup %8568  ;;  %8594 = vpow2.f32 %v7219_v24  ;;  %6112 = vmatprep.subr.mxu0 %v6033_v45  ;;  %v6005_v24 = vmul.f32 %v12063_v16, %v11856_v53  ;;  %v4719_v19 = vadd.f32 1.0, %v8567_v32  ;;  %v5991_v16 = vmul.f32 %v12027_v31, %v11827_v22  ;;  %16528 = vst [vmem:[#allocation224_spill] sm:$0xff] %v12159_v61 }
 0x2f7   : > { %v12129_v18 = vpop.eup %8570  ;;  %8596 = vpow2.f32 %v7221_v20  ;;  %16525 = vst [vmem:[#allocation221_spill] sm:$0xff] %v12134_v15  ;;  %6113 = vmatpush2.msra.mxu0 %v6032_v39  ;;  %v6004_v49 = vmul.f32 %v8569_v44, %v11842_v25  ;;  %v5990_v60 = vmul.f32 %v12017_v33, %v11815_v38  ;;  %v7235_v58 = vmul.f32 -1.442695, %v12134_v15  ;;  %v16600_v15 = vld [vmem:[#allocation160_spill] sm:$0xff] }
 0x2f8   : > { %v12136_v6 = vpop.eup %8572  ;;  %8598 = vpow2.f32 %v7232_v63  ;;  %6114 = vmatprep.subr.mxu0 %v6019_v23  ;;  %v12168_v50 = vadd.f32 %v11523_v7, %v12054_v37  ;;  %v5977_v54 = vmul.f32 %v11992_v2, %v11790_v28  ;;  %v7246_v31 = vmul.f32 -1.442695, %v12142_v30  ;;  %v12181_v2 = vpop.f32.mrf.mxu1 }
 0x2f9   : > { %v12144_v62 = vpop.eup %8574  ;;  %8600 = vrcp.f32 %v4704_v34  ;;  %6115 = vmatpush2.msra.mxu0 %v6018_v0  ;;  %v5976_v38 = vmul.f32 %v11978_v35, %v11780_v13  ;;  %v7248_v33 = vmul.f32 -1.442695, %v12150_v17  ;;  %v5963_v41 = vmul.f32 %v11967_v43, %v11765_v14 }
 0x2fa   : > { %v12152_v53 = vpop.eup %8576  ;;  %8602 = vrcp.f32 %v4705_v52  ;;  %6116 = vmatprep.subr.mxu0 %v6005_v24  ;;  %16529 = vst [vmem:[#allocation225_spill] sm:$0xff] %v12168_v50  ;;  %v7247_v20 = vmul.f32 -1.442695, %v12159_v61  ;;  %v5962_v46 = vmul.f32 %v11954_v11, %v11753_v55  ;;  %v7249_v13 = vmul.f32 -1.442695, %v12168_v50  ;;  %v12192_v34 = vpop.f32.mrf.mxu1  ;;  %v16534_v52 = vld [vmem:[#allocation200_spill] sm:$0xff] }
 0x2fb   : > { %v12161_v25 = vpop.eup %8578  ;;  %8604 = vrcp.f32 %v4718_v40  ;;  %6117 = vmatpush2.msra.mxu0 %v6004_v49  ;;  %v5949_v45 = vmul.f32 %v11903_v26, %v11725_v36  ;;  %v5948_v43 = vmul.f32 %v11891_v10, %v11708_v57  ;;  %v5935_v11 = vmul.f32 %v11863_v56, %v11675_v42  ;;  %16530 = vst [vmem:[#allocation226_spill] sm:$0xff] %v12192_v34  ;;  %v16531_v26 = vld [vmem:[#allocation67_spill] sm:$0xff]  ;;  %v16536_v24 = vld [vmem:[#allocation82_spill] sm:$0xff] }
 0x2fc   : > { %v12170_v22 = vpop.eup %8580  ;;  %8606 = vrcp.f32 %v4719_v19  ;;  %6118 = vmatprep.subr.mxu0 %v5991_v16  ;;  %v5934_v44 = vmul.f32 %v16532_v21, %v16531_v26  ;;  %v16533_v10 = vld [vmem:[#allocation71_spill] sm:$0xff]  ;;  %v12198_v56 = vpop.f32.mrf.mxu1  ;;  %v16537_v19 = vld [vmem:[#allocation129_spill] sm:$0xff]  ;;  %v16598_v1 = vmov 1.0  }
 0x2fd   : > { %v8583_v8 = vpop.eup %8582  ;;  %8608 = vpow2.f32 %v7234_v59  ;;  %6119 = vmatpush2.msra.mxu0 %v5990_v60  ;;  %v5921_v0 = vmul.f32 %v16534_v52, %v16533_v10  ;;  %16535 = vst [vmem:[#allocation67_spill] sm:$0xff] %v12198_v56  ;;  %v5920_v49 = vmul.f32 %v16537_v19, %v16536_v24  ;;  %v16538_v16 = vld [vmem:[#allocation89_spill] sm:$0xff]  ;;  %v16561_v19 = vld [vmem:[#allocation116_spill] sm:$0xff] }
 0x2fe   : > { %v8585_v7 = vpop.eup %8584  ;;  %8610 = vpow2.f32 %v7233_v12  ;;  %6120 = vmatprep.subr.mxu0 %v5977_v54  ;;  %v4286_v63 = vadd.f32 1.0, %v8583_v8  ;;  %v12204_v12 = vadd.f32 %v16538_v16, %v12035_v4  ;;  %v16541_v54 = vld [vmem:[#allocation197_spill] sm:$0xff]  ;;  %v16608_v56 = vld [vmem:[#allocation100_spill] sm:$0xff] }
 0x2ff   : > { %v8587_v28 = vpop.eup %8586  ;;  %8612 = vpow2.f32 %v7235_v58  ;;  %6121 = vmatpush2.msra.mxu0 %v5976_v38  ;;  %v4288_v32 = vadd.f32 1.0, %v8585_v7  ;;  %v16540_v58 = vld [vmem:[#allocation94_spill] sm:$0xff]  ;;  %v16542_v38 = vld [vmem:[#allocation85_spill] sm:$0xff]  ;;  %v12214_v7 = vpop.f32.mrf.mxu1 }
 0x300   : > { %v8589_v35 = vpop.eup %8588  ;;  %8614 = vpow2.f32 %v7246_v31  ;;  %6122 = vmatprep.subr.mxu0 %v5963_v41  ;;  %v4287_v55 = vadd.f32 1.0, %v8587_v28  ;;  %16539 = vst [vmem:[#allocation134_spill] sm:$0xff] %v12204_v12  ;;  %v5907_v31 = vmul.f32 %v16541_v54, %v16540_v58  ;;  %16544 = vst [vmem:[#allocation200_spill] sm:$0xff] %v12214_v7  ;;  %v16545_v41 = vld [vmem:[#allocation15_spill] sm:$0xff]  ;;  %v16546_v28 = vld [vmem:[#allocation52_spill] sm:$0xff] }
 0x301   : > { %v8591_v14 = vpop.eup %8590  ;;  %8616 = vpow2.f32 %v7248_v33  ;;  %6123 = vmatpush2.msra.mxu0 %v5962_v46  ;;  %v4289_v23 = vadd.f32 1.0, %v8589_v35  ;;  %v12212_v33 = vadd.f32 %v16542_v38, %v12042_v3  ;;  %2838 = vmatmul.mubr.bf16.gmra.mxu1 %v16545_v41  ;;  %v16547_v46 = vld [vmem:[#allocation127_spill] sm:$0xff]  ;;  %v12234_v21 = vpop.f32.mrf.mxu1  ;;  %v7260_v52 = vmul.f32 -1.442695, %v12204_v12  ;;  %v16562_v58 = vld [vmem:[#allocation58_spill] sm:$0xff]  ;;  %v16565_v38 = vld [vmem:[#allocation177_spill] sm:$0xff] }
 0x302   : > { %v8593_v39 = vpop.eup %8592  ;;  %8618 = vpow2.f32 %v7247_v20  ;;  %6124 = vmatprep.subr.mxu0 %v5949_v45  ;;  %v4300_v40 = vadd.f32 1.0, %v8591_v14  ;;  %v16548_v45 = vld [vmem:[#allocation81_spill] sm:$0xff]  ;;  %v16550_v14 = vmov 0   ;;  %16555 = vst [vmem:[#allocation89_spill] sm:$0xff] %v12234_v21  ;;  %v12252_v54 = vadd.f32 %v16562_v58, %v12042_v3  ;;  %v16566_v41 = vld [vmem:[#allocation111_spill] sm:$0xff] }
 0x303   : > { %v8595_v36 = vpop.eup %8594  ;;  %8620 = vpow2.f32 %v7249_v13  ;;  %6125 = vmatpush2.msra.mxu0 %v5948_v43  ;;  %v4302_v59 = vadd.f32 1.0, %v8593_v39  ;;  %16543 = vst [vmem:[#allocation71_spill] sm:$0xff] %v12212_v33  ;;  %v5906_v13 = vmul.f32 %v16547_v46, %v16546_v28  ;;  %2847 = vmatprep.mubr.bf16.mxu1 %v16550_v14  ;;  %v16552_v39 = vld [vmem:[#allocation193_spill] sm:$0xff]  ;;  %v7262_v16 = vmul.f32 -1.442695, %v12212_v33 }
 0x304   : > { %v8597_v57 = vpop.eup %8596  ;;  %8622 = vrcp.f32 %v4286_v63  ;;  %6126 = vmatprep.subr.mxu0 %v5935_v11  ;;  %v4301_v8 = vadd.f32 1.0, %v8595_v36  ;;  %v12223_v63 = vadd.f32 %v16548_v45, %v12046_v5  ;;  %v16553_v36 = vld [vmem:[#allocation70_spill] sm:$0xff]  ;;  %16563 = vst [vmem:[#allocation197_spill] sm:$0xff] %v12252_v54  ;;  %v5878_v28 = vmul.f32 %v16566_v41, %v16565_v38 }
 0x305   : > { %v8599_v42 = vpop.eup %8598  ;;  %8624 = vrcp.f32 %v4288_v32  ;;  %6127 = vmatpush2.msra.mxu0 %v5934_v44  ;;  %v4303_v35 = vadd.f32 1.0, %v8597_v57  ;;  %v16551_v32 = vld [vmem:[#allocation185_spill] sm:$0xff]  ;;  %v12232_v26 = vadd.f32 %v16553_v36, %v12054_v37  ;;  %v16557_v57 = vld [vmem:[#allocation120_spill] sm:$0xff] }
 0x306   : > { %v12206_v60 = vpop.eup %8600  ;;  %8626 = vrcp.f32 %v4287_v55  ;;  %6128 = vmatprep.subr.mxu0 %v5921_v0  ;;  %16549 = vst [vmem:[#allocation82_spill] sm:$0xff] %v12223_v63  ;;  %v5893_v11 = vmul.f32 %v16552_v39, %v16551_v32  ;;  %v4314_v55 = vadd.f32 1.0, %v8599_v42  ;;  %v16558_v0 = vld [vmem:[#allocation66_spill] sm:$0xff]  ;;  %v16560_v42 = vld [vmem:[#allocation179_spill] sm:$0xff]  ;;  %v7261_v46 = vmul.f32 -1.442695, %v12223_v63 }
 0x307   : > { %v12217_v20 = vpop.eup %8602  ;;  %8628 = vrcp.f32 %v4289_v23  ;;  %6129 = vmatpush2.msra.mxu0 %v5920_v49  ;;  %16554 = vst [vmem:[#allocation129_spill] sm:$0xff] %v12232_v26  ;;  %v16556_v23 = vld [vmem:[#allocation181_spill] sm:$0xff]  ;;  %v12243_v24 = vadd.f32 %v16558_v0, %v12035_v4  ;;  %v5879_v49 = vmul.f32 %v16561_v19, %v16560_v42  ;;  %v16570_v39 = vld [vmem:[#allocation55_spill] sm:$0xff]  ;;  %v7263_v36 = vmul.f32 -1.442695, %v12232_v26 }
 0x308   : > { %v12226_v43 = vpop.eup %8604  ;;  %8630 = vrcp.f32 %v4300_v40  ;;  %6130 = vmatprep.subr.mxu0 %v5907_v31  ;;  %v5892_v10 = vmul.f32 %v16557_v57, %v16556_v23  ;;  %v16569_v32 = vld [vmem:[#allocation173_spill] sm:$0xff]  ;;  %v16571_v23 = vld [vmem:[#allocation50_spill] sm:$0xff]  ;;  %v16574_v19 = vld [vmem:[#allocation79_spill] sm:$0xff] }
 0x309   : > { %v12236_v44 = vpop.eup %8606  ;;  %8632 = vrcp.f32 %v4302_v59  ;;  %16559 = vst [vmem:[#allocation94_spill] sm:$0xff] %v12243_v24  ;;  %6131 = vmatpush2.msra.mxu0 %v5906_v13  ;;  %v12254_v59 = vpop.f32.mrf.mxu1  ;;  %v16567_v13 = vld [vmem:[#allocation54_spill] sm:$0xff]  ;;  %v12272_v57 = vadd.f32 %v16571_v23, %v12054_v37  ;;  %v7274_v38 = vmul.f32 -1.442695, %v12243_v24 }
 0x30a   : > { %v12245_v40 = vpop.eup %8608  ;;  %8634 = vrcp.f32 %v4301_v8  ;;  %6132 = vmatprep.subr.mxu0 %v5893_v11  ;;  %16564 = vst [vmem:[#allocation85_spill] sm:$0xff] %v12254_v59  ;;  %v12263_v8 = vadd.f32 %v16567_v13, %v12046_v5  ;;  %v5865_v11 = vmul.f32 %v16570_v39, %v16569_v32  ;;  %v16578_v32 = vld [vmem:[#allocation77_spill] sm:$0xff]  ;;  %v16579_v39 = vld [vmem:[#allocation34_spill] sm:$0xff] }
 0x30b   : > { %v12256_v31 = vpop.eup %8610  ;;  %8636 = vrcp.f32 %v4303_v35  ;;  %6133 = vmatpush2.msra.mxu0 %v5892_v10  ;;  %16572 = vst [vmem:[#allocation52_spill] sm:$0xff] %v12272_v57  ;;  %v12274_v35 = vpop.f32.mrf.mxu0  ;;  %v16575_v10 = vld [vmem:[#allocation103_spill] sm:$0xff]  ;;  %v5851_v23 = vmul.f32 %v16579_v39, %v16578_v32  ;;  %v16589_v39 = vld [vmem:[#allocation42_spill] sm:$0xff] }
 0x30c   : > { %16568 = vst [vmem:[#allocation15_spill] sm:$0xff] %v12263_v8  ;;  %v12265_v45 = vpop.eup %8612  ;;  %8638 = vrcp.f32 %v4314_v55  ;;  %6134 = vmatprep.subr.mxu0 %v5879_v49  ;;  %v12276_v0 = vpop.f32.mrf.mxu1  ;;  %v5864_v58 = vmul.f32 %v16575_v10, %v16574_v19  ;;  %v16576_v55 = vld [vmem:[#allocation92_spill] sm:$0xff]  ;;  %v7276_v49 = vmul.f32 -1.442695, %v12252_v54  ;;  %v7275_v27 = vmul.f32 -1.442695, %v12263_v8 }
 0x30d   : > { %16573 = vst [vmem:[#allocation127_spill] sm:$0xff] %v12276_v0  ;;  %v8615_v42 = vpop.eup %8614  ;;  %8640 = vpow2.f32 %v7260_v52  ;;  %v12283_v41 = vadd.f32 %v16576_v55, %v12035_v4  ;;  %6135 = vmatpush2.msra.mxu0 %v5878_v28  ;;  %v16580_v0 = vld [vmem:[#allocation93_spill] sm:$0xff]  ;;  %v16583_v19 = vld [vmem:[#allocation16_spill] sm:$0xff]  ;;  %v16584_v55 = vld [vmem:[#allocation75_spill] sm:$0xff] }
 0x30e   : > { %v12285_v13 = vpop.eup %8616  ;;  %8642 = vpow2.f32 %v7262_v16  ;;  %v12292_v59 = vadd.f32 %v16580_v0, %v12042_v3  ;;  %6136 = vmatprep.subr.mxu0 %v5865_v11  ;;  %v12294_v52 = vpop.f32.mrf.mxu1  ;;  %2848 = vmatmul.mubr.bf16.gmra.mxu1 %v16583_v19  ;;  %v16585_v28 = vld [vmem:[#allocation36_spill] sm:$0xff]  ;;  %v16586_v16 = vld [vmem:[#allocation38_spill] sm:$0xff]  ;;  %v7277_v19 = vmul.f32 -1.442695, %v12272_v57  ;;  %v4328_v9 = vadd.f32 1.0, %v8615_v42  ;;  %v16687_v8 = vld [vmem:[#allocation63_spill] sm:$0xff] }
 0x30f   : > { %16577 = vst [vmem:[#allocation81_spill] sm:$0xff] %v12283_v41  ;;  %16582 = vst [vmem:[#allocation193_spill] sm:$0xff] %v12294_v52  ;;  %v8619_v10 = vpop.eup %8618  ;;  %v5850_v21 = vmul.f32 %v16585_v28, %v16584_v55  ;;  %8644 = vpow2.f32 %v7261_v46  ;;  %v12302_v32 = vadd.f32 %v16586_v16, %v12046_v5  ;;  %6137 = vmatpush2.msra.mxu0 %v5864_v58  ;;  %2857 = vmatprep.mubr.bf16.mxu1 %v16550_v14  ;;  %v16588_v11 = vld [vmem:[#allocation74_spill] sm:$0xff]  ;;  %v12312_v46 = vpop.f32.mrf.mxu0  ;;  %v16593_v16 = vld [vmem:[#allocation163_spill] sm:$0xff] }
 0x310   : > { %16581 = vst [vmem:[#allocation185_spill] sm:$0xff] %v12292_v59  ;;  %v8621_v0 = vpop.eup %8620  ;;  %v5839_v52 = vmul.f32 %v16589_v39, %v16588_v11  ;;  %8646 = vpow2.f32 %v7263_v36  ;;  %v12310_v55 = vadd.f32 %v16590_v47, %v12054_v37  ;;  %6138 = vmatprep.subr.mxu0 %v5851_v23  ;;  %v16594_v58 = vld [vmem:[#allocation44_spill] sm:$0xff]  ;;  %v7288_v7 = vmul.f32 -1.442695, %v12283_v41  ;;  %v16596_v36 = vld [vmem:[#allocation161_spill] sm:$0xff]  ;;  %v16597_v39 = vld [vmem:[#allocation46_spill] sm:$0xff] }
 0x311   : > { %16587 = vst [vmem:[#allocation70_spill] sm:$0xff] %v12302_v32  ;;  %v12314_v28 = vpop.eup %8622  ;;  %v5838_v29 = vmul.f32 %v16594_v58, %v16593_v16  ;;  %8648 = vpow2.f32 %v7274_v38  ;;  %6139 = vmatpush2.msra.mxu0 %v5850_v21  ;;  %v5825_v51 = vmul.f32 %v16597_v39, %v16596_v36  ;;  %v7290_v47 = vmul.f32 -1.442695, %v12292_v59  ;;  %v16603_v58 = vld [vmem:[#allocation146_spill] sm:$0xff]  ;;  %v12336_v39 = vpop.f32.mrf.mxu0  ;;  %v16640_v54 = vld [vmem:[#allocation144_spill] sm:$0xff] }
 0x312   : > { %16591 = vst [vmem:[#allocation181_spill] sm:$0xff] %v12310_v55  ;;  %16592 = vst [vmem:[#allocation120_spill] sm:$0xff] %v12314_v28  ;;  %v12319_v11 = vpop.eup %8624  ;;  %8650 = vpow2.f32 %v7276_v49  ;;  %6147 = vmatprep.subr.mxu0 %v5839_v52  ;;  %6141 = vmatmul.mubr.f32.vlgmr.msra.gmra.mxu0 %v16598_v1  ;;  %v5824_v16 = vmul.f32 %v16601_v48, %v16600_v15  ;;  %v7289_v38 = vmul.f32 -1.442695, %v12302_v32  ;;  %v16604_v49 = vld [vmem:[#allocation188_spill] sm:$0xff]  ;;  %v16606_v48 = vld [vmem:[#allocation145_spill] sm:$0xff] }
 0x313   : > { %16595 = vst [vmem:[#allocation66_spill] sm:$0xff] %v12319_v11  ;;  %v12325_v23 = vpop.eup %8626  ;;  %8652 = vpow2.f32 %v7275_v27  ;;  %6148 = vmatpush1.msra.mxu0 %v5838_v29  ;;  %6211 = vmatprep.mubr.f32.mxu0 %v16598_v1  ;;  %v5811_v36 = vmul.f32 %v16604_v49, %v16603_v58  ;;  %v7291_v52 = vmul.f32 -1.442695, %v12310_v55  ;;  %v16607_v27 = vld [vmem:[#allocation186_spill] sm:$0xff]  ;;  %v4315_v29 = vadd.f32 1.0, %v12256_v31  ;;  %v16612_v49 = vld [vmem:[#allocation184_spill] sm:$0xff]  ;;  %v12371_v50 = vpop.f32.mrf.mxu0 }
 0x314   : > { %16599 = vst [vmem:[#allocation179_spill] sm:$0xff] %v12325_v23  ;;  %v12331_v21 = vpop.eup %8628  ;;  %8654 = vpow2.f32 %v7277_v19  ;;  %6149 = vmatprep.subr.mxu0 %v5825_v51  ;;  %v5810_v15 = vmul.f32 %v16607_v27, %v16606_v48  ;;  %v16611_v19 = vld [vmem:[#allocation141_spill] sm:$0xff]  ;;  %v16613_v51 = vld [vmem:[#allocation59_spill] sm:$0xff]  ;;  %v16617_v31 = vld [vmem:[#allocation182_spill] sm:$0xff] }
 0x315   : > { %16602 = vst [vmem:[#allocation116_spill] sm:$0xff] %v12331_v21  ;;  %v12338_v11 = vpop.eup %8630  ;;  %8656 = vpow2.f32 %v7288_v7  ;;  %v12345_v21 = vadd.f32 %v16608_v56, %v12035_v4  ;;  %6150 = vmatpush1.msra.mxu0 %v5824_v16  ;;  %v5797_v17 = vmul.f32 %v16612_v49, %v16611_v19  ;;  %v16616_v7 = vld [vmem:[#allocation140_spill] sm:$0xff]  ;;  %v4329_v56 = vadd.f32 1.0, %v8619_v10  ;;  %v16621_v42 = vld [vmem:[#allocation114_spill] sm:$0xff] }
 0x316   : > { %16605 = vst [vmem:[#allocation58_spill] sm:$0xff] %v12338_v11  ;;  %v12347_v58 = vpop.eup %8632  ;;  %8658 = vpow2.f32 %v7290_v47  ;;  %v12353_v11 = vadd.f32 %v16613_v51, %v12042_v3  ;;  %6151 = vmatprep.subr.mxu0 %v5811_v36  ;;  %v5796_v27 = vmul.f32 %v16617_v31, %v16616_v7  ;;  %v16618_v16 = vld [vmem:[#allocation104_spill] sm:$0xff]  ;;  %v4331_v51 = vadd.f32 1.0, %v8621_v0  ;;  %v16627_v7 = vld [vmem:[#allocation169_spill] sm:$0xff]  ;;  %v16629_v0 = vld [vmem:[#allocation166_spill] sm:$0xff] }
 0x317   : > { %16609 = vst [vmem:[#allocation177_spill] sm:$0xff] %v12345_v21  ;;  %16610 = vst [vmem:[#allocation111_spill] sm:$0xff] %v12347_v58  ;;  %v12355_v48 = vpop.eup %8634  ;;  %8660 = vpow2.f32 %v7289_v38  ;;  %v12361_v58 = vadd.f32 %v16618_v16, %v12046_v5  ;;  %6152 = vmatpush1.msra.mxu0 %v5810_v15  ;;  %v16622_v47 = vld [vmem:[#allocation172_spill] sm:$0xff]  ;;  %v16626_v38 = vld [vmem:[#allocation110_spill] sm:$0xff]  ;;  %v7302_v15 = vmul.f32 -1.442695, %v12345_v21 }
 0x318   : > { %16614 = vst [vmem:[#allocation54_spill] sm:$0xff] %v12353_v11  ;;  %16615 = vst [vmem:[#allocation173_spill] sm:$0xff] %v12355_v48  ;;  %v12363_v19 = vpop.eup %8636  ;;  %v5783_v49 = vmul.f32 %v16622_v47, %v16621_v42  ;;  %8662 = vpow2.f32 %v7291_v52  ;;  %v16623_v36 = vld [vmem:[#allocation108_spill] sm:$0xff]  ;;  %6153 = vmatprep.subr.mxu0 %v5797_v17  ;;  %v5782_v31 = vmul.f32 %v16627_v7, %v16626_v38  ;;  %v16628_v42 = vld [vmem:[#allocation106_spill] sm:$0xff]  ;;  %v7304_v47 = vmul.f32 -1.442695, %v12353_v11 }
 0x319   : > { %16619 = vst [vmem:[#allocation55_spill] sm:$0xff] %v12361_v58  ;;  %16620 = vst [vmem:[#allocation50_spill] sm:$0xff] %v12363_v19  ;;  %v12369_v48 = vadd.f32 %v16623_v36, %v12054_v37  ;;  %v12373_v10 = vpop.eup %8638  ;;  %8664 = vrcp.f32 %v4315_v29  ;;  %6154 = vmatpush1.msra.mxu0 %v5796_v27  ;;  %v5769_v52 = vmul.f32 %v16629_v0, %v16628_v42  ;;  %v16630_v19 = vld [vmem:[#allocation102_spill] sm:$0xff]  ;;  %v16632_v38 = vld [vmem:[#allocation91_spill] sm:$0xff]  ;;  %v12387_v42 = vpop.f32.mrf.mxu0 }
 0x31a   : > { %16625 = vst [vmem:[#allocation103_spill] sm:$0xff] %v12373_v10  ;;  %v8641_v16 = vpop.eup %8640  ;;  %8666 = vrcp.f32 %v4328_v9  ;;  %6155 = vmatprep.subr.mxu0 %v5783_v49  ;;  %v16631_v17 = vld [vmem:[#allocation162_spill] sm:$0xff]  ;;  %v7303_v10 = vmul.f32 -1.442695, %v12361_v58  ;;  %v16633_v7 = vld [vmem:[#allocation153_spill] sm:$0xff]  ;;  %v16635_v0 = vld [vmem:[#allocation151_spill] sm:$0xff] }
 0x31b   : > { %16624 = vst [vmem:[#allocation79_spill] sm:$0xff] %v12369_v48  ;;  %v8643_v36 = vpop.eup %8642  ;;  %v5768_v30 = vmul.f32 %v16631_v17, %v16630_v19  ;;  %8668 = vrcp.f32 %v4329_v56  ;;  %6156 = vmatpush1.msra.mxu0 %v5782_v31  ;;  %v5755_v27 = vmul.f32 %v16633_v7, %v16632_v38  ;;  %v7305_v33 = vmul.f32 -1.442695, %v12369_v48  ;;  %v16634_v49 = vld [vmem:[#allocation90_spill] sm:$0xff]  ;;  %v16636_v19 = vld [vmem:[#allocation87_spill] sm:$0xff]  ;;  %v16637_v31 = vld [vmem:[#allocation149_spill] sm:$0xff]  ;;  %v12399_v57 = vpop.f32.mrf.mxu0 }
 0x31c   : > { %v8645_v29 = vpop.eup %8644  ;;  %8670 = vrcp.f32 %v4331_v51  ;;  %6157 = vmatprep.subr.mxu0 %v5769_v52  ;;  %v5754_v61 = vmul.f32 %v16635_v0, %v16634_v49  ;;  %v4342_v26 = vadd.f32 1.0, %v8641_v16  ;;  %v5741_v17 = vmul.f32 %v16637_v31, %v16636_v19  ;;  %v12393_v51 = vpop.f32.mrf.mxu1  ;;  %v16639_v7 = vld [vmem:[#allocation83_spill] sm:$0xff]  ;;  %v16641_v16 = vld [vmem:[#allocation72_spill] sm:$0xff] }
 0x31d   : > { %v8647_v9 = vpop.eup %8646  ;;  %8672 = vpow2.f32 %v7302_v15  ;;  %6158 = vmatpush1.msra.mxu0 %v5768_v30  ;;  %v4344_v12 = vadd.f32 1.0, %v8643_v36  ;;  %16638 = vst [vmem:[#allocation92_spill] sm:$0xff] %v12393_v51  ;;  %v5740_v52 = vmul.f32 %v16640_v54, %v16639_v7  ;;  %v4343_v63 = vadd.f32 1.0, %v8645_v29  ;;  %v16642_v15 = vld [vmem:[#allocation131_spill] sm:$0xff]  ;;  %v16643_v36 = vld [vmem:[#allocation68_spill] sm:$0xff]  ;;  %v12411_v24 = vpop.f32.mrf.mxu0 }
 0x31e   : > { %v8649_v56 = vpop.eup %8648  ;;  %8674 = vpow2.f32 %v7304_v47  ;;  %6159 = vmatprep.subr.mxu0 %v5755_v27  ;;  %v5727_v30 = vmul.f32 %v16642_v15, %v16641_v16  ;;  %v4345_v0 = vadd.f32 1.0, %v8647_v9  ;;  %v16644_v27 = vld [vmem:[#allocation128_spill] sm:$0xff]  ;;  %v12405_v16 = vpop.f32.mrf.mxu1  ;;  %v16649_v15 = vld [vmem:[#allocation113_spill] sm:$0xff]  ;;  %v16774_v58 = vld [vmem:[#allocation207_spill] sm:$0xff] }
 0x31f   : > { %v8651_v38 = vpop.eup %8650  ;;  %8676 = vpow2.f32 %v7303_v10  ;;  %6160 = vmatpush1.msra.mxu0 %v5754_v61  ;;  %v5726_v19 = vmul.f32 %v16644_v27, %v16643_v36  ;;  %v4356_v31 = vadd.f32 1.0, %v8649_v56  ;;  %v16645_v29 = vld [vmem:[#allocation60_spill] sm:$0xff]  ;;  %v16646_v10 = vld [vmem:[#allocation117_spill] sm:$0xff]  ;;  %16647 = vst [vmem:[#allocation77_spill] sm:$0xff] %v12405_v16 }
 0x320   : > { %v8653_v49 = vpop.eup %8652  ;;  %8678 = vpow2.f32 %v7305_v33  ;;  %6161 = vmatprep.subr.mxu0 %v5741_v17  ;;  %v5713_v61 = vmul.f32 %v16646_v10, %v16645_v29  ;;  %v4358_v7 = vadd.f32 1.0, %v8651_v38  ;;  %v16648_v9 = vld [vmem:[#allocation56_spill] sm:$0xff]  ;;  %v16651_v56 = vld [vmem:[#allocation109_spill] sm:$0xff] }
 0x321   : > { %v8655_v47 = vpop.eup %8654  ;;  %8680 = vrcp.f32 %v4342_v26  ;;  %6162 = vmatpush1.msra.mxu0 %v5740_v52  ;;  %v5712_v17 = vmul.f32 %v16649_v15, %v16648_v9  ;;  %v4357_v51 = vadd.f32 1.0, %v8653_v49  ;;  %v16650_v26 = vld [vmem:[#allocation53_spill] sm:$0xff] }
 0x322   : > { %v8657_v54 = vpop.eup %8656  ;;  %8682 = vrcp.f32 %v4344_v12  ;;  %6163 = vmatprep.subr.mxu0 %v5727_v30  ;;  %v5699_v52 = vmul.f32 %v16651_v56, %v16650_v26  ;;  %v4359_v27 = vadd.f32 1.0, %v8655_v47  ;;  %v12413_v12 = vpop.f32.mrf.mxu1  ;;  %v16653_v30 = vld [vmem:[#allocation51_spill] sm:$0xff]  ;;  %v16654_v29 = vld [vmem:[#allocation105_spill] sm:$0xff]  ;;  %v16660_v26 = vld [vmem:[#allocation190_spill] sm:$0xff] }
 0x323   : > { %v8659_v33 = vpop.eup %8658  ;;  %8684 = vrcp.f32 %v4343_v63  ;;  %6164 = vmatpush1.msra.mxu0 %v5726_v19  ;;  %16652 = vst [vmem:[#allocation34_spill] sm:$0xff] %v12413_v12  ;;  %v5698_v10 = vmul.f32 %v16654_v29, %v16653_v30  ;;  %v4370_v9 = vadd.f32 1.0, %v8657_v54  ;;  %v16655_v63 = vld [vmem:[#allocation189_spill] sm:$0xff]  ;;  %v12427_v56 = vadd.f32 %v16660_v26, %v12046_v5  ;;  %v16665_v29 = vld [vmem:[#allocation47_spill] sm:$0xff] }
 0x324   : > { %v8661_v36 = vpop.eup %8660  ;;  %8686 = vrcp.f32 %v4345_v0  ;;  %6165 = vmatprep.subr.mxu0 %v5713_v61  ;;  %v12419_v49 = vadd.f32 %v16655_v63, %v12035_v4  ;;  %v16658_v0 = vld [vmem:[#allocation49_spill] sm:$0xff]  ;;  %v4372_v61 = vadd.f32 1.0, %v8659_v33  ;;  %v12429_v30 = vpop.f32.mrf.mxu1 }
 0x325   : > { %v8663_v38 = vpop.eup %8662  ;;  %8688 = vrcp.f32 %v4356_v31  ;;  %6166 = vmatpush1.msra.mxu0 %v5712_v17  ;;  %v16659_v47 = vld [vmem:[#allocation101_spill] sm:$0xff]  ;;  %16661 = vst [vmem:[#allocation75_spill] sm:$0xff] %v12427_v56  ;;  %16662 = vst [vmem:[#allocation36_spill] sm:$0xff] %v12429_v30  ;;  %v4371_v12 = vadd.f32 1.0, %v8661_v36  ;;  %v16672_v30 = vld [vmem:[#allocation122_spill] sm:$0xff] }
 0x326   : > { %16656 = vst [vmem:[#allocation93_spill] sm:$0xff] %v12419_v49  ;;  %v12421_v19 = vpop.eup %8664  ;;  %v5685_v15 = vmul.f32 %v16659_v47, %v16658_v0  ;;  %8690 = vrcp.f32 %v4358_v7  ;;  %6167 = vmatprep.subr.mxu0 %v5699_v52  ;;  %v16663_v31 = vld [vmem:[#allocation17_spill] sm:$0xff]  ;;  %v16667_v0 = vld [vmem:[#allocation191_spill] sm:$0xff]  ;;  %v16671_v47 = vld [vmem:[#allocation88_spill] sm:$0xff]  ;;  %v12447_v16 = vadd.f32 %v16672_v30, %v12046_v5  ;;  %v12451_v36 = vpop.f32.mrf.mxu1  ;;  %v7317_v30 = vmul.f32 -1.442695, %v12427_v56 }
 0x327   : > { %16657 = vst [vmem:[#allocation16_spill] sm:$0xff] %v12421_v19  ;;  %2858 = vmatmul.mubr.bf16.gmra.mxu1 %v16663_v31  ;;  %v12432_v54 = vpop.eup %8666  ;;  %v16666_v17 = vld [vmem:[#allocation97_spill] sm:$0xff]  ;;  %8692 = vrcp.f32 %v4357_v51  ;;  %v12438_v7 = vadd.f32 %v16667_v0, %v12035_v4  ;;  %6168 = vmatpush1.msra.mxu0 %v5698_v10  ;;  %v4373_v31 = vadd.f32 1.0, %v8663_v38  ;;  %v12449_v51 = vpop.f32.mrf.mxu0  ;;  %16674 = vst [vmem:[#allocation163_spill] sm:$0xff] %v12451_v36  ;;  %v16676_v10 = vld [vmem:[#allocation43_spill] sm:$0xff] }
 0x328   : > { %16664 = vst [vmem:[#allocation38_spill] sm:$0xff] %v12432_v54  ;;  %v5684_v63 = vmul.f32 %v16666_v17, %v16665_v29  ;;  %2867 = vmatprep.mubr.bf16.mxu1 %v16550_v14  ;;  %v12441_v33 = vpop.eup %8668  ;;  %v16670_v52 = vld [vmem:[#allocation45_spill] sm:$0xff]  ;;  %8694 = vrcp.f32 %v4359_v27  ;;  %16673 = vst [vmem:[#allocation96_spill] sm:$0xff] %v12447_v16  ;;  %6169 = vmatprep.subr.mxu0 %v5685_v15  ;;  %v16677_v17 = vld [vmem:[#allocation84_spill] sm:$0xff]  ;;  %v7316_v19 = vmul.f32 -1.442695, %v12419_v49  ;;  %v12461_v15 = vpop.f32.mrf.mxu1 }
 0x329   : > { %16668 = vst [vmem:[#allocation74_spill] sm:$0xff] %v12438_v7  ;;  %16669 = vst [vmem:[#allocation42_spill] sm:$0xff] %v12441_v33  ;;  %v5671_v26 = vmul.f32 %v16671_v47, %v16670_v52  ;;  %v12453_v29 = vpop.eup %8670  ;;  %v5670_v0 = vmul.f32 %v16677_v17, %v16676_v10  ;;  %8696 = vrcp.f32 %v4370_v9  ;;  %v16678_v38 = vld [vmem:[#allocation41_spill] sm:$0xff]  ;;  %v16681_v54 = vld [vmem:[#allocation39_spill] sm:$0xff]  ;;  %v7330_v9 = vmul.f32 -1.442695, %v12438_v7 }
 0x32a   : > { %16675 = vst [vmem:[#allocation44_spill] sm:$0xff] %v12453_v29  ;;  %6170 = vmatpush1.msra.mxu0 %v5684_v63  ;;  %v8673_v27 = vpop.eup %8672  ;;  %v16679_v52 = vld [vmem:[#allocation73_spill] sm:$0xff]  ;;  %8698 = vrcp.f32 %v4372_v61  ;;  %16680 = vst [vmem:[#allocation161_spill] sm:$0xff] %v12461_v15  ;;  %v7331_v61 = vmul.f32 -1.442695, %v12447_v16  ;;  %v16686_v15 = vld [vmem:[#allocation35_spill] sm:$0xff] }
 0x32b   : > { %v5657_v47 = vmul.f32 %v16679_v52, %v16678_v38  ;;  %6171 = vmatprep.subr.mxu0 %v5671_v26  ;;  %v8675_v36 = vpop.eup %8674  ;;  %v16682_v29 = vld [vmem:[#allocation69_spill] sm:$0xff]  ;;  %8700 = vrcp.f32 %v4371_v12  ;;  %v12469_v38 = vpop.f32.mrf.mxu0  ;;  %v4384_v12 = vadd.f32 1.0, %v8673_v27  ;;  %v16785_v7 = vld [vmem:[#allocation107_spill] sm:$0xff] }
 0x32c   : > { %v5656_v33 = vmul.f32 %v16682_v29, %v16681_v54  ;;  %6172 = vmatpush1.msra.mxu0 %v5670_v0  ;;  %v8677_v10 = vpop.eup %8676  ;;  %v16683_v63 = vld [vmem:[#allocation37_spill] sm:$0xff]  ;;  %8702 = vrcp.f32 %v4373_v31  ;;  %v12471_v26 = vpop.f32.mrf.mxu1  ;;  %v5642_v54 = vmul.f32 %v16687_v8, %v16686_v15  ;;  %v12477_v29 = vadd.f32 %v12274_v35, %v12042_v3  ;;  %v16696_v35 = vld [vmem:[#allocation31_spill] sm:$0xff] }
 0x32d   : > { %v16684_v17 = vld [vmem:[#allocation65_spill] sm:$0xff]  ;;  %6173 = vmatprep.subr.mxu0 %v5657_v47  ;;  %16685 = vst [vmem:[#allocation46_spill] sm:$0xff] %v12471_v26  ;;  %v8679_v52 = vpop.eup %8678  ;;  %8704 = vpow2.f32 %v7316_v19  ;;  %v4386_v55 = vadd.f32 1.0, %v8675_v36  ;;  %v12485_v47 = vadd.f32 %v12312_v46, %v12054_v37  ;;  %v16694_v19 = vld [vmem:[#allocation18_spill] sm:$0xff]  ;;  %v4385_v26 = vadd.f32 1.0, %v8677_v10  ;;  %v12507_v10 = vpop.f32.mrf.mxu0 }
 0x32e   : > { %v5643_v59 = vmul.f32 %v16684_v17, %v16683_v63  ;;  %16688 = vst [vmem:[#allocation160_spill] sm:$0xff] %v12477_v29  ;;  %6174 = vmatpush1.msra.mxu0 %v5656_v33  ;;  %v12479_v0 = vpop.eup %8680  ;;  %v16690_v31 = vld [vmem:[#allocation33_spill] sm:$0xff]  ;;  %8706 = vpow2.f32 %v7317_v30  ;;  %v12487_v8 = vpop.f32.mrf.mxu1  ;;  %v12496_v36 = vadd.f32 %v12336_v39, %v12042_v3  ;;  %v16703_v39 = vld [vmem:[#allocation156_spill] sm:$0xff]  ;;  %v12621_v41 = vadd.f32 %v12507_v10, %v12054_v37 }
 0x32f   : > { %16689 = vst [vmem:[#allocation48_spill] sm:$0xff] %v12479_v0  ;;  %v16691_v63 = vld [vmem:[#allocation61_spill] sm:$0xff]  ;;  %16692 = vst [vmem:[#allocation146_spill] sm:$0xff] %v12485_v47  ;;  %2868 = vmatmul.mubr.bf16.gmra.mxu1 %v16694_v19  ;;  %v12490_v27 = vpop.eup %8682  ;;  %8708 = vpow2.f32 %v7330_v9  ;;  %v7318_v19 = vmul.f32 -1.442695, %v12477_v29 }
 0x330   : > { %v5629_v17 = vmul.f32 %v16691_v63, %v16690_v31  ;;  %6175 = vmatprep.subr.mxu0 %v5643_v59  ;;  %16693 = vst [vmem:[#allocation188_spill] sm:$0xff] %v12487_v8  ;;  %16695 = vst [vmem:[#allocation145_spill] sm:$0xff] %v12490_v27  ;;  %v16697_v33 = vld [vmem:[#allocation57_spill] sm:$0xff]  ;;  %2877 = vmatprep.mubr.bf16.mxu1 %v16550_v14  ;;  %v12499_v46 = vpop.eup %8684  ;;  %v4387_v31 = vadd.f32 1.0, %v8679_v52  ;;  %8710 = vpow2.f32 %v7331_v61 }
 0x331   : > { %v5628_v15 = vmul.f32 %v16697_v33, %v16696_v35  ;;  %16698 = vst [vmem:[#allocation186_spill] sm:$0xff] %v12496_v36  ;;  %6176 = vmatpush1.msra.mxu0 %v5642_v54  ;;  %16699 = vst [vmem:[#allocation100_spill] sm:$0xff] %v12499_v46  ;;  %v16700_v59 = vld [vmem:[#allocation157_spill] sm:$0xff]  ;;  %v12505_v63 = vadd.f32 %v12371_v50, %v12054_v37  ;;  %v12509_v9 = vpop.eup %8686  ;;  %v6062_v54 = vmul.f32 %v12226_v43, %v16703_v39  ;;  %v16707_v50 = vld [vmem:[#allocation154_spill] sm:$0xff] }
 0x332   : > { %v6063_v30 = vmul.f32 %v12236_v44, %v16700_v59  ;;  %6177 = vmatprep.subr.mxu0 %v5629_v17  ;;  %16702 = vst [vmem:[#allocation184_spill] sm:$0xff] %v12509_v9  ;;  %8712 = vrcp.f32 %v4384_v12  ;;  %v16704_v35 = vld [vmem:[#allocation125_spill] sm:$0xff]  ;;  %v12518_v61 = vpop.eup %8688  ;;  %v6049_v52 = vmul.f32 %v12217_v20, %v16707_v50  ;;  %v7319_v17 = vmul.f32 -1.442695, %v12485_v47  ;;  %v16710_v12 = vld [vmem:[#allocation152_spill] sm:$0xff]  ;;  %v16731_v46 = vld [vmem:[#allocation130_spill] sm:$0xff] }
 0x333   : > { %16701 = vst [vmem:[#allocation141_spill] sm:$0xff] %v12505_v63  ;;  %v12516_v44 = vadd.f32 %v16704_v35, %v12035_v4  ;;  %6178 = vmatpush1.msra.mxu0 %v5628_v15  ;;  %16706 = vst [vmem:[#allocation140_spill] sm:$0xff] %v12518_v61  ;;  %8714 = vrcp.f32 %v4386_v55  ;;  %v12525_v33 = vadd.f32 %v12387_v42, %v12042_v3  ;;  %v12527_v43 = vpop.eup %8690  ;;  %v7332_v15 = vmul.f32 -1.442695, %v12496_v36  ;;  %v16711_v39 = vld [vmem:[#allocation196_spill] sm:$0xff] }
 0x334   : > { %6179 = vmatprep.subr.mxu0 %v6063_v30  ;;  %16709 = vst [vmem:[#allocation104_spill] sm:$0xff] %v12527_v43  ;;  %v6048_v59 = vmul.f32 %v12206_v60, %v16710_v12  ;;  %8716 = vrcp.f32 %v4385_v26  ;;  %v12534_v35 = vadd.f32 %v16711_v39, %v12046_v5  ;;  %v12536_v20 = vpop.eup %8692  ;;  %v16714_v55 = vld [vmem:[#allocation148_spill] sm:$0xff]  ;;  %v7333_v30 = vmul.f32 -1.442695, %v12505_v63  ;;  %v12545_v60 = vpop.f32.mrf.mxu0  ;;  %v16717_v12 = vld [vmem:[#allocation143_spill] sm:$0xff] }
 0x335   : > { %16705 = vst [vmem:[#allocation59_spill] sm:$0xff] %v12516_v44  ;;  %16708 = vst [vmem:[#allocation182_spill] sm:$0xff] %v12525_v33  ;;  %6180 = vmatpush2.msra.mxu0 %v6062_v54  ;;  %v6035_v42 = vmul.f32 %v12170_v22, %v16714_v55  ;;  %8718 = vrcp.f32 %v4387_v31  ;;  %v12543_v50 = vadd.f32 %v12399_v57, %v12054_v37  ;;  %v12547_v26 = vpop.eup %8694  ;;  %v7344_v39 = vmul.f32 -1.442695, %v12516_v44  ;;  %v16718_v22 = vld [vmem:[#allocation132_spill] sm:$0xff]  ;;  %v16720_v57 = vld [vmem:[#allocation139_spill] sm:$0xff] }
 0x336   : > { %16712 = vst [vmem:[#allocation114_spill] sm:$0xff] %v12534_v35  ;;  %16713 = vst [vmem:[#allocation172_spill] sm:$0xff] %v12536_v20  ;;  %6181 = vmatprep.subr.mxu0 %v6049_v52  ;;  %v6034_v54 = vmul.f32 %v12161_v25, %v16717_v12  ;;  %8720 = vpow2.f32 %v7318_v19  ;;  %v12554_v31 = vadd.f32 %v16718_v22, %v12035_v4  ;;  %v12556_v55 = vpop.eup %8696  ;;  %v7346_v52 = vmul.f32 -1.442695, %v12525_v33  ;;  %v16723_v19 = vld [vmem:[#allocation147_spill] sm:$0xff]  ;;  %v16724_v22 = vld [vmem:[#allocation136_spill] sm:$0xff] }
 0x337   : > { %16715 = vst [vmem:[#allocation108_spill] sm:$0xff] %v12543_v50  ;;  %16716 = vst [vmem:[#allocation110_spill] sm:$0xff] %v12547_v26  ;;  %6182 = vmatpush2.msra.mxu0 %v6048_v59  ;;  %v6021_v8 = vmul.f32 %v12152_v53, %v16720_v57  ;;  %8722 = vpow2.f32 %v7319_v17  ;;  %v12563_v27 = vadd.f32 %v12411_v24, %v12042_v3  ;;  %v12565_v25 = vpop.eup %8698  ;;  %v7345_v59 = vmul.f32 -1.442695, %v12534_v35  ;;  %v16726_v17 = vld [vmem:[#allocation137_spill] sm:$0xff] }
 0x338   : > { %16719 = vst [vmem:[#allocation169_spill] sm:$0xff] %v12556_v55  ;;  %6183 = vmatprep.subr.mxu0 %v6035_v42  ;;  %16722 = vst [vmem:[#allocation166_spill] sm:$0xff] %v12565_v25  ;;  %v6020_v12 = vmul.f32 %v12144_v62, %v16723_v19  ;;  %8724 = vpow2.f32 %v7332_v15  ;;  %v12572_v9 = vadd.f32 %v16724_v22, %v12046_v5  ;;  %v12574_v53 = vpop.eup %8700  ;;  %v7347_v42 = vmul.f32 -1.442695, %v12543_v50  ;;  %v12583_v62 = vpop.f32.mrf.mxu0  ;;  %v16728_v19 = vld [vmem:[#allocation135_spill] sm:$0xff] }
 0x339   : > { %16721 = vst [vmem:[#allocation106_spill] sm:$0xff] %v12563_v27  ;;  %6184 = vmatpush2.msra.mxu0 %v6034_v54  ;;  %16725 = vst [vmem:[#allocation102_spill] sm:$0xff] %v12574_v53  ;;  %v6007_v24 = vmul.f32 %v12136_v6, %v16726_v17  ;;  %8726 = vpow2.f32 %v7333_v30  ;;  %v12581_v57 = vadd.f32 %v12449_v51, %v12054_v37  ;;  %v12585_v15 = vpop.eup %8702  ;;  %v7358_v22 = vmul.f32 -1.442695, %v12554_v31  ;;  %v16729_v30 = vld [vmem:[#allocation133_spill] sm:$0xff]  ;;  %v16730_v17 = vld [vmem:[#allocation215_spill] sm:$0xff] }
 0x33a   : > { %6185 = vmatprep.subr.mxu0 %v6021_v8  ;;  %16727 = vst [vmem:[#allocation162_spill] sm:$0xff] %v12585_v15  ;;  %v6006_v54 = vmul.f32 %v12129_v18, %v16728_v19  ;;  %8728 = vpow2.f32 %v7344_v39  ;;  %v8705_v6 = vpop.eup %8704  ;;  %v5993_v0 = vmul.f32 %v16730_v17, %v16729_v30  ;;  %v7360_v51 = vmul.f32 -1.442695, %v12563_v27  ;;  %v16732_v8 = vld [vmem:[#allocation212_spill] sm:$0xff]  ;;  %v16733_v39 = vld [vmem:[#allocation126_spill] sm:$0xff]  ;;  %v16734_v19 = vld [vmem:[#allocation209_spill] sm:$0xff]  ;;  %v2270_v30 = vpop.f32.mrf.mxu0 }
 0x33b   : > { %6186 = vmatpush2.msra.mxu0 %v6020_v12  ;;  %8730 = vpow2.f32 %v7346_v52  ;;  %v8707_v43 = vpop.eup %8706  ;;  %v5992_v26 = vmul.f32 %v16732_v8, %v16731_v46  ;;  %v7359_v61 = vmul.f32 -1.442695, %v12572_v9  ;;  %v5979_v12 = vmul.f32 %v16734_v19, %v16733_v39  ;;  %v16735_v17 = vld [vmem:[#allocation124_spill] sm:$0xff]  ;;  %v16739_v8 = vld [vmem:[#allocation123_spill] sm:$0xff]  ;;  %v16740_v39 = vld [vmem:[#allocation150_spill] sm:$0xff] }
 0x33c   : > { %6187 = vmatprep.subr.mxu0 %v6007_v24  ;;  %8732 = vpow2.f32 %v7345_v59  ;;  %v8709_v18 = vpop.eup %8708  ;;  %v7361_v25 = vmul.f32 -1.442695, %v12581_v57  ;;  %v16736_v24 = vld [vmem:[#allocation208_spill] sm:$0xff]  ;;  %v4398_v15 = vadd.f32 1.0, %v8705_v6  ;;  %v4399_v19 = vadd.f32 1.0, %v8707_v43  ;;  %v16744_v6 = vld [vmem:[#allocation121_spill] sm:$0xff] }
 0x33d   : > { %6188 = vmatpush2.msra.mxu0 %v6006_v54  ;;  %8734 = vpow2.f32 %v7347_v42  ;;  %v8711_v52 = vpop.eup %8710  ;;  %v5978_v20 = vmul.f32 %v16736_v24, %v16735_v17  ;;  %v16737_v46 = vld [vmem:[#allocation204_spill] sm:$0xff]  ;;  %v5965_v42 = vmul.f32 %v16740_v39, %v16739_v8  ;;  %v12613_v17 = vpop.f32.mrf.mxu1  ;;  %v16745_v24 = vld [vmem:[#allocation11_spill] sm:$0xff]  ;;  %v16748_v8 = vld [vmem:[#allocation206_spill] sm:$0xff]  ;;  %v7375_v53 = vmul.f32 -1.442695, %v12621_v41 }
 0x33e   : > { %6189 = vmatprep.subr.mxu0 %v5993_v0  ;;  %8736 = vpow2.f32 %v7358_v22  ;;  %v12603_v59 = vadd.f32 %v16737_v46, %v12035_v4  ;;  %v16741_v0 = vld [vmem:[#allocation9_spill] sm:$0xff]  ;;  %16742 = vst [vmem:[#allocation153_spill] sm:$0xff] %v12613_v17  ;;  %v5964_v46 = vmul.f32 %v16745_v24, %v16744_v6  ;;  %v12638_v24 = vadd.f32 %v12545_v60, %v12042_v3  ;;  %v16757_v60 = vld [vmem:[#allocation64_spill] sm:$0xff] }
 0x33f   : > { %6190 = vmatpush2.msra.mxu0 %v5992_v26  ;;  %v12605_v54 = vpop.eup %8712  ;;  %8738 = vpow2.f32 %v7360_v51  ;;  %v12611_v55 = vadd.f32 %v16741_v0, %v12046_v5  ;;  %v4412_v26 = vadd.f32 1.0, %v8709_v18  ;;  %v16747_v51 = vld [vmem:[#allocation118_spill] sm:$0xff]  ;;  %v16752_v6 = vld [vmem:[#allocation205_spill] sm:$0xff]  ;;  %v12705_v47 = vadd.f32 %v16774_v58, %v12035_v4  ;;  %v16779_v58 = vld [vmem:[#allocation119_spill] sm:$0xff] }
 0x340   : > { %16738 = vst [vmem:[#allocation91_spill] sm:$0xff] %v12605_v54  ;;  %6191 = vmatprep.subr.mxu0 %v5979_v12  ;;  %v12615_v22 = vpop.eup %8714  ;;  %8740 = vpow2.f32 %v7359_v61  ;;  %v5951_v39 = vmul.f32 %v16748_v8, %v16747_v51  ;;  %v4413_v12 = vadd.f32 1.0, %v8711_v52  ;;  %v16749_v0 = vld [vmem:[#allocation142_spill] sm:$0xff]  ;;  %v16751_v61 = vld [vmem:[#allocation112_spill] sm:$0xff]  ;;  %v16754_v51 = vld [vmem:[#allocation203_spill] sm:$0xff] }
 0x341   : > { %16743 = vst [vmem:[#allocation90_spill] sm:$0xff] %v12615_v22  ;;  %6192 = vmatpush2.msra.mxu0 %v5978_v20  ;;  %v12623_v43 = vpop.eup %8716  ;;  %8742 = vpow2.f32 %v7361_v25  ;;  %v12629_v17 = vadd.f32 %v16749_v0, %v12035_v4  ;;  %v2272_v22 = vpop.f32.mrf.mxu0  ;;  %v5950_v10 = vmul.f32 %v16752_v6, %v16751_v61  ;;  %v7372_v20 = vmul.f32 -1.442695, %v12603_v59  ;;  %v16753_v52 = vld [vmem:[#allocation62_spill] sm:$0xff]  ;;  %v16755_v0 = vld [vmem:[#allocation155_spill] sm:$0xff] }
 0x342   : > { %16746 = vst [vmem:[#allocation151_spill] sm:$0xff] %v12623_v43  ;;  %6193 = vmatprep.subr.mxu0 %v5965_v42  ;;  %v12631_v18 = vpop.eup %8718  ;;  %8744 = vrcp.f32 %v4398_v15  ;;  %v5937_v8 = vmul.f32 %v16754_v51, %v16753_v52  ;;  %v7373_v42 = vmul.f32 -1.442695, %v12611_v55  ;;  %v12647_v11 = vadd.f32 %v16755_v0, %v12046_v5  ;;  %v12649_v15 = vpop.f32.mrf.mxu1  ;;  %v16758_v6 = vld [vmem:[#allocation202_spill] sm:$0xff]  ;;  %v16759_v51 = vld [vmem:[#allocation95_spill] sm:$0xff]  ;;  %v16760_v0 = vld [vmem:[#allocation201_spill] sm:$0xff] }
 0x343   : > { %16750 = vst [vmem:[#allocation87_spill] sm:$0xff] %v12631_v18  ;;  %6194 = vmatpush2.msra.mxu0 %v5964_v46  ;;  %v12640_v25 = vpop.eup %8720  ;;  %8746 = vrcp.f32 %v4399_v19  ;;  %16756 = vst [vmem:[#allocation149_spill] sm:$0xff] %v12649_v15  ;;  %v5936_v46 = vmul.f32 %v16758_v6, %v16757_v60  ;;  %v12658_v19 = vadd.f32 %v12583_v62, %v12054_v37  ;;  %v16761_v15 = vld [vmem:[#allocation10_spill] sm:$0xff]  ;;  %v16763_v62 = vld [vmem:[#allocation40_spill] sm:$0xff]  ;;  %v7388_v54 = vmul.f32 -1.442695, %v12638_v24 }
 0x344   : > { %6195 = vmatprep.subr.mxu0 %v5951_v39  ;;  %v12651_v61 = vpop.eup %8722  ;;  %8748 = vrcp.f32 %v4412_v26  ;;  %v5923_v32 = vmul.f32 %v16760_v0, %v16759_v51  ;;  %v7386_v39 = vmul.f32 -1.442695, %v12629_v17  ;;  %v12667_v18 = vadd.f32 %v16761_v15, %v12035_v4  ;;  %v2274_v26 = vpop.f32.mrf.mxu0  ;;  %v16765_v15 = vld [vmem:[#allocation86_spill] sm:$0xff] }
 0x345   : > { %6196 = vmatpush2.msra.mxu0 %v5950_v10  ;;  %v12660_v52 = vpop.eup %8724  ;;  %8750 = vrcp.f32 %v4413_v12  ;;  %v12669_v60 = vpop.f32.mrf.mxu1  ;;  %v16764_v10 = vld [vmem:[#allocation199_spill] sm:$0xff]  ;;  %v12677_v12 = vadd.f32 %v2270_v30, %v12042_v3  ;;  %v16766_v0 = vld [vmem:[#allocation198_spill] sm:$0xff] }
 0x346   : > { %16762 = vst [vmem:[#allocation83_spill] sm:$0xff] %v12669_v60  ;;  %6197 = vmatprep.subr.mxu0 %v5937_v8  ;;  %v12671_v6 = vpop.eup %8726  ;;  %v5922_v48 = vmul.f32 %v16764_v10, %v16763_v62  ;;  %8752 = vpow2.f32 %v7372_v20  ;;  %v5909_v21 = vmul.f32 %v16766_v0, %v16765_v15  ;;  %v7387_v8 = vmul.f32 -1.442695, %v12647_v11  ;;  %v16767_v60 = vld [vmem:[#allocation138_spill] sm:$0xff]  ;;  %v16769_v20 = vld [vmem:[#allocation19_spill] sm:$0xff] }
 0x347   : > { %6198 = vmatpush2.msra.mxu0 %v5936_v46  ;;  %v12679_v51 = vpop.eup %8728  ;;  %8754 = vpow2.f32 %v7373_v42  ;;  %v12686_v29 = vadd.f32 %v16767_v60, %v12046_v5  ;;  %v12688_v62 = vpop.f32.mrf.mxu1  ;;  %2878 = vmatmul.mubr.bf16.gmra.mxu1 %v16769_v20  ;;  %v16770_v46 = vld [vmem:[#allocation98_spill] sm:$0xff]  ;;  %v16771_v10 = vld [vmem:[#allocation195_spill] sm:$0xff]  ;;  %v7389_v15 = vmul.f32 -1.442695, %v12658_v19  ;;  %v12697_v42 = vadd.f32 %v2272_v22, %v12054_v37 }
 0x348   : > { %16768 = vst [vmem:[#allocation144_spill] sm:$0xff] %v12688_v62  ;;  %6199 = vmatprep.subr.mxu0 %v5923_v32  ;;  %v12691_v30 = vpop.eup %8730  ;;  %v5908_v43 = vmul.f32 %v16771_v10, %v16770_v46  ;;  %8756 = vpow2.f32 %v7375_v53  ;;  %2887 = vmatprep.mubr.bf16.mxu1 %v16550_v14  ;;  %v16772_v0 = vld [vmem:[#allocation187_spill] sm:$0xff]  ;;  %v16773_v62 = vld [vmem:[#allocation194_spill] sm:$0xff]  ;;  %v7400_v20 = vmul.f32 -1.442695, %v12667_v18  ;;  %v2276_v53 = vpop.f32.mrf.mxu0  ;;  %v16777_v10 = vld [vmem:[#allocation192_spill] sm:$0xff] }
 0x349   : > { %6200 = vmatpush2.msra.mxu0 %v5922_v48  ;;  %v8733_v60 = vpop.eup %8732  ;;  %v5895_v32 = vmul.f32 %v16773_v62, %v16772_v0  ;;  %8758 = vpow2.f32 %v7386_v39  ;;  %v12707_v46 = vpop.f32.mrf.mxu1  ;;  %v16776_v48 = vld [vmem:[#allocation183_spill] sm:$0xff]  ;;  %v7402_v36 = vmul.f32 -1.442695, %v12677_v12  ;;  %v12715_v39 = vadd.f32 %v2274_v26, %v12042_v3  ;;  %v16778_v0 = vld [vmem:[#allocation180_spill] sm:$0xff] }
 0x34a   : > { %16775 = vst [vmem:[#allocation72_spill] sm:$0xff] %v12707_v46  ;;  %6201 = vmatprep.subr.mxu0 %v5909_v21  ;;  %v12709_v22 = vpop.eup %8734  ;;  %v5894_v49 = vmul.f32 %v16777_v10, %v16776_v48  ;;  %8760 = vpow2.f32 %v7388_v54  ;;  %v5881_v56 = vmul.f32 %v16779_v58, %v16778_v0  ;;  %v7401_v46 = vmul.f32 -1.442695, %v12686_v29  ;;  %v16780_v21 = vld [vmem:[#allocation210_spill] sm:$0xff]  ;;  %v16783_v26 = vld [vmem:[#allocation115_spill] sm:$0xff]  ;;  %v12741_v28 = vpop.f32.mrf.mxu0 }
 0x34b   : > { %6202 = vmatpush2.msra.mxu0 %v5908_v43  ;;  %v8737_v62 = vpop.eup %8736  ;;  %8762 = vpow2.f32 %v7387_v8  ;;  %v12722_v23 = vadd.f32 %v16780_v21, %v12046_v5  ;;  %v12724_v63 = vpop.f32.mrf.mxu1  ;;  %v16782_v48 = vld [vmem:[#allocation178_spill] sm:$0xff]  ;;  %v7403_v43 = vmul.f32 -1.442695, %v12697_v42  ;;  %v12732_v0 = vadd.f32 %v2276_v53, %v12054_v37  ;;  %v16784_v58 = vld [vmem:[#allocation175_spill] sm:$0xff]  ;;  %v16787_v53 = vld [vmem:[#allocation80_spill] sm:$0xff] }
 0x34c   : > { %16781 = vst [vmem:[#allocation131_spill] sm:$0xff] %v12724_v63  ;;  %6203 = vmatprep.subr.mxu0 %v5895_v32  ;;  %v12726_v54 = vpop.eup %8738  ;;  %v5880_v10 = vmul.f32 %v16783_v26, %v16782_v48  ;;  %8764 = vpow2.f32 %v7389_v15  ;;  %v5867_v21 = vmul.f32 %v16785_v7, %v16784_v58  ;;  %v12738_v63 = vadd.f32 %v12469_v38, %v12042_v3  ;;  %v16790_v38 = vld [vmem:[#allocation78_spill] sm:$0xff] }
 0x34d   : > { %6204 = vmatpush2.msra.mxu0 %v5894_v49  ;;  %v8741_v8 = vpop.eup %8740  ;;  %8766 = vpow2.f32 %v7400_v20  ;;  %v7414_v32 = vmul.f32 -1.442695, %v12705_v47  ;;  %v12743_v15 = vpop.f32.mrf.mxu1  ;;  %v16788_v49 = vld [vmem:[#allocation30_spill] sm:$0xff]  ;;  %v7416_v7 = vmul.f32 -1.442695, %v12715_v39  ;;  %v16791_v20 = vld [vmem:[#allocation32_spill] sm:$0xff] }
 0x34e   : > { %16786 = vst [vmem:[#allocation68_spill] sm:$0xff] %v12743_v15  ;;  %6205 = vmatprep.subr.mxu0 %v5881_v56  ;;  %v12745_v48 = vpop.eup %8742  ;;  %v5866_v26 = vmul.f32 %v16788_v49, %v16787_v53  ;;  %8768 = vpow2.f32 %v7402_v36  ;;  %v5853_v33 = vmul.f32 %v16791_v20, %v16790_v38  ;;  %v7415_v16 = vmul.f32 -1.442695, %v12722_v23  ;;  %v16793_v56 = vld [vmem:[#allocation20_spill] sm:$0xff]  ;;  %v16796_v36 = vld [vmem:[#allocation99_spill] sm:$0xff]  ;;  %v12767_v20 = vpop.f32.mrf.mxu0 }
 0x34f   : > { %6206 = vmatpush2.msra.mxu0 %v5880_v10  ;;  %v12750_v58 = vpop.eup %8744  ;;  %8770 = vpow2.f32 %v7401_v46  ;;  %v12755_v34 = vpop.f32.mrf.mxu1  ;;  %2888 = vmatmul.mubr.bf16.gmra.mxu1 %v16793_v56  ;;  %v16795_v53 = vld [vmem:[#allocation76_spill] sm:$0xff]  ;;  %v7417_v10 = vmul.f32 -1.442695, %v12732_v0  ;;  %v7374_v46 = vmul.f32 -1.442695, %v12738_v63  ;;  %v4426_v56 = vadd.f32 1.0, %v12679_v51 }
 0x350   : > { %16789 = vst [vmem:[#allocation128_spill] sm:$0xff] %v12750_v58  ;;  %16792 = vst [vmem:[#allocation60_spill] sm:$0xff] %v12755_v34  ;;  %6207 = vmatprep.subr.mxu0 %v5867_v21  ;;  %v12758_v15 = vpop.eup %8746  ;;  %v5852_v49 = vmul.f32 %v16796_v36, %v16795_v53  ;;  %8772 = vpow2.f32 %v7403_v43  ;;  %2897 = vmatprep.mubr.bf16.mxu1 %v16550_v14  ;;  %v4427_v53 = vadd.f32 1.0, %v8733_v60  ;;  %v4440_v36 = vadd.f32 1.0, %v8737_v62 }
 0x351   : > { %16794 = vst [vmem:[#allocation117_spill] sm:$0xff] %v12758_v15  ;;  %6208 = vmatpush2.msra.mxu0 %v5866_v26  ;;  %v12764_v38 = vpop.eup %8748  ;;  %8774 = vpow2.f32 %v7414_v32  ;;  %v4441_v34 = vadd.f32 1.0, %v8741_v8 }
 0x352   : > { %16797 = vst [vmem:[#allocation56_spill] sm:$0xff] %v12764_v38  ;;  %6209 = vmatprep.subr.mxu0 %v5853_v33  ;;  %v12769_v21 = vpop.eup %8750  ;;  %8776 = vpow2.f32 %v7416_v7  ;;  %v12774_v33 = vpop.f32.mrf.mxu0 }
 0x353   : > { %16798 = vst [vmem:[#allocation113_spill] sm:$0xff] %v12769_v21  ;;  %6210 = vmatpush2.msra.mxu0 %v5852_v49  ;;  %v8753_v43 = vpop.eup %8752  ;;  %8778 = vpow2.f32 %v7415_v16 }
 0x354   : > { %6212 = vmatmul.mubr.f32.vlgmr.msra.gmra.mxu0 %v16598_v1  ;;  %v8755_v26 = vpop.eup %8754  ;;  %8780 = vpow2.f32 %v7417_v10  ;;  %v4454_v51 = vadd.f32 1.0, %v8753_v43  ;;  %v12776_v10 = vpop.f32.mrf.mxu0 }
 0x355   : > { %6353 = vmatprep.mubr.f32.mxu0 %v16598_v1  ;;  %v8757_v32 = vpop.eup %8756  ;;  %8782 = vpow2.f32 %v7374_v46  ;;  %v4455_v49 = vadd.f32 1.0, %v8755_v26 }
 0x356   : > { %v8759_v58 = vpop.eup %8758  ;;  %8784 = vrcp.f32 %v4426_v56 }
 0x357   : > { %v8761_v7 = vpop.eup %8760  ;;  %8786 = vrcp.f32 %v4427_v53  ;;  %v4468_v16 = vadd.f32 1.0, %v8759_v58  ;;  %v12778_v53 = vpop.f32.mrf.mxu0 }
 0x358   : > { %v8763_v60 = vpop.eup %8762  ;;  %8788 = vrcp.f32 %v4440_v36 }
 0x359   : > { %v8765_v15 = vpop.eup %8764  ;;  %8790 = vrcp.f32 %v4441_v34  ;;  %v4469_v62 = vadd.f32 1.0, %v8763_v60  ;;  %v12780_v60 = vpop.f32.mrf.mxu1 }
 0x35a   : > { %v8767_v1 = vpop.eup %8766  ;;  %8792 = vrcp.f32 %v4454_v51  ;;  %16799 = vst [vmem:[#allocation53_spill] sm:$0xff] %v12780_v60  ;;  %v12782_v50 = vpop.f32.mrf.mxu0  ;;  %v12849_v60 = vadd.f32 %v12774_v33, %v12042_v3 }
 0x35b   : > { %v8769_v8 = vpop.eup %8768  ;;  %8794 = vrcp.f32 %v4455_v49  ;;  %v4482_v46 = vadd.f32 1.0, %v8767_v1 }
 0x35c   : > { %v8771_v38 = vpop.eup %8770  ;;  %8796 = vrcp.f32 %v4468_v16  ;;  %v4484_v1 = vadd.f32 1.0, %v8769_v8  ;;  %v4457_v8 = vadd.f32 1.0, %v8757_v32  ;;  %16817 = vst [vmem:[#allocation122_spill] sm:$0xff] %v12849_v60  ;;  %v12886_v27 = vmul.f32 -1.442695, %v12849_v60 }
 0x35d   : > { %v8773_v56 = vpop.eup %8772  ;;  %8798 = vrcp.f32 %v4469_v62  ;;  %v4483_v43 = vadd.f32 1.0, %v8771_v38  ;;  %v4471_v62 = vadd.f32 1.0, %v8765_v15  ;;  %v16806_v15 = vld [vmem:[#allocation214_spill] sm:$0xff] }
 0x35e   : > { %v8775_v26 = vpop.eup %8774  ;;  %8800 = vrcp.f32 %v4482_v46  ;;  %v4485_v58 = vadd.f32 1.0, %v8773_v56  ;;  %v4470_v56 = vadd.f32 1.0, %v8761_v7  ;;  %16829 = vst [vmem:[#allocation35_spill] sm:$0xff] %v12886_v27  ;;  %v16835_v27 = vld [vmem:[#allocation220_spill] sm:$0xff] }
 0x35f   : > { %v8777_v36 = vpop.eup %8776  ;;  %8802 = vrcp.f32 %v4483_v43  ;;  %v4496_v34 = vadd.f32 1.0, %v8775_v26  ;;  %v16801_v43 = vld [vmem:[#allocation12_spill] sm:$0xff] }
 0x360   : > { %v8779_v21 = vpop.eup %8778  ;;  %8804 = vrcp.f32 %v4485_v58  ;;  %v4498_v51 = vadd.f32 1.0, %v8777_v36  ;;  %v12788_v26 = vadd.f32 %v16801_v43, %v12035_v4  ;;  %v12790_v58 = vpop.f32.mrf.mxu1 }
 0x361   : > { %v8781_v49 = vpop.eup %8780  ;;  %8806 = vrcp.f32 %v4496_v34  ;;  %v4497_v16 = vadd.f32 1.0, %v8779_v21  ;;  %16803 = vst [vmem:[#allocation105_spill] sm:$0xff] %v12790_v58  ;;  %v12796_v21 = vadd.f32 %v12741_v28, %v12042_v3  ;;  %v12800_v34 = vadd.f32 %v16806_v15, %v12046_v5 }
 0x362   : > { %v8783_v38 = vpop.eup %8782  ;;  %8808 = vrcp.f32 %v4498_v51  ;;  %v4499_v44 = vadd.f32 1.0, %v8781_v49  ;;  %16802 = vst [vmem:[#allocation51_spill] sm:$0xff] %v12788_v26  ;;  %v12806_v49 = vadd.f32 %v12767_v20, %v12054_v37  ;;  %v12808_v43 = vpop.f32.mrf.mxu1  ;;  %v4443_v28 = vadd.f32 1.0, %v12745_v48  ;;  %v16811_v20 = vld [vmem:[#allocation21_spill] sm:$0xff] }
 0x363   : > { %v12784_v46 = vpop.eup %8784  ;;  %8810 = vrcp.f32 %v4497_v16  ;;  %16805 = vst [vmem:[#allocation49_spill] sm:$0xff] %v12796_v21  ;;  %16807 = vst [vmem:[#allocation101_spill] sm:$0xff] %v12800_v34  ;;  %v4456_v51 = vadd.f32 1.0, %v8783_v38  ;;  %v2294_v16 = vpop.f32.mrf.mxu0  ;;  %v4442_v15 = vadd.f32 1.0, %v12726_v54  ;;  %v12817_v38 = vmul.f32 -1.442695, %v12788_v26 }
 0x364   : > { %16800 = vst [vmem:[#allocation109_spill] sm:$0xff] %v12784_v46  ;;  %v12792_v36 = vpop.eup %8786  ;;  %8812 = vrcp.f32 %v4499_v44  ;;  %16808 = vst [vmem:[#allocation190_spill] sm:$0xff] %v12806_v49  ;;  %v12826_v48 = vmul.f32 -1.442695, %v12796_v21  ;;  %v16814_v26 = vld [vmem:[#allocation216_spill] sm:$0xff]  ;;  %v4400_v46 = vadd.f32 1.0, %v12640_v25  ;;  %v12896_v35 = vadd.f32 %v2294_v16, %v12042_v3 }
 0x365   : > { %16804 = vst [vmem:[#allocation189_spill] sm:$0xff] %v12792_v36  ;;  %v12802_v7 = vpop.eup %8788  ;;  %8814 = vrcp.f32 %v4484_v1  ;;  %16809 = vst [vmem:[#allocation17_spill] sm:$0xff] %v12808_v43  ;;  %v12819_v1 = vpop.f32.mrf.mxu1  ;;  %2898 = vmatmul.mubr.bf16.gmra.mxu1 %v16811_v20  ;;  %v4429_v43 = vadd.f32 1.0, %v12709_v22  ;;  %v12836_v20 = vmul.f32 -1.442695, %v12806_v49  ;;  %v12840_v22 = vadd.f32 %v16814_v26, %v12035_v4  ;;  %v16830_v25 = vld [vmem:[#allocation219_spill] sm:$0xff] }
 0x366   : > { %v12810_v44 = vpop.eup %8790  ;;  %8816 = vrcp.f32 %v4471_v62  ;;  %16810 = vst [vmem:[#allocation47_spill] sm:$0xff] %v12819_v1  ;;  %16812 = vst [vmem:[#allocation97_spill] sm:$0xff] %v12826_v48  ;;  %v12829_v62 = vmul.f32 -1.442695, %v12800_v34  ;;  %2907 = vmatprep.mubr.bf16.mxu1 %v16550_v14  ;;  %v4415_v34 = vadd.f32 1.0, %v12671_v6  ;;  %v4414_v26 = vadd.f32 1.0, %v12660_v52 }
 0x367   : > { %v12813_v32 = vpop.eup %8792  ;;  %8818 = vrcp.f32 %v4470_v56  ;;  %v4428_v56 = vadd.f32 1.0, %v12691_v30  ;;  %16813 = vst [vmem:[#allocation191_spill] sm:$0xff] %v12836_v20  ;;  %16815 = vst [vmem:[#allocation45_spill] sm:$0xff] %v12840_v22  ;;  %v12842_v21 = vpop.f32.mrf.mxu1  ;;  %v16818_v30 = vld [vmem:[#allocation217_spill] sm:$0xff]  ;;  %v16821_v20 = vld [vmem:[#allocation158_spill] sm:$0xff]  ;;  %v4401_v48 = vadd.f32 1.0, %v12651_v61 }
 0x368   : > { %v12822_v58 = vpop.eup %8794  ;;  %8820 = vrcp.f32 %v4457_v8  ;;  %v2296_v8 = vpop.f32.mrf.mxu0  ;;  %16816 = vst [vmem:[#allocation88_spill] sm:$0xff] %v12842_v21  ;;  %v12858_v21 = vadd.f32 %v12776_v10, %v12054_v37  ;;  %v12862_v6 = vadd.f32 %v16821_v20, %v12035_v4  ;;  %v16825_v52 = vld [vmem:[#allocation218_spill] sm:$0xff]  ;;  %v7442_v20 = vmul.f32 -1.442695, %v12840_v22  ;;  %16832 = vst [vmem:[#allocation33_spill] sm:$0xff] %v12896_v35 }
 0x369   : > { %v12832_v54 = vpop.eup %8796  ;;  %8822 = vrcp.f32 %v4456_v51  ;;  %v12853_v51 = vadd.f32 %v16818_v30, %v12046_v5  ;;  %v12869_v30 = vadd.f32 %v12778_v53, %v12042_v3 }
 0x36a   : > { %v12844_v1 = vpop.eup %8798  ;;  %8824 = vrcp.f32 %v4443_v28  ;;  %16820 = vst [vmem:[#allocation84_spill] sm:$0xff] %v12858_v21  ;;  %16822 = vst [vmem:[#allocation41_spill] sm:$0xff] %v12862_v6  ;;  %v12864_v28 = vpop.f32.mrf.mxu1  ;;  %v7456_v36 = vmul.f32 -1.442695, %v12862_v6 }
 0x36b   : > { %16819 = vst [vmem:[#allocation43_spill] sm:$0xff] %v12853_v51  ;;  %v8801_v49 = vpop.eup %8800  ;;  %8826 = vrcp.f32 %v4442_v15  ;;  %16823 = vst [vmem:[#allocation73_spill] sm:$0xff] %v12864_v28  ;;  %v12873_v15 = vadd.f32 %v16825_v52, %v12046_v5  ;;  %v12879_v28 = vadd.f32 %v12782_v50, %v12054_v37  ;;  %v12881_v61 = vpop.f32.mrf.mxu0  ;;  %v7443_v52 = vmul.f32 -1.442695, %v12853_v51 }
 0x36c   : > { %v8803_v33 = vpop.eup %8802  ;;  %8828 = vrcp.f32 %v4429_v43  ;;  %16824 = vst [vmem:[#allocation39_spill] sm:$0xff] %v12869_v30  ;;  %v12883_v43 = vpop.f32.mrf.mxu1  ;;  %v7445_v50 = vmul.f32 -1.442695, %v12858_v21  ;;  %v7458_v51 = vmul.f32 -1.442695, %v12869_v30 }
 0x36d   : > { %16826 = vst [vmem:[#allocation69_spill] sm:$0xff] %v12873_v15  ;;  %v8805_v10 = vpop.eup %8804  ;;  %8830 = vrcp.f32 %v4428_v56  ;;  %16827 = vst [vmem:[#allocation37_spill] sm:$0xff] %v12879_v28  ;;  %v12891_v56 = vadd.f32 %v16830_v25, %v12035_v4  ;;  %v7457_v25 = vmul.f32 -1.442695, %v12873_v15  ;;  %v7459_v6 = vmul.f32 -1.442695, %v12879_v28 }
 0x36e   : > { %16828 = vst [vmem:[#allocation65_spill] sm:$0xff] %v12883_v43  ;;  %v8807_v53 = vpop.eup %8806  ;;  %8832 = vrcp.f32 %v4415_v34  ;;  %v12898_v43 = vpop.f32.mrf.mxu1  ;;  %v16834_v34 = vld [vmem:[#allocation22_spill] sm:$0xff] }
 0x36f   : > { %16831 = vst [vmem:[#allocation63_spill] sm:$0xff] %v12891_v56  ;;  %v8809_v22 = vpop.eup %8808  ;;  %8834 = vrcp.f32 %v4414_v26  ;;  %16833 = vst [vmem:[#allocation61_spill] sm:$0xff] %v12898_v43  ;;  %2908 = vmatmul.mubr.bf16.gmra.mxu1 %v16834_v34  ;;  %v12905_v26 = vadd.f32 %v16835_v27, %v12046_v5  ;;  %v12911_v34 = vadd.f32 %v2296_v8, %v12054_v37  ;;  %v12919_v27 = vmul.f32 -1.442695, %v12891_v56 }
 0x370   : > { %v8811_v60 = vpop.eup %8810  ;;  %8836 = vrcp.f32 %v4401_v48  ;;  %2917 = vmatprep.mubr.bf16.mxu1 %v16550_v14  ;;  %v12913_v48 = vpop.f32.mrf.mxu0  ;;  %v5840_v15 = vmul.f32 %v8807_v53, %v12705_v47  ;;  %v12925_v8 = vmul.f32 -1.442695, %v12896_v35  ;;  %v5826_v47 = vmul.f32 %v8801_v49, %v12667_v18  ;;  %v16996_v35 = vld [vmem:[#allocation161_spill] sm:$0xff] }
 0x371   : > { %16836 = vst [vmem:[#allocation18_spill] sm:$0xff] %v12905_v26  ;;  %v8813_v21 = vpop.eup %8812  ;;  %8838 = vrcp.f32 %v4400_v46  ;;  %v5841_v16 = vmul.f32 %v8811_v60, %v12722_v23  ;;  %16837 = vst [vmem:[#allocation31_spill] sm:$0xff] %v12911_v34  ;;  %v5827_v23 = vmul.f32 %v8803_v33, %v12686_v29  ;;  %v5842_v60 = vmul.f32 %v8809_v22, %v12715_v39 }
 0x372   : > { %v8815_v30 = vpop.eup %8814  ;;  %v5843_v43 = vmul.f32 %v8813_v21, %v12732_v0  ;;  %8840 = vpow2.f32 %v12817_v38  ;;  %v5829_v0 = vmul.f32 %v8805_v10, %v12697_v42  ;;  %v12930_v21 = vmul.f32 -1.442695, %v12905_v26  ;;  %v12938_v22 = vpop.f32.mrf.mxu0  ;;  %v16845_v10 = vld [vmem:[#allocation108_spill] sm:$0xff] }
 0x373   : > { %v8817_v46 = vpop.eup %8816  ;;  %8842 = vpow2.f32 %v12829_v62  ;;  %6218 = vmatprep.subr.mxu1 %v5841_v16  ;;  %v5813_v39 = vmul.f32 %v12844_v1, %v12647_v11  ;;  %v5828_v38 = vmul.f32 %v8815_v30, %v12677_v12  ;;  %v12936_v62 = vmul.f32 -1.442695, %v12911_v34  ;;  %v16850_v16 = vld [vmem:[#allocation182_spill] sm:$0xff] }
 0x374   : > { %v8819_v28 = vpop.eup %8818  ;;  %8844 = vpow2.f32 %v7442_v20  ;;  %6219 = vmatpush1.msra.mxu1 %v5840_v15  ;;  %6289 = vmatprep.subr.mxu0 %v5843_v43  ;;  %v5812_v42 = vmul.f32 %v12832_v54, %v12629_v17  ;;  %v5815_v49 = vmul.f32 %v8817_v46, %v12658_v19  ;;  %v12945_v11 = vadd.f32 %v12181_v2, %v12035_v4  ;;  %v17000_v34 = vld [vmem:[#allocation46_spill] sm:$0xff] }
 0x375   : > { %v8821_v29 = vpop.eup %8820  ;;  %8846 = vpow2.f32 %v7443_v52  ;;  %6220 = vmatprep.subr.mxu1 %v5827_v23  ;;  %6290 = vmatpush1.msra.mxu0 %v5842_v60  ;;  %v4330_v1 = vadd.f32 1.0, %v12285_v13  ;;  %v5799_v33 = vmul.f32 %v12822_v58, %v12611_v55  ;;  %v5814_v30 = vmul.f32 %v8819_v28, %v12638_v24  ;;  %v12959_v58 = vpop.f32.mrf.mxu0  ;;  %v16848_v52 = vld [vmem:[#allocation96_spill] sm:$0xff] }
 0x376   : > { %v8823_v18 = vpop.eup %8822  ;;  %8848 = vpow2.f32 %v7445_v50  ;;  %16838 = vst [vmem:[#allocation57_spill] sm:$0xff] %v12945_v11  ;;  %6221 = vmatpush1.msra.mxu1 %v5826_v47  ;;  %6291 = vmatprep.subr.mxu0 %v5829_v0  ;;  %v4317_v19 = vadd.f32 1.0, %v12265_v45  ;;  %v5798_v2 = vmul.f32 %v12813_v32, %v12603_v59  ;;  %v5801_v54 = vmul.f32 %v8821_v29, %v12621_v41  ;;  %v16842_v32 = vld [vmem:[#allocation106_spill] sm:$0xff]  ;;  %v16849_v50 = vld [vmem:[#allocation113_spill] sm:$0xff]  ;;  %v16853_v29 = vld [vmem:[#allocation120_spill] sm:$0xff] }
 0x377   : > { %v8825_v12 = vpop.eup %8824  ;;  %8850 = vpow2.f32 %v7456_v36  ;;  %6222 = vmatprep.subr.mxu1 %v5813_v39  ;;  %6292 = vmatpush1.msra.mxu0 %v5828_v38  ;;  %v4316_v15 = vadd.f32 1.0, %v12245_v40  ;;  %v5785_v55 = vmul.f32 %v12810_v44, %v12572_v9  ;;  %v5800_v24 = vmul.f32 %v8823_v18, %v12738_v63  ;;  %v16840_v63 = vld [vmem:[#allocation114_spill] sm:$0xff]  ;;  %v16841_v36 = vld [vmem:[#allocation189_spill] sm:$0xff]  ;;  %v12988_v60 = vpop.f32.mrf.mxu0  ;;  %v16855_v18 = vld [vmem:[#allocation56_spill] sm:$0xff] }
 0x378   : > { %v8827_v17 = vpop.eup %8826  ;;  %8852 = vpow2.f32 %v7458_v51  ;;  %6223 = vmatpush1.msra.mxu1 %v5812_v42  ;;  %6293 = vmatprep.subr.mxu0 %v5815_v49  ;;  %v5784_v41 = vmul.f32 %v12802_v7, %v12554_v31  ;;  %v5787_v59 = vmul.f32 %v8825_v12, %v12581_v57  ;;  %v12966_v40 = vadd.f32 %v12881_v61, %v12042_v3  ;;  %v16843_v57 = vld [vmem:[#allocation59_spill] sm:$0xff]  ;;  %v16844_v7 = vld [vmem:[#allocation109_spill] sm:$0xff]  ;;  %v16846_v61 = vld [vmem:[#allocation226_spill] sm:$0xff] }
 0x379   : > { %v8829_v13 = vpop.eup %8828  ;;  %8854 = vpow2.f32 %v7457_v25  ;;  %6224 = vmatprep.subr.mxu1 %v5799_v33  ;;  %6294 = vmatpush1.msra.mxu0 %v5814_v30  ;;  %v5771_v44 = vmul.f32 %v16841_v36, %v16840_v63  ;;  %v5786_v51 = vmul.f32 %v8827_v17, %v16842_v32  ;;  %v12972_v28 = vmul.f32 -1.442695, %v12945_v11  ;;  %v16852_v0 = vld [vmem:[#allocation13_spill] sm:$0xff]  ;;  %v16854_v38 = vld [vmem:[#allocation74_spill] sm:$0xff]  ;;  %v16857_v33 = vld [vmem:[#allocation164_spill] sm:$0xff] }
 0x37a   : > { %v8831_v45 = vpop.eup %8830  ;;  %8856 = vpow2.f32 %v7459_v6  ;;  %16839 = vst [vmem:[#allocation157_spill] sm:$0xff] %v12966_v40  ;;  %6225 = vmatpush1.msra.mxu1 %v5798_v2  ;;  %6295 = vmatprep.subr.mxu0 %v5801_v54  ;;  %v5770_v6 = vmul.f32 %v16844_v7, %v16843_v57  ;;  %v5773_v20 = vmul.f32 %v8829_v13, %v16845_v10  ;;  %v16856_v49 = vld [vmem:[#allocation141_spill] sm:$0xff]  ;;  %v16858_v30 = vld [vmem:[#allocation179_spill] sm:$0xff]  ;;  %v16861_v13 = vld [vmem:[#allocation186_spill] sm:$0xff] }
 0x37b   : > { %v8833_v9 = vpop.eup %8832  ;;  %8858 = vrcp.f32 %v4330_v1  ;;  %6226 = vmatprep.subr.mxu1 %v5785_v55  ;;  %6296 = vmatpush1.msra.mxu0 %v5800_v24  ;;  %v12979_v43 = vadd.f32 %v16846_v61, %v12046_v5  ;;  %v5757_v25 = vmul.f32 %v16849_v50, %v16848_v52  ;;  %v5772_v46 = vmul.f32 %v8831_v45, %v16850_v16  ;;  %v16860_v2 = vld [vmem:[#allocation117_spill] sm:$0xff]  ;;  %v13008_v24 = vpop.f32.mrf.mxu1  ;;  %v16866_v63 = vld [vmem:[#allocation146_spill] sm:$0xff]  ;;  %v16869_v57 = vld [vmem:[#allocation151_spill] sm:$0xff] }
 0x37c   : > { %v8835_v31 = vpop.eup %8834  ;;  %8860 = vrcp.f32 %v4317_v19  ;;  %6227 = vmatpush1.msra.mxu1 %v5784_v41  ;;  %6297 = vmatprep.subr.mxu0 %v5787_v59  ;;  %v12986_v23 = vadd.f32 %v12913_v48, %v12054_v37  ;;  %v12992_v39 = vmul.f32 %v16853_v29, %v16852_v0  ;;  %v5756_v42 = vmul.f32 %v16855_v18, %v16854_v38  ;;  %v16859_v19 = vld [vmem:[#allocation75_spill] sm:$0xff]  ;;  %v16862_v55 = vld [vmem:[#allocation97_spill] sm:$0xff]  ;;  %v16865_v59 = vld [vmem:[#allocation128_spill] sm:$0xff]  ;;  %v13024_v52 = vpop.f32.mrf.mxu0 }
 0x37d   : > { %16847 = vst [vmem:[#allocation156_spill] sm:$0xff] %v12979_v43  ;;  %v8837_v53 = vpop.eup %8836  ;;  %8862 = vrcp.f32 %v4316_v15  ;;  %6228 = vmatprep.subr.mxu1 %v5771_v44  ;;  %6298 = vmatpush1.msra.mxu0 %v5786_v51  ;;  %v5759_v12 = vmul.f32 %v8833_v9, %v16856_v49  ;;  %v12998_v1 = vmul.f32 -1.442695, %v12966_v40  ;;  %v13002_v17 = vmul.f32 %v16858_v30, %v16857_v33  ;;  %v16864_v41 = vld [vmem:[#allocation93_spill] sm:$0xff]  ;;  %v16867_v44 = vld [vmem:[#allocation191_spill] sm:$0xff]  ;;  %v16876_v18 = vld [vmem:[#allocation70_spill] sm:$0xff] }
 0x37e   : > { %16851 = vst [vmem:[#allocation125_spill] sm:$0xff] %v12986_v23  ;;  %v8839_v47 = vpop.eup %8838  ;;  %6229 = vmatpush1.msra.mxu1 %v5770_v6  ;;  %6299 = vmatprep.subr.mxu0 %v5773_v20  ;;  %v5743_v54 = vmul.f32 %v16860_v2, %v16859_v19  ;;  %v5758_v15 = vmul.f32 %v8835_v31, %v16861_v13  ;;  %8864 = vpow2.f32 %v16862_v55  ;;  %16863 = vst [vmem:[#allocation154_spill] sm:$0xff] %v13008_v24  ;;  %v16868_v31 = vld [vmem:[#allocation55_spill] sm:$0xff]  ;;  %v16870_v6 = vld [vmem:[#allocation160_spill] sm:$0xff]  ;;  %v13036_v2 = vpop.f32.mrf.mxu1 }
 0x37f   : > { %v8841_v48 = vpop.eup %8840  ;;  %6230 = vmatprep.subr.mxu1 %v5757_v25  ;;  %6300 = vmatpush1.msra.mxu0 %v5772_v46  ;;  %v5742_v9 = vmul.f32 %v16865_v59, %v16864_v41  ;;  %v5745_v36 = vmul.f32 %v8837_v53, %v16866_v63  ;;  %8866 = vpow2.f32 %v16867_v44  ;;  %v13015_v32 = vmul.f32 -1.442695, %v12979_v43  ;;  %v16871_v20 = vld [vmem:[#allocation35_spill] sm:$0xff]  ;;  %v16872_v50 = vld [vmem:[#allocation177_spill] sm:$0xff]  ;;  %v16879_v33 = vld [vmem:[#allocation90_spill] sm:$0xff]  ;;  %16880 = vst [vmem:[#allocation152_spill] sm:$0xff] %v13036_v2 }
 0x380   : > { %v8843_v45 = vpop.eup %8842  ;;  %6231 = vmatpush1.msra.mxu1 %v5756_v42  ;;  %6301 = vmatprep.subr.mxu0 %v5759_v12  ;;  %v5729_v7 = vmul.f32 %v16869_v57, %v16868_v31  ;;  %v5744_v10 = vmul.f32 %v8839_v47, %v16870_v6  ;;  %8868 = vpow2.f32 %v16871_v20  ;;  %v13022_v61 = vmul.f32 -1.442695, %v12986_v23  ;;  %v16873_v25 = vld [vmem:[#allocation91_spill] sm:$0xff]  ;;  %v16877_v42 = vld [vmem:[#allocation102_spill] sm:$0xff]  ;;  %v16882_v13 = vld [vmem:[#allocation169_spill] sm:$0xff] }
 0x381   : > { %v8845_v51 = vpop.eup %8844  ;;  %6232 = vmatprep.subr.mxu1 %v5743_v54  ;;  %6302 = vmatpush1.msra.mxu0 %v5758_v15  ;;  %v5728_v16 = vmul.f32 %v16873_v25, %v16872_v50  ;;  %v16874_v46 = vld [vmem:[#allocation79_spill] sm:$0xff]  ;;  %v4510_v38 = vadd.f32 1.0, %v8841_v48  ;;  %8870 = vpow2.f32 %v12919_v27  ;;  %v5715_v49 = vmul.f32 %v16877_v42, %v16876_v18  ;;  %v16878_v12 = vld [vmem:[#allocation54_spill] sm:$0xff]  ;;  %v16881_v48 = vld [vmem:[#allocation81_spill] sm:$0xff] }
 0x382   : > { %v8847_v53 = vpop.eup %8846  ;;  %v16875_v0 = vld [vmem:[#allocation87_spill] sm:$0xff]  ;;  %6233 = vmatpush1.msra.mxu1 %v5742_v9  ;;  %6303 = vmatprep.subr.mxu0 %v5745_v36  ;;  %v5730_v30 = vmul.f32 %v16879_v33, %v16878_v12  ;;  %v4511_v19 = vadd.f32 1.0, %v8843_v45  ;;  %8872 = vpow2.f32 %v12925_v8  ;;  %v5714_v27 = vmul.f32 %v16882_v13, %v16881_v48  ;;  %v16883_v15 = vld [vmem:[#allocation181_spill] sm:$0xff]  ;;  %v16884_v55 = vld [vmem:[#allocation162_spill] sm:$0xff]  ;;  %v13058_v12 = vpop.f32.mrf.mxu1 }
 0x383   : > { %v5731_v29 = vmul.f32 %v16875_v0, %v16874_v46  ;;  %v8849_v47 = vpop.eup %8848  ;;  %6234 = vmatprep.subr.mxu1 %v5729_v7  ;;  %6304 = vmatpush1.msra.mxu0 %v5744_v10  ;;  %v5717_v41 = vmul.f32 %v16884_v55, %v16883_v15  ;;  %v4524_v59 = vadd.f32 1.0, %v8845_v51  ;;  %8874 = vpow2.f32 %v12930_v21  ;;  %v16885_v45 = vld [vmem:[#allocation15_spill] sm:$0xff]  ;;  %v16886_v63 = vld [vmem:[#allocation172_spill] sm:$0xff]  ;;  %v16887_v36 = vld [vmem:[#allocation185_spill] sm:$0xff]  ;;  %v13048_v7 = vpop.f32.mrf.mxu0  ;;  %16897 = vst [vmem:[#allocation196_spill] sm:$0xff] %v13058_v12 }
 0x384   : > { %v8851_v54 = vpop.eup %8850  ;;  %6235 = vmatpush1.msra.mxu1 %v5728_v16  ;;  %v5701_v8 = vmul.f32 %v16886_v63, %v16885_v45  ;;  %v16888_v44 = vld [vmem:[#allocation166_spill] sm:$0xff]  ;;  %v4525_v57 = vadd.f32 1.0, %v8847_v53  ;;  %8876 = vpow2.f32 %v12936_v62  ;;  %v16890_v10 = vld [vmem:[#allocation140_spill] sm:$0xff]  ;;  %v4527_v16 = vadd.f32 1.0, %v8849_v47  ;;  %v16895_v62 = vld [vmem:[#allocation197_spill] sm:$0xff] }
 0x385   : > { %6305 = vmatprep.subr.mxu0 %v5731_v29  ;;  %v8853_v9 = vpop.eup %8852  ;;  %v5716_v31 = vmul.f32 %v16888_v44, %v16887_v36  ;;  %6236 = vmatprep.subr.mxu1 %v5715_v49  ;;  %v16889_v51 = vld [vmem:[#allocation94_spill] sm:$0xff]  ;;  %v16891_v20 = vld [vmem:[#allocation52_spill] sm:$0xff]  ;;  %8878 = vrcp.f32 %v4510_v38  ;;  %v4538_v49 = vadd.f32 1.0, %v8851_v54  ;;  %v16900_v47 = vld [vmem:[#allocation129_spill] sm:$0xff]  ;;  %v13068_v44 = vpop.f32.mrf.mxu0 }
 0x386   : > { %6306 = vmatpush1.msra.mxu0 %v5730_v30  ;;  %v8855_v6 = vpop.eup %8854  ;;  %v5700_v21 = vmul.f32 %v16890_v10, %v16889_v51  ;;  %v16892_v50 = vld [vmem:[#allocation110_spill] sm:$0xff]  ;;  %6237 = vmatpush1.msra.mxu1 %v5714_v27  ;;  %v16894_v53 = vld [vmem:[#allocation100_spill] sm:$0xff]  ;;  %8880 = vrcp.f32 %v4511_v19  ;;  %v4540_v15 = vadd.f32 1.0, %v8853_v9  ;;  %v16904_v54 = vld [vmem:[#allocation71_spill] sm:$0xff] }
 0x387   : > { %v5703_v25 = vmul.f32 %v16892_v50, %v16891_v20  ;;  %6307 = vmatprep.subr.mxu0 %v5717_v41  ;;  %v8857_v46 = vpop.eup %8856  ;;  %v16893_v0 = vld [vmem:[#allocation82_spill] sm:$0xff]  ;;  %v16896_v18 = vld [vmem:[#allocation104_spill] sm:$0xff]  ;;  %6238 = vmatprep.subr.mxu1 %v5701_v8  ;;  %8882 = vrcp.f32 %v4524_v59  ;;  %v16905_v63 = vld [vmem:[#allocation145_spill] sm:$0xff]  ;;  %v4539_v36 = vadd.f32 1.0, %v8855_v6 }
 0x388   : > { %v5687_v29 = vmul.f32 %v16894_v53, %v16893_v0  ;;  %v5702_v42 = vmul.f32 %v16896_v18, %v16895_v62  ;;  %6308 = vmatpush1.msra.mxu0 %v5716_v31  ;;  %v8859_v33 = vpop.eup %8858  ;;  %v16898_v30 = vld [vmem:[#allocation134_spill] sm:$0xff]  ;;  %v16899_v48 = vld [vmem:[#allocation48_spill] sm:$0xff]  ;;  %6239 = vmatpush1.msra.mxu1 %v5700_v21  ;;  %v5688_v8 = vmul.f32 %v16905_v63, %v16904_v54  ;;  %8884 = vrcp.f32 %v4525_v57  ;;  %v16908_v9 = vld [vmem:[#allocation225_spill] sm:$0xff]  ;;  %v13081_v18 = vpop.f32.mrf.mxu1 }
 0x389   : > { %v5686_v38 = vmul.f32 %v16899_v48, %v16898_v30  ;;  %v16901_v13 = vld [vmem:[#allocation184_spill] sm:$0xff]  ;;  %6309 = vmatprep.subr.mxu0 %v5703_v25  ;;  %v8861_v55 = vpop.eup %8860  ;;  %v16903_v45 = vld [vmem:[#allocation42_spill] sm:$0xff]  ;;  %8886 = vrcp.f32 %v4527_v16  ;;  %v4541_v50 = vadd.f32 1.0, %v8857_v46  ;;  %v16912_v57 = vld [vmem:[#allocation223_spill] sm:$0xff]  ;;  %16915 = vst [vmem:[#allocation143_spill] sm:$0xff] %v13081_v18 }
 0x38a   : > { %v5689_v27 = vmul.f32 %v16901_v13, %v16900_v47  ;;  %v16902_v41 = vld [vmem:[#allocation224_spill] sm:$0xff]  ;;  %6240 = vmatprep.subr.mxu1 %v5687_v29  ;;  %6310 = vmatpush1.msra.mxu0 %v5702_v42  ;;  %v8863_v31 = vpop.eup %8862  ;;  %v16906_v51 = vld [vmem:[#allocation222_spill] sm:$0xff]  ;;  %v5674_v6 = vmul.f32 %v8859_v33, %v16912_v57  ;;  %8888 = vrcp.f32 %v4538_v49  ;;  %v16913_v29 = vld [vmem:[#allocation67_spill] sm:$0xff]  ;;  %v13090_v33 = vadd.f32 %v12938_v22, %v12042_v3 }
 0x38b   : > { %v5673_v19 = vmul.f32 %v16903_v45, %v16902_v41  ;;  %v16907_v10 = vld [vmem:[#allocation38_spill] sm:$0xff]  ;;  %v16909_v21 = vld [vmem:[#allocation44_spill] sm:$0xff]  ;;  %6241 = vmatpush1.msra.mxu1 %v5686_v38  ;;  %v13079_v62 = vadd.f32 %v16913_v29, %v12035_v4  ;;  %v13083_v42 = vpop.eup %8864  ;;  %v16917_v16 = vld [vmem:[#allocation171_spill] sm:$0xff]  ;;  %8890 = vrcp.f32 %v4540_v15 }
 0x38c   : > { %v5672_v59 = vmul.f32 %v16907_v10, %v16906_v51  ;;  %v5675_v20 = vmul.f32 %v16909_v21, %v16908_v9  ;;  %6311 = vmatprep.subr.mxu0 %v5689_v27  ;;  %v16910_v25 = vld [vmem:[#allocation176_spill] sm:$0xff]  ;;  %16916 = vst [vmem:[#allocation132_spill] sm:$0xff] %v13083_v42  ;;  %v16918_v46 = vld [vmem:[#allocation103_spill] sm:$0xff]  ;;  %v16919_v48 = vld [vmem:[#allocation221_spill] sm:$0xff]  ;;  %v13092_v49 = vpop.eup %8866  ;;  %8892 = vrcp.f32 %v4539_v36  ;;  %v13111_v36 = vadd.f32 %v12959_v58, %v12054_v37 }
 0x38d   : > { %v16911_v0 = vld [vmem:[#allocation16_spill] sm:$0xff]  ;;  %16914 = vst [vmem:[#allocation148_spill] sm:$0xff] %v13079_v62  ;;  %6242 = vmatprep.subr.mxu1 %v5673_v19  ;;  %6312 = vmatpush1.msra.mxu0 %v5688_v8  ;;  %v5658_v30 = vmul.f32 %v16918_v46, %v16917_v16  ;;  %v5661_v38 = vmul.f32 %v8861_v55, %v16919_v48  ;;  %16920 = vst [vmem:[#allocation139_spill] sm:$0xff] %v13090_v33  ;;  %v16922_v47 = vld [vmem:[#allocation170_spill] sm:$0xff]  ;;  %v13101_v55 = vpop.f32.mrf.mxu0  ;;  %v13103_v22 = vpop.eup %8868  ;;  %8894 = vrcp.f32 %v4541_v50 }
 0x38e   : > { %v5659_v53 = vmul.f32 %v16911_v0, %v16910_v25  ;;  %6243 = vmatpush1.msra.mxu1 %v5672_v59  ;;  %6313 = vmatprep.subr.mxu0 %v5675_v20  ;;  %16921 = vst [vmem:[#allocation147_spill] sm:$0xff] %v13092_v49  ;;  %v16923_v13 = vld [vmem:[#allocation173_spill] sm:$0xff]  ;;  %v16924_v41 = vld [vmem:[#allocation174_spill] sm:$0xff]  ;;  %v16925_v19 = vld [vmem:[#allocation200_spill] sm:$0xff]  ;;  %8896 = vpow2.f32 %v12972_v28  ;;  %v7498_v25 = vmul.f32 -1.442695, %v13079_v62  ;;  %v13121_v50 = vpop.f32.mrf.mxu1  ;;  %v13129_v28 = vadd.f32 %v12988_v60, %v12042_v3 }
 0x38f   : > { %v5645_v27 = vmul.f32 %v16923_v13, %v16922_v47  ;;  %v5660_v45 = vmul.f32 %v8863_v31, %v16924_v41  ;;  %v13099_v54 = vadd.f32 %v16925_v19, %v12046_v5  ;;  %6314 = vmatpush1.msra.mxu0 %v5674_v6  ;;  %v16927_v15 = vld [vmem:[#allocation167_spill] sm:$0xff]  ;;  %v16928_v63 = vld [vmem:[#allocation58_spill] sm:$0xff]  ;;  %16931 = vst [vmem:[#allocation137_spill] sm:$0xff] %v13111_v36  ;;  %v8871_v31 = vpop.eup %8870  ;;  %v16932_v9 = vld [vmem:[#allocation168_spill] sm:$0xff]  ;;  %8898 = vpow2.f32 %v12998_v1  ;;  %v13139_v1 = vpop.f32.mrf.mxu0 }
 0x390   : > { %6244 = vmatprep.subr.mxu1 %v5659_v53  ;;  %v5644_v8 = vmul.f32 %v16928_v63, %v16927_v15  ;;  %v16929_v51 = vld [vmem:[#allocation14_spill] sm:$0xff]  ;;  %6315 = vmatprep.subr.mxu0 %v5661_v38  ;;  %v16933_v21 = vld [vmem:[#allocation111_spill] sm:$0xff]  ;;  %v16934_v0 = vld [vmem:[#allocation89_spill] sm:$0xff]  ;;  %16936 = vst [vmem:[#allocation133_spill] sm:$0xff] %v13121_v50  ;;  %v8873_v58 = vpop.eup %8872  ;;  %v7500_v16 = vmul.f32 -1.442695, %v13090_v33  ;;  %8900 = vpow2.f32 %v13015_v32  ;;  %v13148_v19 = vpop.f32.mrf.mxu1 }
 0x391   : > { %16926 = vst [vmem:[#allocation136_spill] sm:$0xff] %v13099_v54  ;;  %v16930_v10 = vld [vmem:[#allocation50_spill] sm:$0xff]  ;;  %6245 = vmatpush1.msra.mxu1 %v5658_v30  ;;  %v5646_v20 = vmul.f32 %v16933_v21, %v16932_v9  ;;  %v13119_v53 = vadd.f32 %v16934_v0, %v12035_v4  ;;  %6316 = vmatpush1.msra.mxu0 %v5660_v45  ;;  %v16937_v57 = vld [vmem:[#allocation165_spill] sm:$0xff]  ;;  %v16938_v6 = vld [vmem:[#allocation116_spill] sm:$0xff]  ;;  %v8875_v46 = vpop.eup %8874  ;;  %v7499_v47 = vmul.f32 -1.442695, %v13099_v54  ;;  %8902 = vpow2.f32 %v13022_v61 }
 0x392   : > { %v5647_v59 = vmul.f32 %v16930_v10, %v16929_v51  ;;  %6246 = vmatprep.subr.mxu1 %v5645_v27  ;;  %v5633_v29 = vmul.f32 %v16938_v6, %v16937_v57  ;;  %16939 = vst [vmem:[#allocation215_spill] sm:$0xff] %v13129_v28  ;;  %v16940_v30 = vld [vmem:[#allocation159_spill] sm:$0xff]  ;;  %v16941_v48 = vld [vmem:[#allocation66_spill] sm:$0xff]  ;;  %v16942_v13 = vld [vmem:[#allocation85_spill] sm:$0xff]  ;;  %v8877_v60 = vpop.eup %8876  ;;  %v7501_v41 = vmul.f32 -1.442695, %v13111_v36  ;;  %8904 = vpow2.f32 %v7498_v25  ;;  %v13172_v25 = vpop.f32.mrf.mxu1 }
 0x393   : > { %16935 = vst [vmem:[#allocation135_spill] sm:$0xff] %v13119_v53  ;;  %6247 = vmatpush1.msra.mxu1 %v5644_v8  ;;  %v5632_v38 = vmul.f32 %v16941_v48, %v16940_v30  ;;  %v13137_v27 = vadd.f32 %v16942_v13, %v12046_v5  ;;  %v13145_v32 = vpop.eup %8878  ;;  %v7512_v45 = vmul.f32 -1.442695, %v13119_v53  ;;  %16945 = vst [vmem:[#allocation126_spill] sm:$0xff] %v13148_v19  ;;  %v16946_v15 = vld [vmem:[#allocation23_spill] sm:$0xff]  ;;  %8906 = vpow2.f32 %v7500_v16  ;;  %v13158_v8 = vpop.f32.mrf.mxu0  ;;  %v16964_v13 = vld [vmem:[#allocation24_spill] sm:$0xff] }
 0x394   : > { %6317 = vmatprep.subr.mxu0 %v5647_v59  ;;  %6248 = vmatprep.subr.mxu1 %v13002_v17  ;;  %16944 = vst [vmem:[#allocation212_spill] sm:$0xff] %v13145_v32  ;;  %v13151_v17 = vpop.eup %8880  ;;  %v7514_v61 = vmul.f32 -1.442695, %v13129_v28  ;;  %8908 = vpow2.f32 %v7499_v47  ;;  %v4552_v10 = vadd.f32 1.0, %v8871_v31  ;;  %v13164_v59 = vadd.f32 %v13024_v52, %v12054_v37  ;;  %16954 = vst [vmem:[#allocation9_spill] sm:$0xff] %v13172_v25  ;;  %v13198_v47 = vpop.f32.mrf.mxu1  ;;  %v16968_v12 = vld [vmem:[#allocation92_spill] sm:$0xff] }
 0x395   : > { %16943 = vst [vmem:[#allocation130_spill] sm:$0xff] %v13137_v27  ;;  %6318 = vmatpush1.msra.mxu0 %v5646_v20  ;;  %6249 = vmatpush1.msra.mxu1 %v12992_v39  ;;  %16947 = vst [vmem:[#allocation209_spill] sm:$0xff] %v13151_v17  ;;  %v13155_v63 = vpop.eup %8882  ;;  %v7513_v39 = vmul.f32 -1.442695, %v13137_v27  ;;  %8910 = vpow2.f32 %v7501_v41  ;;  %v4554_v21 = vadd.f32 1.0, %v8873_v58  ;;  %v4553_v57 = vadd.f32 1.0, %v8875_v46  ;;  %v13186_v16 = vpop.f32.mrf.mxu0 }
 0x396   : > { %6319 = vmatprep.subr.mxu0 %v5633_v29  ;;  %2918 = vmatmul.mubr.bf16.gmra.mxu1 %v16946_v15  ;;  %16948 = vst [vmem:[#allocation124_spill] sm:$0xff] %v13155_v63  ;;  %v13160_v51 = vpop.eup %8884  ;;  %16950 = vst [vmem:[#allocation204_spill] sm:$0xff] %v13164_v59  ;;  %8912 = vpow2.f32 %v7512_v45  ;;  %v13178_v31 = vadd.f32 %v13048_v7, %v12042_v3  ;;  %v4555_v6 = vadd.f32 1.0, %v8877_v60  ;;  %v16958_v58 = vld [vmem:[#allocation193_spill] sm:$0xff]  ;;  %v7515_v46 = vmul.f32 -1.442695, %v13164_v59 }
 0x397   : > { %6320 = vmatpush1.msra.mxu0 %v5632_v38  ;;  %2927 = vmatprep.mubr.bf16.mxu1 %v16550_v14  ;;  %16949 = vst [vmem:[#allocation208_spill] sm:$0xff] %v13160_v51  ;;  %v13166_v9 = vpop.eup %8886  ;;  %v16952_v14 = vld [vmem:[#allocation127_spill] sm:$0xff]  ;;  %8914 = vpow2.f32 %v7514_v61  ;;  %v13184_v29 = vadd.f32 %v16958_v58, %v12046_v5  ;;  %v13193_v48 = vadd.f32 %v13068_v44, %v12054_v37  ;;  %16963 = vst [vmem:[#allocation62_spill] sm:$0xff] %v13198_v47  ;;  %v16965_v45 = vmov 1.0   ;;  %v13204_v61 = vpop.f32.mrf.mxu0  ;;  %v17005_v40 = vld [vmem:[#allocation188_spill] sm:$0xff] }
 0x398   : > { %16951 = vst [vmem:[#allocation123_spill] sm:$0xff] %v13166_v9  ;;  %v13170_v20 = vadd.f32 %v16952_v14, %v12035_v4  ;;  %v13174_v0 = vpop.eup %8888  ;;  %16956 = vst [vmem:[#allocation11_spill] sm:$0xff] %v13178_v31  ;;  %8916 = vpow2.f32 %v7513_v39  ;;  %v7528_v41 = vmul.f32 -1.442695, %v13178_v31  ;;  %v13207_v58 = vpop.f32.mrf.mxu1  ;;  %v17022_v31 = vld [vmem:[#allocation68_spill] sm:$0xff] }
 0x399   : > { %16955 = vst [vmem:[#allocation121_spill] sm:$0xff] %v13174_v0  ;;  %v13180_v52 = vpop.eup %8890  ;;  %16959 = vst [vmem:[#allocation206_spill] sm:$0xff] %v13184_v29  ;;  %8918 = vrcp.f32 %v4552_v10  ;;  %v7527_v44 = vmul.f32 -1.442695, %v13184_v29  ;;  %v7529_v10 = vmul.f32 -1.442695, %v13193_v48 }
 0x39a   : > { %16953 = vst [vmem:[#allocation150_spill] sm:$0xff] %v13170_v20  ;;  %16957 = vst [vmem:[#allocation118_spill] sm:$0xff] %v13180_v52  ;;  %v13188_v30 = vpop.eup %8892  ;;  %8920 = vrcp.f32 %v4554_v21  ;;  %v7526_v38 = vmul.f32 -1.442695, %v13170_v20  ;;  %v13211_v18 = vpop.f32.mrf.mxu1 }
 0x39b   : > { %16960 = vst [vmem:[#allocation142_spill] sm:$0xff] %v13188_v30  ;;  %16961 = vst [vmem:[#allocation112_spill] sm:$0xff] %v13193_v48  ;;  %v13195_v7 = vpop.eup %8894  ;;  %8922 = vrcp.f32 %v4553_v57 }
 0x39c   : > { %16962 = vst [vmem:[#allocation205_spill] sm:$0xff] %v13195_v7  ;;  %v8897_v60 = vpop.eup %8896  ;;  %8924 = vrcp.f32 %v4555_v6  ;;  %16966 = vst [vmem:[#allocation203_spill] sm:$0xff] %v13207_v58  ;;  %v13209_v6 = vpop.f32.mrf.mxu0 }
 0x39d   : > { %v8899_v15 = vpop.eup %8898  ;;  %8926 = vpow2.f32 %v7515_v46  ;;  %v4566_v14 = vadd.f32 1.0, %v8897_v60  ;;  %16967 = vst [vmem:[#allocation155_spill] sm:$0xff] %v13211_v18 }
 0x39e   : > { %2928 = vmatmul.mubr.bf16.gmra.mxu1 %v16964_v13  ;;  %v8901_v39 = vpop.eup %8900  ;;  %8928 = vpow2.f32 %v7526_v38  ;;  %v4568_v13 = vadd.f32 1.0, %v8899_v15 }
 0x39f   : > { %6282 = vmatprep.mubr.f32.mxu1 %v16965_v45  ;;  %v8903_v21 = vpop.eup %8902  ;;  %8930 = vpow2.f32 %v7528_v41  ;;  %v4567_v25 = vadd.f32 1.0, %v8901_v39  ;;  %v13213_v41 = vpop.f32.mrf.mxu0 }
 0x3a0   : > { %v8905_v57 = vpop.eup %8904  ;;  %8932 = vpow2.f32 %v7527_v44  ;;  %v4569_v50 = vadd.f32 1.0, %v8903_v21  ;;  %v13217_v21 = vadd.f32 %v16968_v12, %v12035_v4  ;;  %v13319_v56 = vadd.f32 %v13213_v41, %v12042_v3 }
 0x3a1   : > { %v8907_v47 = vpop.eup %8906  ;;  %8934 = vpow2.f32 %v7529_v10  ;;  %v4580_v46 = vadd.f32 1.0, %v8905_v57  ;;  %v16971_v57 = vld [vmem:[#allocation77_spill] sm:$0xff] }
 0x3a2   : > { %v8909_v19 = vpop.eup %8908  ;;  %8936 = vrcp.f32 %v4566_v14  ;;  %v4582_v38 = vadd.f32 1.0, %v8907_v47  ;;  %16969 = vst [vmem:[#allocation64_spill] sm:$0xff] %v13217_v21  ;;  %v13225_v47 = vpop.f32.mrf.mxu1  ;;  %17002 = vst [vmem:[#allocation78_spill] sm:$0xff] %v13319_v56 }
 0x3a3   : > { %v8911_v45 = vpop.eup %8910  ;;  %8938 = vrcp.f32 %v4568_v13  ;;  %v4581_v15 = vadd.f32 1.0, %v8909_v19  ;;  %v13223_v13 = vadd.f32 %v16971_v57, %v12046_v5  ;;  %16973 = vst [vmem:[#allocation201_spill] sm:$0xff] %v13225_v47  ;;  %v13239_v57 = vpop.f32.mrf.mxu0 }
 0x3a4   : > { %v8913_v60 = vpop.eup %8912  ;;  %8940 = vrcp.f32 %v4567_v25  ;;  %v4583_v44 = vadd.f32 1.0, %v8911_v45  ;;  %v13245_v47 = vpop.f32.mrf.mxu1  ;;  %v13335_v41 = vadd.f32 %v13239_v57, %v12054_v37 }
 0x3a5   : > { %v8915_v58 = vpop.eup %8914  ;;  %8942 = vrcp.f32 %v4569_v50  ;;  %v4594_v14 = vadd.f32 1.0, %v8913_v60  ;;  %16972 = vst [vmem:[#allocation95_spill] sm:$0xff] %v13223_v13  ;;  %v16975_v50 = vld [vmem:[#allocation34_spill] sm:$0xff]  ;;  %16981 = vst [vmem:[#allocation138_spill] sm:$0xff] %v13245_v47  ;;  %v13249_v63 = vpop.f32.mrf.mxu0 }
 0x3a6   : > { %v8917_v39 = vpop.eup %8916  ;;  %8944 = vrcp.f32 %v4580_v46  ;;  %v4596_v25 = vadd.f32 1.0, %v8915_v58  ;;  %v13231_v45 = vadd.f32 %v16975_v50, %v12035_v4  ;;  %v16978_v46 = vld [vmem:[#allocation36_spill] sm:$0xff]  ;;  %v7541_v50 = vmul.f32 -1.442695, %v13223_v13 }
 0x3a7   : > { %v13219_v10 = vpop.eup %8918  ;;  %8946 = vrcp.f32 %v4582_v38  ;;  %v4595_v18 = vadd.f32 1.0, %v8917_v39  ;;  %v13237_v60 = vadd.f32 %v16978_v46, %v12046_v5  ;;  %v7540_v38 = vmul.f32 -1.442695, %v13217_v21 }
 0x3a8   : > { %16970 = vst [vmem:[#allocation202_spill] sm:$0xff] %v13219_v10  ;;  %v13227_v19 = vpop.eup %8920  ;;  %16976 = vst [vmem:[#allocation40_spill] sm:$0xff] %v13231_v45  ;;  %8948 = vrcp.f32 %v4581_v15  ;;  %v7554_v15 = vmul.f32 -1.442695, %v13231_v45  ;;  %v13312_v10 = vadd.f32 %v17000_v34, %v12035_v4  ;;  %v13328_v34 = vadd.f32 %v17005_v40, %v12046_v5  ;;  %v17035_v45 = vld [vmem:[#allocation27_spill] sm:$0xff] }
 0x3a9   : > { %16974 = vst [vmem:[#allocation10_spill] sm:$0xff] %v13227_v19  ;;  %v13233_v12 = vpop.eup %8922  ;;  %16979 = vst [vmem:[#allocation86_spill] sm:$0xff] %v13237_v60  ;;  %8950 = vrcp.f32 %v4583_v44  ;;  %v7555_v46 = vmul.f32 -1.442695, %v13237_v60  ;;  %v7584_v40 = vmul.f32 -1.442695, %v13319_v56 }
 0x3aa   : > { %16977 = vst [vmem:[#allocation199_spill] sm:$0xff] %v13233_v12  ;;  %v13241_v17 = vpop.eup %8924  ;;  %8952 = vrcp.f32 %v4594_v14  ;;  %v13253_v14 = vadd.f32 %v13101_v55, %v12042_v3  ;;  %v7585_v57 = vmul.f32 -1.442695, %v13335_v41 }
 0x3ab   : > { %16980 = vst [vmem:[#allocation198_spill] sm:$0xff] %v13241_v17  ;;  %v8927_v58 = vpop.eup %8926  ;;  %8954 = vrcp.f32 %v4596_v25  ;;  %v13259_v25 = vadd.f32 %v13139_v1, %v12054_v37  ;;  %v13275_v1 = vpop.f32.mrf.mxu0 }
 0x3ac   : > { %v8929_v9 = vpop.eup %8928  ;;  %8956 = vrcp.f32 %v4595_v18  ;;  %v4597_v44 = vadd.f32 1.0, %v8927_v58  ;;  %16982 = vst [vmem:[#allocation19_spill] sm:$0xff] %v13253_v14  ;;  %v13261_v18 = vpop.f32.mrf.mxu1 }
 0x3ad   : > { %v8931_v39 = vpop.eup %8930  ;;  %8958 = vpow2.f32 %v7540_v38  ;;  %v4608_v47 = vadd.f32 1.0, %v8929_v9  ;;  %16983 = vst [vmem:[#allocation98_spill] sm:$0xff] %v13259_v25  ;;  %16984 = vst [vmem:[#allocation195_spill] sm:$0xff] %v13261_v18  ;;  %v13267_v38 = vadd.f32 %v13158_v8, %v12042_v3  ;;  %v13273_v9 = vadd.f32 %v13186_v16, %v12054_v37  ;;  %v2344_v17 = vpop.f32.mrf.mxu0 }
 0x3ae   : > { %v8933_v52 = vpop.eup %8932  ;;  %8960 = vpow2.f32 %v7541_v50  ;;  %v4610_v0 = vadd.f32 1.0, %v8931_v39  ;;  %v7542_v39 = vmul.f32 -1.442695, %v13253_v14  ;;  %v13289_v16 = vadd.f32 %v13204_v61, %v12042_v3 }
 0x3af   : > { %v13255_v51 = vpop.eup %8934  ;;  %8962 = vpow2.f32 %v7554_v15  ;;  %16986 = vst [vmem:[#allocation194_spill] sm:$0xff] %v13267_v38  ;;  %v4609_v58 = vadd.f32 1.0, %v8933_v52  ;;  %16988 = vst [vmem:[#allocation183_spill] sm:$0xff] %v13273_v9  ;;  %v16990_v15 = vld [vmem:[#allocation163_spill] sm:$0xff]  ;;  %v7543_v52 = vmul.f32 -1.442695, %v13259_v25  ;;  %v13305_v61 = vadd.f32 %v13209_v6, %v12054_v37  ;;  %v2346_v26 = vpop.f32.mrf.mxu0 }
 0x3b0   : > { %v13263_v7 = vpop.eup %8936  ;;  %8964 = vpow2.f32 %v7555_v46  ;;  %v13282_v18 = vadd.f32 %v16990_v15, %v12035_v4  ;;  %16993 = vst [vmem:[#allocation210_spill] sm:$0xff] %v13289_v16  ;;  %v13291_v46 = vpop.f32.mrf.mxu1  ;;  %v13298_v15 = vadd.f32 %v16996_v35, %v12046_v5  ;;  %v13388_v28 = vadd.f32 %v2346_v26, %v12054_v37 }
 0x3b1   : > { %16985 = vst [vmem:[#allocation187_spill] sm:$0xff] %v13263_v7  ;;  %v13269_v55 = vpop.eup %8938  ;;  %8966 = vrcp.f32 %v4597_v44  ;;  %16994 = vst [vmem:[#allocation178_spill] sm:$0xff] %v13291_v46  ;;  %v7556_v44 = vmul.f32 -1.442695, %v13267_v38 }
 0x3b2   : > { %16987 = vst [vmem:[#allocation207_spill] sm:$0xff] %v13269_v55  ;;  %v13277_v50 = vpop.eup %8940  ;;  %16991 = vst [vmem:[#allocation180_spill] sm:$0xff] %v13282_v18  ;;  %8968 = vrcp.f32 %v4608_v47  ;;  %v7557_v47 = vmul.f32 -1.442695, %v13273_v9  ;;  %v13321_v6 = vpop.f32.mrf.mxu1 }
 0x3b3   : > { %16989 = vst [vmem:[#allocation192_spill] sm:$0xff] %v13277_v50  ;;  %v13284_v8 = vpop.eup %8942  ;;  %8970 = vrcp.f32 %v4610_v0  ;;  %16998 = vst [vmem:[#allocation107_spill] sm:$0xff] %v13305_v61  ;;  %v7568_v0 = vmul.f32 -1.442695, %v13282_v18  ;;  %v4611_v18 = vadd.f32 1.0, %v13255_v51 }
 0x3b4   : > { %16992 = vst [vmem:[#allocation119_spill] sm:$0xff] %v13284_v8  ;;  %v13293_v19 = vpop.eup %8944  ;;  %8972 = vrcp.f32 %v4609_v58  ;;  %v7570_v58 = vmul.f32 -1.442695, %v13289_v16  ;;  %17003 = vst [vmem:[#allocation32_spill] sm:$0xff] %v13321_v6  ;;  %v13341_v23 = vpop.f32.mrf.mxu1 }
 0x3b5   : > { %16995 = vst [vmem:[#allocation115_spill] sm:$0xff] %v13293_v19  ;;  %v13300_v30 = vpop.eup %8946  ;;  %8974 = vpow2.f32 %v7542_v39  ;;  %v7569_v39 = vmul.f32 -1.442695, %v13298_v15  ;;  %17008 = vst [vmem:[#allocation12_spill] sm:$0xff] %v13341_v23 }
 0x3b6   : > { %16997 = vst [vmem:[#allocation175_spill] sm:$0xff] %v13300_v30  ;;  %v13307_v46 = vpop.eup %8948  ;;  %8976 = vpow2.f32 %v7543_v52  ;;  %v7571_v52 = vmul.f32 -1.442695, %v13305_v61  ;;  %v2350_v30 = vpop.f32.mrf.mxu0 }
 0x3b7   : > { %16999 = vst [vmem:[#allocation80_spill] sm:$0xff] %v13307_v46  ;;  %v13314_v35 = vpop.eup %8950  ;;  %8978 = vpow2.f32 %v7556_v44  ;;  %v7582_v44 = vmul.f32 -1.442695, %v13312_v10  ;;  %v13355_v36 = vpop.f32.mrf.mxu1  ;;  %v17019_v46 = vld [vmem:[#allocation72_spill] sm:$0xff] }
 0x3b8   : > { %17001 = vst [vmem:[#allocation30_spill] sm:$0xff] %v13314_v35  ;;  %v13323_v55 = vpop.eup %8952  ;;  %8980 = vpow2.f32 %v7557_v47  ;;  %v7583_v47 = vmul.f32 -1.442695, %v13328_v34  ;;  %17012 = vst [vmem:[#allocation21_spill] sm:$0xff] %v13355_v36  ;;  %v13395_v54 = vadd.f32 %v17019_v46, %v12035_v4 }
 0x3b9   : > { %17004 = vst [vmem:[#allocation20_spill] sm:$0xff] %v13323_v55  ;;  %v13330_v12 = vpop.eup %8954  ;;  %8982 = vpow2.f32 %v7568_v0  ;;  %v17009_v0 = vld [vmem:[#allocation153_spill] sm:$0xff] }
 0x3ba   : > { %17006 = vst [vmem:[#allocation76_spill] sm:$0xff] %v13330_v12  ;;  %v13337_v6 = vpop.eup %8956  ;;  %8984 = vpow2.f32 %v7570_v58  ;;  %v13347_v43 = vadd.f32 %v17009_v0, %v12035_v4 }
 0x3bb   : > { %17007 = vst [vmem:[#allocation99_spill] sm:$0xff] %v13337_v6  ;;  %v8959_v8 = vpop.eup %8958  ;;  %8986 = vpow2.f32 %v7569_v39  ;;  %v17011_v39 = vld [vmem:[#allocation149_spill] sm:$0xff]  ;;  %v13419_v6 = vadd.f32 %v17022_v31, %v12035_v4 }
 0x3bc   : > { %v8961_v7 = vpop.eup %8960  ;;  %8988 = vpow2.f32 %v7571_v52  ;;  %v4622_v50 = vadd.f32 1.0, %v8959_v8  ;;  %v13353_v23 = vadd.f32 %v17011_v39, %v12046_v5  ;;  %v13361_v8 = vadd.f32 %v13275_v1, %v12054_v37  ;;  %v2352_v39 = vpop.f32.mrf.mxu0 }
 0x3bd   : > { %v8963_v11 = vpop.eup %8962  ;;  %8990 = vpow2.f32 %v7582_v44  ;;  %v4623_v35 = vadd.f32 1.0, %v8961_v7  ;;  %v17015_v7 = vld [vmem:[#allocation83_spill] sm:$0xff]  ;;  %v7596_v36 = vmul.f32 -1.442695, %v13347_v43  ;;  %v7638_v2 = vmul.f32 -1.442695, %v13419_v6 }
 0x3be   : > { %v8965_v33 = vpop.eup %8964  ;;  %8992 = vpow2.f32 %v7584_v40  ;;  %v4636_v19 = vadd.f32 1.0, %v8963_v11  ;;  %v13367_v40 = vadd.f32 %v17015_v7, %v12035_v4  ;;  %v13373_v11 = vadd.f32 %v2344_v17, %v12042_v3  ;;  %v13382_v7 = vpop.f32.mrf.mxu1 }
 0x3bf   : > { %v13349_v58 = vpop.eup %8966  ;;  %8994 = vpow2.f32 %v7583_v47  ;;  %v4637_v0 = vadd.f32 1.0, %v8965_v33  ;;  %v7597_v1 = vmul.f32 -1.442695, %v13353_v23  ;;  %v17017_v33 = vld [vmem:[#allocation144_spill] sm:$0xff]  ;;  %17018 = vst [vmem:[#allocation218_spill] sm:$0xff] %v13382_v7  ;;  %v13401_v7 = vadd.f32 %v2350_v30, %v12042_v3 }
 0x3c0   : > { %17010 = vst [vmem:[#allocation214_spill] sm:$0xff] %v13349_v58  ;;  %v13357_v52 = vpop.eup %8968  ;;  %8996 = vpow2.f32 %v7585_v57  ;;  %v13380_v57 = vadd.f32 %v17017_v33, %v12046_v5  ;;  %v2354_v33 = vpop.f32.mrf.mxu0 }
 0x3c1   : > { %17013 = vst [vmem:[#allocation216_spill] sm:$0xff] %v13357_v52  ;;  %v13363_v44 = vpop.eup %8970  ;;  %8998 = vrcp.f32 %v4622_v50  ;;  %v7599_v50 = vmul.f32 -1.442695, %v13361_v8  ;;  %v13408_v53 = vpop.f32.mrf.mxu1 }
 0x3c2   : > { %17014 = vst [vmem:[#allocation217_spill] sm:$0xff] %v13363_v44  ;;  %v13369_v62 = vpop.eup %8972  ;;  %9000 = vrcp.f32 %v4623_v35  ;;  %v7610_v35 = vmul.f32 -1.442695, %v13367_v40  ;;  %v7611_v59 = vmul.f32 -1.442695, %v13380_v57  ;;  %17021 = vst [vmem:[#allocation219_spill] sm:$0xff] %v13408_v53  ;;  %v13414_v44 = vadd.f32 %v2352_v39, %v12054_v37 }
 0x3c3   : > { %17016 = vst [vmem:[#allocation158_spill] sm:$0xff] %v13369_v62  ;;  %v13375_v47 = vpop.eup %8974  ;;  %9002 = vrcp.f32 %v4636_v19  ;;  %v7612_v19 = vmul.f32 -1.442695, %v13373_v11  ;;  %v7626_v53 = vmul.f32 -1.442695, %v13401_v7  ;;  %v13432_v20 = vpop.f32.mrf.mxu1 }
 0x3c4   : > { %v13384_v12 = vpop.eup %8976  ;;  %9004 = vrcp.f32 %v4637_v0  ;;  %v17020_v0 = vld [vmem:[#allocation131_spill] sm:$0xff]  ;;  %17024 = vst [vmem:[#allocation22_spill] sm:$0xff] %v13432_v20  ;;  %v7627_v31 = vmul.f32 -1.442695, %v13414_v44 }
 0x3c5   : > { %v13390_v17 = vpop.eup %8978  ;;  %9006 = vpow2.f32 %v7596_v36  ;;  %v13406_v55 = vadd.f32 %v17020_v0, %v12046_v5  ;;  %v7613_v36 = vmul.f32 -1.442695, %v13388_v28  ;;  %v2356_v0 = vpop.f32.mrf.mxu0  ;;  %v4625_v61 = vadd.f32 1.0, %v13384_v12 }
 0x3c6   : > { %v13397_v58 = vpop.eup %8980  ;;  %9008 = vpow2.f32 %v7597_v1  ;;  %v7624_v1 = vmul.f32 -1.442695, %v13395_v54 }
 0x3c7   : > { %v8983_v26 = vpop.eup %8982  ;;  %9010 = vpow2.f32 %v7599_v50  ;;  %v13425_v50 = vadd.f32 %v2354_v33, %v12042_v3  ;;  %v7625_v39 = vmul.f32 -1.442695, %v13406_v55 }
 0x3c8   : > { %v13410_v46 = vpop.eup %8984  ;;  %9012 = vpow2.f32 %v7610_v35  ;;  %v17023_v35 = vld [vmem:[#allocation60_spill] sm:$0xff]  ;;  %v4650_v29 = vadd.f32 1.0, %v8983_v26 }
 0x3c9   : > { %v8987_v30 = vpop.eup %8986  ;;  %9014 = vpow2.f32 %v7612_v19  ;;  %v13430_v52 = vadd.f32 %v17023_v35, %v12046_v5  ;;  %v13438_v19 = vadd.f32 %v2356_v0, %v12054_v37  ;;  %v13445_v5 = vpop.f32.mrf.mxu0 }
 0x3ca   : > { %v13421_v27 = vpop.eup %8988  ;;  %9016 = vpow2.f32 %v7611_v59  ;;  %v13442_v59 = vadd.f32 %v13249_v63, %v12042_v3  ;;  %v13453_v0 = vpop.f32.mrf.mxu1  ;;  %v4651_v25 = vadd.f32 1.0, %v8987_v30 }
 0x3cb   : > { %v8991_v48 = vpop.eup %8990  ;;  %9018 = vpow2.f32 %v7613_v36  ;;  %v7640_v36 = vmul.f32 -1.442695, %v13425_v50  ;;  %v7639_v37 = vmul.f32 -1.442695, %v13430_v52  ;;  %17026 = vst [vmem:[#allocation114_spill] sm:$0xff] %v13453_v0 }
 0x3cc   : > { %v13434_v4 = vpop.eup %8992  ;;  %9020 = vpow2.f32 %v7624_v1  ;;  %v7641_v3 = vmul.f32 -1.442695, %v13438_v19  ;;  %v7598_v1 = vmul.f32 -1.442695, %v13442_v59  ;;  %v13465_v0 = vpop.f32.mrf.mxu1 }
 0x3cd   : > { %v8995_v33 = vpop.eup %8994  ;;  %9022 = vpow2.f32 %v7626_v53  ;;  %v13461_v53 = vpop.f32.mrf.mxu0  ;;  %17030 = vst [vmem:[#allocation109_spill] sm:$0xff] %v13465_v0 }
 0x3ce   : > { %v13447_v35 = vpop.eup %8996  ;;  %9024 = vpow2.f32 %v7625_v39  ;;  %v4665_v32 = vadd.f32 1.0, %v8995_v33 }
 0x3cf   : > { %v13450_v20 = vpop.eup %8998  ;;  %9026 = vpow2.f32 %v7627_v31  ;;  %v4664_v31 = vadd.f32 1.0, %v8991_v48  ;;  %v13467_v38 = vpop.f32.mrf.mxu0 }
 0x3d0   : > { %17025 = vst [vmem:[#allocation220_spill] sm:$0xff] %v13450_v20  ;;  %v13455_v14 = vpop.eup %9000  ;;  %9028 = vpow2.f32 %v7638_v2 }
 0x3d1   : > { %17027 = vst [vmem:[#allocation189_spill] sm:$0xff] %v13455_v14  ;;  %v13458_v63 = vpop.eup %9002  ;;  %9030 = vpow2.f32 %v7640_v36  ;;  %v13469_v36 = vpop.f32.mrf.mxu1 }
 0x3d2   : > { %17028 = vst [vmem:[#allocation106_spill] sm:$0xff] %v13458_v63  ;;  %v13463_v62 = vpop.eup %9004  ;;  %9032 = vpow2.f32 %v7639_v37  ;;  %17031 = vst [vmem:[#allocation108_spill] sm:$0xff] %v13469_v36  ;;  %v954_v36 = vld [vmem:[#allocation5 + $0x8] sm:$0x3f] }
 0x3d3   : > { %17029 = vst [vmem:[#allocation59_spill] sm:$0xff] %v13463_v62  ;;  %v9007_v39 = vpop.eup %9006  ;;  %9034 = vpow2.f32 %v7641_v3  ;;  %v13471_v3 = vpop.f32.mrf.mxu0  ;;  %v13483_v16 = vrot.slane %v954_v36, %v17035_v45 }
 0x3d4   : > { %v9009_v20 = vpop.eup %9008  ;;  %9036 = vpow2.f32 %v7598_v1  ;;  %v4678_v14 = vadd.f32 1.0, %v9007_v39 }
 0x3d5   : > { %v9011_v21 = vpop.eup %9010  ;;  %9038 = vrcp.f32 %v4650_v29  ;;  %v4679_v26 = vadd.f32 1.0, %v9009_v20  ;;  %v13473_v29 = vpop.f32.mrf.mxu1 }
 0x3d6   : > { %v9013_v2 = vpop.eup %9012  ;;  %9040 = vrcp.f32 %v4651_v25  ;;  %17032 = vst [vmem:[#allocation226_spill] sm:$0xff] %v13473_v29  ;;  %v17034_v29 = vld [vmem:[#allocation26_spill] sm:$0xff] }
 0x3d7   : > { %v9015_v13 = vpop.eup %9014  ;;  %9042 = vrcp.f32 %v4664_v31  ;;  %v4692_v37 = vadd.f32 1.0, %v9013_v2  ;;  %v13475_v31 = vpop.f32.mrf.mxu0  ;;  %v13480_v63 = vrot.slane %v954_v36, %v17034_v29 }
 0x3d8   : > { %v9017_v30 = vpop.eup %9016  ;;  %9044 = vrcp.f32 %v4665_v32 }
 0x3d9   : > { %v9019_v0 = vpop.eup %9018  ;;  %v4693_v48 = vadd.f32 1.0, %v9017_v30  ;;  %9046 = vrcp.f32 %v4678_v14  ;;  %v13477_v14 = vpop.f32.mrf.mxu1 }
 0x3da   : > { %v9021_v33 = vpop.eup %9020  ;;  %9048 = vrcp.f32 %v4679_v26  ;;  %17033 = vst [vmem:[#allocation96_spill] sm:$0xff] %v13477_v14 }
 0x3db   : > { %v9023_v1 = vpop.eup %9022  ;;  %v4706_v24 = vadd.f32 1.0, %v9021_v33  ;;  %9050 = vrcp.f32 %v4692_v37 }
 0x3dc   : > { %v9025_v39 = vpop.eup %9024  ;;  %9052 = vrcp.f32 %v4693_v48  ;;  %v4708_v48 = vadd.f32 1.0, %v9023_v1  ;;  %v4681_v1 = vadd.f32 1.0, %v9011_v21  ;;  %v4667_v21 = vadd.f32 1.0, %v13447_v35 }
 0x3dd   : > { %v9027_v20 = vpop.eup %9026  ;;  %v4707_v25 = vadd.f32 1.0, %v9025_v39  ;;  %9054 = vrcp.f32 %v4706_v24  ;;  %v13485_v24 = vpop.f32.mrf.mxu0  ;;  %v4652_v35 = vadd.f32 1.0, %v13410_v46  ;;  %v17047_v46 = vld [vmem:[#allocation17_spill] sm:$0xff] }
 0x3de   : > { %v9029_v2 = vpop.eup %9028  ;;  %v4709_v32 = vadd.f32 1.0, %v9027_v20 }
 0x3df   : > { %v9031_v30 = vpop.eup %9030  ;;  %9056 = vrcp.f32 %v4707_v25  ;;  %v4720_v9 = vadd.f32 1.0, %v9029_v2  ;;  %v4695_v25 = vadd.f32 1.0, %v9019_v0  ;;  %v13501_v0 = vadd.f32 %v13445_v5, %v13483_v16 }
 0x3e0   : > { %v9033_v26 = vpop.eup %9032  ;;  %9058 = vrcp.f32 %v4709_v32  ;;  %v4722_v33 = vadd.f32 1.0, %v9031_v30  ;;  %v4694_v32 = vadd.f32 1.0, %v9015_v13  ;;  %v13489_v30 = vpop.f32.mrf.mxu1  ;;  %v17041_v13 = vld [vmem:[#allocation28_spill] sm:$0xff] }
 0x3e1   : > { %v9035_v37 = vpop.eup %9034  ;;  %9060 = vrcp.f32 %v4720_v9  ;;  %v4721_v39 = vadd.f32 1.0, %v9033_v26  ;;  %17037 = vst [vmem:[#allocation182_spill] sm:$0xff] %v13489_v30  ;;  %v17038_v9 = vld [vmem:[#allocation53_spill] sm:$0xff]  ;;  %17040 = vst [vmem:[#allocation120_spill] sm:$0xff] %v13501_v0 }
 0x3e2   : > { %v9037_v20 = vpop.eup %9036  ;;  %9062 = vrcp.f32 %v4722_v33  ;;  %v4723_v2 = vadd.f32 1.0, %v9035_v37  ;;  %v13495_v26 = vadd.f32 %v17038_v9, %v13480_v63  ;;  %v13504_v33 = vrot.slane %v954_v36, %v17041_v13  ;;  %v13506_v37 = vpop.f32.mrf.mxu0 }
 0x3e3   : > { %v13487_v14 = vpop.eup %9038  ;;  %9064 = vrcp.f32 %v4721_v39  ;;  %v4680_v62 = vadd.f32 1.0, %v9037_v20  ;;  %v13517_v5 = vpop.f32.mrf.mxu1  ;;  %v4653_v13 = vadd.f32 1.0, %v13421_v27  ;;  %v4639_v27 = vadd.f32 1.0, %v13397_v58 }
 0x3e4   : > { %17036 = vst [vmem:[#allocation113_spill] sm:$0xff] %v13487_v14  ;;  %v13491_v29 = vpop.eup %9040  ;;  %9066 = vrcp.f32 %v4723_v2  ;;  %17039 = vst [vmem:[#allocation13_spill] sm:$0xff] %v13495_v26  ;;  %v17042_v2 = vld [vmem:[#allocation29_spill] sm:$0xff]  ;;  %v7208_v60 = vmul.f32 -1.442695, %v13495_v26  ;;  %v4638_v26 = vadd.f32 1.0, %v13390_v17 }
 0x3e5   : > { %v13497_v45 = vpop.eup %9042  ;;  %9068 = vrcp.f32 %v4708_v48  ;;  %v13512_v9 = vrot.slane %v954_v36, %v17042_v2  ;;  %v4666_v48 = vadd.f32 1.0, %v13434_v4  ;;  %17043 = vst [vmem:[#allocation74_spill] sm:$0xff] %v13517_v5  ;;  %v7210_v36 = vmul.f32 -1.442695, %v13501_v0  ;;  %v17050_v5 = vld [vmem:[#allocation47_spill] sm:$0xff]  ;;  %v17054_v17 = vld [vmem:[#allocation88_spill] sm:$0xff] }
 0x3e6   : > { %v13508_v39 = vpop.eup %9044  ;;  %9070 = vrcp.f32 %v4695_v25  ;;  %v17044_v25 = vld [vmem:[#allocation105_spill] sm:$0xff]  ;;  %v13551_v58 = vadd.f32 %v17050_v5, %v13504_v33  ;;  %v4624_v14 = vadd.f32 1.0, %v13375_v47  ;;  %v13567_v5 = vadd.f32 %v13475_v31, %v13483_v16 }
 0x3e7   : > { %v13514_v30 = vpop.eup %9046  ;;  %9072 = vrcp.f32 %v4694_v32  ;;  %v13529_v4 = vadd.f32 %v17044_v25, %v13504_v33  ;;  %v13531_v32 = vpop.f32.mrf.mxu0  ;;  %v13547_v25 = vadd.f32 %v13467_v38, %v13483_v16  ;;  %v13579_v47 = vadd.f32 %v13485_v24, %v13512_v9 }
 0x3e8   : > { %v13519_v20 = vpop.eup %9048  ;;  %9074 = vrcp.f32 %v4681_v1  ;;  %v13538_v1 = vadd.f32 %v13461_v53, %v13512_v9  ;;  %17051 = vst [vmem:[#allocation75_spill] sm:$0xff] %v13551_v58  ;;  %17056 = vst [vmem:[#allocation93_spill] sm:$0xff] %v13567_v5  ;;  %v7223_v51 = vmul.f32 -1.442695, %v13551_v58 }
 0x3e9   : > { %v13523_v42 = vpop.eup %9050  ;;  %9076 = vrcp.f32 %v4680_v62  ;;  %17045 = vst [vmem:[#allocation56_spill] sm:$0xff] %v13529_v4  ;;  %v13542_v62 = vadd.f32 %v17047_v46, %v13480_v63  ;;  %17049 = vst [vmem:[#allocation179_spill] sm:$0xff] %v13547_v25  ;;  %v13558_v46 = vadd.f32 %v13471_v3, %v13512_v9 }
 0x3ea   : > { %v13533_v2 = vpop.eup %9052  ;;  %9078 = vrcp.f32 %v4667_v21  ;;  %17046 = vst [vmem:[#allocation141_spill] sm:$0xff] %v13538_v1  ;;  %v13553_v21 = vpop.f32.mrf.mxu1  ;;  %17060 = vst [vmem:[#allocation191_spill] sm:$0xff] %v13579_v47  ;;  %v7211_v31 = vmul.f32 -1.442695, %v13538_v1  ;;  %v13595_v1 = vmul.f32 -1.442695, %v13567_v5 }
 0x3eb   : > { %17048 = vst [vmem:[#allocation164_spill] sm:$0xff] %v13542_v62  ;;  %v9055_v0 = vpop.eup %9054  ;;  %9080 = vrcp.f32 %v4666_v48  ;;  %17052 = vst [vmem:[#allocation117_spill] sm:$0xff] %v13553_v21  ;;  %v13562_v48 = vadd.f32 %v17054_v17, %v13480_v63  ;;  %v17057_v21 = vld [vmem:[#allocation73_spill] sm:$0xff]  ;;  %v7209_v17 = vmul.f32 -1.442695, %v13529_v4 }
 0x3ec   : > { %v9057_v53 = vpop.eup %9056  ;;  %9082 = vrcp.f32 %v4653_v13  ;;  %17053 = vst [vmem:[#allocation186_spill] sm:$0xff] %v13558_v46  ;;  %v13571_v12 = vadd.f32 %v17057_v21, %v13504_v33  ;;  %v13573_v13 = vpop.f32.mrf.mxu0  ;;  %v7222_v49 = vmul.f32 -1.442695, %v13542_v62  ;;  %v7224_v21 = vmul.f32 -1.442695, %v13547_v25  ;;  %v17062_v5 = vld [vmem:[#allocation65_spill] sm:$0xff] }
 0x3ed   : > { %17055 = vst [vmem:[#allocation97_spill] sm:$0xff] %v13562_v48  ;;  %v9059_v38 = vpop.eup %9058  ;;  %9084 = vrcp.f32 %v4652_v35  ;;  %17059 = vst [vmem:[#allocation146_spill] sm:$0xff] %v13573_v13  ;;  %v13584_v56 = vpop.f32.mrf.mxu1  ;;  %v13591_v24 = vmul.f32 -1.442695, %v13562_v48  ;;  %v13605_v48 = vmul.f32 -1.442695, %v13579_v47 }
 0x3ee   : > { %17058 = vst [vmem:[#allocation128_spill] sm:$0xff] %v13571_v12  ;;  %v9061_v3 = vpop.eup %9060  ;;  %9086 = vrcp.f32 %v4639_v27  ;;  %17061 = vst [vmem:[#allocation55_spill] sm:$0xff] %v13584_v56  ;;  %v13588_v27 = vmul.f32 -1.442695, %v13558_v46  ;;  %v13598_v25 = vmul.f32 -1.442695, %v13571_v12  ;;  %v13600_v62 = vpop.f32.mrf.mxu0  ;;  %v13611_v12 = vadd.f32 %v17062_v5, %v13480_v63 }
 0x3ef   : > { %v9063_v35 = vpop.eup %9062  ;;  %9088 = vrcp.f32 %v4638_v26  ;;  %v6064_v46 = vmul.f32 %v9061_v3, %v13419_v6  ;;  %v13613_v56 = vpop.f32.mrf.mxu1  ;;  %v6050_v6 = vmul.f32 %v9055_v0, %v13395_v54  ;;  %v6036_v0 = vmul.f32 %v13523_v42, %v13367_v40 }
 0x3f0   : > { %v9065_v13 = vpop.eup %9064  ;;  %9090 = vrcp.f32 %v4625_v61  ;;  %17063 = vst [vmem:[#allocation151_spill] sm:$0xff] %v13611_v12  ;;  %v13628_v54 = vpop.f32.mrf.mxu0  ;;  %v6022_v40 = vmul.f32 %v13514_v30, %v13347_v43  ;;  %v5995_v3 = vmul.f32 %v13491_v29, %v13298_v15  ;;  %v17075_v15 = vld [vmem:[#allocation132_spill] sm:$0xff] }
 0x3f1   : > { %v9067_v4 = vpop.eup %9066  ;;  %9092 = vrcp.f32 %v4624_v14  ;;  %v6065_v26 = vmul.f32 %v9065_v13, %v13430_v52  ;;  %v6051_v52 = vmul.f32 %v9057_v53, %v13406_v55  ;;  %v6066_v13 = vmul.f32 %v9063_v35, %v13425_v50  ;;  %v17065_v53 = vld [vmem:[#allocation61_spill] sm:$0xff]  ;;  %v13643_v42 = vpop.f32.mrf.mxu1 }
 0x3f2   : > { %v9069_v61 = vpop.eup %9068  ;;  %9094 = vrcp.f32 %v4611_v18  ;;  %v6067_v58 = vmul.f32 %v9067_v4, %v13438_v19  ;;  %v6053_v19 = vmul.f32 %v9059_v38, %v13414_v44  ;;  %v13619_v4 = vadd.f32 %v13506_v37, %v13483_v16  ;;  %17068 = vst [vmem:[#allocation91_spill] sm:$0xff] %v13643_v42  ;;  %v13657_v38 = vpop.f32.mrf.mxu0 }
 0x3f3   : > { %v9071_v14 = vpop.eup %9070  ;;  %9096 = vpow2.f32 %v7208_v60  ;;  %6250 = vmatprep.subr.mxu1 %v6065_v26  ;;  %v6037_v55 = vmul.f32 %v13533_v2, %v13380_v57  ;;  %v6052_v50 = vmul.f32 %v9069_v61, %v13401_v7  ;;  %v13626_v5 = vadd.f32 %v17065_v53, %v13504_v33  ;;  %v17074_v26 = vld [vmem:[#allocation107_spill] sm:$0xff] }
 0x3f4   : > { %v9073_v18 = vpop.eup %9072  ;;  %9098 = vpow2.f32 %v7210_v36  ;;  %17064 = vst [vmem:[#allocation160_spill] sm:$0xff] %v13619_v4  ;;  %6321 = vmatprep.subr.mxu0 %v6067_v58  ;;  %6251 = vmatpush2.msra.mxu1 %v6064_v46  ;;  %v6039_v37 = vmul.f32 %v9071_v14, %v13388_v28  ;;  %v13635_v57 = vadd.f32 %v13531_v32, %v13512_v9  ;;  %v13641_v58 = vmul.f32 -1.442695, %v13611_v12  ;;  %v17077_v14 = vld [vmem:[#allocation59_spill] sm:$0xff] }
 0x3f5   : > { %v9075_v60 = vpop.eup %9074  ;;  %9100 = vpow2.f32 %v7209_v17  ;;  %17066 = vst [vmem:[#allocation35_spill] sm:$0xff] %v13626_v5  ;;  %6322 = vmatpush2.msra.mxu0 %v6066_v13  ;;  %6252 = vmatprep.subr.mxu1 %v6051_v52  ;;  %v6023_v2 = vmul.f32 %v13519_v20, %v13353_v23  ;;  %v6038_v36 = vmul.f32 %v9073_v18, %v13373_v11  ;;  %v13649_v46 = vmul.f32 -1.442695, %v13619_v4  ;;  %v17069_v17 = vld [vmem:[#allocation78_spill] sm:$0xff] }
 0x3f6   : > { %v9077_v44 = vpop.eup %9076  ;;  %9102 = vpow2.f32 %v7211_v31  ;;  %17067 = vst [vmem:[#allocation177_spill] sm:$0xff] %v13635_v57  ;;  %6323 = vmatprep.subr.mxu0 %v6053_v19  ;;  %6253 = vmatpush2.msra.mxu1 %v6050_v6  ;;  %v6025_v32 = vmul.f32 %v9075_v60, %v13361_v8  ;;  %v13655_v20 = vmul.f32 -1.442695, %v13626_v5  ;;  %v6008_v8 = vmul.f32 %v13497_v45, %v13312_v10  ;;  %v13671_v10 = vpop.f32.mrf.mxu1  ;;  %v17078_v13 = vld [vmem:[#allocation210_spill] sm:$0xff]  ;;  %v17079_v60 = vld [vmem:[#allocation40_spill] sm:$0xff] }
 0x3f7   : > { %v9079_v7 = vpop.eup %9078  ;;  %9104 = vpow2.f32 %v7222_v49  ;;  %6324 = vmatpush2.msra.mxu0 %v6052_v50  ;;  %6254 = vmatprep.subr.mxu1 %v6037_v55  ;;  %v6009_v49 = vmul.f32 %v13508_v39, %v13328_v34  ;;  %v6024_v11 = vmul.f32 %v9077_v44, %v13442_v59  ;;  %v13664_v34 = vmul.f32 -1.442695, %v13635_v57  ;;  %17070 = vst [vmem:[#allocation79_spill] sm:$0xff] %v13671_v10  ;;  %v13683_v6 = vpop.f32.mrf.mxu0  ;;  %v17080_v55 = vld [vmem:[#allocation106_spill] sm:$0xff]  ;;  %v17081_v50 = vld [vmem:[#allocation183_spill] sm:$0xff]  ;;  %v17225_v57 = vld [vmem:[#allocation32_spill] sm:$0xff] }
 0x3f8   : > { %v9081_v28 = vpop.eup %9080  ;;  %9106 = vpow2.f32 %v7224_v21  ;;  %6325 = vmatprep.subr.mxu0 %v6039_v37  ;;  %6255 = vmatpush2.msra.mxu1 %v6036_v0  ;;  %v6011_v30 = vmul.f32 %v9079_v7, %v13335_v41  ;;  %v4526_v39 = vadd.f32 1.0, %v13103_v22  ;;  %v17071_v41 = vld [vmem:[#allocation147_spill] sm:$0xff]  ;;  %v17072_v21 = vld [vmem:[#allocation180_spill] sm:$0xff]  ;;  %v4512_v29 = vadd.f32 1.0, %v17075_v15  ;;  %v17082_v44 = vld [vmem:[#allocation154_spill] sm:$0xff] }
 0x3f9   : > { %v9083_v23 = vpop.eup %9082  ;;  %9108 = vpow2.f32 %v7223_v51  ;;  %6326 = vmatpush2.msra.mxu0 %v6038_v36  ;;  %6256 = vmatprep.subr.mxu1 %v6023_v2  ;;  %v6010_v35 = vmul.f32 %v9081_v28, %v17069_v17  ;;  %v4513_v31 = vadd.f32 1.0, %v17071_v41  ;;  %v17073_v51 = vld [vmem:[#allocation113_spill] sm:$0xff]  ;;  %v13691_v0 = vadd.f32 %v17082_v44, %v13480_v63  ;;  %v17086_v36 = vld [vmem:[#allocation194_spill] sm:$0xff] }
 0x3fa   : > { %v9085_v43 = vpop.eup %9084  ;;  %9110 = vpow2.f32 %v13588_v27  ;;  %6327 = vmatprep.subr.mxu0 %v6025_v32  ;;  %6257 = vmatpush2.msra.mxu1 %v6022_v40  ;;  %v5994_v27 = vmul.f32 %v17073_v51, %v17072_v21  ;;  %v5997_v61 = vmul.f32 %v9083_v23, %v17074_v26  ;;  %v17085_v7 = vld [vmem:[#allocation189_spill] sm:$0xff]  ;;  %v17087_v40 = vld [vmem:[#allocation146_spill] sm:$0xff]  ;;  %v17097_v21 = vld [vmem:[#allocation19_spill] sm:$0xff] }
 0x3fb   : > { %v9087_v59 = vpop.eup %9086  ;;  %9112 = vpow2.f32 %v13591_v24  ;;  %6328 = vmatpush2.msra.mxu0 %v6024_v11  ;;  %6258 = vmatprep.subr.mxu1 %v6009_v49  ;;  %v17076_v24 = vld [vmem:[#allocation86_spill] sm:$0xff]  ;;  %v5996_v18 = vmul.f32 %v9085_v43, %v17078_v13  ;;  %17083 = vst [vmem:[#allocation87_spill] sm:$0xff] %v13691_v0  ;;  %v13698_v32 = vadd.f32 %v17087_v40, %v13483_v16  ;;  %v17090_v49 = vld [vmem:[#allocation51_spill] sm:$0xff]  ;;  %v17091_v11 = vld [vmem:[#allocation212_spill] sm:$0xff] }
 0x3fc   : > { %v9089_v45 = vpop.eup %9088  ;;  %9114 = vpow2.f32 %v13595_v1  ;;  %6329 = vmatprep.subr.mxu0 %v6011_v30  ;;  %6259 = vmatpush2.msra.mxu1 %v6008_v8  ;;  %v5981_v52 = vmul.f32 %v17077_v14, %v17076_v24  ;;  %v5980_v1 = vmul.f32 %v17080_v55, %v17079_v60  ;;  %v5983_v53 = vmul.f32 %v9087_v59, %v17081_v50  ;;  %v17092_v8 = vld [vmem:[#allocation64_spill] sm:$0xff]  ;;  %v17100_v15 = vld [vmem:[#allocation150_spill] sm:$0xff]  ;;  %v17105_v60 = vld [vmem:[#allocation99_spill] sm:$0xff] }
 0x3fd   : > { %v9091_v22 = vpop.eup %9090  ;;  %9116 = vpow2.f32 %v13598_v25  ;;  %6330 = vmatpush2.msra.mxu0 %v6010_v35  ;;  %6260 = vmatprep.subr.mxu1 %v5995_v3  ;;  %v17084_v25 = vld [vmem:[#allocation95_spill] sm:$0xff]  ;;  %v5982_v28 = vmul.f32 %v9089_v45, %v17086_v36  ;;  %17088 = vst [vmem:[#allocation70_spill] sm:$0xff] %v13698_v32  ;;  %v13704_v43 = vmul.f32 %v17091_v11, %v17090_v49  ;;  %v17093_v30 = vld [vmem:[#allocation220_spill] sm:$0xff]  ;;  %v17095_v35 = vld [vmem:[#allocation206_spill] sm:$0xff] }
 0x3fe   : > { %v9093_v19 = vpop.eup %9092  ;;  %9118 = vpow2.f32 %v13605_v48  ;;  %6331 = vmatprep.subr.mxu0 %v5997_v61  ;;  %6261 = vmatpush2.msra.mxu1 %v5994_v27  ;;  %v5967_v2 = vmul.f32 %v17085_v7, %v17084_v25  ;;  %v13700_v48 = vpop.f32.mrf.mxu1  ;;  %v5966_v59 = vmul.f32 %v17093_v30, %v17092_v8  ;;  %v17096_v45 = vld [vmem:[#allocation158_spill] sm:$0xff]  ;;  %v17098_v27 = vld [vmem:[#allocation152_spill] sm:$0xff]  ;;  %v13726_v13 = vadd.f32 %v13600_v62, %v13512_v9  ;;  %v17107_v50 = vld [vmem:[#allocation217_spill] sm:$0xff] }
 0x3ff   : > { %v9095_v37 = vpop.eup %9094  ;;  %9120 = vrcp.f32 %v4526_v39  ;;  %6332 = vmatpush2.msra.mxu0 %v5996_v18  ;;  %6262 = vmatprep.subr.mxu1 %v5981_v52  ;;  %17089 = vst [vmem:[#allocation102_spill] sm:$0xff] %v13700_v48  ;;  %v17094_v39 = vld [vmem:[#allocation98_spill] sm:$0xff]  ;;  %v5953_v41 = vmul.f32 %v17096_v45, %v17095_v35  ;;  %v5968_v51 = vmul.f32 %v9093_v19, %v17097_v21  ;;  %v13716_v61 = vpop.f32.mrf.mxu0  ;;  %v17102_v14 = vld [vmem:[#allocation112_spill] sm:$0xff]  ;;  %v17109_v7 = vld [vmem:[#allocation135_spill] sm:$0xff] }
 0x400   : > { %v9097_v23 = vpop.eup %9096  ;;  %9122 = vrcp.f32 %v4513_v31  ;;  %v5969_v3 = vmul.f32 %v9091_v22, %v17094_v39  ;;  %6333 = vmatprep.subr.mxu0 %v5983_v53  ;;  %6263 = vmatpush2.msra.mxu1 %v5980_v1  ;;  %v13714_v26 = vadd.f32 %v17098_v27, %v13504_v33  ;;  %v17101_v22 = vld [vmem:[#allocation216_spill] sm:$0xff]  ;;  %v5955_v52 = vmul.f32 %v9095_v37, %v17102_v14  ;;  %v17104_v19 = vld [vmem:[#allocation130_spill] sm:$0xff]  ;;  %v17106_v1 = vld [vmem:[#allocation11_spill] sm:$0xff]  ;;  %v13733_v37 = vpop.f32.mrf.mxu1 }
 0x401   : > { %v9099_v17 = vpop.eup %9098  ;;  %9124 = vrcp.f32 %v4512_v29  ;;  %6334 = vmatpush2.msra.mxu0 %v5982_v28  ;;  %6264 = vmatprep.subr.mxu1 %v5967_v2  ;;  %v5952_v24 = vmul.f32 %v17101_v22, %v17100_v15  ;;  %v13722_v29 = vmul.f32 -1.442695, %v13691_v0  ;;  %17103 = vst [vmem:[#allocation90_spill] sm:$0xff] %v13726_v13  ;;  %v5939_v55 = vmul.f32 %v17105_v60, %v17104_v19  ;;  %v17110_v62 = vld [vmem:[#allocation20_spill] sm:$0xff]  ;;  %v17112_v28 = vld [vmem:[#allocation214_spill] sm:$0xff]  ;;  %v17115_v30 = vld [vmem:[#allocation215_spill] sm:$0xff]  ;;  %v13745_v35 = vpop.f32.mrf.mxu0 }
 0x402   : > { %17099 = vst [vmem:[#allocation54_spill] sm:$0xff] %v13714_v26  ;;  %v9101_v31 = vpop.eup %9100  ;;  %6335 = vmatprep.subr.mxu0 %v5969_v3  ;;  %6265 = vmatpush2.msra.mxu1 %v5966_v59  ;;  %v5954_v53 = vmul.f32 %v17107_v50, %v17106_v1  ;;  %v4290_v44 = vadd.f32 1.0, %v9097_v23  ;;  %9126 = vpow2.f32 %v13641_v58  ;;  %17108 = vst [vmem:[#allocation81_spill] sm:$0xff] %v13733_v37  ;;  %v17111_v36 = vld [vmem:[#allocation204_spill] sm:$0xff]  ;;  %v4292_v49 = vadd.f32 1.0, %v9099_v17  ;;  %v17119_v21 = vld [vmem:[#allocation137_spill] sm:$0xff] }
 0x403   : > { %v9103_v18 = vpop.eup %9102  ;;  %6336 = vmatpush2.msra.mxu0 %v5968_v51  ;;  %6266 = vmatprep.subr.mxu1 %v5953_v41  ;;  %v5938_v2 = vmul.f32 %v17110_v62, %v17109_v7  ;;  %v5941_v40 = vmul.f32 %v17112_v28, %v17111_v36  ;;  %9128 = vpow2.f32 %v13649_v46  ;;  %v17113_v23 = vld [vmem:[#allocation136_spill] sm:$0xff]  ;;  %v4291_v3 = vadd.f32 1.0, %v9101_v31  ;;  %v17118_v41 = vld [vmem:[#allocation115_spill] sm:$0xff]  ;;  %v17120_v51 = vld [vmem:[#allocation30_spill] sm:$0xff] }
 0x404   : > { %v9105_v25 = vpop.eup %9104  ;;  %6337 = vmatprep.subr.mxu0 %v5955_v52  ;;  %6267 = vmatpush2.msra.mxu1 %v5952_v24  ;;  %v17114_v8 = vld [vmem:[#allocation80_spill] sm:$0xff]  ;;  %9130 = vpow2.f32 %v13655_v20  ;;  %v5927_v27 = vmul.f32 %v17120_v51, %v17119_v21  ;;  %v4293_v15 = vadd.f32 1.0, %v9103_v18  ;;  %v17123_v14 = vld [vmem:[#allocation139_spill] sm:$0xff]  ;;  %v17126_v50 = vld [vmem:[#allocation57_spill] sm:$0xff] }
 0x405   : > { %v9107_v11 = vpop.eup %9106  ;;  %v5925_v58 = vmul.f32 %v17114_v8, %v17113_v23  ;;  %v17116_v59 = vld [vmem:[#allocation76_spill] sm:$0xff]  ;;  %6338 = vmatpush2.msra.mxu0 %v5954_v53  ;;  %6268 = vmatprep.subr.mxu1 %v5939_v55  ;;  %9132 = vpow2.f32 %v13664_v34  ;;  %v17124_v52 = vld [vmem:[#allocation175_spill] sm:$0xff]  ;;  %v4304_v60 = vadd.f32 1.0, %v9105_v25  ;;  %v13756_v55 = vpop.f32.mrf.mxu1  ;;  %v17128_v34 = vld [vmem:[#allocation125_spill] sm:$0xff] }
 0x406   : > { %v5940_v39 = vmul.f32 %v17116_v59, %v17115_v30  ;;  %v9109_v45 = vpop.eup %9108  ;;  %v17117_v17 = vld [vmem:[#allocation148_spill] sm:$0xff]  ;;  %6339 = vmatprep.subr.mxu0 %v5941_v40  ;;  %6269 = vmatpush2.msra.mxu1 %v5938_v2  ;;  %v5926_v19 = vmul.f32 %v17124_v52, %v17123_v14  ;;  %9134 = vrcp.f32 %v4290_v44  ;;  %17125 = vst [vmem:[#allocation169_spill] sm:$0xff] %v13756_v55  ;;  %v17127_v18 = vld [vmem:[#allocation187_spill] sm:$0xff]  ;;  %v4306_v2 = vadd.f32 1.0, %v9107_v11  ;;  %v17130_v28 = vld [vmem:[#allocation18_spill] sm:$0xff]  ;;  %v13766_v30 = vpop.f32.mrf.mxu0 }
 0x407   : > { %v5924_v46 = vmul.f32 %v17118_v41, %v17117_v17  ;;  %v9111_v22 = vpop.eup %9110  ;;  %v17121_v31 = vld [vmem:[#allocation156_spill] sm:$0xff]  ;;  %6270 = vmatprep.subr.mxu1 %v5925_v58  ;;  %v5910_v53 = vmul.f32 %v17127_v18, %v17126_v50  ;;  %v17129_v7 = vld [vmem:[#allocation119_spill] sm:$0xff]  ;;  %9136 = vrcp.f32 %v4292_v49  ;;  %v17132_v25 = vld [vmem:[#allocation157_spill] sm:$0xff]  ;;  %v4305_v58 = vadd.f32 1.0, %v9109_v45  ;;  %v13776_v52 = vpop.f32.mrf.mxu1 }
 0x408   : > { %v17122_v24 = vld [vmem:[#allocation192_spill] sm:$0xff]  ;;  %6340 = vmatpush2.msra.mxu0 %v5940_v39  ;;  %v9113_v1 = vpop.eup %9112  ;;  %v5913_v62 = vmul.f32 %v17129_v7, %v17128_v34  ;;  %v17131_v40 = vld [vmem:[#allocation199_spill] sm:$0xff]  ;;  %9138 = vrcp.f32 %v4291_v3  ;;  %v17135_v17 = vld [vmem:[#allocation202_spill] sm:$0xff]  ;;  %v4307_v21 = vadd.f32 1.0, %v9111_v22  ;;  %17142 = vst [vmem:[#allocation181_spill] sm:$0xff] %v13776_v52 }
 0x409   : > { %v5911_v20 = vmul.f32 %v17122_v24, %v17121_v31  ;;  %6341 = vmatprep.subr.mxu0 %v5927_v27  ;;  %6271 = vmatpush2.msra.mxu1 %v5924_v46  ;;  %v9115_v36 = vpop.eup %9114  ;;  %v5897_v44 = vmul.f32 %v17131_v40, %v17130_v28  ;;  %v17133_v23 = vld [vmem:[#allocation207_spill] sm:$0xff]  ;;  %v17137_v41 = vld [vmem:[#allocation198_spill] sm:$0xff]  ;;  %9140 = vrcp.f32 %v4293_v15  ;;  %v17138_v27 = vld [vmem:[#allocation69_spill] sm:$0xff] }
 0x40a   : > { %v5912_v8 = vmul.f32 %v17133_v23, %v17132_v25  ;;  %6342 = vmatpush2.msra.mxu0 %v5926_v19  ;;  %v9117_v59 = vpop.eup %9116  ;;  %v17134_v39 = vld [vmem:[#allocation63_spill] sm:$0xff]  ;;  %v17139_v31 = vld [vmem:[#allocation142_spill] sm:$0xff]  ;;  %v17140_v45 = vld [vmem:[#allocation33_spill] sm:$0xff]  ;;  %9142 = vrcp.f32 %v4304_v60  ;;  %v4320_v7 = vadd.f32 1.0, %v9115_v36 }
 0x40b   : > { %6272 = vmatprep.subr.mxu1 %v5911_v20  ;;  %v5896_v49 = vmul.f32 %v17135_v17, %v17134_v39  ;;  %v17136_v11 = vld [vmem:[#allocation31_spill] sm:$0xff]  ;;  %6343 = vmatprep.subr.mxu0 %v5913_v62  ;;  %v9119_v51 = vpop.eup %9118  ;;  %v5883_v3 = vmul.f32 %v17139_v31, %v17138_v27  ;;  %v17141_v24 = vld [vmem:[#allocation10_spill] sm:$0xff]  ;;  %v4318_v20 = vadd.f32 1.0, %v9113_v1  ;;  %v17143_v50 = vld [vmem:[#allocation41_spill] sm:$0xff]  ;;  %9144 = vrcp.f32 %v4306_v2 }
 0x40c   : > { %v5899_v46 = vmul.f32 %v17137_v41, %v17136_v11  ;;  %6273 = vmatpush2.msra.mxu1 %v5910_v53  ;;  %v5898_v14 = vmul.f32 %v17141_v24, %v17140_v45  ;;  %6344 = vmatpush2.msra.mxu0 %v5912_v8  ;;  %v9121_v19 = vpop.eup %9120  ;;  %v17144_v18 = vld [vmem:[#allocation121_spill] sm:$0xff]  ;;  %v17147_v28 = vld [vmem:[#allocation43_spill] sm:$0xff]  ;;  %v17148_v40 = vld [vmem:[#allocation208_spill] sm:$0xff]  ;;  %9146 = vrcp.f32 %v4305_v58  ;;  %v4319_v23 = vadd.f32 1.0, %v9117_v59  ;;  %v13786_v8 = vpop.f32.mrf.mxu0 }
 0x40d   : > { %6274 = vmatprep.subr.mxu1 %v5897_v44  ;;  %v5882_v15 = vmul.f32 %v17144_v18, %v17143_v50  ;;  %v17145_v22 = vld [vmem:[#allocation37_spill] sm:$0xff]  ;;  %v9123_v62 = vpop.eup %9122  ;;  %v5869_v60 = vmul.f32 %v17148_v40, %v17147_v28  ;;  %v17149_v1 = vld [vmem:[#allocation39_spill] sm:$0xff]  ;;  %v17150_v25 = vld [vmem:[#allocation118_spill] sm:$0xff]  ;;  %9148 = vrcp.f32 %v4307_v21 }
 0x40e   : > { %v17146_v34 = vld [vmem:[#allocation205_spill] sm:$0xff]  ;;  %6345 = vmatprep.subr.mxu0 %v5899_v46  ;;  %6275 = vmatpush2.msra.mxu1 %v5896_v49  ;;  %v5884_v44 = vmul.f32 %v17150_v25, %v17149_v1  ;;  %v9125_v39 = vpop.eup %9124  ;;  %v17152_v11 = vld [vmem:[#allocation124_spill] sm:$0xff]  ;;  %v17154_v41 = vld [vmem:[#allocation123_spill] sm:$0xff]  ;;  %v4321_v46 = vadd.f32 1.0, %v9119_v51  ;;  %9150 = vrcp.f32 %v4318_v20  ;;  %v7266_v51 = vmul.f32 -1.442695, %v13698_v32 }
 0x40f   : > { %v5885_v53 = vmul.f32 %v17146_v34, %v17145_v22  ;;  %6346 = vmatpush2.msra.mxu0 %v5898_v14  ;;  %6276 = vmatprep.subr.mxu1 %v5883_v3  ;;  %v17151_v17 = vld [vmem:[#allocation45_spill] sm:$0xff]  ;;  %v17153_v36 = vld [vmem:[#allocation84_spill] sm:$0xff]  ;;  %v17157_v58 = vld [vmem:[#allocation122_spill] sm:$0xff]  ;;  %v13799_v14 = vpop.f32.mrf.mxu1  ;;  %v9127_v50 = vpop.eup %9126  ;;  %9152 = vrcp.f32 %v4320_v7  ;;  %v7265_v34 = vmul.f32 -1.442695, %v13714_v26  ;;  %v17167_v25 = vmov 1.0  }
 0x410   : > { %v5868_v2 = vmul.f32 %v17152_v11, %v17151_v17  ;;  %v5871_v49 = vmul.f32 %v17154_v41, %v17153_v36  ;;  %6277 = vmatpush2.msra.mxu1 %v5882_v15  ;;  %v17155_v27 = vld [vmem:[#allocation101_spill] sm:$0xff]  ;;  %v5870_v59 = vmul.f32 %v9121_v19, %v17157_v58  ;;  %v17158_v24 = vld [vmem:[#allocation196_spill] sm:$0xff]  ;;  %17160 = vst [vmem:[#allocation15_spill] sm:$0xff] %v13799_v14  ;;  %v17161_v18 = vld [vmem:[#allocation190_spill] sm:$0xff]  ;;  %v9129_v20 = vpop.eup %9128  ;;  %9154 = vrcp.f32 %v4319_v23 }
 0x411   : > { %6347 = vmatprep.subr.mxu0 %v5885_v53  ;;  %v17156_v31 = vld [vmem:[#allocation209_spill] sm:$0xff]  ;;  %v13797_v3 = vadd.f32 %v17158_v24, %v13480_v63  ;;  %6278 = vmatprep.subr.mxu1 %v5869_v60  ;;  %v5857_v21 = vmul.f32 %v9123_v62, %v17161_v18  ;;  %v13805_v15 = vadd.f32 %v13628_v54, %v13483_v16  ;;  %v17164_v53 = vld [vmem:[#allocation143_spill] sm:$0xff]  ;;  %v13813_v62 = vpop.f32.mrf.mxu0  ;;  %v9131_v7 = vpop.eup %9130  ;;  %9156 = vrcp.f32 %v4321_v46  ;;  %v17174_v46 = vld [vmem:[#allocation126_spill] sm:$0xff] }
 0x412   : > { %v5855_v45 = vmul.f32 %v17156_v31, %v17155_v27  ;;  %6348 = vmatpush2.msra.mxu0 %v5884_v44  ;;  %6279 = vmatpush2.msra.mxu1 %v5868_v2  ;;  %v17163_v19 = vld [vmem:[#allocation49_spill] sm:$0xff]  ;;  %v13811_v28 = vadd.f32 %v17164_v53, %v13504_v33  ;;  %v7267_v54 = vmul.f32 -1.442695, %v13726_v13  ;;  %v9133_v40 = vpop.eup %9132  ;;  %9158 = vpow2.f32 %v13722_v29  ;;  %v13819_v1 = vpop.f32.mrf.mxu1  ;;  %v17221_v4 = vld [vmem:[#allocation178_spill] sm:$0xff]  ;;  %v17230_v32 = vld [vmem:[#allocation12_spill] sm:$0xff] }
 0x413   : > { %17159 = vst [vmem:[#allocation162_spill] sm:$0xff] %v13797_v3  ;;  %17162 = vst [vmem:[#allocation172_spill] sm:$0xff] %v13805_v15  ;;  %6349 = vmatprep.subr.mxu0 %v5871_v49  ;;  %v5856_v22 = vmul.f32 %v9125_v39, %v17163_v19  ;;  %v7278_v60 = vmul.f32 -1.442695, %v13797_v3  ;;  %v13822_v44 = vpop.eup %9134  ;;  %9160 = vpow2.f32 %v7266_v51  ;;  %v7280_v23 = vmul.f32 -1.442695, %v13805_v15  ;;  %v13830_v39 = vpop.f32.mrf.mxu0 }
 0x414   : > { %17165 = vst [vmem:[#allocation185_spill] sm:$0xff] %v13811_v28  ;;  %6350 = vmatpush2.msra.mxu0 %v5870_v59  ;;  %6280 = vmatprep.subr.mxu1 %v5855_v45  ;;  %17166 = vst [vmem:[#allocation166_spill] sm:$0xff] %v13819_v1  ;;  %9162 = vpow2.f32 %v7265_v34  ;;  %v7279_v29 = vmul.f32 -1.442695, %v13811_v28  ;;  %v4332_v11 = vadd.f32 1.0, %v9127_v50  ;;  %v17171_v2 = vld [vmem:[#allocation133_spill] sm:$0xff]  ;;  %v13843_v27 = vadd.f32 %v17174_v46, %v13504_v33  ;;  %v13845_v31 = vpop.f32.mrf.mxu1 }
 0x415   : > { %6351 = vmatprep.subr.mxu0 %v5857_v21  ;;  %6281 = vmatpush2.msra.mxu1 %v13704_v43  ;;  %17168 = vst [vmem:[#allocation94_spill] sm:$0xff] %v13822_v44  ;;  %v13827_v43 = vpop.eup %9136  ;;  %9164 = vpow2.f32 %v7267_v54  ;;  %v13837_v36 = vadd.f32 %v17171_v2, %v13480_v63  ;;  %v4334_v49 = vadd.f32 1.0, %v9129_v20  ;;  %17176 = vst [vmem:[#allocation197_spill] sm:$0xff] %v13845_v31  ;;  %v4333_v58 = vadd.f32 1.0, %v9131_v7  ;;  %v17178_v59 = vld [vmem:[#allocation9_spill] sm:$0xff]  ;;  %v17181_v21 = vld [vmem:[#allocation62_spill] sm:$0xff]  ;;  %v13859_v20 = vpop.f32.mrf.mxu0 }
 0x416   : > { %6352 = vmatpush2.msra.mxu0 %v5856_v22  ;;  %6283 = vmatmul.mubr.f32.vlgmr.msra.gmra.mxu1 %v17167_v25  ;;  %17169 = vst [vmem:[#allocation140_spill] sm:$0xff] %v13827_v43  ;;  %v13833_v17 = vpop.eup %9138  ;;  %9166 = vpow2.f32 %v7278_v60  ;;  %17175 = vst [vmem:[#allocation100_spill] sm:$0xff] %v13843_v27  ;;  %v13851_v24 = vadd.f32 %v17178_v59, %v13480_v63  ;;  %v4335_v18 = vadd.f32 1.0, %v9133_v40  ;;  %v7293_v54 = vmul.f32 -1.442695, %v13843_v27  ;;  %v13875_v40 = vpop.f32.mrf.mxu1  ;;  %v17244_v28 = vld [vmem:[#allocation114_spill] sm:$0xff] }
 0x417   : > { %6354 = vmatmul.mubr.f32.vlgmr.msra.gmra.mxu0 %v17167_v25  ;;  %6424 = vmatprep.mubr.f32.mxu1 %v17167_v25  ;;  %17170 = vst [vmem:[#allocation52_spill] sm:$0xff] %v13833_v17  ;;  %17172 = vst [vmem:[#allocation110_spill] sm:$0xff] %v13837_v36  ;;  %v13839_v41 = vpop.eup %9140  ;;  %9168 = vpow2.f32 %v7280_v23  ;;  %v13857_v51 = vadd.f32 %v17181_v21, %v13504_v33  ;;  %v13865_v22 = vadd.f32 %v13657_v38, %v13512_v9  ;;  %v13891_v2 = vpop.f32.mrf.mxu0 }
 0x418   : > { %6495 = vmatprep.mubr.f32.mxu0 %v17167_v25  ;;  %17173 = vst [vmem:[#allocation82_spill] sm:$0xff] %v13839_v41  ;;  %v13847_v45 = vpop.eup %9142  ;;  %17179 = vst [vmem:[#allocation134_spill] sm:$0xff] %v13851_v24  ;;  %9170 = vpow2.f32 %v7279_v29  ;;  %v7292_v34 = vmul.f32 -1.442695, %v13837_v36  ;;  %v13872_v7 = vadd.f32 %v13683_v6, %v13483_v16  ;;  %v13881_v38 = vadd.f32 %v13716_v61, %v13512_v9 }
 0x419   : > { %17177 = vst [vmem:[#allocation104_spill] sm:$0xff] %v13847_v45  ;;  %v13853_v50 = vpop.eup %9144  ;;  %17182 = vst [vmem:[#allocation129_spill] sm:$0xff] %v13857_v51  ;;  %9172 = vrcp.f32 %v4332_v11  ;;  %v7306_v23 = vmul.f32 -1.442695, %v13851_v24  ;;  %v13888_v6 = vadd.f32 %v13745_v35, %v13483_v16  ;;  %v7307_v11 = vmul.f32 -1.442695, %v13857_v51  ;;  %v13903_v35 = vpop.f32.mrf.mxu1 }
 0x41a   : > { %17180 = vst [vmem:[#allocation48_spill] sm:$0xff] %v13853_v50  ;;  %v13861_v19 = vpop.eup %9146  ;;  %17184 = vst [vmem:[#allocation224_spill] sm:$0xff] %v13865_v22  ;;  %9174 = vrcp.f32 %v4334_v49  ;;  %v7281_v46 = vmul.f32 -1.442695, %v13865_v22  ;;  %v13898_v61 = vadd.f32 %v13766_v30, %v13512_v9  ;;  %v7294_v59 = vmul.f32 -1.442695, %v13872_v7 }
 0x41b   : > { %17183 = vst [vmem:[#allocation184_spill] sm:$0xff] %v13861_v19  ;;  %v13868_v53 = vpop.eup %9148  ;;  %17186 = vst [vmem:[#allocation71_spill] sm:$0xff] %v13872_v7  ;;  %9176 = vrcp.f32 %v4333_v58  ;;  %v7295_v21 = vmul.f32 -1.442695, %v13881_v38  ;;  %v14094_v44 = vadd.f32 %v17244_v28, %v13480_v63  ;;  %v17249_v24 = vld [vmem:[#allocation226_spill] sm:$0xff] }
 0x41c   : > { %17185 = vst [vmem:[#allocation42_spill] sm:$0xff] %v13868_v53  ;;  %17187 = vst [vmem:[#allocation145_spill] sm:$0xff] %v13875_v40  ;;  %v13877_v60 = vpop.eup %9150  ;;  %9178 = vrcp.f32 %v4335_v18  ;;  %v7308_v40 = vmul.f32 -1.442695, %v13888_v6  ;;  %v7309_v30 = vmul.f32 -1.442695, %v13898_v61 }
 0x41d   : > { %17188 = vst [vmem:[#allocation222_spill] sm:$0xff] %v13877_v60  ;;  %17189 = vst [vmem:[#allocation38_spill] sm:$0xff] %v13881_v38  ;;  %v13884_v29 = vpop.eup %9152  ;;  %9180 = vpow2.f32 %v7292_v34  ;;  %v13907_v34 = vpop.f32.mrf.mxu0 }
 0x41e   : > { %17190 = vst [vmem:[#allocation225_spill] sm:$0xff] %v13884_v29  ;;  %17191 = vst [vmem:[#allocation44_spill] sm:$0xff] %v13888_v6  ;;  %v13893_v49 = vpop.eup %9154  ;;  %9182 = vpow2.f32 %v7293_v54  ;;  %v13910_v54 = vpop.f32.mrf.mxu1 }
 0x41f   : > { %17192 = vst [vmem:[#allocation176_spill] sm:$0xff] %v13893_v49  ;;  %17193 = vst [vmem:[#allocation16_spill] sm:$0xff] %v13898_v61  ;;  %v13900_v58 = vpop.eup %9156  ;;  %9184 = vpow2.f32 %v7306_v23  ;;  %v13912_v55 = vpop.f32.mrf.mxu0 }
 0x420   : > { %17194 = vst [vmem:[#allocation223_spill] sm:$0xff] %v13900_v58  ;;  %17195 = vst [vmem:[#allocation67_spill] sm:$0xff] %v13903_v35  ;;  %v9159_v18 = vpop.eup %9158  ;;  %9186 = vpow2.f32 %v7307_v11  ;;  %v14018_v12 = vadd.f32 %v13912_v55, %v13483_v16 }
 0x421   : > { %v9161_v25 = vpop.eup %9160  ;;  %9188 = vpow2.f32 %v7281_v46  ;;  %v4346_v14 = vadd.f32 1.0, %v9159_v18  ;;  %17196 = vst [vmem:[#allocation171_spill] sm:$0xff] %v13910_v54  ;;  %v17197_v46 = vld [vmem:[#allocation203_spill] sm:$0xff] }
 0x422   : > { %v9163_v31 = vpop.eup %9162  ;;  %9190 = vpow2.f32 %v7294_v59  ;;  %v4348_v52 = vadd.f32 1.0, %v9161_v25  ;;  %v13916_v50 = vadd.f32 %v17197_v46, %v13480_v63  ;;  %v17200_v18 = vld [vmem:[#allocation155_spill] sm:$0xff]  ;;  %17227 = vst [vmem:[#allocation77_spill] sm:$0xff] %v14018_v12 }
 0x423   : > { %v9165_v1 = vpop.eup %9164  ;;  %9192 = vpow2.f32 %v7295_v21  ;;  %v4347_v23 = vadd.f32 1.0, %v9163_v31  ;;  %v13922_v25 = vadd.f32 %v17200_v18, %v13504_v33  ;;  %v13924_v21 = vpop.f32.mrf.mxu1 }
 0x424   : > { %v9167_v35 = vpop.eup %9166  ;;  %9194 = vpow2.f32 %v7308_v40  ;;  %v4349_v41 = vadd.f32 1.0, %v9165_v1  ;;  %17198 = vst [vmem:[#allocation103_spill] sm:$0xff] %v13916_v50  ;;  %17202 = vst [vmem:[#allocation173_spill] sm:$0xff] %v13924_v21  ;;  %v17204_v1 = vld [vmem:[#allocation201_spill] sm:$0xff]  ;;  %v13938_v18 = vpop.f32.mrf.mxu0 }
 0x425   : > { %v9169_v43 = vpop.eup %9168  ;;  %9196 = vpow2.f32 %v7309_v30  ;;  %v4360_v59 = vadd.f32 1.0, %v9167_v35  ;;  %17201 = vst [vmem:[#allocation170_spill] sm:$0xff] %v13922_v25  ;;  %v13930_v30 = vadd.f32 %v17204_v1, %v13480_v63  ;;  %v7321_v1 = vmul.f32 -1.442695, %v13922_v25  ;;  %v13944_v21 = vpop.f32.mrf.mxu1 }
 0x426   : > { %v9171_v11 = vpop.eup %9170  ;;  %9198 = vrcp.f32 %v4346_v14  ;;  %v4362_v40 = vadd.f32 1.0, %v9169_v43  ;;  %v17207_v14 = vld [vmem:[#allocation138_spill] sm:$0xff]  ;;  %17210 = vst [vmem:[#allocation50_spill] sm:$0xff] %v13944_v21  ;;  %v13948_v29 = vpop.f32.mrf.mxu0  ;;  %v14034_v55 = vadd.f32 %v13938_v18, %v13512_v9 }
 0x427   : > { %v13918_v17 = vpop.eup %9172  ;;  %9200 = vrcp.f32 %v4348_v52  ;;  %17205 = vst [vmem:[#allocation200_spill] sm:$0xff] %v13930_v30  ;;  %v4361_v54 = vadd.f32 1.0, %v9171_v11  ;;  %v13936_v35 = vadd.f32 %v17207_v14, %v13504_v33  ;;  %v7320_v52 = vmul.f32 -1.442695, %v13916_v50 }
 0x428   : > { %17199 = vst [vmem:[#allocation221_spill] sm:$0xff] %v13918_v17  ;;  %v13926_v31 = vpop.eup %9174  ;;  %9202 = vrcp.f32 %v4347_v23  ;;  %v7334_v23 = vmul.f32 -1.442695, %v13930_v30  ;;  %v14011_v17 = vadd.f32 %v17225_v57, %v13480_v63  ;;  %v14027_v57 = vadd.f32 %v17230_v32, %v13504_v33 }
 0x429   : > { %17203 = vst [vmem:[#allocation174_spill] sm:$0xff] %v13926_v31  ;;  %v13932_v46 = vpop.eup %9176  ;;  %17208 = vst [vmem:[#allocation58_spill] sm:$0xff] %v13936_v35  ;;  %9204 = vrcp.f32 %v4349_v41  ;;  %v7335_v14 = vmul.f32 -1.442695, %v13936_v35  ;;  %v7364_v32 = vmul.f32 -1.442695, %v14018_v12 }
 0x42a   : > { %17206 = vst [vmem:[#allocation167_spill] sm:$0xff] %v13932_v46  ;;  %v13940_v53 = vpop.eup %9178  ;;  %9206 = vrcp.f32 %v4360_v59  ;;  %v13952_v59 = vadd.f32 %v13786_v8, %v13483_v16  ;;  %v7365_v18 = vmul.f32 -1.442695, %v14034_v55 }
 0x42b   : > { %17209 = vst [vmem:[#allocation14_spill] sm:$0xff] %v13940_v53  ;;  %v9181_v43 = vpop.eup %9180  ;;  %9208 = vrcp.f32 %v4362_v40  ;;  %v13958_v40 = vadd.f32 %v13813_v62, %v13512_v9  ;;  %v13974_v62 = vpop.f32.mrf.mxu0 }
 0x42c   : > { %v9183_v45 = vpop.eup %9182  ;;  %9210 = vrcp.f32 %v4361_v54  ;;  %v4374_v41 = vadd.f32 1.0, %v9181_v43  ;;  %17211 = vst [vmem:[#allocation168_spill] sm:$0xff] %v13952_v59  ;;  %v13960_v54 = vpop.f32.mrf.mxu1 }
 0x42d   : > { %v9185_v11 = vpop.eup %9184  ;;  %9212 = vpow2.f32 %v7320_v52  ;;  %v4375_v21 = vadd.f32 1.0, %v9183_v45  ;;  %17212 = vst [vmem:[#allocation111_spill] sm:$0xff] %v13958_v40  ;;  %17213 = vst [vmem:[#allocation89_spill] sm:$0xff] %v13960_v54  ;;  %v13966_v52 = vadd.f32 %v13830_v39, %v13483_v16  ;;  %v13972_v45 = vadd.f32 %v13859_v20, %v13512_v9  ;;  %v2650_v53 = vpop.f32.mrf.mxu0 }
 0x42e   : > { %v9187_v19 = vpop.eup %9186  ;;  %9214 = vpow2.f32 %v7321_v1  ;;  %v4388_v60 = vadd.f32 1.0, %v9185_v11  ;;  %v7322_v11 = vmul.f32 -1.442695, %v13952_v59  ;;  %v13988_v20 = vadd.f32 %v13891_v2, %v13483_v16 }
 0x42f   : > { %v13954_v58 = vpop.eup %9188  ;;  %9216 = vpow2.f32 %v7334_v23  ;;  %17214 = vst [vmem:[#allocation165_spill] sm:$0xff] %v13966_v52  ;;  %v4389_v43 = vadd.f32 1.0, %v9187_v19  ;;  %17215 = vst [vmem:[#allocation116_spill] sm:$0xff] %v13972_v45  ;;  %v17216_v23 = vld [vmem:[#allocation195_spill] sm:$0xff]  ;;  %v7323_v19 = vmul.f32 -1.442695, %v13958_v40  ;;  %v14004_v2 = vadd.f32 %v13907_v34, %v13512_v9  ;;  %v2652_v5 = vpop.f32.mrf.mxu0 }
 0x430   : > { %v13962_v47 = vpop.eup %9190  ;;  %9218 = vpow2.f32 %v7335_v14  ;;  %v13981_v54 = vadd.f32 %v17216_v23, %v13480_v63  ;;  %17218 = vst [vmem:[#allocation66_spill] sm:$0xff] %v13988_v20  ;;  %v13990_v14 = vpop.f32.mrf.mxu1  ;;  %v13997_v23 = vadd.f32 %v17221_v4, %v13504_v33  ;;  %v14131_v59 = vadd.f32 %v17249_v24, %v13504_v33 }
 0x431   : > { %v13968_v8 = vpop.eup %9192  ;;  %9220 = vrcp.f32 %v4374_v41  ;;  %17219 = vst [vmem:[#allocation85_spill] sm:$0xff] %v13990_v14  ;;  %v7336_v41 = vmul.f32 -1.442695, %v13966_v52  ;;  %17223 = vst [vmem:[#allocation193_spill] sm:$0xff] %v14004_v2 }
 0x432   : > { %v13976_v1 = vpop.eup %9194  ;;  %17217 = vst [vmem:[#allocation159_spill] sm:$0xff] %v13981_v54  ;;  %9222 = vrcp.f32 %v4375_v21  ;;  %v7337_v21 = vmul.f32 -1.442695, %v13972_v45  ;;  %v14020_v34 = vpop.f32.mrf.mxu1 }
 0x433   : > { %v13983_v39 = vpop.eup %9196  ;;  %9224 = vrcp.f32 %v4388_v60  ;;  %v7348_v60 = vmul.f32 -1.442695, %v13981_v54  ;;  %17228 = vst [vmem:[#allocation34_spill] sm:$0xff] %v14020_v34 }
 0x434   : > { %v13992_v31 = vpop.eup %9198  ;;  %9226 = vrcp.f32 %v4389_v43  ;;  %v7350_v43 = vmul.f32 -1.442695, %v13988_v20  ;;  %v14040_v13 = vpop.f32.mrf.mxu1 }
 0x435   : > { %17220 = vst [vmem:[#allocation23_spill] sm:$0xff] %v13992_v31  ;;  %v13999_v49 = vpop.eup %9200  ;;  %9228 = vpow2.f32 %v7322_v11  ;;  %v7349_v11 = vmul.f32 -1.442695, %v13997_v23  ;;  %17233 = vst [vmem:[#allocation46_spill] sm:$0xff] %v14040_v13 }
 0x436   : > { %17222 = vst [vmem:[#allocation127_spill] sm:$0xff] %v13999_v49  ;;  %v14006_v14 = vpop.eup %9202  ;;  %9230 = vpow2.f32 %v7323_v19  ;;  %v7351_v19 = vmul.f32 -1.442695, %v14004_v2  ;;  %v14054_v22 = vpop.f32.mrf.mxu1 }
 0x437   : > { %17224 = vst [vmem:[#allocation24_spill] sm:$0xff] %v14006_v14  ;;  %v14013_v4 = vpop.eup %9204  ;;  %9232 = vpow2.f32 %v7336_v41  ;;  %v7362_v41 = vmul.f32 -1.442695, %v14011_v17  ;;  %17237 = vst [vmem:[#allocation153_spill] sm:$0xff] %v14054_v22 }
 0x438   : > { %17226 = vst [vmem:[#allocation92_spill] sm:$0xff] %v14013_v4  ;;  %v14022_v49 = vpop.eup %9206  ;;  %9234 = vpow2.f32 %v7337_v21  ;;  %v7363_v21 = vmul.f32 -1.442695, %v14027_v57 }
 0x439   : > { %17229 = vst [vmem:[#allocation36_spill] sm:$0xff] %v14022_v49  ;;  %v14029_v46 = vpop.eup %9208  ;;  %9236 = vpow2.f32 %v7348_v60  ;;  %v17234_v60 = vld [vmem:[#allocation21_spill] sm:$0xff] }
 0x43a   : > { %17231 = vst [vmem:[#allocation163_spill] sm:$0xff] %v14029_v46  ;;  %v14036_v34 = vpop.eup %9210  ;;  %9238 = vpow2.f32 %v7350_v43  ;;  %v2656_v46 = vpop.f32.mrf.mxu0  ;;  %v14046_v26 = vadd.f32 %v17234_v60, %v13480_v63 }
 0x43b   : > { %17232 = vst [vmem:[#allocation161_spill] sm:$0xff] %v14036_v34  ;;  %v9213_v4 = vpop.eup %9212  ;;  %9240 = vpow2.f32 %v7349_v11  ;;  %v17236_v11 = vld [vmem:[#allocation218_spill] sm:$0xff]  ;;  %v14087_v34 = vadd.f32 %v2652_v5, %v13512_v9 }
 0x43c   : > { %v9215_v31 = vpop.eup %9214  ;;  %9242 = vpow2.f32 %v7351_v19  ;;  %v4402_v14 = vadd.f32 1.0, %v9213_v4  ;;  %v14052_v13 = vadd.f32 %v17236_v11, %v13504_v33  ;;  %v14060_v4 = vadd.f32 %v13974_v62, %v13512_v9  ;;  %v2658_v11 = vpop.f32.mrf.mxu0 }
 0x43d   : > { %v9217_v0 = vpop.eup %9216  ;;  %9244 = vpow2.f32 %v7362_v41  ;;  %v4403_v37 = vadd.f32 1.0, %v9215_v31  ;;  %v17240_v31 = vld [vmem:[#allocation219_spill] sm:$0xff]  ;;  %v7376_v22 = vmul.f32 -1.442695, %v14046_v26  ;;  %v14113_v6 = vadd.f32 %v2658_v11, %v13512_v9 }
 0x43e   : > { %v9219_v15 = vpop.eup %9218  ;;  %9246 = vpow2.f32 %v7364_v32  ;;  %v4416_v49 = vadd.f32 1.0, %v9217_v0  ;;  %v14066_v32 = vadd.f32 %v17240_v31, %v13480_v63  ;;  %v14072_v0 = vadd.f32 %v2650_v53, %v13483_v16  ;;  %v14081_v31 = vpop.f32.mrf.mxu1 }
 0x43f   : > { %v14048_v43 = vpop.eup %9220  ;;  %9248 = vpow2.f32 %v7363_v21  ;;  %v4417_v60 = vadd.f32 1.0, %v9219_v15  ;;  %v7377_v62 = vmul.f32 -1.442695, %v14052_v13  ;;  %v17242_v15 = vld [vmem:[#allocation22_spill] sm:$0xff]  ;;  %17243 = vst [vmem:[#allocation72_spill] sm:$0xff] %v14081_v31  ;;  %v14100_v31 = vadd.f32 %v2656_v46, %v13483_v16 }
 0x440   : > { %17235 = vst [vmem:[#allocation188_spill] sm:$0xff] %v14048_v43  ;;  %v14056_v19 = vpop.eup %9222  ;;  %9250 = vpow2.f32 %v7365_v18  ;;  %v14079_v18 = vadd.f32 %v17242_v15, %v13504_v33  ;;  %v2660_v15 = vpop.f32.mrf.mxu0  ;;  %v17246_v43 = vld [vmem:[#allocation109_spill] sm:$0xff] }
 0x441   : > { %17238 = vst [vmem:[#allocation149_spill] sm:$0xff] %v14056_v19  ;;  %v14062_v41 = vpop.eup %9224  ;;  %9252 = vrcp.f32 %v4402_v14  ;;  %v7379_v14 = vmul.f32 -1.442695, %v14060_v4  ;;  %v14102_v5 = vpop.f32.mrf.mxu1  ;;  %v14107_v36 = vadd.f32 %v17246_v43, %v13504_v33  ;;  %v7406_v43 = vmul.f32 -1.442695, %v14100_v31 }
 0x442   : > { %17239 = vst [vmem:[#allocation83_spill] sm:$0xff] %v14062_v41  ;;  %v14068_v3 = vpop.eup %9226  ;;  %9254 = vrcp.f32 %v4403_v37  ;;  %v7390_v37 = vmul.f32 -1.442695, %v14066_v32  ;;  %17245 = vst [vmem:[#allocation131_spill] sm:$0xff] %v14102_v5  ;;  %v7404_v5 = vmul.f32 -1.442695, %v14094_v44  ;;  %v2662_v27 = vpop.f32.mrf.mxu0 }
 0x443   : > { %17241 = vst [vmem:[#allocation144_spill] sm:$0xff] %v14068_v3  ;;  %v14074_v21 = vpop.eup %9228  ;;  %9256 = vrcp.f32 %v4416_v49  ;;  %v7392_v49 = vmul.f32 -1.442695, %v14072_v0  ;;  %v14126_v41 = vpop.f32.mrf.mxu1  ;;  %v14137_v3 = vadd.f32 %v2662_v27, %v13512_v9  ;;  %v7419_v27 = vmul.f32 -1.442695, %v14131_v59 }
 0x444   : > { %v14083_v7 = vpop.eup %9230  ;;  %9258 = vrcp.f32 %v4417_v60  ;;  %v7391_v60 = vmul.f32 -1.442695, %v14079_v18  ;;  %17248 = vst [vmem:[#allocation68_spill] sm:$0xff] %v14126_v41  ;;  %v14141_v41 = vadd.f32 %v13948_v29, %v13483_v16  ;;  %v14144_v51 = vpop.f32.mrf.mxu0 }
 0x445   : > { %v14089_v53 = vpop.eup %9232  ;;  %9260 = vpow2.f32 %v7376_v22  ;;  %v7393_v22 = vmul.f32 -1.442695, %v14087_v34  ;;  %v14149_v10 = vpop.f32.mrf.mxu1  ;;  %v7421_v29 = vmul.f32 -1.442695, %v14137_v3 }
 0x446   : > { %v14096_v48 = vpop.eup %9234  ;;  %9262 = vpow2.f32 %v7377_v62  ;;  %v17247_v62 = vld [vmem:[#allocation108_spill] sm:$0xff]  ;;  %17250 = vst [vmem:[#allocation60_spill] sm:$0xff] %v14149_v10  ;;  %v7378_v52 = vmul.f32 -1.442695, %v14141_v41 }
 0x447   : > { %v9237_v38 = vpop.eup %9236  ;;  %9264 = vpow2.f32 %v7379_v14  ;;  %v14118_v19 = vadd.f32 %v17247_v62, %v13480_v63  ;;  %v14124_v14 = vadd.f32 %v2660_v15, %v13483_v16 }
 0x448   : > { %v14109_v28 = vpop.eup %9238  ;;  %9266 = vpow2.f32 %v7390_v37  ;;  %v7405_v37 = vmul.f32 -1.442695, %v14107_v36  ;;  %v4430_v10 = vadd.f32 1.0, %v9237_v38 }
 0x449   : > { %v9241_v46 = vpop.eup %9240  ;;  %9268 = vpow2.f32 %v7392_v49  ;;  %v7407_v49 = vmul.f32 -1.442695, %v14113_v6 }
 0x44a   : > { %v14120_v61 = vpop.eup %9242  ;;  %9270 = vpow2.f32 %v7391_v60  ;;  %v7418_v60 = vmul.f32 -1.442695, %v14118_v19  ;;  %v4431_v42 = vadd.f32 1.0, %v9241_v46 }
 0x44b   : > { %v9245_v11 = vpop.eup %9244  ;;  %9272 = vpow2.f32 %v7393_v22  ;;  %v7420_v22 = vmul.f32 -1.442695, %v14124_v14 }
 0x44c   : > { %v14133_v62 = vpop.eup %9246  ;;  %9274 = vpow2.f32 %v7404_v5 }
 0x44d   : > { %v9249_v15 = vpop.eup %9248  ;;  %9276 = vpow2.f32 %v7406_v43  ;;  %v14160_v43 = vpop.f32.mrf.mxu0 }
 0x44e   : > { %v14146_v24 = vpop.eup %9250  ;;  %9278 = vpow2.f32 %v7405_v37  ;;  %v4445_v30 = vadd.f32 1.0, %v9249_v15 }
 0x44f   : > { %v14151_v40 = vpop.eup %9252  ;;  %9280 = vpow2.f32 %v7407_v49  ;;  %v4444_v49 = vadd.f32 1.0, %v9245_v11 }
 0x450   : > { %17251 = vst [vmem:[#allocation53_spill] sm:$0xff] %v14151_v40  ;;  %v14154_v50 = vpop.eup %9254  ;;  %9282 = vpow2.f32 %v7418_v60  ;;  %v14164_v40 = vpop.f32.mrf.mxu1 }
 0x451   : > { %17252 = vst [vmem:[#allocation105_spill] sm:$0xff] %v14154_v50  ;;  %v14157_v5 = vpop.eup %9256  ;;  %9284 = vpow2.f32 %v7420_v22  ;;  %17255 = vst [vmem:[#allocation88_spill] sm:$0xff] %v14164_v40 }
 0x452   : > { %17253 = vst [vmem:[#allocation17_spill] sm:$0xff] %v14157_v5  ;;  %v14162_v25 = vpop.eup %9258  ;;  %9286 = vpow2.f32 %v7419_v27  ;;  %v14166_v5 = vpop.f32.mrf.mxu0 }
 0x453   : > { %17254 = vst [vmem:[#allocation47_spill] sm:$0xff] %v14162_v25  ;;  %v9261_v37 = vpop.eup %9260  ;;  %9288 = vpow2.f32 %v7421_v29  ;;  %v14168_v35 = vpop.f32.mrf.mxu1 }
 0x454   : > { %v9263_v50 = vpop.eup %9262  ;;  %9290 = vpow2.f32 %v7378_v52  ;;  %v4458_v20 = vadd.f32 1.0, %v9261_v37  ;;  %17256 = vst [vmem:[#allocation73_spill] sm:$0xff] %v14168_v35  ;;  %v14170_v29 = vpop.f32.mrf.mxu0 }
 0x455   : > { %v9265_v45 = vpop.eup %9264  ;;  %9292 = vrcp.f32 %v4430_v10  ;;  %v4459_v22 = vadd.f32 1.0, %v9263_v50  ;;  %v14172_v52 = vpop.f32.mrf.mxu1 }
 0x456   : > { %v9267_v60 = vpop.eup %9266  ;;  %9294 = vrcp.f32 %v4431_v42  ;;  %17257 = vst [vmem:[#allocation65_spill] sm:$0xff] %v14172_v52  ;;  %v14174_v50 = vpop.f32.mrf.mxu0 }
 0x457   : > { %v9269_v38 = vpop.eup %9268  ;;  %9296 = vrcp.f32 %v4444_v49  ;;  %v4472_v46 = vadd.f32 1.0, %v9267_v60 }
 0x458   : > { %v9271_v40 = vpop.eup %9270  ;;  %9298 = vrcp.f32 %v4445_v30  ;;  %v14178_v54 = vpop.f32.mrf.mxu0 }
 0x459   : > { %v9273_v27 = vpop.eup %9272  ;;  %v4473_v11 = vadd.f32 1.0, %v9271_v40  ;;  %9300 = vrcp.f32 %v4458_v20  ;;  %v14176_v40 = vpop.f32.mrf.mxu1 }
 0x45a   : > { %v9275_v15 = vpop.eup %9274  ;;  %9302 = vrcp.f32 %v4459_v22  ;;  %17258 = vst [vmem:[#allocation61_spill] sm:$0xff] %v14176_v40  ;;  %v4474_v40 = vadd.f32 1.0, %v9269_v38 }
 0x45b   : > { %v9277_v25 = vpop.eup %9276  ;;  %v4486_v10 = vadd.f32 1.0, %v9275_v15  ;;  %9304 = vrcp.f32 %v4472_v46 }
 0x45c   : > { %v9279_v37 = vpop.eup %9278  ;;  %9306 = vrcp.f32 %v4473_v11  ;;  %v4488_v15 = vadd.f32 1.0, %v9277_v25 }
 0x45d   : > { %v9281_v35 = vpop.eup %9280  ;;  %v4487_v42 = vadd.f32 1.0, %v9279_v37  ;;  %9308 = vrcp.f32 %v4486_v10  ;;  %v4475_v37 = vadd.f32 1.0, %v9273_v27  ;;  %v14180_v10 = vpop.f32.mrf.mxu1 }
 0x45e   : > { %v9283_v49 = vpop.eup %9282  ;;  %v4489_v30 = vadd.f32 1.0, %v9281_v35  ;;  %17259 = vst [vmem:[#allocation78_spill] sm:$0xff] %v14180_v10 }
 0x45f   : > { %v9285_v60 = vpop.eup %9284  ;;  %9310 = vrcp.f32 %v4487_v42  ;;  %v4500_v20 = vadd.f32 1.0, %v9283_v49  ;;  %v4461_v49 = vadd.f32 1.0, %v9265_v45  ;;  %v4446_v45 = vadd.f32 1.0, %v14133_v62 }
 0x460   : > { %v9287_v2 = vpop.eup %9286  ;;  %9312 = vrcp.f32 %v4489_v30  ;;  %v4502_v52 = vadd.f32 1.0, %v9285_v60  ;;  %v14186_v30 = vpop.f32.mrf.mxu1 }
 0x461   : > { %v9289_v22 = vpop.eup %9288  ;;  %9314 = vrcp.f32 %v4500_v20  ;;  %v4501_v46 = vadd.f32 1.0, %v9287_v2  ;;  %17261 = vst [vmem:[#allocation180_spill] sm:$0xff] %v14186_v30  ;;  %v14190_v60 = vpop.f32.mrf.mxu0  ;;  %v14230_v30 = vadd.f32 %v14160_v43, %v13512_v9 }
 0x462   : > { %v9291_v11 = vpop.eup %9290  ;;  %9316 = vrcp.f32 %v4502_v52  ;;  %v4503_v12 = vadd.f32 1.0, %v9289_v22  ;;  %17262 = vst [vmem:[#allocation113_spill] sm:$0xff] %v14190_v60  ;;  %v4447_v52 = vadd.f32 1.0, %v14146_v24  ;;  %v14195_v20 = vpop.f32.mrf.mxu1  ;;  %v4433_v22 = vadd.f32 1.0, %v14120_v61  ;;  %v17265_v24 = vld [vmem:[#allocation96_spill] sm:$0xff] }
 0x463   : > { %v14182_v35 = vpop.eup %9292  ;;  %9318 = vrcp.f32 %v4501_v46  ;;  %v4460_v2 = vadd.f32 1.0, %v9291_v11  ;;  %17263 = vst [vmem:[#allocation107_spill] sm:$0xff] %v14195_v20  ;;  %v4432_v11 = vadd.f32 1.0, %v14109_v28  ;;  %v14212_v20 = vpop.f32.mrf.mxu0  ;;  %v14219_v61 = vadd.f32 %v14144_v51, %v13483_v16  ;;  %17272 = vst [vmem:[#allocation183_spill] sm:$0xff] %v14230_v30 }
 0x464   : > { %17260 = vst [vmem:[#allocation147_spill] sm:$0xff] %v14182_v35  ;;  %v14184_v42 = vpop.eup %9294  ;;  %9320 = vrcp.f32 %v4503_v12  ;;  %17267 = vst [vmem:[#allocation59_spill] sm:$0xff] %v14212_v20  ;;  %v4363_v60 = vadd.f32 1.0, %v13954_v58 }
 0x465   : > { %v14188_v25 = vpop.eup %9296  ;;  %9322 = vrcp.f32 %v4488_v15  ;;  %v14203_v15 = vpop.f32.mrf.mxu1  ;;  %17268 = vst [vmem:[#allocation210_spill] sm:$0xff] %v14219_v61  ;;  %v14243_v43 = vmul.f32 -1.442695, %v14219_v61  ;;  %v17279_v61 = vld [vmem:[#allocation117_spill] sm:$0xff] }
 0x466   : > { %v14192_v27 = vpop.eup %9298  ;;  %9324 = vrcp.f32 %v4475_v37  ;;  %17264 = vst [vmem:[#allocation132_spill] sm:$0xff] %v14203_v15  ;;  %v14210_v37 = vadd.f32 %v17265_v24, %v13480_v63  ;;  %v4418_v24 = vadd.f32 1.0, %v14089_v53  ;;  %v14239_v20 = vpop.f32.mrf.mxu0 }
 0x467   : > { %v14197_v38 = vpop.eup %9300  ;;  %9326 = vrcp.f32 %v4474_v40  ;;  %v4419_v40 = vadd.f32 1.0, %v14096_v48  ;;  %v14225_v28 = vpop.f32.mrf.mxu1  ;;  %17274 = vst [vmem:[#allocation95_spill] sm:$0xff] %v14239_v20 }
 0x468   : > { %v14200_v12 = vpop.eup %9302  ;;  %9328 = vrcp.f32 %v4461_v49  ;;  %17266 = vst [vmem:[#allocation86_spill] sm:$0xff] %v14210_v37  ;;  %v17269_v49 = vld [vmem:[#allocation182_spill] sm:$0xff]  ;;  %17271 = vst [vmem:[#allocation106_spill] sm:$0xff] %v14225_v28  ;;  %v14237_v28 = vmul.f32 -1.442695, %v14210_v37 }
 0x469   : > { %v14205_v46 = vpop.eup %9304  ;;  %9330 = vrcp.f32 %v4460_v2  ;;  %v14223_v15 = vadd.f32 %v17269_v49, %v13504_v33  ;;  %v14233_v51 = vpop.f32.mrf.mxu1  ;;  %v4404_v49 = vadd.f32 1.0, %v14074_v21  ;;  %v4390_v21 = vadd.f32 1.0, %v13976_v1  ;;  %v17276_v37 = vld [vmem:[#allocation74_spill] sm:$0xff] }
 0x46a   : > { %v14214_v62 = vpop.eup %9306  ;;  %9332 = vrcp.f32 %v4447_v52  ;;  %v4405_v52 = vadd.f32 1.0, %v14083_v7  ;;  %17273 = vst [vmem:[#allocation154_spill] sm:$0xff] %v14233_v51  ;;  %v14256_v20 = vadd.f32 %v17276_v37, %v13480_v63 }
 0x46b   : > { %17270 = vst [vmem:[#allocation40_spill] sm:$0xff] %v14223_v15  ;;  %v9309_v2 = vpop.eup %9308  ;;  %9334 = vrcp.f32 %v4446_v45  ;;  %v4391_v45 = vadd.f32 1.0, %v13983_v39  ;;  %v14246_v7 = vmul.f32 -1.442695, %v14223_v15  ;;  %v14261_v15 = vadd.f32 %v14166_v5, %v13483_v16 }
 0x46c   : > { %v9311_v48 = vpop.eup %9310  ;;  %9336 = vrcp.f32 %v4433_v22  ;;  %v14248_v22 = vpop.f32.mrf.mxu1  ;;  %17277 = vst [vmem:[#allocation194_spill] sm:$0xff] %v14256_v20  ;;  %v5830_v58 = vmul.f32 %v9309_v2, %v14094_v44 }
 0x46d   : > { %v9313_v10 = vpop.eup %9312  ;;  %9338 = vrcp.f32 %v4432_v11  ;;  %17275 = vst [vmem:[#allocation189_spill] sm:$0xff] %v14248_v22  ;;  %v14252_v11 = vmul.f32 -1.442695, %v14230_v30  ;;  %17278 = vst [vmem:[#allocation146_spill] sm:$0xff] %v14261_v15  ;;  %v14265_v22 = vadd.f32 %v17279_v61, %v13504_v33  ;;  %v4376_v30 = vadd.f32 1.0, %v13962_v47 }
 0x46e   : > { %v9315_v53 = vpop.eup %9314  ;;  %9340 = vrcp.f32 %v4419_v40  ;;  %v4377_v40 = vadd.f32 1.0, %v13968_v8  ;;  %v14267_v1 = vpop.f32.mrf.mxu1  ;;  %v14273_v8 = vadd.f32 %v14170_v29, %v13512_v9  ;;  %v7446_v29 = vmul.f32 -1.442695, %v14256_v20 }
 0x46f   : > { %v9317_v51 = vpop.eup %9316  ;;  %9342 = vrcp.f32 %v4418_v24  ;;  %17280 = vst [vmem:[#allocation51_spill] sm:$0xff] %v14265_v22  ;;  %17281 = vst [vmem:[#allocation212_spill] sm:$0xff] %v14267_v1  ;;  %v5844_v61 = vmul.f32 %v9315_v53, %v14118_v19  ;;  %v7448_v19 = vmul.f32 -1.442695, %v14261_v15 }
 0x470   : > { %v9319_v39 = vpop.eup %9318  ;;  %9344 = vrcp.f32 %v4405_v52  ;;  %17282 = vst [vmem:[#allocation64_spill] sm:$0xff] %v14273_v8  ;;  %v14275_v52 = vpop.f32.mrf.mxu0 }
 0x471   : > { %v9321_v24 = vpop.eup %9320  ;;  %9346 = vrcp.f32 %v4404_v49  ;;  %v5845_v37 = vmul.f32 %v9319_v39, %v14131_v59  ;;  %v14280_v35 = vpop.f32.mrf.mxu1  ;;  %v5831_v59 = vmul.f32 %v9311_v48, %v14107_v36  ;;  %v5846_v49 = vmul.f32 %v9317_v51, %v14124_v14 }
 0x472   : > { %v9323_v5 = vpop.eup %9322  ;;  %9348 = vrcp.f32 %v4391_v45  ;;  %v5847_v1 = vmul.f32 %v9321_v24, %v14137_v3  ;;  %v5833_v45 = vmul.f32 %v9313_v10, %v14113_v6  ;;  %v5817_v36 = vmul.f32 %v14214_v62, %v14079_v18  ;;  %v14294_v51 = vpop.f32.mrf.mxu0  ;;  %v17292_v24 = vld [vmem:[#allocation193_spill] sm:$0xff] }
 0x473   : > { %v9325_v47 = vpop.eup %9324  ;;  %9350 = vrcp.f32 %v4390_v21  ;;  %6360 = vmatprep.subr.mxu1 %v5845_v37  ;;  %v14288_v3 = vpop.f32.mrf.mxu1  ;;  %v5832_v14 = vmul.f32 %v9323_v5, %v14100_v31  ;;  %v7447_v48 = vmul.f32 -1.442695, %v14265_v22  ;;  %v5816_v6 = vmul.f32 %v14205_v46, %v14066_v32 }
 0x474   : > { %v9327_v39 = vpop.eup %9326  ;;  %9352 = vrcp.f32 %v4377_v40  ;;  %6431 = vmatprep.subr.mxu0 %v5847_v1  ;;  %6361 = vmatpush1.msra.mxu1 %v5844_v61  ;;  %v5819_v10 = vmul.f32 %v9325_v47, %v14087_v34  ;;  %v5803_v62 = vmul.f32 %v14200_v12, %v14052_v13  ;;  %v14311_v32 = vadd.f32 %v14174_v50, %v13483_v16  ;;  %v17294_v47 = vld [vmem:[#allocation47_spill] sm:$0xff] }
 0x475   : > { %v9329_v53 = vpop.eup %9328  ;;  %9354 = vrcp.f32 %v4376_v30  ;;  %6432 = vmatpush1.msra.mxu0 %v5846_v49  ;;  %6362 = vmatprep.subr.mxu1 %v5831_v59  ;;  %v17283_v30 = vld [vmem:[#allocation55_spill] sm:$0xff]  ;;  %v14303_v18 = vpop.f32.mrf.mxu1  ;;  %v5818_v21 = vmul.f32 %v9327_v39, %v14072_v0  ;;  %v14319_v13 = vadd.f32 %v13613_v56, %v13504_v33  ;;  %v5789_v12 = vmul.f32 %v14192_v27, %v14027_v57  ;;  %v17295_v49 = vld [vmem:[#allocation66_spill] sm:$0xff] }
 0x476   : > { %v9331_v44 = vpop.eup %9330  ;;  %9356 = vrcp.f32 %v4363_v60  ;;  %v14301_v2 = vadd.f32 %v17283_v30, %v13480_v63  ;;  %6433 = vmatprep.subr.mxu0 %v5833_v45  ;;  %6363 = vmatpush1.msra.mxu1 %v5830_v58  ;;  %17285 = vst [vmem:[#allocation98_spill] sm:$0xff] %v14311_v32  ;;  %v5802_v60 = vmul.f32 %v14197_v38, %v14046_v26  ;;  %v7462_v1 = vmul.f32 -1.442695, %v14311_v32 }
 0x477   : > { %v9333_v31 = vpop.eup %9332  ;;  %9358 = vpow2.f32 %v14237_v28  ;;  %6434 = vmatpush1.msra.mxu0 %v5832_v14  ;;  %6364 = vmatprep.subr.mxu1 %v5817_v36  ;;  %v5805_v46 = vmul.f32 %v9329_v53, %v14060_v4  ;;  %17286 = vst [vmem:[#allocation206_spill] sm:$0xff] %v14319_v13  ;;  %v14321_v0 = vpop.f32.mrf.mxu1  ;;  %v5804_v28 = vmul.f32 %v9331_v44, %v14141_v41  ;;  %v7461_v5 = vmul.f32 -1.442695, %v14319_v13  ;;  %v17297_v53 = vld [vmem:[#allocation17_spill] sm:$0xff]  ;;  %v17298_v14 = vld [vmem:[#allocation116_spill] sm:$0xff] }
 0x478   : > { %17284 = vst [vmem:[#allocation220_spill] sm:$0xff] %v14301_v2  ;;  %v9335_v34 = vpop.eup %9334  ;;  %9360 = vpow2.f32 %v14243_v43  ;;  %6435 = vmatprep.subr.mxu0 %v5819_v10  ;;  %6365 = vmatpush1.msra.mxu1 %v5816_v6  ;;  %17287 = vst [vmem:[#allocation158_spill] sm:$0xff] %v14321_v0  ;;  %v14329_v26 = vadd.f32 %v14178_v54, %v13512_v9  ;;  %v14331_v4 = vpop.f32.mrf.mxu0  ;;  %v5788_v38 = vmul.f32 %v14188_v25, %v14011_v17  ;;  %v17291_v25 = vld [vmem:[#allocation147_spill] sm:$0xff] }
 0x479   : > { %v9337_v50 = vpop.eup %9336  ;;  %9362 = vpow2.f32 %v14246_v7  ;;  %6436 = vmatpush1.msra.mxu0 %v5818_v21  ;;  %6366 = vmatprep.subr.mxu1 %v5803_v62  ;;  %v5791_v43 = vmul.f32 %v9333_v31, %v14034_v55  ;;  %v7460_v57 = vmul.f32 -1.442695, %v14301_v2  ;;  %v14338_v41 = vpop.f32.mrf.mxu1  ;;  %v5775_v27 = vmul.f32 %v14184_v42, %v13997_v23  ;;  %v17289_v7 = vld [vmem:[#allocation77_spill] sm:$0xff]  ;;  %v17290_v55 = vld [vmem:[#allocation159_spill] sm:$0xff]  ;;  %v17293_v42 = vld [vmem:[#allocation58_spill] sm:$0xff] }
 0x47a   : > { %17288 = vst [vmem:[#allocation19_spill] sm:$0xff] %v14329_v26  ;;  %v9339_v56 = vpop.eup %9338  ;;  %9364 = vpow2.f32 %v14252_v11  ;;  %6437 = vmatprep.subr.mxu0 %v5805_v46  ;;  %6367 = vmatpush1.msra.mxu1 %v5802_v60  ;;  %v5790_v40 = vmul.f32 %v9335_v34, %v17289_v7  ;;  %v5774_v11 = vmul.f32 %v17291_v25, %v17290_v55  ;;  %v7463_v39 = vmul.f32 -1.442695, %v14329_v26  ;;  %v14354_v58 = vpop.f32.mrf.mxu0  ;;  %v17299_v6 = vld [vmem:[#allocation91_spill] sm:$0xff]  ;;  %v17302_v31 = vld [vmem:[#allocation170_spill] sm:$0xff]  ;;  %v17303_v62 = vld [vmem:[#allocation105_spill] sm:$0xff] }
 0x47b   : > { %v9341_v54 = vpop.eup %9340  ;;  %9366 = vpow2.f32 %v7446_v29  ;;  %6438 = vmatpush1.msra.mxu0 %v5804_v28  ;;  %6368 = vmatprep.subr.mxu1 %v5789_v12  ;;  %v5777_v37 = vmul.f32 %v9337_v50, %v17292_v24  ;;  %v14348_v61 = vpop.f32.mrf.mxu1  ;;  %v5761_v59 = vmul.f32 %v17294_v47, %v17293_v42  ;;  %v5776_v29 = vmul.f32 %v9339_v56, %v17295_v49  ;;  %v17304_v34 = vld [vmem:[#allocation165_spill] sm:$0xff]  ;;  %v17307_v28 = vld [vmem:[#allocation103_spill] sm:$0xff]  ;;  %v17315_v25 = vld [vmem:[#allocation168_spill] sm:$0xff] }
 0x47c   : > { %v9343_v17 = vpop.eup %9342  ;;  %9368 = vpow2.f32 %v7448_v19  ;;  %6439 = vmatprep.subr.mxu0 %v5791_v43  ;;  %6369 = vmatpush1.msra.mxu1 %v5788_v38  ;;  %v17296_v19 = vld [vmem:[#allocation200_spill] sm:$0xff]  ;;  %v5763_v44 = vmul.f32 %v9341_v54, %v17298_v14  ;;  %v14361_v10 = vadd.f32 %v17299_v6, %v13480_v63  ;;  %v5747_v21 = vmul.f32 %v17303_v62, %v17302_v31  ;;  %v17305_v46 = vld [vmem:[#allocation113_spill] sm:$0xff]  ;;  %v17309_v43 = vld [vmem:[#allocation111_spill] sm:$0xff] }
 0x47d   : > { %v9345_v23 = vpop.eup %9344  ;;  %9370 = vpow2.f32 %v7447_v48  ;;  %6440 = vmatpush1.msra.mxu0 %v5790_v40  ;;  %6370 = vmatprep.subr.mxu1 %v5775_v27  ;;  %v5760_v36 = vmul.f32 %v17297_v53, %v17296_v19  ;;  %v14363_v48 = vpop.f32.mrf.mxu1  ;;  %v5762_v60 = vmul.f32 %v9343_v17, %v17304_v34  ;;  %v14370_v50 = vadd.f32 %v17305_v46, %v13483_v16  ;;  %v17308_v56 = vld [vmem:[#allocation53_spill] sm:$0xff]  ;;  %v17310_v54 = vld [vmem:[#allocation79_spill] sm:$0xff]  ;;  %v17314_v17 = vld [vmem:[#allocation144_spill] sm:$0xff] }
 0x47e   : > { %v9347_v45 = vpop.eup %9346  ;;  %9372 = vpow2.f32 %v7460_v57  ;;  %17300 = vst [vmem:[#allocation152_spill] sm:$0xff] %v14361_v10  ;;  %6441 = vmatprep.subr.mxu0 %v5777_v37  ;;  %6371 = vmatpush1.msra.mxu1 %v5774_v11  ;;  %17301 = vst [vmem:[#allocation150_spill] sm:$0xff] %v14363_v48  ;;  %v5746_v38 = vmul.f32 %v17308_v56, %v17307_v28  ;;  %v5749_v57 = vmul.f32 %v9345_v23, %v17309_v43  ;;  %v17316_v24 = vld [vmem:[#allocation59_spill] sm:$0xff]  ;;  %v17318_v42 = vld [vmem:[#allocation134_spill] sm:$0xff] }
 0x47f   : > { %v9349_v30 = vpop.eup %9348  ;;  %9374 = vpow2.f32 %v7462_v1  ;;  %17306 = vst [vmem:[#allocation216_spill] sm:$0xff] %v14370_v50  ;;  %6442 = vmatpush1.msra.mxu0 %v5776_v29  ;;  %6372 = vmatprep.subr.mxu1 %v5761_v59  ;;  %v14377_v27 = vadd.f32 %v17310_v54, %v13504_v33  ;;  %v14379_v7 = vpop.f32.mrf.mxu1  ;;  %v17313_v1 = vld [vmem:[#allocation129_spill] sm:$0xff]  ;;  %v5748_v11 = vmul.f32 %v9347_v45, %v17315_v25  ;;  %v17319_v47 = vld [vmem:[#allocation83_spill] sm:$0xff]  ;;  %v17320_v49 = vld [vmem:[#allocation16_spill] sm:$0xff]  ;;  %v7474_v19 = vmul.f32 -1.442695, %v14361_v10 }
 0x480   : > { %v9351_v12 = vpop.eup %9350  ;;  %9376 = vpow2.f32 %v7461_v5  ;;  %6443 = vmatprep.subr.mxu0 %v5763_v44  ;;  %6373 = vmatpush1.msra.mxu1 %v5760_v36  ;;  %17312 = vst [vmem:[#allocation130_spill] sm:$0xff] %v14379_v7  ;;  %v5733_v55 = vmul.f32 %v17314_v17, %v17313_v1  ;;  %v14386_v37 = vadd.f32 %v17316_v24, %v13512_v9  ;;  %v14388_v5 = vpop.f32.mrf.mxu0  ;;  %v17322_v53 = vld [vmem:[#allocation100_spill] sm:$0xff]  ;;  %v17323_v36 = vld [vmem:[#allocation149_spill] sm:$0xff]  ;;  %v7449_v31 = vmul.f32 -1.442695, %v14273_v8  ;;  %v17327_v46 = vld [vmem:[#allocation38_spill] sm:$0xff] }
 0x481   : > { %17311 = vst [vmem:[#allocation112_spill] sm:$0xff] %v14377_v27  ;;  %v9353_v40 = vpop.eup %9352  ;;  %9378 = vpow2.f32 %v7463_v39  ;;  %6444 = vmatpush1.msra.mxu0 %v5762_v60  ;;  %6374 = vmatprep.subr.mxu1 %v5747_v21  ;;  %v5732_v59 = vmul.f32 %v17319_v47, %v17318_v42  ;;  %v5735_v29 = vmul.f32 %v9349_v30, %v17320_v49  ;;  %v14394_v45 = vpop.f32.mrf.mxu1  ;;  %v17324_v44 = vld [vmem:[#allocation44_spill] sm:$0xff]  ;;  %v7476_v62 = vmul.f32 -1.442695, %v14370_v50  ;;  %v17325_v30 = vld [vmem:[#allocation110_spill] sm:$0xff]  ;;  %v17330_v54 = vld [vmem:[#allocation13_spill] sm:$0xff] }
 0x482   : > { %17317 = vst [vmem:[#allocation99_spill] sm:$0xff] %v14386_v37  ;;  %v9355_v23 = vpop.eup %9354  ;;  %6445 = vmatprep.subr.mxu0 %v5749_v57  ;;  %6375 = vmatpush1.msra.mxu1 %v5746_v38  ;;  %17321 = vst [vmem:[#allocation11_spill] sm:$0xff] %v14394_v45  ;;  %v5719_v14 = vmul.f32 %v17323_v36, %v17322_v53  ;;  %v5734_v6 = vmul.f32 %v9351_v12, %v17324_v44  ;;  %v17326_v34 = vld [vmem:[#allocation188_spill] sm:$0xff]  ;;  %v7475_v56 = vmul.f32 -1.442695, %v14377_v27  ;;  %v17328_v38 = vld [vmem:[#allocation102_spill] sm:$0xff]  ;;  %v14419_v47 = vpop.f32.mrf.mxu0 }
 0x483   : > { %v9357_v39 = vpop.eup %9356  ;;  %6446 = vmatpush1.msra.mxu0 %v5748_v11  ;;  %6376 = vmatprep.subr.mxu1 %v5733_v55  ;;  %v5718_v60 = vmul.f32 %v17326_v34, %v17325_v30  ;;  %v5721_v28 = vmul.f32 %v9353_v40, %v17327_v46  ;;  %v14407_v43 = vadd.f32 %v17328_v38, %v13480_v63  ;;  %v14409_v12 = vpop.f32.mrf.mxu1  ;;  %v17331_v1 = vld [vmem:[#allocation94_spill] sm:$0xff]  ;;  %v17332_v55 = vld [vmem:[#allocation185_spill] sm:$0xff]  ;;  %v17334_v24 = vld [vmem:[#allocation71_spill] sm:$0xff]  ;;  %v7477_v42 = vmul.f32 -1.442695, %v14386_v37 }
 0x484   : > { %v9359_v21 = vpop.eup %9358  ;;  %6447 = vmatprep.subr.mxu0 %v5735_v29  ;;  %6377 = vmatpush1.msra.mxu1 %v5732_v59  ;;  %v14413_v17 = vmul.f32 %v17331_v1, %v17330_v54  ;;  %v17333_v25 = vld [vmem:[#allocation161_spill] sm:$0xff]  ;;  %v5720_v40 = vmul.f32 %v9355_v23, %v17334_v24  ;;  %v17335_v59 = vld [vmem:[#allocation162_spill] sm:$0xff]  ;;  %v17336_v29 = vld [vmem:[#allocation36_spill] sm:$0xff]  ;;  %9380 = vpow2.f32 %v7474_v19  ;;  %v14444_v48 = vpop.f32.mrf.mxu0 }
 0x485   : > { %17329 = vst [vmem:[#allocation217_spill] sm:$0xff] %v14407_v43  ;;  %v9361_v57 = vpop.eup %9360  ;;  %v5705_v11 = vmul.f32 %v17333_v25, %v17332_v55  ;;  %6448 = vmatpush1.msra.mxu0 %v5734_v6  ;;  %6378 = vmatprep.subr.mxu1 %v5719_v14  ;;  %v5704_v53 = vmul.f32 %v17336_v29, %v17335_v59  ;;  %v17337_v36 = vld [vmem:[#allocation224_spill] sm:$0xff]  ;;  %v17338_v30 = vld [vmem:[#allocation81_spill] sm:$0xff]  ;;  %v14428_v23 = vpop.f32.mrf.mxu1  ;;  %v17341_v38 = vld [vmem:[#allocation54_spill] sm:$0xff]  ;;  %v4514_v25 = vadd.f32 1.0, %v9359_v21  ;;  %9382 = vpow2.f32 %v7476_v62 }
 0x486   : > { %v9363_v49 = vpop.eup %9362  ;;  %v5707_v44 = vmul.f32 %v9357_v39, %v17337_v36  ;;  %v14426_v34 = vadd.f32 %v17338_v30, %v13504_v33  ;;  %6449 = vmatprep.subr.mxu0 %v5721_v28  ;;  %6379 = vmatpush1.msra.mxu1 %v5718_v60  ;;  %17340 = vst [vmem:[#allocation20_spill] sm:$0xff] %v14428_v23  ;;  %v17342_v54 = vld [vmem:[#allocation24_spill] sm:$0xff]  ;;  %v17344_v1 = vld [vmem:[#allocation163_spill] sm:$0xff]  ;;  %v17347_v29 = vld [vmem:[#allocation90_spill] sm:$0xff]  ;;  %v4516_v36 = vadd.f32 1.0, %v9361_v57  ;;  %9384 = vpow2.f32 %v7475_v56  ;;  %v14466_v23 = vpop.f32.mrf.mxu0 }
 0x487   : > { %v9365_v46 = vpop.eup %9364  ;;  %v5691_v6 = vmul.f32 %v17342_v54, %v17341_v38  ;;  %v17343_v14 = vld [vmem:[#allocation172_spill] sm:$0xff]  ;;  %6450 = vmatpush1.msra.mxu0 %v5720_v40  ;;  %6380 = vmatprep.subr.mxu1 %v5705_v11  ;;  %v17345_v39 = vld [vmem:[#allocation87_spill] sm:$0xff]  ;;  %v14438_v30 = vpop.f32.mrf.mxu1  ;;  %v17352_v62 = vld [vmem:[#allocation70_spill] sm:$0xff]  ;;  %9386 = vpow2.f32 %v7477_v42 }
 0x488   : > { %17339 = vst [vmem:[#allocation135_spill] sm:$0xff] %v14426_v34  ;;  %v5706_v55 = vmul.f32 %v17344_v1, %v17343_v14  ;;  %v9367_v19 = vpop.eup %9366  ;;  %v17346_v24 = vld [vmem:[#allocation23_spill] sm:$0xff]  ;;  %v17348_v28 = vld [vmem:[#allocation92_spill] sm:$0xff]  ;;  %6451 = vmatprep.subr.mxu0 %v5707_v44  ;;  %6381 = vmatpush1.msra.mxu1 %v5704_v53  ;;  %17349 = vst [vmem:[#allocation204_spill] sm:$0xff] %v14438_v30  ;;  %v4515_v1 = vadd.f32 1.0, %v9363_v49  ;;  %9388 = vpow2.f32 %v7449_v31 }
 0x489   : > { %v5690_v59 = vmul.f32 %v17346_v24, %v17345_v39  ;;  %v5693_v60 = vmul.f32 %v17348_v28, %v17347_v29  ;;  %v9369_v38 = vpop.eup %9368  ;;  %v17350_v54 = vld [vmem:[#allocation35_spill] sm:$0xff]  ;;  %6382 = vmatprep.subr.mxu1 %v5691_v6  ;;  %v17355_v56 = vld [vmem:[#allocation221_spill] sm:$0xff]  ;;  %v17357_v24 = vld [vmem:[#allocation14_spill] sm:$0xff]  ;;  %v4517_v28 = vadd.f32 1.0, %v9365_v46  ;;  %9390 = vrcp.f32 %v4514_v25 }
 0x48a   : > { %v17351_v14 = vld [vmem:[#allocation167_spill] sm:$0xff]  ;;  %6452 = vmatpush1.msra.mxu0 %v5706_v55  ;;  %v9371_v39 = vpop.eup %9370  ;;  %v17356_v53 = vld [vmem:[#allocation177_spill] sm:$0xff]  ;;  %v17359_v49 = vld [vmem:[#allocation128_spill] sm:$0xff]  ;;  %v4528_v7 = vadd.f32 1.0, %v9367_v19  ;;  %9392 = vrcp.f32 %v4516_v36 }
 0x48b   : > { %v5677_v21 = vmul.f32 %v17351_v14, %v17350_v54  ;;  %v17353_v40 = vld [vmem:[#allocation127_spill] sm:$0xff]  ;;  %v5679_v29 = vmul.f32 %v17357_v24, %v17356_v53  ;;  %6453 = vmatprep.subr.mxu0 %v5693_v60  ;;  %6383 = vmatpush1.msra.mxu1 %v5690_v59  ;;  %v14450_v54 = vpop.f32.mrf.mxu1  ;;  %v9373_v14 = vpop.eup %9372  ;;  %v17360_v42 = vld [vmem:[#allocation176_spill] sm:$0xff]  ;;  %v17362_v55 = vld [vmem:[#allocation174_spill] sm:$0xff]  ;;  %v4530_v24 = vadd.f32 1.0, %v9369_v38  ;;  %9394 = vrcp.f32 %v4515_v1 }
 0x48c   : > { %v5692_v11 = vmul.f32 %v17353_v40, %v17352_v62  ;;  %v17354_v57 = vld [vmem:[#allocation151_spill] sm:$0xff]  ;;  %17358 = vst [vmem:[#allocation214_spill] sm:$0xff] %v14450_v54  ;;  %v5663_v62 = vmul.f32 %v17360_v42, %v17359_v49  ;;  %v17361_v40 = vld [vmem:[#allocation160_spill] sm:$0xff]  ;;  %v17364_v53 = vld [vmem:[#allocation222_spill] sm:$0xff]  ;;  %9396 = vrcp.f32 %v4517_v28 }
 0x48d   : > { %v5676_v44 = vmul.f32 %v17355_v56, %v17354_v57  ;;  %v5678_v6 = vmul.f32 %v17362_v55, %v17361_v40  ;;  %6384 = vmatprep.subr.mxu1 %v5677_v21  ;;  %v9375_v57 = vpop.eup %9374  ;;  %v17363_v56 = vld [vmem:[#allocation97_spill] sm:$0xff]  ;;  %v17365_v31 = vld [vmem:[#allocation191_spill] sm:$0xff]  ;;  %v14460_v45 = vpop.f32.mrf.mxu1  ;;  %v17369_v40 = vld [vmem:[#allocation184_spill] sm:$0xff]  ;;  %v4529_v55 = vadd.f32 1.0, %v9371_v39  ;;  %9398 = vrcp.f32 %v4528_v7 }
 0x48e   : > { %6454 = vmatpush1.msra.mxu0 %v5692_v11  ;;  %v5662_v46 = vmul.f32 %v17364_v53, %v17363_v56  ;;  %v17366_v60 = vld [vmem:[#allocation223_spill] sm:$0xff]  ;;  %17367 = vst [vmem:[#allocation136_spill] sm:$0xff] %v14460_v45  ;;  %v9377_v49 = vpop.eup %9376  ;;  %v17370_v19 = vld [vmem:[#allocation93_spill] sm:$0xff]  ;;  %v17372_v36 = vld [vmem:[#allocation164_spill] sm:$0xff]  ;;  %9400 = vrcp.f32 %v4530_v24  ;;  %v7488_v24 = vmul.f32 -1.442695, %v14407_v43 }
 0x48f   : > { %v5665_v59 = vmul.f32 %v17366_v60, %v17365_v31  ;;  %6455 = vmatprep.subr.mxu0 %v5679_v29  ;;  %6385 = vmatpush1.msra.mxu1 %v5676_v44  ;;  %v17368_v42 = vld [vmem:[#allocation75_spill] sm:$0xff]  ;;  %v17371_v11 = vld [vmem:[#allocation225_spill] sm:$0xff]  ;;  %v9379_v56 = vpop.eup %9378  ;;  %v17373_v38 = vld [vmem:[#allocation104_spill] sm:$0xff]  ;;  %v4542_v60 = vadd.f32 1.0, %v9373_v14  ;;  %v4543_v28 = vadd.f32 1.0, %v9377_v49  ;;  %9402 = vrcp.f32 %v4529_v55 }
 0x490   : > { %v5649_v25 = vmul.f32 %v17369_v40, %v17368_v42  ;;  %v5664_v21 = vmul.f32 %v17371_v11, %v17370_v19  ;;  %6456 = vmatpush1.msra.mxu0 %v5678_v6  ;;  %6386 = vmatprep.subr.mxu1 %v5663_v62  ;;  %v5648_v29 = vmul.f32 %v17373_v38, %v17372_v36  ;;  %v17374_v44 = vld [vmem:[#allocation186_spill] sm:$0xff]  ;;  %v14472_v42 = vpop.f32.mrf.mxu1  ;;  %v17377_v40 = vld [vmem:[#allocation56_spill] sm:$0xff]  ;;  %v17379_v19 = vld [vmem:[#allocation179_spill] sm:$0xff]  ;;  %v4544_v62 = vadd.f32 1.0, %v9375_v57 }
 0x491   : > { %v17375_v53 = vld [vmem:[#allocation42_spill] sm:$0xff]  ;;  %6457 = vmatprep.subr.mxu0 %v5665_v59  ;;  %6387 = vmatpush1.msra.mxu1 %v5662_v46  ;;  %17376 = vst [vmem:[#allocation80_spill] sm:$0xff] %v14472_v42  ;;  %v17378_v1 = vld [vmem:[#allocation52_spill] sm:$0xff]  ;;  %v17381_v36 = vld [vmem:[#allocation141_spill] sm:$0xff]  ;;  %v4545_v7 = vadd.f32 1.0, %v9379_v56  ;;  %9404 = vrcp.f32 %v4542_v60 }
 0x492   : > { %v5651_v31 = vmul.f32 %v17375_v53, %v17374_v44  ;;  %v5635_v39 = vmul.f32 %v17378_v1, %v17377_v40  ;;  %v17380_v11 = vld [vmem:[#allocation48_spill] sm:$0xff]  ;;  %6458 = vmatpush1.msra.mxu0 %v5664_v21  ;;  %6388 = vmatprep.subr.mxu1 %v5649_v25  ;;  %v17382_v38 = vld [vmem:[#allocation82_spill] sm:$0xff]  ;;  %v17383_v14 = vld [vmem:[#allocation169_spill] sm:$0xff]  ;;  %v14484_v59 = vpop.f32.mrf.mxu1  ;;  %v14492_v21 = vpop.f32.mrf.mxu0  ;;  %9406 = vrcp.f32 %v4544_v62  ;;  %v7489_v55 = vmul.f32 -1.442695, %v14426_v34 }
 0x493   : > { %v5650_v6 = vmul.f32 %v17380_v11, %v17379_v19  ;;  %v5637_v0 = vmul.f32 %v17382_v38, %v17381_v36  ;;  %v14482_v46 = vadd.f32 %v17383_v14, %v13480_v63  ;;  %6389 = vmatpush1.msra.mxu1 %v5648_v29  ;;  %17385 = vst [vmem:[#allocation76_spill] sm:$0xff] %v14484_v59  ;;  %v17386_v44 = vld [vmem:[#allocation120_spill] sm:$0xff]  ;;  %v17388_v57 = vld [vmem:[#allocation181_spill] sm:$0xff]  ;;  %v9381_v29 = vpop.eup %9380  ;;  %9408 = vrcp.f32 %v4543_v28  ;;  %v17392_v11 = vld [vmem:[#allocation15_spill] sm:$0xff] }
 0x494   : > { %6459 = vmatprep.subr.mxu0 %v5651_v31  ;;  %v17387_v53 = vld [vmem:[#allocation140_spill] sm:$0xff]  ;;  %v14490_v25 = vadd.f32 %v17388_v57, %v13504_v33  ;;  %6390 = vmatprep.subr.mxu1 %v5635_v39  ;;  %v14496_v49 = vpop.f32.mrf.mxu1  ;;  %v9383_v56 = vpop.eup %9382  ;;  %9410 = vrcp.f32 %v4545_v7  ;;  %v4556_v19 = vadd.f32 1.0, %v9381_v29  ;;  %v17395_v28 = vld [vmem:[#allocation166_spill] sm:$0xff] }
 0x495   : > { %17384 = vst [vmem:[#allocation215_spill] sm:$0xff] %v14482_v46  ;;  %v5636_v40 = vmul.f32 %v17387_v53, %v17386_v44  ;;  %6460 = vmatpush1.msra.mxu0 %v5650_v6  ;;  %6391 = vmatpush1.msra.mxu1 %v14413_v17  ;;  %17390 = vst [vmem:[#allocation115_spill] sm:$0xff] %v14496_v49  ;;  %v7502_v31 = vmul.f32 -1.442695, %v14482_v46  ;;  %v9385_v39 = vpop.eup %9384  ;;  %9412 = vpow2.f32 %v7488_v24  ;;  %v4558_v38 = vadd.f32 1.0, %v9383_v56 }
 0x496   : > { %17389 = vst [vmem:[#allocation148_spill] sm:$0xff] %v14490_v25  ;;  %6461 = vmatprep.subr.mxu0 %v5637_v0  ;;  %v14500_v1 = vpop.f32.mrf.mxu1  ;;  %v7503_v60 = vmul.f32 -1.442695, %v14490_v25  ;;  %v14503_v0 = vpop.f32.mrf.mxu0  ;;  %v14507_v6 = vadd.f32 %v17392_v11, %v13480_v63  ;;  %9414 = vpow2.f32 %v7489_v55  ;;  %v14515_v14 = vadd.f32 %v17395_v28, %v13504_v33  ;;  %v17400_v55 = vld [vmem:[#allocation145_spill] sm:$0xff] }
 0x497   : > { %6462 = vmatpush1.msra.mxu0 %v5636_v40  ;;  %17391 = vst [vmem:[#allocation137_spill] sm:$0xff] %v14500_v1  ;;  %v9387_v17 = vpop.eup %9386  ;;  %v4557_v53 = vadd.f32 1.0, %v9385_v39  ;;  %9416 = vpow2.f32 %v7502_v31  ;;  %v17397_v40 = vld [vmem:[#allocation197_spill] sm:$0xff]  ;;  %v14529_v56 = vadd.f32 %v17400_v55, %v13504_v33  ;;  %v17402_v31 = vld [vmem:[#allocation95_spill] sm:$0xff] }
 0x498   : > { %17393 = vst [vmem:[#allocation30_spill] sm:$0xff] %v14507_v6  ;;  %v14509_v62 = vpop.f32.mrf.mxu1  ;;  %v14511_v36 = vpop.eup %9388  ;;  %17396 = vst [vmem:[#allocation192_spill] sm:$0xff] %v14515_v14  ;;  %v14521_v7 = vadd.f32 %v17397_v40, %v13480_v63  ;;  %v4559_v29 = vadd.f32 1.0, %v9387_v17  ;;  %9418 = vpow2.f32 %v7503_v60  ;;  %v14537_v39 = vadd.f32 %v17402_v31, %v13483_v16 }
 0x499   : > { %17394 = vst [vmem:[#allocation156_spill] sm:$0xff] %v14509_v62  ;;  %v14517_v44 = vpop.eup %9390  ;;  %17401 = vst [vmem:[#allocation57_spill] sm:$0xff] %v14529_v56  ;;  %v14531_v11 = vpop.f32.mrf.mxu0  ;;  %9420 = vrcp.f32 %v4556_v19  ;;  %v7516_v40 = vmul.f32 -1.442695, %v14507_v6  ;;  %v14546_v60 = vadd.f32 %v14275_v52, %v13512_v9  ;;  %v7517_v17 = vmul.f32 -1.442695, %v14515_v14 }
 0x49a   : > { %17398 = vst [vmem:[#allocation139_spill] sm:$0xff] %v14521_v7  ;;  %v14523_v57 = vpop.f32.mrf.mxu1  ;;  %v14525_v24 = vpop.eup %9392  ;;  %17403 = vst [vmem:[#allocation187_spill] sm:$0xff] %v14537_v39  ;;  %9422 = vrcp.f32 %v4558_v38  ;;  %v14553_v19 = vadd.f32 %v14294_v51, %v13483_v16  ;;  %v7530_v31 = vmul.f32 -1.442695, %v14521_v7  ;;  %v14562_v52 = vadd.f32 %v14331_v4, %v13512_v9  ;;  %v17450_v7 = vld [vmem:[#allocation85_spill] sm:$0xff] }
 0x49b   : > { %17399 = vst [vmem:[#allocation175_spill] sm:$0xff] %v14523_v57  ;;  %v14533_v28 = vpop.eup %9394  ;;  %17406 = vst [vmem:[#allocation18_spill] sm:$0xff] %v14546_v60  ;;  %9424 = vrcp.f32 %v4557_v53  ;;  %v7531_v38 = vmul.f32 -1.442695, %v14529_v56  ;;  %v14565_v59 = vpop.f32.mrf.mxu0  ;;  %v7490_v51 = vmul.f32 -1.442695, %v14537_v39  ;;  %v14581_v57 = vadd.f32 %v14388_v5, %v13512_v9 }
 0x49c   : > { %v14540_v54 = vpop.f32.mrf.mxu1  ;;  %v14542_v30 = vpop.eup %9396  ;;  %17408 = vst [vmem:[#allocation157_spill] sm:$0xff] %v14553_v19  ;;  %9426 = vrcp.f32 %v4559_v29  ;;  %17411 = vst [vmem:[#allocation202_spill] sm:$0xff] %v14562_v52  ;;  %v7491_v4 = vmul.f32 -1.442695, %v14546_v60  ;;  %v7504_v39 = vmul.f32 -1.442695, %v14553_v19  ;;  %v14597_v5 = vadd.f32 %v14444_v48, %v13512_v9 }
 0x49d   : > { %17404 = vst [vmem:[#allocation125_spill] sm:$0xff] %v14540_v54  ;;  %17405 = vst [vmem:[#allocation119_spill] sm:$0xff] %v14542_v30  ;;  %v14549_v55 = vpop.eup %9398  ;;  %9428 = vpow2.f32 %v7516_v40  ;;  %v14572_v54 = vadd.f32 %v14354_v58, %v13483_v16  ;;  %v14588_v58 = vadd.f32 %v14419_v47, %v13483_v16  ;;  %v7505_v62 = vmul.f32 -1.442695, %v14562_v52 }
 0x49e   : > { %17407 = vst [vmem:[#allocation199_spill] sm:$0xff] %v14549_v55  ;;  %v14556_v42 = vpop.f32.mrf.mxu1  ;;  %v14558_v8 = vpop.eup %9400  ;;  %9430 = vpow2.f32 %v7517_v17  ;;  %17416 = vst [vmem:[#allocation33_spill] sm:$0xff] %v14581_v57  ;;  %v7533_v34 = vmul.f32 -1.442695, %v14597_v5 }
 0x49f   : > { %17409 = vst [vmem:[#allocation207_spill] sm:$0xff] %v14556_v42  ;;  %17410 = vst [vmem:[#allocation63_spill] sm:$0xff] %v14558_v8  ;;  %v14567_v53 = vpop.eup %9402  ;;  %9432 = vpow2.f32 %v7530_v31  ;;  %v14599_v17 = vpop.f32.mrf.mxu0  ;;  %v7518_v31 = vmul.f32 -1.442695, %v14572_v54 }
 0x4a0   : > { %17412 = vst [vmem:[#allocation31_spill] sm:$0xff] %v14567_v53  ;;  %17413 = vst [vmem:[#allocation198_spill] sm:$0xff] %v14572_v54  ;;  %v14574_v42 = vpop.f32.mrf.mxu1  ;;  %v14576_v29 = vpop.eup %9404  ;;  %9434 = vpow2.f32 %v7531_v38  ;;  %v7532_v38 = vmul.f32 -1.442695, %v14588_v58 }
 0x4a1   : > { %17414 = vst [vmem:[#allocation69_spill] sm:$0xff] %v14574_v42  ;;  %17415 = vst [vmem:[#allocation142_spill] sm:$0xff] %v14576_v29  ;;  %v14583_v37 = vpop.eup %9406  ;;  %9436 = vpow2.f32 %v7490_v51  ;;  %v14611_v49 = vpop.f32.mrf.mxu0  ;;  %v17477_v29 = vld [vmem:[#allocation88_spill] sm:$0xff] }
 0x4a2   : > { %17417 = vst [vmem:[#allocation10_spill] sm:$0xff] %v14583_v37  ;;  %17418 = vst [vmem:[#allocation41_spill] sm:$0xff] %v14588_v58  ;;  %v14590_v40 = vpop.f32.mrf.mxu1  ;;  %v14592_v42 = vpop.eup %9408  ;;  %9438 = vpow2.f32 %v7491_v4  ;;  %v14810_v2 = vadd.f32 %v17477_v29, %v13504_v33 }
 0x4a3   : > { %17419 = vst [vmem:[#allocation121_spill] sm:$0xff] %v14590_v40  ;;  %17420 = vst [vmem:[#allocation37_spill] sm:$0xff] %v14592_v42  ;;  %v14601_v60 = vpop.eup %9410  ;;  %v7519_v40 = vmul.f32 -1.442695, %v14581_v57  ;;  %9440 = vpow2.f32 %v7504_v39 }
 0x4a4   : > { %17421 = vst [vmem:[#allocation205_spill] sm:$0xff] %v14597_v5  ;;  %17422 = vst [vmem:[#allocation43_spill] sm:$0xff] %v14601_v60  ;;  %v14604_v47 = vpop.f32.mrf.mxu1  ;;  %v9413_v43 = vpop.eup %9412  ;;  %9442 = vpow2.f32 %v7505_v62 }
 0x4a5   : > { %17423 = vst [vmem:[#allocation208_spill] sm:$0xff] %v14604_v47  ;;  %v9415_v1 = vpop.eup %9414  ;;  %v4570_v52 = vadd.f32 1.0, %v9413_v43  ;;  %9444 = vpow2.f32 %v7518_v31  ;;  %v17425_v47 = vld [vmem:[#allocation67_spill] sm:$0xff]  ;;  %v17432_v43 = vld [vmem:[#allocation173_spill] sm:$0xff] }
 0x4a6   : > { %v14608_v19 = vpop.f32.mrf.mxu1  ;;  %v9417_v48 = vpop.eup %9416  ;;  %v14615_v4 = vadd.f32 %v17425_v47, %v13480_v63  ;;  %v4571_v54 = vadd.f32 1.0, %v9415_v1  ;;  %9446 = vpow2.f32 %v7519_v40  ;;  %v14629_v31 = vadd.f32 %v17432_v43, %v13480_v63  ;;  %v17436_v1 = vld [vmem:[#allocation50_spill] sm:$0xff] }
 0x4a7   : > { %17424 = vst [vmem:[#allocation39_spill] sm:$0xff] %v14608_v19  ;;  %v9419_v51 = vpop.eup %9418  ;;  %v17429_v19 = vld [vmem:[#allocation171_spill] sm:$0xff]  ;;  %v4584_v27 = vadd.f32 1.0, %v9417_v48  ;;  %9448 = vpow2.f32 %v7532_v38  ;;  %v14637_v40 = vadd.f32 %v17436_v1, %v13504_v33 }
 0x4a8   : > { %17426 = vst [vmem:[#allocation118_spill] sm:$0xff] %v14615_v4  ;;  %v14617_v46 = vpop.f32.mrf.mxu1  ;;  %v14619_v39 = vpop.eup %9420  ;;  %v14623_v62 = vadd.f32 %v17429_v19, %v13504_v33  ;;  %17433 = vst [vmem:[#allocation101_spill] sm:$0xff] %v14629_v31  ;;  %9450 = vpow2.f32 %v7533_v34  ;;  %v7544_v38 = vmul.f32 -1.442695, %v14615_v4  ;;  %v7558_v34 = vmul.f32 -1.442695, %v14629_v31 }
 0x4a9   : > { %17427 = vst [vmem:[#allocation45_spill] sm:$0xff] %v14617_v46  ;;  %17428 = vst [vmem:[#allocation124_spill] sm:$0xff] %v14619_v39  ;;  %v14625_v25 = vpop.eup %9422  ;;  %v4585_v46 = vadd.f32 1.0, %v9419_v51  ;;  %v14639_v19 = vpop.f32.mrf.mxu0  ;;  %9452 = vrcp.f32 %v4570_v52 }
 0x4aa   : > { %17430 = vst [vmem:[#allocation84_spill] sm:$0xff] %v14623_v62  ;;  %17431 = vst [vmem:[#allocation123_spill] sm:$0xff] %v14625_v25  ;;  %v14631_v47 = vpop.f32.mrf.mxu1  ;;  %v14633_v57 = vpop.eup %9424  ;;  %9454 = vrcp.f32 %v4571_v54  ;;  %v7559_v25 = vmul.f32 -1.442695, %v14637_v40  ;;  %v14655_v54 = vadd.f32 %v14466_v23, %v13483_v16 }
 0x4ab   : > { %17434 = vst [vmem:[#allocation209_spill] sm:$0xff] %v14631_v47  ;;  %17435 = vst [vmem:[#allocation122_spill] sm:$0xff] %v14633_v57  ;;  %v14641_v6 = vpop.eup %9426  ;;  %v7545_v47 = vmul.f32 -1.442695, %v14623_v62  ;;  %9456 = vrcp.f32 %v4584_v27 }
 0x4ac   : > { %17437 = vst [vmem:[#allocation196_spill] sm:$0xff] %v14637_v40  ;;  %17438 = vst [vmem:[#allocation190_spill] sm:$0xff] %v14641_v6  ;;  %v14644_v48 = vpop.f32.mrf.mxu1  ;;  %v9429_v43 = vpop.eup %9428  ;;  %9458 = vrcp.f32 %v4585_v46  ;;  %v14663_v46 = vadd.f32 %v14492_v21, %v13512_v9 }
 0x4ad   : > { %17439 = vst [vmem:[#allocation49_spill] sm:$0xff] %v14644_v48  ;;  %v9431_v57 = vpop.eup %9430  ;;  %v14651_v6 = vpop.f32.mrf.mxu0  ;;  %v4598_v50 = vadd.f32 1.0, %v9429_v43  ;;  %9460 = vpow2.f32 %v7544_v38  ;;  %17441 = vst [vmem:[#allocation133_spill] sm:$0xff] %v14655_v54  ;;  %v14669_v38 = vadd.f32 %v14503_v0, %v13483_v16 }
 0x4ae   : > { %v14648_v51 = vpop.f32.mrf.mxu1  ;;  %v9433_v1 = vpop.eup %9432  ;;  %v4599_v58 = vadd.f32 1.0, %v9431_v57  ;;  %9462 = vpow2.f32 %v7545_v47  ;;  %17443 = vst [vmem:[#allocation9_spill] sm:$0xff] %v14663_v46  ;;  %v14675_v57 = vadd.f32 %v14531_v11, %v13512_v9  ;;  %v14693_v11 = vadd.f32 %v14565_v59, %v13483_v16 }
 0x4af   : > { %17440 = vst [vmem:[#allocation143_spill] sm:$0xff] %v14648_v51  ;;  %v9435_v52 = vpop.eup %9434  ;;  %v4612_v14 = vadd.f32 1.0, %v9433_v1  ;;  %9464 = vpow2.f32 %v7558_v34  ;;  %17444 = vst [vmem:[#allocation62_spill] sm:$0xff] %v14669_v38  ;;  %v14677_v47 = vpop.f32.mrf.mxu0  ;;  %v7546_v1 = vmul.f32 -1.442695, %v14655_v54  ;;  %v17446_v34 = vld [vmem:[#allocation89_spill] sm:$0xff] }
 0x4b0   : > { %v14657_v48 = vpop.f32.mrf.mxu1  ;;  %v14659_v27 = vpop.eup %9436  ;;  %v4613_v43 = vadd.f32 1.0, %v9435_v52  ;;  %9466 = vpow2.f32 %v7559_v25  ;;  %17445 = vst [vmem:[#allocation203_spill] sm:$0xff] %v14675_v57  ;;  %v7547_v25 = vmul.f32 -1.442695, %v14663_v46  ;;  %17449 = vst [vmem:[#allocation138_spill] sm:$0xff] %v14693_v11  ;;  %v17453_v54 = vld [vmem:[#allocation34_spill] sm:$0xff] }
 0x4b1   : > { %17442 = vst [vmem:[#allocation126_spill] sm:$0xff] %v14657_v48  ;;  %v14665_v51 = vpop.eup %9438  ;;  %9468 = vrcp.f32 %v4598_v50  ;;  %v14684_v48 = vadd.f32 %v17446_v34, %v13480_v63  ;;  %v7560_v50 = vmul.f32 -1.442695, %v14669_v38  ;;  %v14700_v34 = vadd.f32 %v17450_v7, %v13504_v33  ;;  %v2730_v59 = vpop.f32.mrf.mxu0  ;;  %v17459_v46 = vld [vmem:[#allocation46_spill] sm:$0xff] }
 0x4b2   : > { %v14671_v23 = vpop.eup %9440  ;;  %v14686_v0 = vpop.f32.mrf.mxu1  ;;  %9470 = vrcp.f32 %v4599_v58  ;;  %v7561_v58 = vmul.f32 -1.442695, %v14675_v57  ;;  %v14714_v56 = vadd.f32 %v17453_v54, %v13480_v63  ;;  %v14730_v54 = vadd.f32 %v17459_v46, %v13504_v33 }
 0x4b3   : > { %v14679_v21 = vpop.eup %9442  ;;  %17447 = vst [vmem:[#allocation155_spill] sm:$0xff] %v14684_v48  ;;  %17448 = vst [vmem:[#allocation201_spill] sm:$0xff] %v14686_v0  ;;  %9472 = vrcp.f32 %v4612_v14  ;;  %v14707_v0 = vadd.f32 %v14599_v17, %v13512_v9  ;;  %v7572_v14 = vmul.f32 -1.442695, %v14684_v48  ;;  %v14723_v17 = vadd.f32 %v14611_v49, %v13483_v16  ;;  %v2732_v49 = vpop.f32.mrf.mxu0 }
 0x4b4   : > { %v14688_v5 = vpop.eup %9444  ;;  %17451 = vst [vmem:[#allocation195_spill] sm:$0xff] %v14700_v34  ;;  %9474 = vrcp.f32 %v4613_v43  ;;  %17454 = vst [vmem:[#allocation32_spill] sm:$0xff] %v14714_v56  ;;  %v14716_v7 = vpop.f32.mrf.mxu1  ;;  %v7574_v43 = vmul.f32 -1.442695, %v14693_v11 }
 0x4b5   : > { %v14695_v52 = vpop.eup %9446  ;;  %17452 = vst [vmem:[#allocation178_spill] sm:$0xff] %v14707_v0  ;;  %9476 = vpow2.f32 %v7546_v1  ;;  %17455 = vst [vmem:[#allocation12_spill] sm:$0xff] %v14716_v7  ;;  %v7573_v1 = vmul.f32 -1.442695, %v14700_v34  ;;  %v14737_v7 = vadd.f32 %v14639_v19, %v13512_v9  ;;  %v7588_v46 = vmul.f32 -1.442695, %v14723_v17  ;;  %v2736_v45 = vpop.f32.mrf.mxu0 }
 0x4b6   : > { %v14702_v39 = vpop.eup %9448  ;;  %9478 = vpow2.f32 %v7547_v25  ;;  %17457 = vst [vmem:[#allocation218_spill] sm:$0xff] %v14723_v17  ;;  %17460 = vst [vmem:[#allocation22_spill] sm:$0xff] %v14730_v54  ;;  %v7575_v25 = vmul.f32 -1.442695, %v14707_v0  ;;  %v14803_v11 = vadd.f32 %v2736_v45, %v13483_v16  ;;  %v17480_v34 = vld [vmem:[#allocation65_spill] sm:$0xff] }
 0x4b7   : > { %v14709_v10 = vpop.eup %9450  ;;  %9480 = vpow2.f32 %v7560_v50  ;;  %17462 = vst [vmem:[#allocation109_spill] sm:$0xff] %v14737_v7  ;;  %v7586_v50 = vmul.f32 -1.442695, %v14714_v56  ;;  %v7589_v19 = vmul.f32 -1.442695, %v14737_v7  ;;  %v14834_v8 = vadd.f32 %v17480_v34, %v13504_v33 }
 0x4b8   : > { %v14718_v60 = vpop.eup %9452  ;;  %9482 = vpow2.f32 %v7561_v58  ;;  %v7587_v58 = vmul.f32 -1.442695, %v14730_v54  ;;  %v7630_v29 = vmul.f32 -1.442695, %v14803_v11 }
 0x4b9   : > { %17456 = vst [vmem:[#allocation21_spill] sm:$0xff] %v14718_v60  ;;  %v14725_v26 = vpop.eup %9454  ;;  %9484 = vpow2.f32 %v7572_v14  ;;  %v17465_v14 = vld [vmem:[#allocation153_spill] sm:$0xff] }
 0x4ba   : > { %17458 = vst [vmem:[#allocation219_spill] sm:$0xff] %v14725_v26  ;;  %v14732_v4 = vpop.eup %9456  ;;  %v14742_v26 = vpop.f32.mrf.mxu1  ;;  %9486 = vpow2.f32 %v7574_v43  ;;  %v14749_v62 = vadd.f32 %v17465_v14, %v13480_v63 }
 0x4bb   : > { %17461 = vst [vmem:[#allocation114_spill] sm:$0xff] %v14732_v4  ;;  %v14739_v60 = vpop.eup %9458  ;;  %17464 = vst [vmem:[#allocation226_spill] sm:$0xff] %v14742_v26  ;;  %9488 = vpow2.f32 %v7573_v1  ;;  %v17468_v1 = vld [vmem:[#allocation72_spill] sm:$0xff] }
 0x4bc   : > { %17463 = vst [vmem:[#allocation108_spill] sm:$0xff] %v14739_v60  ;;  %v9461_v42 = vpop.eup %9460  ;;  %9490 = vpow2.f32 %v7575_v25  ;;  %v14751_v26 = vpop.f32.mrf.mxu1  ;;  %v14757_v31 = vadd.f32 %v17468_v1, %v13504_v33  ;;  %v7600_v1 = vmul.f32 -1.442695, %v14749_v62 }
 0x4bd   : > { %v9463_v4 = vpop.eup %9462  ;;  %v4626_v60 = vadd.f32 1.0, %v9461_v42  ;;  %9492 = vpow2.f32 %v7586_v50  ;;  %17466 = vst [vmem:[#allocation96_spill] sm:$0xff] %v14751_v26  ;;  %v14763_v42 = vadd.f32 %v14677_v47, %v13512_v9  ;;  %v17471_v26 = vld [vmem:[#allocation131_spill] sm:$0xff] }
 0x4be   : > { %v9465_v13 = vpop.eup %9464  ;;  %v4627_v57 = vadd.f32 1.0, %v9463_v4  ;;  %9494 = vpow2.f32 %v7588_v46  ;;  %v14769_v4 = vadd.f32 %v17471_v26, %v13480_v63  ;;  %v2738_v46 = vpop.f32.mrf.mxu0 }
 0x4bf   : > { %v9467_v38 = vpop.eup %9466  ;;  %v4640_v37 = vadd.f32 1.0, %v9465_v13  ;;  %9496 = vpow2.f32 %v7587_v58  ;;  %v14775_v13 = vadd.f32 %v2730_v59, %v13483_v16  ;;  %v14777_v58 = vpop.f32.mrf.mxu1  ;;  %v14816_v0 = vadd.f32 %v2738_v46, %v13512_v9 }
 0x4c0   : > { %v14753_v43 = vpop.eup %9468  ;;  %v4641_v14 = vadd.f32 1.0, %v9467_v38  ;;  %9498 = vpow2.f32 %v7589_v19  ;;  %17473 = vst [vmem:[#allocation77_spill] sm:$0xff] %v14777_v58  ;;  %v7601_v38 = vmul.f32 -1.442695, %v14757_v31  ;;  %v17474_v19 = vld [vmem:[#allocation68_spill] sm:$0xff]  ;;  %v2740_v32 = vpop.f32.mrf.mxu0 }
 0x4c1   : > { %17467 = vst [vmem:[#allocation182_spill] sm:$0xff] %v14753_v43  ;;  %v14759_v25 = vpop.eup %9470  ;;  %9500 = vrcp.f32 %v4626_v60  ;;  %v14784_v26 = vadd.f32 %v17474_v19, %v13504_v33  ;;  %v7603_v60 = vmul.f32 -1.442695, %v14763_v42  ;;  %v7614_v58 = vmul.f32 -1.442695, %v14769_v4 }
 0x4c2   : > { %17469 = vst [vmem:[#allocation74_spill] sm:$0xff] %v14759_v25  ;;  %v14765_v50 = vpop.eup %9472  ;;  %9502 = vrcp.f32 %v4627_v57  ;;  %v17475_v57 = vld [vmem:[#allocation60_spill] sm:$0xff]  ;;  %v2742_v53 = vpop.f32.mrf.mxu0 }
 0x4c3   : > { %17470 = vst [vmem:[#allocation117_spill] sm:$0xff] %v14765_v50  ;;  %v14771_v43 = vpop.eup %9474  ;;  %9504 = vrcp.f32 %v4640_v37  ;;  %v14790_v50 = vadd.f32 %v2732_v49, %v13512_v9  ;;  %v7616_v37 = vmul.f32 -1.442695, %v14775_v13  ;;  %v14805_v49 = vpop.f32.mrf.mxu1 }
 0x4c4   : > { %17472 = vst [vmem:[#allocation55_spill] sm:$0xff] %v14771_v43  ;;  %v14779_v47 = vpop.eup %9476  ;;  %9506 = vrcp.f32 %v4641_v14  ;;  %v14797_v43 = vadd.f32 %v17475_v57, %v13480_v63  ;;  %17476 = vst [vmem:[#allocation159_spill] sm:$0xff] %v14805_v49  ;;  %v7615_v14 = vmul.f32 -1.442695, %v14784_v26 }
 0x4c5   : > { %v14786_v25 = vpop.eup %9478  ;;  %9508 = vpow2.f32 %v7600_v1  ;;  %v7617_v1 = vmul.f32 -1.442695, %v14790_v50  ;;  %v14829_v17 = vpop.f32.mrf.mxu1 }
 0x4c6   : > { %v14792_v59 = vpop.eup %9480  ;;  %9510 = vpow2.f32 %v7601_v38  ;;  %v7628_v49 = vmul.f32 -1.442695, %v14797_v43  ;;  %v17478_v38 = vld [vmem:[#allocation73_spill] sm:$0xff]  ;;  %17479 = vst [vmem:[#allocation147_spill] sm:$0xff] %v14829_v17  ;;  %v14844_v17 = vadd.f32 %v14651_v6, %v13483_v16 }
 0x4c7   : > { %v14799_v19 = vpop.eup %9482  ;;  %9512 = vpow2.f32 %v7603_v60  ;;  %v14821_v48 = vadd.f32 %v17478_v38, %v13480_v63  ;;  %v14827_v60 = vadd.f32 %v2740_v32, %v13483_v16  ;;  %v14840_v38 = vadd.f32 %v2742_v53, %v13512_v9  ;;  %v14850_v34 = vpop.f32.mrf.mxu1 }
 0x4c8   : > { %v9485_v40 = vpop.eup %9484  ;;  %9514 = vpow2.f32 %v7614_v58  ;;  %v7629_v58 = vmul.f32 -1.442695, %v14810_v2  ;;  %17481 = vst [vmem:[#allocation193_spill] sm:$0xff] %v14844_v17  ;;  %17482 = vst [vmem:[#allocation58_spill] sm:$0xff] %v14850_v34  ;;  %v7643_v9 = vmul.f32 -1.442695, %v14834_v8 }
 0x4c9   : > { %v14812_v57 = vpop.eup %9486  ;;  %9516 = vpow2.f32 %v7616_v37  ;;  %v7631_v37 = vmul.f32 -1.442695, %v14816_v0  ;;  %v7644_v33 = vmul.f32 -1.442695, %v14827_v60  ;;  %v7645_v16 = vmul.f32 -1.442695, %v14840_v38  ;;  %v14863_v34 = vpop.f32.mrf.mxu1 }
 0x4ca   : > { %v9489_v45 = vpop.eup %9488  ;;  %9518 = vpow2.f32 %v7615_v14  ;;  %v7642_v14 = vmul.f32 -1.442695, %v14821_v48  ;;  %v4654_v7 = vadd.f32 1.0, %v9485_v40  ;;  %17487 = vst [vmem:[#allocation116_spill] sm:$0xff] %v14863_v34 }
 0x4cb   : > { %v14823_v22 = vpop.eup %9490  ;;  %9520 = vpow2.f32 %v7617_v1 }
 0x4cc   : > { %v9493_v46 = vpop.eup %9492  ;;  %9522 = vpow2.f32 %v7628_v49  ;;  %v7602_v49 = vmul.f32 -1.442695, %v14844_v17  ;;  %v14865_v17 = vpop.f32.mrf.mxu1 }
 0x4cd   : > { %v14836_v63 = vpop.eup %9494  ;;  %9524 = vpow2.f32 %v7630_v29  ;;  %v4668_v55 = vadd.f32 1.0, %v9493_v46  ;;  %17488 = vst [vmem:[#allocation91_spill] sm:$0xff] %v14865_v17 }
 0x4ce   : > { %v9497_v32 = vpop.eup %9496  ;;  %9526 = vpow2.f32 %v7629_v58  ;;  %v4655_v58 = vadd.f32 1.0, %v9489_v45  ;;  %v14867_v46 = vpop.f32.mrf.mxu1 }
 0x4cf   : > { %v14847_v15 = vpop.eup %9498  ;;  %9528 = vpow2.f32 %v7631_v37  ;;  %17489 = vst [vmem:[#allocation170_spill] sm:$0xff] %v14867_v46 }
 0x4d0   : > { %v14852_v1 = vpop.eup %9500  ;;  %9530 = vpow2.f32 %v7642_v14 }
 0x4d1   : > { %17483 = vst [vmem:[#allocation47_spill] sm:$0xff] %v14852_v1  ;;  %v14855_v53 = vpop.eup %9502  ;;  %9532 = vpow2.f32 %v7644_v33 }
 0x4d2   : > { %17484 = vst [vmem:[#allocation66_spill] sm:$0xff] %v14855_v53  ;;  %v14858_v6 = vpop.eup %9504  ;;  %9534 = vpow2.f32 %v7643_v9  ;;  %v4669_v53 = vadd.f32 1.0, %v9497_v32 }
 0x4d3   : > { %17485 = vst [vmem:[#allocation200_spill] sm:$0xff] %v14858_v6  ;;  %v14861_v29 = vpop.eup %9506  ;;  %9536 = vpow2.f32 %v7645_v16 }
 0x4d4   : > { %17486 = vst [vmem:[#allocation17_spill] sm:$0xff] %v14861_v29  ;;  %v9509_v1 = vpop.eup %9508  ;;  %9538 = vpow2.f32 %v7602_v49 }
 0x4d5   : > { %v9511_v56 = vpop.eup %9510  ;;  %9540 = vrcp.f32 %v4654_v7  ;;  %v4682_v6 = vadd.f32 1.0, %v9509_v1 }
 0x4d6   : > { %v9513_v37 = vpop.eup %9512  ;;  %9542 = vrcp.f32 %v4655_v58  ;;  %v4683_v40 = vadd.f32 1.0, %v9511_v56  ;;  %v9871_v58 = vld [vmem:[#allocation5 + $0x8] sm:$0x3f]  ;;  %v17490_v56 = vld [vmem:[#allocation211_spill] sm:$0xff] }
 0x4d7   : > { %v9515_v20 = vpop.eup %9514  ;;  %9544 = vrcp.f32 %v4668_v55  ;;  %v14870_v17 = vrot.slane %v9871_v58, %v17490_v56  ;;  %v17494_v56 = vld [vmem:[#allocation61_spill] sm:$0xff] }
 0x4d8   : > { %v9517_v14 = vpop.eup %9516  ;;  %v4696_v34 = vadd.f32 1.0, %v9515_v20  ;;  %9546 = vrcp.f32 %v4669_v53  ;;  %v17491_v53 = vld [vmem:[#allocation213_spill] sm:$0xff] }
 0x4d9   : > { %v9519_v33 = vpop.eup %9518  ;;  %9548 = vrcp.f32 %v4682_v6  ;;  %v14875_v6 = vpop.f32.mrf.mxu1  ;;  %v14879_v30 = vadd.f32 %v17494_v56, %v14870_v17 }
 0x4da   : > { %v9521_v29 = vpop.eup %9520  ;;  %v4697_v45 = vadd.f32 1.0, %v9519_v33  ;;  %9550 = vrcp.f32 %v4683_v40  ;;  %v14873_v33 = vrot.slane %v9871_v58, %v17491_v53  ;;  %17493 = vst [vmem:[#allocation165_spill] sm:$0xff] %v14875_v6  ;;  %v17496_v6 = vld [vmem:[#allocation78_spill] sm:$0xff] }
 0x4db   : > { %v9523_v9 = vpop.eup %9522  ;;  %9552 = vrcp.f32 %v4696_v34  ;;  %17495 = vst [vmem:[#allocation113_spill] sm:$0xff] %v14879_v30 }
 0x4dc   : > { %v9525_v32 = vpop.eup %9524  ;;  %v4710_v16 = vadd.f32 1.0, %v9523_v9  ;;  %9554 = vrcp.f32 %v4697_v45  ;;  %17492 = vst [vmem:[#allocation105_spill] sm:$0xff] %v14873_v33  ;;  %v14883_v53 = vadd.f32 %v17496_v6, %v14873_v33  ;;  %v4671_v6 = vadd.f32 1.0, %v14847_v15  ;;  %v17508_v15 = vld [vmem:[#allocation132_spill] sm:$0xff] }
 0x4dd   : > { %v9527_v7 = vpop.eup %9526 }
 0x4de   : > { %v9529_v1 = vpop.eup %9528  ;;  %v4711_v49 = vadd.f32 1.0, %v9527_v7  ;;  %9556 = vrcp.f32 %v4710_v16  ;;  %v4712_v7 = vadd.f32 1.0, %v9525_v32  ;;  %17497 = vst [vmem:[#allocation103_spill] sm:$0xff] %v14883_v53 }
 0x4df   : > { %v9531_v20 = vpop.eup %9530  ;;  %v4713_v55 = vadd.f32 1.0, %v9529_v1  ;;  %v4699_v1 = vadd.f32 1.0, %v9521_v29  ;;  %v14894_v29 = vmul.f32 -1.442695, %v14879_v30  ;;  %v17510_v30 = vld [vmem:[#allocation106_spill] sm:$0xff] }
 0x4e0   : > { %v9533_v46 = vpop.eup %9532  ;;  %9558 = vrcp.f32 %v4711_v49  ;;  %v4724_v40 = vadd.f32 1.0, %v9531_v20  ;;  %v14885_v49 = vpop.f32.mrf.mxu1 }
 0x4e1   : > { %v9535_v9 = vpop.eup %9534  ;;  %9560 = vrcp.f32 %v4713_v55  ;;  %v4726_v34 = vadd.f32 1.0, %v9533_v46  ;;  %17498 = vst [vmem:[#allocation53_spill] sm:$0xff] %v14885_v49  ;;  %v4698_v46 = vadd.f32 1.0, %v9517_v14  ;;  %v4685_v55 = vadd.f32 1.0, %v9513_v37  ;;  %17501 = vst [vmem:[#allocation129_spill] sm:$0xff] %v14894_v29 }
 0x4e2   : > { %v9537_v45 = vpop.eup %9536  ;;  %9562 = vrcp.f32 %v4724_v40  ;;  %v4725_v54 = vadd.f32 1.0, %v9535_v9  ;;  %v14906_v37 = vpop.f32.mrf.mxu1 }
 0x4e3   : > { %v9539_v16 = vpop.eup %9538  ;;  %9564 = vrcp.f32 %v4726_v34  ;;  %v4727_v58 = vadd.f32 1.0, %v9537_v45  ;;  %v14900_v34 = vmul.f32 -1.442695, %v14883_v53  ;;  %17505 = vst [vmem:[#allocation59_spill] sm:$0xff] %v14906_v37  ;;  %v14924_v37 = vadd.f32 %v17510_v30, %v14873_v33 }
 0x4e4   : > { %v14887_v20 = vpop.eup %9540  ;;  %9566 = vrcp.f32 %v4725_v54  ;;  %v4684_v40 = vadd.f32 1.0, %v9539_v16  ;;  %v17503_v54 = vld [vmem:[#allocation180_spill] sm:$0xff]  ;;  %v17506_v16 = vld [vmem:[#allocation107_spill] sm:$0xff]  ;;  %v4643_v30 = vadd.f32 1.0, %v14799_v19 }
 0x4e5   : > { %17499 = vst [vmem:[#allocation111_spill] sm:$0xff] %v14887_v20  ;;  %v14889_v32 = vpop.eup %9542  ;;  %9568 = vrcp.f32 %v4727_v58  ;;  %17502 = vst [vmem:[#allocation144_spill] sm:$0xff] %v14900_v34  ;;  %v14904_v14 = vadd.f32 %v17503_v54, %v14870_v17  ;;  %v14913_v58 = vadd.f32 %v17506_v16, %v14873_v33  ;;  %v4657_v54 = vadd.f32 1.0, %v14823_v22  ;;  %v17516_v22 = vld [vmem:[#allocation212_spill] sm:$0xff] }
 0x4e6   : > { %17500 = vst [vmem:[#allocation79_spill] sm:$0xff] %v14889_v32  ;;  %v14891_v56 = vpop.eup %9544  ;;  %9570 = vrcp.f32 %v4712_v7  ;;  %v4670_v7 = vadd.f32 1.0, %v14836_v63  ;;  %17511 = vst [vmem:[#allocation16_spill] sm:$0xff] %v14924_v37  ;;  %v17512_v63 = vld [vmem:[#allocation154_spill] sm:$0xff]  ;;  %v4656_v16 = vadd.f32 1.0, %v14812_v57  ;;  %v14949_v57 = vadd.f32 %v14280_v35, %v14873_v33 }
 0x4e7   : > { %v14896_v9 = vpop.eup %9546  ;;  %9572 = vrcp.f32 %v4699_v1  ;;  %17504 = vst [vmem:[#allocation168_spill] sm:$0xff] %v14904_v14  ;;  %17507 = vst [vmem:[#allocation134_spill] sm:$0xff] %v14913_v58  ;;  %v14917_v1 = vadd.f32 %v17508_v15, %v14870_v17  ;;  %v17514_v15 = vld [vmem:[#allocation189_spill] sm:$0xff]  ;;  %v4642_v20 = vadd.f32 1.0, %v14792_v59  ;;  %v4628_v59 = vadd.f32 1.0, %v14779_v47 }
 0x4e8   : > { %v14908_v45 = vpop.eup %9548  ;;  %9574 = vrcp.f32 %v4698_v46  ;;  %v14928_v46 = vadd.f32 %v17512_v63, %v14870_v17  ;;  %v14935_v34 = vadd.f32 %v17514_v15, %v14873_v33  ;;  %v14945_v63 = vmul.f32 -1.442695, %v14904_v14  ;;  %17518 = vst [vmem:[#allocation110_spill] sm:$0xff] %v14949_v57 }
 0x4e9   : > { %17509 = vst [vmem:[#allocation83_spill] sm:$0xff] %v14917_v1  ;;  %v14919_v49 = vpop.eup %9550  ;;  %9576 = vrcp.f32 %v4685_v55  ;;  %v14939_v55 = vadd.f32 %v17516_v22, %v14870_v17  ;;  %v14955_v22 = vmul.f32 -1.442695, %v14913_v58  ;;  %v14958_v32 = vmul.f32 -1.442695, %v14917_v1 }
 0x4ea   : > { %17513 = vst [vmem:[#allocation100_spill] sm:$0xff] %v14928_v46  ;;  %v14930_v53 = vpop.eup %9552  ;;  %9578 = vrcp.f32 %v4684_v40  ;;  %17515 = vst [vmem:[#allocation149_spill] sm:$0xff] %v14935_v34  ;;  %v14951_v40 = vpop.f32.mrf.mxu1  ;;  %v14962_v14 = vmul.f32 -1.442695, %v14924_v37  ;;  %v14965_v35 = vmul.f32 -1.442695, %v14928_v46  ;;  %v14980_v37 = vadd.f32 %v14288_v3, %v14870_v17 }
 0x4eb   : > { %17517 = vst [vmem:[#allocation44_spill] sm:$0xff] %v14939_v55  ;;  %v14941_v29 = vpop.eup %9554  ;;  %9580 = vrcp.f32 %v4671_v6  ;;  %17519 = vst [vmem:[#allocation188_spill] sm:$0xff] %v14951_v40  ;;  %v4629_v6 = vadd.f32 1.0, %v14786_v25  ;;  %v14972_v58 = vmul.f32 -1.442695, %v14939_v55  ;;  %v4615_v25 = vadd.f32 1.0, %v14709_v10 }
 0x4ec   : > { %v9557_v15 = vpop.eup %9556  ;;  %9582 = vrcp.f32 %v4670_v7  ;;  %v14969_v7 = vmul.f32 -1.442695, %v14935_v34  ;;  %17522 = vst [vmem:[#allocation13_spill] sm:$0xff] %v14980_v37  ;;  %v14982_v46 = vpop.f32.mrf.mxu1  ;;  %v4614_v34 = vadd.f32 1.0, %v14702_v39  ;;  %v14990_v10 = vadd.f32 %v14303_v18, %v14873_v33 }
 0x4ed   : > { %v9559_v19 = vpop.eup %9558  ;;  %9584 = vrcp.f32 %v4657_v54  ;;  %17520 = vst [vmem:[#allocation38_spill] sm:$0xff] %v14972_v58  ;;  %v14976_v54 = vmul.f32 -1.442695, %v14949_v57  ;;  %17523 = vst [vmem:[#allocation94_spill] sm:$0xff] %v14982_v46  ;;  %v4601_v55 = vadd.f32 1.0, %v14695_v52  ;;  %v14995_v3 = vadd.f32 %v14338_v41, %v14873_v33  ;;  %v17526_v57 = vld [vmem:[#allocation86_spill] sm:$0xff] }
 0x4ee   : > { %v9561_v40 = vpop.eup %9560  ;;  %9586 = vrcp.f32 %v4656_v16  ;;  %v14985_v16 = vadd.f32 1.0, %v14511_v36  ;;  %17524 = vst [vmem:[#allocation185_spill] sm:$0xff] %v14990_v10  ;;  %v14999_v46 = vadd.f32 %v14348_v61, %v14870_v17  ;;  %v15003_v39 = vmul.f32 %v14517_v44, %v17526_v57  ;;  %v15010_v61 = vpop.f32.mrf.mxu1 }
 0x4ef   : > { %v9563_v1 = vpop.eup %9562  ;;  %9588 = vrcp.f32 %v4643_v30  ;;  %17521 = vst [vmem:[#allocation102_spill] sm:$0xff] %v14976_v54  ;;  %17525 = vst [vmem:[#allocation161_spill] sm:$0xff] %v14995_v3  ;;  %v4600_v18 = vadd.f32 1.0, %v14688_v5  ;;  %v4586_v33 = vadd.f32 1.0, %v14671_v23  ;;  %v6055_v44 = vmul.f32 %v9559_v19, %v14810_v2 }
 0x4f0   : > { %v9565_v47 = vpop.eup %9564  ;;  %9590 = vrcp.f32 %v4642_v20  ;;  %v6068_v41 = vmul.f32 %v9563_v1, %v14821_v48  ;;  %17527 = vst [vmem:[#allocation71_spill] sm:$0xff] %v15010_v61  ;;  %v4573_v57 = vadd.f32 1.0, %v14665_v51  ;;  %v6057_v48 = vmul.f32 %v9561_v40, %v14816_v0  ;;  %v17528_v51 = vld [vmem:[#allocation210_spill] sm:$0xff] }
 0x4f1   : > { %v9567_v30 = vpop.eup %9566  ;;  %9592 = vrcp.f32 %v4629_v6  ;;  %v4587_v6 = vadd.f32 1.0, %v14679_v21  ;;  %v6070_v5 = vmul.f32 %v9565_v47, %v14827_v60  ;;  %v6054_v21 = vmul.f32 %v9557_v15, %v14797_v43  ;;  %v17534_v15 = vld [vmem:[#allocation193_spill] sm:$0xff] }
 0x4f2   : > { %v9569_v36 = vpop.eup %9568  ;;  %9594 = vrcp.f32 %v4628_v59  ;;  %v6069_v20 = vmul.f32 %v9567_v30, %v14834_v8  ;;  %v4572_v1 = vadd.f32 1.0, %v14659_v27  ;;  %v6041_v2 = vmul.f32 %v14941_v29, %v14784_v26  ;;  %v15029_v27 = vpop.f32.mrf.mxu1  ;;  %v17530_v29 = vld [vmem:[#allocation40_spill] sm:$0xff] }
 0x4f3   : > { %v9571_v52 = vpop.eup %9570  ;;  %9596 = vrcp.f32 %v4615_v25  ;;  %v6071_v54 = vmul.f32 %v9569_v36, %v14840_v38  ;;  %v6040_v0 = vmul.f32 %v14930_v53, %v14769_v4  ;;  %17529 = vst [vmem:[#allocation162_spill] sm:$0xff] %v15029_v27  ;;  %v17537_v59 = vld [vmem:[#allocation32_spill] sm:$0xff]  ;;  %v15060_v30 = vmul.f32 -1.442695, %v14980_v37  ;;  %v17646_v37 = vld [vmem:[#allocation27_spill] sm:$0xff] }
 0x4f4   : > { %v9573_v58 = vpop.eup %9572  ;;  %9598 = vrcp.f32 %v4614_v34  ;;  %6392 = vmatprep.subr.mxu1 %v6069_v20  ;;  %v6056_v23 = vmul.f32 %v9571_v52, %v14803_v11  ;;  %v15024_v34 = vmul.f32 %v14525_v24, %v17528_v51  ;;  %v15033_v11 = vmul.f32 %v14533_v28, %v17530_v29  ;;  %v17541_v20 = vld [vmem:[#allocation63_spill] sm:$0xff] }
 0x4f5   : > { %v9575_v8 = vpop.eup %9574  ;;  %9600 = vrcp.f32 %v4601_v55  ;;  %6463 = vmatprep.subr.mxu0 %v6071_v54  ;;  %6393 = vmatpush2.msra.mxu1 %v6068_v41  ;;  %v6043_v43 = vmul.f32 %v9573_v58, %v14790_v50  ;;  %v6027_v24 = vmul.f32 %v14919_v49, %v14757_v31  ;;  %v6026_v50 = vmul.f32 %v14908_v45, %v14749_v62  ;;  %v17532_v31 = vld [vmem:[#allocation119_spill] sm:$0xff]  ;;  %v17538_v54 = vld [vmem:[#allocation109_spill] sm:$0xff] }
 0x4f6   : > { %v9577_v38 = vpop.eup %9576  ;;  %9602 = vrcp.f32 %v4600_v18  ;;  %6464 = vmatpush2.msra.mxu0 %v6070_v5  ;;  %6394 = vmatprep.subr.mxu1 %v6055_v44  ;;  %v6042_v55 = vmul.f32 %v9575_v8, %v14775_v13  ;;  %v15043_v58 = vadd.f32 %v14409_v12, %v14870_v17  ;;  %v17533_v13 = vld [vmem:[#allocation22_spill] sm:$0xff]  ;;  %v17536_v45 = vld [vmem:[#allocation199_spill] sm:$0xff]  ;;  %v6012_v25 = vmul.f32 %v14891_v56, %v17537_v59 }
 0x4f7   : > { %v9579_v60 = vpop.eup %9578  ;;  %9604 = vrcp.f32 %v4587_v6  ;;  %6465 = vmatprep.subr.mxu0 %v6057_v48  ;;  %6395 = vmatpush2.msra.mxu1 %v6054_v21  ;;  %v6029_v53 = vmul.f32 %v9577_v38, %v14763_v42  ;;  %v6013_v40 = vmul.f32 %v14896_v9, %v17533_v13  ;;  %v17535_v42 = vld [vmem:[#allocation194_spill] sm:$0xff]  ;;  %v15062_v9 = vpop.f32.mrf.mxu1  ;;  %v17542_v6 = vld [vmem:[#allocation195_spill] sm:$0xff]  ;;  %v15072_v56 = vmul.f32 -1.442695, %v14990_v10 }
 0x4f8   : > { %v9581_v26 = vpop.eup %9580  ;;  %9606 = vrcp.f32 %v4586_v33  ;;  %6466 = vmatpush2.msra.mxu0 %v6056_v23  ;;  %6396 = vmatprep.subr.mxu1 %v6041_v2  ;;  %v17531_v33 = vld [vmem:[#allocation183_spill] sm:$0xff]  ;;  %v6028_v19 = vmul.f32 %v9579_v60, %v17534_v15  ;;  %v15054_v12 = vmul.f32 %v17536_v45, %v17535_v42  ;;  %17539 = vst [vmem:[#allocation36_spill] sm:$0xff] %v15062_v9  ;;  %v17540_v18 = vld [vmem:[#allocation146_spill] sm:$0xff]  ;;  %v17558_v15 = vld [vmem:[#allocation200_spill] sm:$0xff]  ;;  %v15100_v59 = vmul.f32 -1.442695, %v14999_v46 }
 0x4f9   : > { %v9583_v4 = vpop.eup %9582  ;;  %9608 = vrcp.f32 %v4573_v57  ;;  %6467 = vmatprep.subr.mxu0 %v6043_v43  ;;  %6397 = vmatpush2.msra.mxu1 %v6040_v0  ;;  %v15047_v49 = vmul.f32 %v17532_v31, %v17531_v33  ;;  %v6015_v47 = vmul.f32 %v9581_v26, %v17538_v54  ;;  %v15066_v52 = vmul.f32 %v17541_v20, %v17540_v18  ;;  %v17543_v41 = vld [vmem:[#allocation79_spill] sm:$0xff]  ;;  %v17544_v5 = vld [vmem:[#allocation218_spill] sm:$0xff]  ;;  %v17550_v43 = vld [vmem:[#allocation220_spill] sm:$0xff] }
 0x4fa   : > { %v9585_v28 = vpop.eup %9584  ;;  %9610 = vrcp.f32 %v4572_v1  ;;  %6468 = vmatpush2.msra.mxu0 %v6042_v55  ;;  %6398 = vmatprep.subr.mxu1 %v6027_v24  ;;  %v5999_v44 = vmul.f32 %v17543_v41, %v17542_v6  ;;  %v6014_v8 = vmul.f32 %v9583_v4, %v17544_v5  ;;  %v17545_v21 = vld [vmem:[#allocation51_spill] sm:$0xff]  ;;  %v17549_v60 = vld [vmem:[#allocation178_spill] sm:$0xff]  ;;  %v17552_v24 = vld [vmem:[#allocation196_spill] sm:$0xff]  ;;  %v15090_v33 = vmul.f32 -1.442695, %v14995_v3 }
 0x4fb   : > { %v9587_v62 = vpop.eup %9586  ;;  %6469 = vmatprep.subr.mxu0 %v6029_v53  ;;  %6399 = vmatpush2.msra.mxu1 %v6026_v50  ;;  %v17546_v48 = vld [vmem:[#allocation31_spill] sm:$0xff]  ;;  %9612 = vrcp.f32 %v14985_v16  ;;  %v6001_v51 = vmul.f32 %v9585_v28, %v17549_v60  ;;  %v17551_v26 = vld [vmem:[#allocation142_spill] sm:$0xff]  ;;  %v17553_v55 = vld [vmem:[#allocation17_spill] sm:$0xff] }
 0x4fc   : > { %v9589_v36 = vpop.eup %9588  ;;  %6470 = vmatpush2.msra.mxu0 %v6028_v19  ;;  %6400 = vmatprep.subr.mxu1 %v6013_v40  ;;  %v15076_v38 = vmul.f32 %v17546_v48, %v17545_v21  ;;  %v17547_v1 = vld [vmem:[#allocation155_spill] sm:$0xff]  ;;  %v15084_v29 = vmul.f32 %v17551_v26, %v17550_v43  ;;  %v5985_v4 = vmul.f32 %v17553_v55, %v17552_v24  ;;  %v17554_v50 = vld [vmem:[#allocation138_spill] sm:$0xff]  ;;  %v17557_v40 = vld [vmem:[#allocation101_spill] sm:$0xff] }
 0x4fd   : > { %v9591_v57 = vpop.eup %9590  ;;  %v17548_v2 = vld [vmem:[#allocation111_spill] sm:$0xff]  ;;  %6471 = vmatprep.subr.mxu0 %v6015_v47  ;;  %6401 = vmatpush2.msra.mxu1 %v6012_v25  ;;  %v6000_v53 = vmul.f32 %v9587_v62, %v17554_v50  ;;  %v17555_v31 = vld [vmem:[#allocation98_spill] sm:$0xff]  ;;  %v5984_v19 = vmul.f32 %v17558_v15, %v17557_v40  ;;  %v15102_v62 = vpop.f32.mrf.mxu1  ;;  %v17561_v54 = vld [vmem:[#allocation84_spill] sm:$0xff] }
 0x4fe   : > { %v5998_v23 = vmul.f32 %v17548_v2, %v17547_v1  ;;  %v9593_v0 = vpop.eup %9592  ;;  %6472 = vmatpush2.msra.mxu0 %v6014_v8  ;;  %6402 = vmatprep.subr.mxu1 %v5999_v44  ;;  %v17556_v28 = vld [vmem:[#allocation10_spill] sm:$0xff]  ;;  %v17559_v42 = vld [vmem:[#allocation203_spill] sm:$0xff]  ;;  %17560 = vst [vmem:[#allocation224_spill] sm:$0xff] %v15102_v62  ;;  %v17564_v41 = vld [vmem:[#allocation129_spill] sm:$0xff] }
 0x4ff   : > { %v9595_v16 = vpop.eup %9594  ;;  %v15094_v13 = vmul.f32 %v17556_v28, %v17555_v31  ;;  %v5987_v45 = vmul.f32 %v9589_v36, %v17559_v42  ;;  %6473 = vmatprep.subr.mxu0 %v6001_v51  ;;  %v17562_v47 = vld [vmem:[#allocation66_spill] sm:$0xff]  ;;  %9614 = vpow2.f32 %v17564_v41  ;;  %v17565_v44 = vld [vmem:[#allocation136_spill] sm:$0xff]  ;;  %v17567_v21 = vld [vmem:[#allocation37_spill] sm:$0xff]  ;;  %v15136_v41 = vpop.f32.mrf.mxu1 }
 0x500   : > { %6403 = vmatpush2.msra.mxu1 %v5998_v23  ;;  %v9597_v25 = vpop.eup %9596  ;;  %v5971_v18 = vmul.f32 %v17562_v47, %v17561_v54  ;;  %v17563_v20 = vld [vmem:[#allocation62_spill] sm:$0xff]  ;;  %v15110_v5 = vadd.f32 %v17565_v44, %v14870_v17  ;;  %6474 = vmatpush2.msra.mxu0 %v6000_v53  ;;  %v17569_v2 = vld [vmem:[#allocation47_spill] sm:$0xff]  ;;  %v17570_v60 = vld [vmem:[#allocation9_spill] sm:$0xff]  ;;  %17582 = vst [vmem:[#allocation81_spill] sm:$0xff] %v15136_v41 }
 0x501   : > { %v5986_v6 = vmul.f32 %v9591_v57, %v17563_v20  ;;  %6404 = vmatprep.subr.mxu1 %v5985_v4  ;;  %v9599_v36 = vpop.eup %9598  ;;  %v17566_v8 = vld [vmem:[#allocation206_spill] sm:$0xff]  ;;  %v5973_v51 = vmul.f32 %v9593_v0, %v17570_v60  ;;  %v17571_v43 = vld [vmem:[#allocation144_spill] sm:$0xff]  ;;  %6475 = vmatprep.subr.mxu0 %v5987_v45  ;;  %v17572_v26 = vld [vmem:[#allocation19_spill] sm:$0xff] }
 0x502   : > { %v15114_v48 = vmul.f32 %v17567_v21, %v17566_v8  ;;  %v17568_v1 = vld [vmem:[#allocation118_spill] sm:$0xff]  ;;  %9616 = vpow2.f32 %v17571_v43  ;;  %6405 = vmatpush2.msra.mxu1 %v5984_v19  ;;  %v9601_v57 = vpop.eup %9600  ;;  %v17573_v24 = vld [vmem:[#allocation43_spill] sm:$0xff]  ;;  %v17574_v4 = vld [vmem:[#allocation57_spill] sm:$0xff]  ;;  %v15143_v21 = vmul.f32 -1.442695, %v15110_v5 }
 0x503   : > { %v5970_v23 = vmul.f32 %v17569_v2, %v17568_v1  ;;  %v15122_v55 = vmul.f32 %v17573_v24, %v17572_v26  ;;  %v17575_v50 = vld [vmem:[#allocation55_spill] sm:$0xff]  ;;  %v17576_v31 = vld [vmem:[#allocation133_spill] sm:$0xff]  ;;  %9618 = vpow2.f32 %v14945_v63  ;;  %6476 = vmatpush2.msra.mxu0 %v5986_v6  ;;  %6406 = vmatprep.subr.mxu1 %v5971_v18  ;;  %v9603_v40 = vpop.eup %9602  ;;  %v17577_v0 = vld [vmem:[#allocation152_spill] sm:$0xff] }
 0x504   : > { %v5957_v53 = vmul.f32 %v17575_v50, %v17574_v4  ;;  %v5972_v28 = vmul.f32 %v9595_v16, %v17576_v31  ;;  %v17578_v15 = vld [vmem:[#allocation124_spill] sm:$0xff]  ;;  %v17579_v19 = vld [vmem:[#allocation139_spill] sm:$0xff]  ;;  %v17580_v45 = vld [vmem:[#allocation117_spill] sm:$0xff]  ;;  %9620 = vpow2.f32 %v14955_v22  ;;  %6477 = vmatprep.subr.mxu0 %v5973_v51  ;;  %v9605_v16 = vpop.eup %9604 }
 0x505   : > { %v15130_v42 = vmul.f32 %v17578_v15, %v17577_v0  ;;  %v5956_v54 = vmul.f32 %v17580_v45, %v17579_v19  ;;  %v17581_v47 = vld [vmem:[#allocation205_spill] sm:$0xff]  ;;  %6407 = vmatpush2.msra.mxu1 %v5970_v23  ;;  %v17583_v63 = vld [vmem:[#allocation192_spill] sm:$0xff]  ;;  %v17584_v6 = vld [vmem:[#allocation74_spill] sm:$0xff]  ;;  %9622 = vpow2.f32 %v14958_v32 }
 0x506   : > { %v5959_v20 = vmul.f32 %v9597_v25, %v17581_v47  ;;  %v5943_v18 = vmul.f32 %v17584_v6, %v17583_v63  ;;  %v17585_v44 = vld [vmem:[#allocation41_spill] sm:$0xff]  ;;  %6478 = vmatpush2.msra.mxu0 %v5972_v28  ;;  %6408 = vmatprep.subr.mxu1 %v5957_v53  ;;  %v9607_v25 = vpop.eup %9606  ;;  %v17586_v1 = vld [vmem:[#allocation216_spill] sm:$0xff]  ;;  %v17587_v22 = vld [vmem:[#allocation123_spill] sm:$0xff]  ;;  %9624 = vpow2.f32 %v14962_v14  ;;  %v15167_v6 = vpop.f32.mrf.mxu1 }
 0x507   : > { %v5958_v8 = vmul.f32 %v9599_v36, %v17585_v44  ;;  %v15147_v2 = vmul.f32 %v17587_v22, %v17586_v1  ;;  %v17588_v23 = vld [vmem:[#allocation30_spill] sm:$0xff]  ;;  %v17590_v43 = vld [vmem:[#allocation33_spill] sm:$0xff]  ;;  %6409 = vmatpush2.msra.mxu1 %v5956_v54  ;;  %v9609_v32 = vpop.eup %9608  ;;  %v17591_v36 = vld [vmem:[#allocation112_spill] sm:$0xff]  ;;  %9626 = vpow2.f32 %v14965_v35  ;;  %17601 = vst [vmem:[#allocation54_spill] sm:$0xff] %v15167_v6 }
 0x508   : > { %v17589_v60 = vld [vmem:[#allocation182_spill] sm:$0xff]  ;;  %v5945_v26 = vmul.f32 %v9601_v57, %v17590_v43  ;;  %6479 = vmatprep.subr.mxu0 %v5959_v20  ;;  %v17593_v50 = vld [vmem:[#allocation148_spill] sm:$0xff]  ;;  %6410 = vmatprep.subr.mxu1 %v5943_v18  ;;  %v9611_v15 = vpop.eup %9610  ;;  %v17596_v19 = vld [vmem:[#allocation215_spill] sm:$0xff]  ;;  %9628 = vpow2.f32 %v14969_v7 }
 0x509   : > { %v5942_v51 = vmul.f32 %v17589_v60, %v17588_v23  ;;  %v17592_v24 = vld [vmem:[#allocation122_spill] sm:$0xff]  ;;  %v17594_v53 = vld [vmem:[#allocation108_spill] sm:$0xff]  ;;  %6480 = vmatpush2.msra.mxu0 %v5958_v8  ;;  %v17599_v54 = vld [vmem:[#allocation105_spill] sm:$0xff] }
 0x50a   : > { %v5901_v4 = vmul.f32 %v17592_v24, %v17591_v36  ;;  %v5929_v31 = vmul.f32 %v17594_v53, %v17593_v50  ;;  %v17595_v28 = vld [vmem:[#allocation198_spill] sm:$0xff]  ;;  %v17600_v20 = vld [vmem:[#allocation115_spill] sm:$0xff]  ;;  %6481 = vmatprep.subr.mxu0 %v5945_v26  ;;  %v17604_v18 = vld [vmem:[#allocation157_spill] sm:$0xff]  ;;  %v9613_v50 = vpop.eup %9612 }
 0x50b   : > { %v5944_v0 = vmul.f32 %v9603_v40, %v17595_v28  ;;  %v17597_v57 = vld [vmem:[#allocation114_spill] sm:$0xff]  ;;  %v15165_v63 = vadd.f32 %v17600_v20, %v17599_v54  ;;  %6411 = vmatpush2.msra.mxu1 %v5942_v51  ;;  %v17602_v40 = vld [vmem:[#allocation135_spill] sm:$0xff]  ;;  %v5930_v8 = vmul.f32 %v9607_v25, %v17604_v18  ;;  %v17606_v22 = vld [vmem:[#allocation137_spill] sm:$0xff]  ;;  %v15185_v25 = vpop.f32.mrf.mxu0  ;;  %v15201_v20 = vpop.f32.mrf.mxu1 }
 0x50c   : > { %v5928_v45 = vmul.f32 %v17597_v57, %v17596_v19  ;;  %v17598_v14 = vld [vmem:[#allocation202_spill] sm:$0xff]  ;;  %v17603_v35 = vld [vmem:[#allocation219_spill] sm:$0xff]  ;;  %6412 = vmatprep.subr.mxu1 %v5929_v31  ;;  %v17607_v7 = vld [vmem:[#allocation217_spill] sm:$0xff]  ;;  %17617 = vst [vmem:[#allocation24_spill] sm:$0xff] %v15201_v20  ;;  %v15209_v18 = vpop.eup %9614 }
 0x50d   : > { %v5931_v47 = vmul.f32 %v9605_v16, %v17598_v14  ;;  %v5915_v44 = vmul.f32 %v17603_v35, %v17602_v40  ;;  %v17605_v1 = vld [vmem:[#allocation38_spill] sm:$0xff]  ;;  %v15175_v16 = vadd.f32 %v17606_v22, %v14870_v17  ;;  %6482 = vmatpush2.msra.mxu0 %v5944_v0  ;;  %v17608_v23 = vld [vmem:[#allocation21_spill] sm:$0xff]  ;;  %v17611_v36 = vld [vmem:[#allocation156_spill] sm:$0xff]  ;;  %v9962_v35 = vmov 1966171168  }
 0x50e   : > { %9630 = vpow2.f32 %v17605_v1  ;;  %v5914_v60 = vmul.f32 %v17608_v23, %v17607_v7  ;;  %v17609_v43 = vld [vmem:[#allocation18_spill] sm:$0xff]  ;;  %v15183_v24 = vadd.f32 %v17611_v36, %v17599_v54  ;;  %6413 = vmatpush2.msra.mxu1 %v5928_v45  ;;  %v17612_v53 = vld [vmem:[#allocation99_spill] sm:$0xff]  ;;  %v7381_v45 = vmul.f32 -1.442695, %v15165_v63  ;;  %v17616_v14 = vld [vmem:[#allocation125_spill] sm:$0xff] }
 0x50f   : > { %v5917_v51 = vmul.f32 %v9609_v32, %v17609_v43  ;;  %v17610_v26 = vld [vmem:[#allocation102_spill] sm:$0xff]  ;;  %6483 = vmatprep.subr.mxu0 %v5931_v47  ;;  %v17614_v31 = vld [vmem:[#allocation187_spill] sm:$0xff]  ;;  %6414 = vmatprep.subr.mxu1 %v5915_v44  ;;  %v15199_v47 = vadd.f32 %v17616_v14, %v17599_v54  ;;  %v6592_v44 = vunpack.c.l.s4 %v9962_v35  ;;  %v15222_v23 = vpop.eup %9616  ;;  %v17622_v36 = vld [vmem:[#allocation80_spill] sm:$0xff] }
 0x510   : > { %9632 = vpow2.f32 %v17610_v26  ;;  %v17613_v28 = vld [vmem:[#allocation190_spill] sm:$0xff]  ;;  %v5916_v19 = vmul.f32 %v9611_v15, %v17614_v31  ;;  %v17615_v32 = vld [vmem:[#allocation175_spill] sm:$0xff]  ;;  %6484 = vmatpush2.msra.mxu0 %v5930_v8  ;;  %6415 = vmatpush2.msra.mxu1 %v5914_v60  ;;  %v6144_v15 = vpop.f32.mrf.mxu0  ;;  %v17619_v8 = vld [vmem:[#allocation76_spill] sm:$0xff] }
 0x511   : > { %v5903_v0 = vmul.f32 %v17613_v28, %v17612_v53  ;;  %9634 = vpow2.f32 %v15060_v30  ;;  %v15193_v57 = vadd.f32 %v17615_v32, %v14870_v17  ;;  %6485 = vmatprep.subr.mxu0 %v5917_v51  ;;  %v7394_v30 = vmul.f32 -1.442695, %v15175_v16  ;;  %6416 = vmatprep.subr.mxu1 %v5901_v4  ;;  %v17618_v40 = vld [vmem:[#allocation207_spill] sm:$0xff]  ;;  %v17620_v4 = vld [vmem:[#allocation69_spill] sm:$0xff]  ;;  %v15229_v51 = vpop.eup %9618  ;;  %v17626_v32 = vld [vmem:[#allocation214_spill] sm:$0xff] }
 0x512   : > { %9636 = vpow2.f32 %v15072_v56  ;;  %6486 = vmatpush2.msra.mxu0 %v5916_v19  ;;  %v15207_v56 = vadd.f32 %v17618_v40, %v14870_v17  ;;  %v15214_v1 = vadd.f32 %v17619_v8, %v14870_v17  ;;  %6417 = vmatpush2.msra.mxu1 %v15130_v42  ;;  %v15220_v22 = vadd.f32 %v17620_v4, %v17599_v54  ;;  %v6213_v7 = vpop.f32.mrf.mxu0  ;;  %v17621_v42 = vld [vmem:[#allocation64_spill] sm:$0xff]  ;;  %v17627_v8 = vld [vmem:[#allocation158_spill] sm:$0xff] }
 0x513   : > { %9638 = vpow2.f32 %v15090_v33  ;;  %v7395_v33 = vmul.f32 -1.442695, %v15183_v24  ;;  %6487 = vmatprep.subr.mxu0 %v5903_v0  ;;  %6418 = vmatprep.subr.mxu1 %v15114_v48  ;;  %v6587_v60 = vcombine.low %v15185_v25, %v6144_v15  ;;  %v6593_v43 = vunpack.c.0.s8 %v6592_v44  ;;  %v15241_v25 = vpop.eup %9620  ;;  %v17645_v62 = vld [vmem:[#allocation28_spill] sm:$0xff] }
 0x514   : > { %9640 = vpow2.f32 %v15100_v59  ;;  %v7408_v59 = vmul.f32 -1.442695, %v15193_v57  ;;  %6488 = vmatpush2.msra.mxu0 %v15147_v2  ;;  %v5875_v26 = vmul.f32 %v9613_v50, %v17621_v42  ;;  %v15234_v53 = vadd.f32 %v17622_v36, %v17599_v54  ;;  %6419 = vmatpush2.msra.mxu1 %v15084_v29  ;;  %v15239_v2 = vpop.f32.mrf.mxu1  ;;  %v6215_v48 = vpop.f32.mrf.mxu0  ;;  %v17624_v50 = vld [vmem:[#allocation25_spill] sm:$0xff]  ;;  %v17625_v29 = vld [vmem:[#allocation204_spill] sm:$0xff] }
 0x515   : > { %9642 = vpow2.f32 %v15143_v21  ;;  %v7409_v21 = vmul.f32 -1.442695, %v15199_v47  ;;  %6489 = vmatprep.subr.mxu0 %v15122_v55  ;;  %17623 = vst [vmem:[#allocation172_spill] sm:$0xff] %v15239_v2  ;;  %v7422_v28 = vmul.f32 -1.442695, %v15207_v56  ;;  %6420 = vmatprep.subr.mxu1 %v15076_v38  ;;  %v15247_v0 = vsub.s32 %v6593_v43, %v17624_v50  ;;  %v15249_v19 = vpop.eup %9622 }
 0x516   : > { %9644 = vpow2.f32 %v7381_v45  ;;  %6490 = vmatpush2.msra.mxu0 %v15094_v13  ;;  %v6588_v31 = vcombine.low %v6213_v7, %v6215_v48  ;;  %v15253_v55 = vadd.f32 %v17625_v29, %v14870_v17  ;;  %v15257_v45 = vadd.f32 %v17626_v32, %v17599_v54  ;;  %6421 = vmatpush2.msra.mxu1 %v15054_v12  ;;  %v6284_v38 = vpop.f32.mrf.mxu1  ;;  %v6355_v13 = vpop.f32.mrf.mxu0 }
 0x517   : > { %9646 = vpow2.f32 %v7394_v30  ;;  %v7423_v14 = vmul.f32 -1.442695, %v15220_v22  ;;  %6491 = vmatprep.subr.mxu0 %v5875_v26  ;;  %v15261_v15 = vpop.eup %9624  ;;  %v7380_v30 = vmul.f32 -1.442695, %v15214_v1  ;;  %6422 = vmatprep.subr.mxu1 %v15033_v11  ;;  %v6597_v40 = vrot.slane %v6587_v60, %v15247_v0  ;;  %v17630_v60 = vld [vmem:[#allocation11_spill] sm:$0xff] }
 0x518   : > { %9648 = vpow2.f32 %v7395_v33  ;;  %6492 = vmatpush2.msra.mxu0 %v15066_v52  ;;  %v6604_v35 = vrot.slane %v6588_v31, %v15247_v0  ;;  %v15268_v44 = vpop.eup %9626  ;;  %v15272_v12 = vadd.f32 %v17627_v8, %v14870_v17  ;;  %v17629_v33 = vld [vmem:[#allocation20_spill] sm:$0xff]  ;;  %v7367_v7 = vmul.f32 -1.442695, %v15234_v53  ;;  %6423 = vmatpush2.msra.mxu1 %v15003_v39  ;;  %v6286_v11 = vpop.f32.mrf.mxu1 }
 0x519   : > { %9650 = vpow2.f32 %v7408_v59  ;;  %v15276_v4 = vadd.f32 %v17629_v33, %v17599_v54  ;;  %6493 = vmatprep.subr.mxu0 %v15047_v49  ;;  %v6357_v52 = vpop.f32.mrf.mxu0  ;;  %v15281_v59 = vpop.eup %9628  ;;  %v15285_v43 = vadd.f32 %v17630_v60, %v17599_v54  ;;  %v7338_v42 = vmul.f32 -1.442695, %v15043_v58 }
 0x51a   : > { %17628 = vst [vmem:[#allocation163_spill] sm:$0xff] %v15272_v12  ;;  %9652 = vpow2.f32 %v7409_v21  ;;  %6494 = vmatpush2.msra.mxu0 %v15024_v34  ;;  %v17631_v26 = vmov 1.0   ;;  %v6589_v36 = vcombine.low %v6284_v38, %v6286_v11  ;;  %v7353_v39 = vmul.f32 -1.442695, %v15257_v45 }
 0x51b   : > { %9654 = vpow2.f32 %v7422_v28  ;;  %6425 = vmatmul.mubr.f32.vlgmr.msra.gmra.mxu1 %v17631_v26  ;;  %v15290_v21 = vpop.eup %9630  ;;  %6496 = vmatmul.mubr.f32.vlgmr.msra.gmra.mxu0 %v17631_v26  ;;  %v6619_v49 = vcombine.low %v6597_v40, %v6604_v35  ;;  %v6590_v48 = vcombine.low %v6355_v13, %v6357_v52  ;;  %v17632_v28 = vld [vmem:[#allocation130_spill] sm:$0xff]  ;;  %v7352_v34 = vmul.f32 -1.442695, %v15253_v55 }
 0x51c   : > { %9656 = vpow2.f32 %v7423_v14  ;;  %6566 = vmatprep.mubr.f32.mxu1 %v17631_v26  ;;  %v15299_v29 = vadd.f32 %v17632_v28, %v14870_v17  ;;  %v6611_v32 = vrot.slane %v6589_v36, %v15247_v0  ;;  %v17633_v14 = vld [vmem:[#allocation150_spill] sm:$0xff]  ;;  %v7339_v13 = vmul.f32 -1.442695, %v15276_v4 }
 0x51d   : > { %v15295_v31 = vpop.eup %9632  ;;  %9658 = vpow2.f32 %v7380_v30  ;;  %v15307_v8 = vadd.f32 %v17633_v14, %v17599_v54  ;;  %v6618_v40 = vrot.slane %v6590_v48, %v15247_v0  ;;  %v7296_v33 = vmul.f32 -1.442695, %v15272_v12  ;;  %v17648_v12 = vld [vmem:[#allocation211_spill] sm:$0xff] }
 0x51e   : > { %v15303_v38 = vpop.eup %9634  ;;  %9660 = vpow2.f32 %v7367_v7  ;;  %v7325_v30 = vmul.f32 -1.442695, %v15285_v43  ;;  %v6627_v52 = vrot.slane %v6619_v49, %v15247_v0  ;;  %v7324_v28 = vmul.f32 -1.442695, %v15299_v29 }
 0x51f   : > { %v15311_v35 = vpop.eup %9636  ;;  %9662 = vpow2.f32 %v7338_v42  ;;  %v6620_v60 = vcombine.low %v6611_v32, %v6618_v40  ;;  %v7311_v7 = vmul.f32 -1.442695, %v15307_v8 }
 0x520   : > { %v9639_v11 = vpop.eup %9638  ;;  %9664 = vpow2.f32 %v7353_v39 }
 0x521   : > { %v9641_v36 = vpop.eup %9640  ;;  %9666 = vpow2.f32 %v7352_v34  ;;  %v6634_v48 = vrot.slane %v6620_v60, %v15247_v0  ;;  %v4379_v42 = vadd.f32 1.0, %v9639_v11 }
 0x522   : > { %v9643_v14 = vpop.eup %9642  ;;  %9668 = vpow2.f32 %v7339_v13  ;;  %v4392_v2 = vadd.f32 1.0, %v9641_v36 }
 0x523   : > { %v9645_v26 = vpop.eup %9644  ;;  %9670 = vpow2.f32 %v7296_v33  ;;  %v6635_v39 = vcombine.low %v6627_v52, %v6634_v48  ;;  %v4448_v49 = vadd.f32 1.0, %v9643_v14 }
 0x524   : > { %v9647_v61 = vpop.eup %9646  ;;  %9672 = vpow2.f32 %v7325_v30 }
 0x525   : > { %v9649_v20 = vpop.eup %9648  ;;  %9674 = vpow2.f32 %v7324_v28  ;;  %v4476_v52 = vadd.f32 1.0, %v9647_v61  ;;  %v17634_v28 = vld [vmem:[#allocation121_spill] sm:$0xff] }
 0x526   : > { %v9651_v32 = vpop.eup %9650  ;;  %9676 = vpow2.f32 %v7311_v7  ;;  %v4477_v11 = vadd.f32 1.0, %v9649_v20  ;;  %v15321_v14 = vadd.f32 %v17634_v28, %v14870_v17  ;;  %v17636_v7 = vld [vmem:[#allocation208_spill] sm:$0xff] }
 0x527   : > { %v9653_v40 = vpop.eup %9652  ;;  %9678 = vrcp.f32 %v4379_v42  ;;  %v4490_v60 = vadd.f32 1.0, %v9651_v32  ;;  %v15325_v48 = vadd.f32 %v17636_v7, %v17599_v54  ;;  %v4463_v42 = vadd.f32 1.0, %v9645_v26 }
 0x528   : > { %v9655_v34 = vpop.eup %9654  ;;  %9680 = vrcp.f32 %v4392_v2  ;;  %v4491_v6 = vadd.f32 1.0, %v9653_v40  ;;  %17635 = vst [vmem:[#allocation87_spill] sm:$0xff] %v15321_v14  ;;  %v6691_v40 = vmul.f32 0.00390625, %v6635_v39 }
 0x529   : > { %v9657_v13 = vpop.eup %9656  ;;  %9682 = vrcp.f32 %v4448_v49  ;;  %v4504_v41 = vadd.f32 1.0, %v9655_v34  ;;  %17637 = vst [vmem:[#allocation23_spill] sm:$0xff] %v15325_v48  ;;  %v17638_v49 = vld [vmem:[#allocation39_spill] sm:$0xff]  ;;  %v15335_v28 = vmul.f32 -1.442695, %v15325_v48 }
 0x52a   : > { %v9659_v33 = vpop.eup %9658  ;;  %9684 = vrcp.f32 %v4491_v6  ;;  %v4505_v36 = vadd.f32 1.0, %v9657_v13  ;;  %v15329_v32 = vadd.f32 %v17638_v49, %v14870_v17  ;;  %v15332_v13 = vmul.f32 -1.442695, %v15321_v14 }
 0x52b   : > { %v9661_v30 = vpop.eup %9660  ;;  %9686 = vrcp.f32 %v4504_v41  ;;  %v4462_v20 = vadd.f32 1.0, %v9659_v33  ;;  %17640 = vst [vmem:[#allocation92_spill] sm:$0xff] %v15335_v28  ;;  %v6706_v27 = vrot.slane %v6691_v40, %v17646_v37  ;;  %v15363_v37 = vadd.f32 1.0, %v15209_v18 }
 0x52c   : > { %v9663_v2 = vpop.eup %9662  ;;  %9688 = vrcp.f32 %v4505_v36  ;;  %17639 = vst [vmem:[#allocation90_spill] sm:$0xff] %v15329_v32  ;;  %v4449_v41 = vadd.f32 1.0, %v9661_v30  ;;  %v15338_v7 = vmul.f32 -1.442695, %v15329_v32  ;;  %v6702_v32 = vrot.slane %v6691_v40, %v17645_v62 }
 0x52d   : > { %v9665_v6 = vpop.eup %9664  ;;  %9690 = vrcp.f32 %v4490_v60  ;;  %v17642_v60 = vld [vmem:[#allocation45_spill] sm:$0xff]  ;;  %v4420_v39 = vadd.f32 1.0, %v9663_v2  ;;  %v6714_v2 = vrot.slane %v6691_v40, %v17648_v12  ;;  %v4350_v28 = vadd.f32 1.0, %v15290_v21 }
 0x52e   : > { %v9667_v61 = vpop.eup %9666  ;;  %9692 = vrcp.f32 %v4477_v11  ;;  %v4435_v36 = vadd.f32 1.0, %v9665_v6  ;;  %17641 = vst [vmem:[#allocation35_spill] sm:$0xff] %v15338_v7  ;;  %v15342_v33 = vadd.f32 %v17642_v60, %v17599_v54  ;;  %v17644_v6 = vld [vmem:[#allocation26_spill] sm:$0xff]  ;;  %v17647_v60 = vld [vmem:[#allocation29_spill] sm:$0xff] }
 0x52f   : > { %v9669_v34 = vpop.eup %9668  ;;  %9694 = vrcp.f32 %v4476_v52  ;;  %v4434_v30 = vadd.f32 1.0, %v9667_v61  ;;  %v17643_v52 = vld [vmem:[#allocation209_spill] sm:$0xff]  ;;  %v6710_v10 = vrot.slane %v6691_v40, %v17647_v60  ;;  %v15366_v60 = vadd.f32 1.0, %v15222_v23 }
 0x530   : > { %v9671_v26 = vpop.eup %9670  ;;  %9696 = vrcp.f32 %v4463_v42  ;;  %v15346_v49 = vadd.f32 %v17643_v52, %v14870_v17  ;;  %v4421_v48 = vadd.f32 1.0, %v9669_v34  ;;  %v6698_v42 = vrot.slane %v6691_v40, %v17644_v6  ;;  %v17649_v61 = vld [vmem:[#allocation213_spill] sm:$0xff] }
 0x531   : > { %v9673_v11 = vpop.eup %9672  ;;  %9698 = vrcp.f32 %v4462_v20  ;;  %v6718_v20 = vrot.slane %v6691_v40, %v17649_v61  ;;  %v17651_v34 = vsub.s32 6, %v17624_v50  ;;  %v17652_v6 = vsub.s32 7, %v17624_v50 }
 0x532   : > { %v9675_v14 = vpop.eup %9674  ;;  %9700 = vrcp.f32 %v4449_v41  ;;  %v4407_v52 = vadd.f32 1.0, %v9673_v11  ;;  %v15374_v11 = vadd.f32 1.0, %v15261_v15  ;;  %v7649_v18 = vpack.c.bf16 %v6710_v10, %v6706_v27 }
 0x533   : > { %v9677_v9 = vpop.eup %9676  ;;  %9702 = vrcp.f32 %v4435_v36  ;;  %v6722_v41 = vrot.slane %v6691_v40, %v17651_v34  ;;  %v6726_v3 = vrot.slane %v6691_v40, %v17652_v6  ;;  %v4406_v12 = vadd.f32 1.0, %v9675_v14 }
 0x534   : > { %v15354_v7 = vpop.eup %9678  ;;  %9704 = vrcp.f32 %v4434_v30  ;;  %v15371_v36 = vadd.f32 1.0, %v15249_v19  ;;  %v4393_v50 = vadd.f32 1.0, %v9677_v9  ;;  %v7648_v6 = vpack.c.bf16 %v6702_v32, %v6698_v42 }
 0x535   : > { %17650 = vst [vmem:[#allocation167_spill] sm:$0xff] %v15354_v7  ;;  %v15360_v62 = vpop.eup %9680  ;;  %9706 = vrcp.f32 %v4421_v48  ;;  %v7650_v34 = vpack.c.bf16 %v6718_v20, %v6714_v2  ;;  %v15377_v23 = vadd.f32 1.0, %v15268_v44  ;;  %v4337_v14 = vadd.f32 1.0, %v15281_v59 }
 0x536   : > { %v15368_v61 = vpop.eup %9682  ;;  %9708 = vrcp.f32 %v4420_v39  ;;  %v7651_v30 = vpack.c.bf16 %v6726_v3, %v6722_v41  ;;  %v4351_v15 = vadd.f32 1.0, %v15295_v31  ;;  %v4378_v9 = vadd.f32 1.0, %v9671_v26  ;;  %v17681_v41 = vld [vmem:[#allocation185_spill] sm:$0xff] }
 0x537   : > { %v9685_v40 = vpop.eup %9684  ;;  %9710 = vrcp.f32 %v4407_v52  ;;  %v4364_v32 = vadd.f32 1.0, %v15303_v38  ;;  %v4365_v10 = vadd.f32 1.0, %v15311_v35  ;;  %v6803_v3 = vrot.slane %v7648_v6, %v15247_v0 }
 0x538   : > { %v9687_v7 = vpop.eup %9686  ;;  %9712 = vrcp.f32 %v4406_v12  ;;  %v6810_v39 = vrot.slane %v7649_v18, %v15247_v0  ;;  %v6817_v21 = vrot.slane %v7650_v34, %v15247_v0  ;;  %v5835_v12 = vmul.f32 %v9685_v40, %v15199_v47 }
 0x539   : > { %v9689_v19 = vpop.eup %9688  ;;  %9714 = vrcp.f32 %v4393_v50  ;;  %v5848_v59 = vmul.f32 %v9687_v7, %v15207_v56  ;;  %v6824_v38 = vrot.slane %v7651_v30, %v15247_v0  ;;  %v4308_v40 = vadd.f32 1.0, %v15229_v51 }
 0x53a   : > { %v9691_v48 = vpop.eup %9690  ;;  %v5849_v27 = vmul.f32 %v9689_v19, %v15220_v22  ;;  %9716 = vrcp.f32 %v4378_v9  ;;  %v6825_v2 = vcombine.low %v6803_v3, %v6810_v39  ;;  %v5792_v18 = vmul.f32 %v15368_v61, %v15110_v5  ;;  %v17665_v19 = vld [vmem:[#allocation143_spill] sm:$0xff]  ;;  %v17672_v3 = vld [vmem:[#allocation201_spill] sm:$0xff] }
 0x53b   : > { %v9693_v44 = vpop.eup %9692  ;;  %v5834_v22 = vmul.f32 %v9691_v48, %v15193_v57  ;;  %9718 = vrcp.f32 %v4365_v10  ;;  %v6826_v20 = vcombine.low %v6817_v21, %v6824_v38  ;;  %v7451_v48 = vmul.f32 -1.442695, %v15342_v33 }
 0x53c   : > { %v9695_v31 = vpop.eup %9694  ;;  %6502 = vmatprep.subr.mxu1 %v5849_v27  ;;  %v5821_v47 = vmul.f32 %v9693_v44, %v15183_v24  ;;  %9720 = vrcp.f32 %v4364_v32  ;;  %v7464_v10 = vmul.f32 -1.442695, %v15346_v49  ;;  %v17669_v27 = vld [vmem:[#allocation126_spill] sm:$0xff]  ;;  %v15495_v39 = vadd.f32 %v17672_v3, %v14870_v17  ;;  %v17676_v56 = vld [vmem:[#allocation167_spill] sm:$0xff] }
 0x53d   : > { %v9697_v35 = vpop.eup %9696  ;;  %6503 = vmatpush1.msra.mxu1 %v5848_v59  ;;  %v5820_v57 = vmul.f32 %v9695_v31, %v15175_v16  ;;  %9722 = vrcp.f32 %v4351_v15  ;;  %v6840_v34 = vrot.slane %v6826_v20, %v15247_v0  ;;  %v15478_v44 = vadd.f32 %v17669_v27, %v17599_v54  ;;  %v17680_v20 = vld [vmem:[#allocation96_spill] sm:$0xff] }
 0x53e   : > { %v9699_v26 = vpop.eup %9698  ;;  %6504 = vmatprep.subr.mxu1 %v5835_v12  ;;  %v5807_v24 = vmul.f32 %v9697_v35, %v15165_v63  ;;  %9724 = vrcp.f32 %v4350_v28  ;;  %v4309_v63 = vadd.f32 1.0, %v15241_v25  ;;  %v6833_v25 = vrot.slane %v6825_v2, %v15247_v0  ;;  %v17673_v12 = vld [vmem:[#allocation92_spill] sm:$0xff] }
 0x53f   : > { %v9701_v42 = vpop.eup %9700  ;;  %6505 = vmatpush1.msra.mxu1 %v5834_v22  ;;  %v5806_v16 = vmul.f32 %v9699_v26, %v15214_v1  ;;  %9726 = vrcp.f32 %v4337_v14  ;;  %v17664_v14 = vld [vmem:[#allocation49_spill] sm:$0xff]  ;;  %v5736_v31 = vmul.f32 %v15360_v62, %v14999_v46  ;;  %v17678_v46 = vld [vmem:[#allocation226_spill] sm:$0xff]  ;;  %v7479_v2 = vmul.f32 -1.442695, %v15478_v44 }
 0x540   : > { %6506 = vmatprep.subr.mxu1 %v5821_v47  ;;  %v9703_v52 = vpop.eup %9702  ;;  %v5793_v6 = vmul.f32 %v9701_v42, %v15234_v53  ;;  %9728 = vrcp.f32 %v15377_v23  ;;  %v17661_v23 = vmov 0  ;;  %v15444_v30 = vadd.f32 %v17664_v14, %v17599_v54  ;;  %v17675_v22 = vld [vmem:[#allocation161_spill] sm:$0xff]  ;;  %v17677_v47 = vld [vmem:[#allocation35_spill] sm:$0xff] }
 0x541   : > { %6507 = vmatpush1.msra.mxu1 %v5820_v57  ;;  %v9705_v50 = vpop.eup %9704  ;;  %9730 = vrcp.f32 %v15374_v11  ;;  %v5779_v53 = vmul.f32 %v9703_v52, %v15257_v45  ;;  %v17662_v23 = vsel %vm15437_vm5, 4294967295, %v17661_v23  ;;  %v6841_v32 = vcombine.low %v6833_v25, %v6840_v34  ;;  %v17679_v57 = vld [vmem:[#allocation163_spill] sm:$0xff] }
 0x542   : > { %6508 = vmatprep.subr.mxu1 %v5807_v24  ;;  %v9707_v28 = vpop.eup %9706  ;;  %9732 = vrcp.f32 %v15371_v36  ;;  %v5778_v61 = vmul.f32 %v9705_v50, %v15253_v55  ;;  %17663 = vst [vmem:[#allocation70_spill] sm:$0xff] %v17662_v23  ;;  %v15448_v36 = vadd.f32 %v17665_v19, %v14870_v17  ;;  %v17666_v55 = vmov 0 }
 0x543   : > { %6509 = vmatpush1.msra.mxu1 %v5806_v16  ;;  %v9709_v51 = vpop.eup %9708  ;;  %9734 = vrcp.f32 %v4309_v63  ;;  %v5765_v11 = vmul.f32 %v9707_v28, %v15276_v4  ;;  %v17667_v55 = vsel %vm15459_vm8, 4294967295, %v17666_v55  ;;  %v7465_v59 = vmul.f32 -1.442695, %v15444_v30  ;;  %v17682_v63 = vld [vmem:[#allocation162_spill] sm:$0xff]  ;;  %v17683_v28 = vld [vmem:[#allocation13_spill] sm:$0xff] }
 0x544   : > { %6510 = vmatprep.subr.mxu1 %v5793_v6  ;;  %v9711_v5 = vpop.eup %9710  ;;  %17668 = vst [vmem:[#allocation127_spill] sm:$0xff] %v17667_v55  ;;  %9736 = vrcp.f32 %v4308_v40  ;;  %v5764_v15 = vmul.f32 %v9709_v51, %v15043_v58  ;;  %v5723_v26 = vmul.f32 %v17676_v56, %v17675_v22  ;;  %v15514_v62 = vadd.f32 %v17678_v46, %v14870_v17  ;;  %v17694_v56 = vld [vmem:[#allocation172_spill] sm:$0xff]  ;;  %v17695_v46 = vld [vmem:[#allocation83_spill] sm:$0xff] }
 0x545   : > { %6511 = vmatpush1.msra.mxu1 %v5792_v18  ;;  %v9713_v45 = vpop.eup %9712  ;;  %9738 = vrcp.f32 %v15366_v60  ;;  %v5751_v9 = vmul.f32 %v9711_v5, %v15285_v43  ;;  %v6915_v60 = vld [vmem:[%s15455_s24] sm:$0xff]  ;;  %v15520_v52 = vadd.f32 %v17680_v20, %v17599_v54  ;;  %v7492_v40 = vmul.f32 -1.442695, %v15495_v39  ;;  %v17685_v5 = vld [vmem:[#allocation110_spill] sm:$0xff] }
 0x546   : > { %6512 = vmatprep.subr.mxu1 %v5779_v53  ;;  %v9715_v4 = vpop.eup %9714  ;;  %9740 = vrcp.f32 %v15363_v37  ;;  %v5750_v58 = vmul.f32 %v9713_v45, %v15299_v29  ;;  %v6916_v7 = vsel %vm6914_vm15, %v6841_v32, %v6915_v60  ;;  %v15527_v6 = vadd.f32 %v17682_v63, %v17599_v54  ;;  %v17684_v53 = vld [vmem:[#allocation36_spill] sm:$0xff]  ;;  %v17690_v60 = vld [vmem:[#allocation54_spill] sm:$0xff] }
 0x547   : > { %6513 = vmatpush1.msra.mxu1 %v5778_v61  ;;  %v9717_v37 = vpop.eup %9716  ;;  %v5737_v29 = vmul.f32 %v9715_v4, %v15307_v8  ;;  %9742 = vpow2.f32 %v15332_v13  ;;  %v7478_v8 = vmul.f32 -1.442695, %v15448_v36  ;;  %v17674_v13 = vld [vmem:[#allocation12_spill] sm:$0xff]  ;;  %6917 = vst [vmem:[%s15455_s24] sm:$0xff] %v6916_v7  ;;  %v15533_v25 = vadd.f32 %v17684_v53, %v14870_v17  ;;  %v17697_v20 = vld [vmem:[#allocation134_spill] sm:$0xff] }
 0x548   : > { %6514 = vmatprep.subr.mxu1 %v5765_v11  ;;  %v9719_v21 = vpop.eup %9718  ;;  %9744 = vpow2.f32 %v17673_v12  ;;  %v15505_v38 = vadd.f32 %v17674_v13, %v17599_v54  ;;  %v5722_v24 = vmul.f32 %v9717_v37, %v17679_v57  ;;  %v7506_v45 = vmul.f32 -1.442695, %v15514_v62  ;;  %v17686_v11 = vld [vmem:[#allocation224_spill] sm:$0xff] }
 0x549   : > { %6515 = vmatpush1.msra.mxu1 %v5764_v15  ;;  %v9721_v35 = vpop.eup %9720  ;;  %9746 = vpow2.f32 %v17677_v47  ;;  %v5709_v50 = vmul.f32 %v9719_v21, %v17681_v41  ;;  %v15539_v14 = vadd.f32 %v17686_v11, %v17599_v54  ;;  %v17687_v4 = vld [vmem:[#allocation44_spill] sm:$0xff]  ;;  %v7605_v43 = vmul.f32 -1.442695, %v15527_v6  ;;  %v17698_v41 = vld [vmem:[#allocation94_spill] sm:$0xff] }
 0x54a   : > { %6516 = vmatprep.subr.mxu1 %v5751_v9  ;;  %v9723_v42 = vpop.eup %9722  ;;  %9748 = vpow2.f32 %v7451_v48  ;;  %v5708_v18 = vmul.f32 %v9721_v35, %v17683_v28  ;;  %v7493_v51 = vmul.f32 -1.442695, %v15505_v38  ;;  %v7507_v9 = vmul.f32 -1.442695, %v15520_v52  ;;  %v17688_v48 = vld [vmem:[#allocation81_spill] sm:$0xff]  ;;  %v17693_v13 = vld [vmem:[#allocation16_spill] sm:$0xff] }
 0x54b   : > { %6517 = vmatpush1.msra.mxu1 %v5750_v58  ;;  %v9725_v16 = vpop.eup %9724  ;;  %9750 = vpow2.f32 %v7464_v10  ;;  %v5695_v61 = vmul.f32 %v9723_v42, %v17685_v5  ;;  %v15545_v32 = vadd.f32 %v17688_v48, %v14870_v17  ;;  %v17689_v10 = vld [vmem:[#allocation149_spill] sm:$0xff]  ;;  %v15551_v37 = vadd.f32 %v17690_v60, %v17599_v54  ;;  %v17696_v42 = vld [vmem:[#allocation71_spill] sm:$0xff] }
 0x54c   : > { %6518 = vmatprep.subr.mxu1 %v5737_v29  ;;  %v9727_v1 = vpop.eup %9726  ;;  %9752 = vpow2.f32 %v7465_v59  ;;  %v5694_v15 = vmul.f32 %v9725_v16, %v17687_v4  ;;  %v17691_v59 = vld [vmem:[#allocation100_spill] sm:$0xff]  ;;  %v7618_v21 = vmul.f32 -1.442695, %v15533_v25  ;;  %v7619_v22 = vmul.f32 -1.442695, %v15539_v14  ;;  %v17701_v5 = vld [vmem:[#allocation103_spill] sm:$0xff] }
 0x54d   : > { %6519 = vmatpush1.msra.mxu1 %v5736_v31  ;;  %v9729_v34 = vpop.eup %9728  ;;  %9754 = vpow2.f32 %v7478_v8  ;;  %v5681_v27 = vmul.f32 %v9727_v1, %v17689_v10  ;;  %v17692_v31 = vld [vmem:[#allocation24_spill] sm:$0xff]  ;;  %v15568_v57 = vadd.f32 %v17696_v42, %v14870_v17  ;;  %v17704_v48 = vld [vmem:[#allocation53_spill] sm:$0xff] }
 0x54e   : > { %6520 = vmatprep.subr.mxu1 %v5723_v26  ;;  %v9731_v19 = vpop.eup %9730  ;;  %9756 = vpow2.f32 %v7479_v2  ;;  %v5680_v3 = vmul.f32 %v9729_v34, %v17691_v59  ;;  %v15557_v12 = vadd.f32 %v17692_v31, %v14870_v17  ;;  %v15563_v26 = vadd.f32 %v17694_v56, %v17599_v54  ;;  %v17699_v1 = vld [vmem:[#allocation168_spill] sm:$0xff] }
 0x54f   : > { %6521 = vmatpush1.msra.mxu1 %v5722_v24  ;;  %v9733_v58 = vpop.eup %9732  ;;  %9758 = vpow2.f32 %v7492_v40  ;;  %v5667_v35 = vmul.f32 %v9731_v19, %v17693_v13  ;;  %v7632_v24 = vmul.f32 -1.442695, %v15545_v32  ;;  %v7633_v40 = vmul.f32 -1.442695, %v15551_v37  ;;  %v17707_v13 = vld [vmem:[#allocation91_spill] sm:$0xff] }
 0x550   : > { %6522 = vmatprep.subr.mxu1 %v5709_v50  ;;  %v9735_v29 = vpop.eup %9734  ;;  %9760 = vpow2.f32 %v7493_v51  ;;  %v5666_v7 = vmul.f32 %v9733_v58, %v17695_v46  ;;  %v15574_v50 = vadd.f32 %v17698_v41, %v17599_v54  ;;  %v7646_v53 = vmul.f32 -1.442695, %v15557_v12  ;;  %v17710_v41 = vld [vmem:[#allocation147_spill] sm:$0xff] }
 0x551   : > { %6523 = vmatpush1.msra.mxu1 %v5708_v18  ;;  %v9737_v8 = vpop.eup %9736  ;;  %9762 = vpow2.f32 %v7506_v45  ;;  %v5653_v16 = vmul.f32 %v9735_v29, %v17697_v20  ;;  %v17700_v18 = vld [vmem:[#allocation188_spill] sm:$0xff]  ;;  %v17702_v45 = vld [vmem:[#allocation59_spill] sm:$0xff]  ;;  %v7647_v19 = vmul.f32 -1.442695, %v15563_v26  ;;  %v15598_v58 = vadd.f32 %v17704_v48, %v14870_v17 }
 0x552   : > { %6524 = vmatprep.subr.mxu1 %v5695_v61  ;;  %v9739_v47 = vpop.eup %9738  ;;  %9764 = vpow2.f32 %v7507_v9  ;;  %v5652_v28 = vmul.f32 %v9737_v8, %v17699_v1  ;;  %v15582_v51 = vadd.f32 %v17700_v18, %v14870_v17  ;;  %v15590_v11 = vadd.f32 %v17702_v45, %v17599_v54  ;;  %v17711_v18 = vld [vmem:[#allocation159_spill] sm:$0xff]  ;;  %v17712_v45 = vld [vmem:[#allocation77_spill] sm:$0xff] }
 0x553   : > { %6525 = vmatpush1.msra.mxu1 %v5694_v15  ;;  %v9741_v2 = vpop.eup %9740  ;;  %9766 = vpow2.f32 %v7605_v43  ;;  %v5639_v61 = vmul.f32 %v9739_v47, %v17701_v5  ;;  %v17703_v15 = vld [vmem:[#allocation113_spill] sm:$0xff]  ;;  %v7604_v10 = vmul.f32 -1.442695, %v15568_v57  ;;  %v7591_v29 = vmul.f32 -1.442695, %v15574_v50  ;;  %v17708_v47 = vld [vmem:[#allocation116_spill] sm:$0xff] }
 0x554   : > { %6526 = vmatprep.subr.mxu1 %v5681_v27  ;;  %v15577_v63 = vpop.eup %9742  ;;  %9768 = vpow2.f32 %v7618_v21  ;;  %v5638_v9 = vmul.f32 %v9741_v2, %v17703_v15  ;;  %v17705_v43 = vld [vmem:[#allocation165_spill] sm:$0xff]  ;;  %v7590_v31 = vmul.f32 -1.442695, %v15582_v51  ;;  %v15626_v46 = vadd.f32 %v17708_v47, %v14870_v17 }
 0x555   : > { %6527 = vmatpush1.msra.mxu1 %v5680_v3  ;;  %v15585_v34 = vpop.eup %9744  ;;  %9770 = vpow2.f32 %v7619_v22  ;;  %v15605_v60 = vadd.f32 %v17705_v43, %v17599_v54  ;;  %v17706_v3 = vld [vmem:[#allocation170_spill] sm:$0xff]  ;;  %v7577_v22 = vmul.f32 -1.442695, %v15590_v11 }
 0x556   : > { %6528 = vmatprep.subr.mxu1 %v5667_v35  ;;  %v15593_v4 = vpop.eup %9746  ;;  %9772 = vpow2.f32 %v7632_v24  ;;  %v15612_v21 = vadd.f32 %v17706_v3, %v14870_v17  ;;  %v15619_v35 = vadd.f32 %v17707_v13, %v17599_v54  ;;  %v17709_v24 = vld [vmem:[#allocation58_spill] sm:$0xff]  ;;  %v7548_v15 = vmul.f32 -1.442695, %v15626_v46 }
 0x557   : > { %6529 = vmatpush1.msra.mxu1 %v5666_v7  ;;  %v15601_v27 = vpop.eup %9748  ;;  %9774 = vpow2.f32 %v7633_v40  ;;  %v7576_v7 = vmul.f32 -1.442695, %v15598_v58  ;;  %v15633_v2 = vadd.f32 %v17709_v24, %v17599_v54  ;;  %v7563_v20 = vmul.f32 -1.442695, %v15605_v60 }
 0x558   : > { %6530 = vmatprep.subr.mxu1 %v5653_v16  ;;  %v15608_v59 = vpop.eup %9750  ;;  %9776 = vpow2.f32 %v7646_v53  ;;  %v15640_v40 = vadd.f32 %v17710_v41, %v14870_v17  ;;  %v7562_v1 = vmul.f32 -1.442695, %v15612_v21  ;;  %v15647_v53 = vadd.f32 %v17711_v18, %v17599_v54 }
 0x559   : > { %6531 = vmatpush1.msra.mxu1 %v5652_v28  ;;  %v15615_v8 = vpop.eup %9752  ;;  %9778 = vpow2.f32 %v7647_v19  ;;  %v7549_v5 = vmul.f32 -1.442695, %v15619_v35  ;;  %v15654_v19 = vadd.f32 %v17712_v45, %v14870_v17  ;;  %v7535_v48 = vmul.f32 -1.442695, %v15633_v2 }
 0x55a   : > { %6532 = vmatprep.subr.mxu1 %v5639_v61  ;;  %v15622_v56 = vpop.eup %9754  ;;  %9780 = vpow2.f32 %v7604_v10  ;;  %v7534_v54 = vmul.f32 -1.442695, %v15640_v40 }
 0x55b   : > { %6533 = vmatpush1.msra.mxu1 %v5638_v9  ;;  %v15629_v42 = vpop.eup %9756  ;;  %9782 = vpow2.f32 %v7591_v29  ;;  %v7521_v29 = vmul.f32 -1.442695, %v15647_v53  ;;  %v7520_v17 = vmul.f32 -1.442695, %v15654_v19 }
 0x55c   : > { %v15636_v16 = vpop.eup %9758  ;;  %9784 = vpow2.f32 %v7590_v31 }
 0x55d   : > { %v15643_v28 = vpop.eup %9760  ;;  %9786 = vpow2.f32 %v7577_v22 }
 0x55e   : > { %v15650_v61 = vpop.eup %9762  ;;  %9788 = vpow2.f32 %v7576_v7 }
 0x55f   : > { %v15657_v9 = vpop.eup %9764  ;;  %9790 = vpow2.f32 %v7563_v20 }
 0x560   : > { %v9767_v10 = vpop.eup %9766  ;;  %9792 = vpow2.f32 %v7562_v1 }
 0x561   : > { %v9769_v43 = vpop.eup %9768  ;;  %9794 = vpow2.f32 %v7549_v5 }
 0x562   : > { %v9771_v3 = vpop.eup %9770  ;;  %9796 = vpow2.f32 %v7548_v15  ;;  %v4700_v45 = vadd.f32 1.0, %v9769_v43  ;;  %v4687_v15 = vadd.f32 1.0, %v9767_v10 }
 0x563   : > { %v9773_v31 = vpop.eup %9772  ;;  %9798 = vpow2.f32 %v7535_v48  ;;  %v4701_v1 = vadd.f32 1.0, %v9771_v3 }
 0x564   : > { %v9775_v13 = vpop.eup %9774  ;;  %9800 = vpow2.f32 %v7534_v54  ;;  %v4714_v24 = vadd.f32 1.0, %v9773_v31 }
 0x565   : > { %v9777_v22 = vpop.eup %9776  ;;  %9802 = vpow2.f32 %v7521_v29  ;;  %v4715_v47 = vadd.f32 1.0, %v9775_v13 }
 0x566   : > { %v9779_v7 = vpop.eup %9778  ;;  %9804 = vpow2.f32 %v7520_v17  ;;  %v4728_v20 = vadd.f32 1.0, %v9777_v22 }
 0x567   : > { %v9781_v41 = vpop.eup %9780  ;;  %9806 = vrcp.f32 %v4715_v47  ;;  %v4729_v18 = vadd.f32 1.0, %v9779_v7 }
 0x568   : > { %v9783_v5 = vpop.eup %9782  ;;  %9808 = vrcp.f32 %v4728_v20  ;;  %v4686_v55 = vadd.f32 1.0, %v9781_v41 }
 0x569   : > { %v9785_v23 = vpop.eup %9784  ;;  %9810 = vrcp.f32 %v4729_v18  ;;  %v4673_v29 = vadd.f32 1.0, %v9783_v5 }
 0x56a   : > { %v9787_v48 = vpop.eup %9786  ;;  %9812 = vrcp.f32 %v4714_v24  ;;  %v4672_v17 = vadd.f32 1.0, %v9785_v23 }
 0x56b   : > { %v9789_v54 = vpop.eup %9788  ;;  %9814 = vrcp.f32 %v4701_v1  ;;  %v4659_v22 = vadd.f32 1.0, %v9787_v48 }
 0x56c   : > { %v9791_v13 = vpop.eup %9790  ;;  %9816 = vrcp.f32 %v4700_v45  ;;  %v4658_v47 = vadd.f32 1.0, %v9789_v54 }
 0x56d   : > { %v9793_v31 = vpop.eup %9792  ;;  %9818 = vrcp.f32 %v4687_v15  ;;  %v4645_v7 = vadd.f32 1.0, %v9791_v13 }
 0x56e   : > { %v9795_v3 = vpop.eup %9794  ;;  %9820 = vrcp.f32 %v4686_v55  ;;  %v4644_v20 = vadd.f32 1.0, %v9793_v31 }
 0x56f   : > { %v9797_v43 = vpop.eup %9796  ;;  %9822 = vrcp.f32 %v4673_v29  ;;  %v4631_v24 = vadd.f32 1.0, %v9795_v3  ;;  %v4588_v3 = vadd.f32 1.0, %v15650_v61  ;;  %v4561_v61 = vadd.f32 1.0, %v15629_v42 }
 0x570   : > { %v9799_v10 = vpop.eup %9798  ;;  %9824 = vrcp.f32 %v4672_v17  ;;  %v4630_v1 = vadd.f32 1.0, %v9797_v43  ;;  %v4589_v17 = vadd.f32 1.0, %v15657_v9  ;;  %v4546_v42 = vadd.f32 1.0, %v15608_v59 }
 0x571   : > { %v9801_v41 = vpop.eup %9800  ;;  %9826 = vrcp.f32 %v4659_v22  ;;  %v4617_v5 = vadd.f32 1.0, %v9799_v10  ;;  %v4519_v59 = vadd.f32 1.0, %v15585_v34 }
 0x572   : > { %v9803_v18 = vpop.eup %9802  ;;  %9828 = vrcp.f32 %v4658_v47  ;;  %v4616_v15 = vadd.f32 1.0, %v9801_v41  ;;  %v4574_v41 = vadd.f32 1.0, %v15636_v16  ;;  %v4547_v16 = vadd.f32 1.0, %v15615_v8 }
 0x573   : > { %v9805_v23 = vpop.eup %9804  ;;  %9830 = vrcp.f32 %v4645_v7  ;;  %v4603_v55 = vadd.f32 1.0, %v9803_v18  ;;  %v4575_v7 = vadd.f32 1.0, %v15643_v28  ;;  %v4560_v28 = vadd.f32 1.0, %v15622_v56 }
 0x574   : > { %v9807_v45 = vpop.eup %9806  ;;  %9832 = vrcp.f32 %v4644_v20  ;;  %v4602_v29 = vadd.f32 1.0, %v9805_v23  ;;  %v4533_v56 = vadd.f32 1.0, %v15601_v27  ;;  %v4532_v8 = vadd.f32 1.0, %v15593_v4 }
 0x575   : > { %v9809_v48 = vpop.eup %9808  ;;  %9834 = vrcp.f32 %v4631_v24  ;;  %v6059_v10 = vmul.f32 %v9807_v45, %v15551_v37  ;;  %v4518_v27 = vadd.f32 1.0, %v15577_v63 }
 0x576   : > { %v9811_v54 = vpop.eup %9810  ;;  %9836 = vrcp.f32 %v4630_v1  ;;  %v6072_v47 = vmul.f32 %v9809_v48, %v15557_v12 }
 0x577   : > { %v9813_v13 = vpop.eup %9812  ;;  %9838 = vrcp.f32 %v4617_v5  ;;  %v6073_v31 = vmul.f32 %v9811_v54, %v15563_v26 }
 0x578   : > { %v9815_v22 = vpop.eup %9814  ;;  %9840 = vrcp.f32 %v4616_v15  ;;  %v6058_v9 = vmul.f32 %v9813_v13, %v15545_v32 }
 0x579   : > { %v9817_v43 = vpop.eup %9816  ;;  %9842 = vrcp.f32 %v4603_v55  ;;  %6534 = vmatprep.subr.mxu1 %v6073_v31  ;;  %v6045_v12 = vmul.f32 %v9815_v22, %v15539_v14 }
 0x57a   : > { %v9819_v20 = vpop.eup %9818  ;;  %9844 = vrcp.f32 %v4602_v29  ;;  %6535 = vmatpush2.msra.mxu1 %v6072_v47  ;;  %v6044_v37 = vmul.f32 %v9817_v43, %v15533_v25 }
 0x57b   : > { %v9821_v26 = vpop.eup %9820  ;;  %9846 = vrcp.f32 %v4589_v17  ;;  %6536 = vmatprep.subr.mxu1 %v6059_v10  ;;  %v6031_v32 = vmul.f32 %v9819_v20, %v15527_v6 }
 0x57c   : > { %v9823_v24 = vpop.eup %9822  ;;  %9848 = vrcp.f32 %v4588_v3  ;;  %6537 = vmatpush2.msra.mxu1 %v6058_v9  ;;  %v6030_v14 = vmul.f32 %v9821_v26, %v15568_v57  ;;  %v17713_v26 = vld [vmem:[#allocation90_spill] sm:$0xff] }
 0x57d   : > { %v9825_v18 = vpop.eup %9824  ;;  %9850 = vrcp.f32 %v4575_v7  ;;  %6538 = vmatprep.subr.mxu1 %v6045_v12  ;;  %v6017_v25 = vmul.f32 %v9823_v24, %v15574_v50 }
 0x57e   : > { %v9827_v1 = vpop.eup %9826  ;;  %9852 = vrcp.f32 %v4574_v41  ;;  %6539 = vmatpush2.msra.mxu1 %v6044_v37  ;;  %v6016_v6 = vmul.f32 %v9825_v18, %v15582_v51 }
 0x57f   : > { %v9829_v23 = vpop.eup %9828  ;;  %9854 = vrcp.f32 %v4561_v61  ;;  %6540 = vmatprep.subr.mxu1 %v6031_v32  ;;  %v6003_v57 = vmul.f32 %v9827_v1, %v15590_v11 }
 0x580   : > { %v9831_v5 = vpop.eup %9830  ;;  %9856 = vrcp.f32 %v4560_v28  ;;  %6541 = vmatpush2.msra.mxu1 %v6030_v14  ;;  %v6002_v50 = vmul.f32 %v9829_v23, %v15598_v58  ;;  %v17717_v28 = vlaneseq }
 0x581   : > { %v9833_v45 = vpop.eup %9832  ;;  %9858 = vrcp.f32 %v4547_v16  ;;  %6542 = vmatprep.subr.mxu1 %v6017_v25  ;;  %v5989_v4 = vmul.f32 %v9831_v5, %v15605_v60 }
 0x582   : > { %v9835_v15 = vpop.eup %9834  ;;  %9860 = vrcp.f32 %v4546_v42  ;;  %6543 = vmatpush2.msra.mxu1 %v6016_v6  ;;  %v5988_v34 = vmul.f32 %v9833_v45, %v15612_v21  ;;  %vm15709_vm0 = vcmp.lt.s32.totalorder %v17717_v28, 768 }
 0x583   : > { %v9837_v48 = vpop.eup %9836  ;;  %9862 = vrcp.f32 %v4533_v56  ;;  %6544 = vmatprep.subr.mxu1 %v6003_v57  ;;  %v5975_v11 = vmul.f32 %v9835_v15, %v15619_v35 }
 0x584   : > { %v9839_v51 = vpop.eup %9838  ;;  %9864 = vrcp.f32 %v4532_v8  ;;  %6545 = vmatpush2.msra.mxu1 %v6002_v50  ;;  %v5974_v58 = vmul.f32 %v9837_v48, %v15626_v46 }
 0x585   : > { %v9841_v55 = vpop.eup %9840  ;;  %9866 = vrcp.f32 %v4519_v59  ;;  %6546 = vmatprep.subr.mxu1 %v5989_v4  ;;  %v5961_v29 = vmul.f32 %v9839_v51, %v15633_v2  ;;  %v17720_v4 = vld [vmem:[#allocation26_spill] sm:$0xff] }
 0x586   : > { %v9843_v63 = vpop.eup %9842  ;;  %9868 = vrcp.f32 %v4518_v27  ;;  %6547 = vmatpush2.msra.mxu1 %v5988_v34  ;;  %v5960_v13 = vmul.f32 %v9841_v55, %v15640_v40  ;;  %v17721_v34 = vld [vmem:[#allocation28_spill] sm:$0xff] }
 0x587   : > { %v9845_v54 = vpop.eup %9844  ;;  %6548 = vmatprep.subr.mxu1 %v5975_v11  ;;  %v5947_v17 = vmul.f32 %v9843_v63, %v15647_v53  ;;  %v17722_v11 = vld [vmem:[#allocation27_spill] sm:$0xff] }
 0x588   : > { %v9847_v60 = vpop.eup %9846  ;;  %6549 = vmatpush2.msra.mxu1 %v5974_v58  ;;  %v5946_v35 = vmul.f32 %v9845_v54, %v15654_v19  ;;  %v17723_v58 = vld [vmem:[#allocation29_spill] sm:$0xff] }
 0x589   : > { %v9849_v21 = vpop.eup %9848  ;;  %6550 = vmatprep.subr.mxu1 %v5961_v29  ;;  %v5933_v46 = vmul.f32 %v9847_v60, %v15520_v52  ;;  %v17724_v29 = vld [vmem:[#allocation211_spill] sm:$0xff] }
 0x58a   : > { %v9851_v31 = vpop.eup %9850  ;;  %6551 = vmatpush2.msra.mxu1 %v5960_v13  ;;  %v5932_v2 = vmul.f32 %v9849_v21, %v15514_v62  ;;  %v17725_v13 = vld [vmem:[#allocation213_spill] sm:$0xff] }
 0x58b   : > { %v9853_v22 = vpop.eup %9852  ;;  %6552 = vmatprep.subr.mxu1 %v5947_v17  ;;  %v5919_v40 = vmul.f32 %v9851_v31, %v15505_v38 }
 0x58c   : > { %v9855_v3 = vpop.eup %9854  ;;  %6553 = vmatpush2.msra.mxu1 %v5946_v35  ;;  %v5918_v53 = vmul.f32 %v9853_v22, %v15495_v39 }
 0x58d   : > { %v9857_v47 = vpop.eup %9856  ;;  %6554 = vmatprep.subr.mxu1 %v5933_v46  ;;  %v5905_v19 = vmul.f32 %v9855_v3, %v15478_v44  ;;  %v17714_v44 = vld [vmem:[#allocation23_spill] sm:$0xff] }
 0x58e   : > { %v9859_v43 = vpop.eup %9858  ;;  %6555 = vmatpush2.msra.mxu1 %v5932_v2  ;;  %v5904_v52 = vmul.f32 %v9857_v47, %v15448_v36  ;;  %v17715_v36 = vld [vmem:[#allocation87_spill] sm:$0xff] }
 0x58f   : > { %v9861_v7 = vpop.eup %9860  ;;  %6556 = vmatprep.subr.mxu1 %v5919_v40  ;;  %v5891_v62 = vmul.f32 %v9859_v43, %v15444_v30  ;;  %v17716_v30 = vmov 1.0   ;;  %v6918_v43 = vld [vmem:[%s15455_s24 + $0x8] sm:$0x3f] }
 0x590   : > { %v9863_v10 = vpop.eup %9862  ;;  %6557 = vmatpush2.msra.mxu1 %v5918_v53  ;;  %v5890_v38 = vmul.f32 %v9861_v7, %v15346_v49 }
 0x591   : > { %v9865_v20 = vpop.eup %9864  ;;  %6558 = vmatprep.subr.mxu1 %v5905_v19  ;;  %v5877_v39 = vmul.f32 %v9863_v10, %v15342_v33  ;;  %v9963_v33 = vmov 0.0  }
 0x592   : > { %v9867_v41 = vpop.eup %9866  ;;  %6559 = vmatpush2.msra.mxu1 %v5904_v52  ;;  %v5876_v61 = vmul.f32 %v9865_v20, %v17713_v26  ;;  %262 = vst.msk [vmem:[#allocation2 + $0x8] sm:$0x3f] %vm15709_vm0, %v9963_v33 }
 0x593   : > { %v9869_v9 = vpop.eup %9868  ;;  %6560 = vmatprep.subr.mxu1 %v5891_v62  ;;  %v5863_v12 = vmul.f32 %v9867_v41, %v17714_v44 }
 0x594   : > { %6561 = vmatpush2.msra.mxu1 %v5890_v38  ;;  %v5862_v24 = vmul.f32 %v9869_v9, %v17715_v36 }
 0x595   : > { %6562 = vmatprep.subr.mxu1 %v5877_v39 }
 0x596   : > { %6563 = vmatpush2.msra.mxu1 %v5876_v61 }
 0x597   : > { %6564 = vmatprep.subr.mxu1 %v5863_v12 }
 0x598   : > { %6565 = vmatpush2.msra.mxu1 %v5862_v24 }
 0x599   : > { %6567 = vmatmul.mubr.f32.vlgmr.msra.gmra.mxu1 %v17716_v30  ;;  %v6075_v57 = vld [vmem:[#allocation2 + $0x8] sm:$0x3f] }
 0x5db   : > { %v6426_v37 = vpop.f32.mrf.mxu1  ;;  %v6497_v18 = vpop.f32.mrf.mxu0 }
 0x5dd   : > { %v6428_v16 = vpop.f32.mrf.mxu1  ;;  %v6499_v32 = vpop.f32.mrf.mxu0 }
 0x5de   : > { %v6636_v1 = vcombine.low %v6426_v37, %v6428_v16  ;;  %v6637_v42 = vcombine.low %v6497_v18, %v6499_v32 }
 0x5e0   : > { %v6645_v14 = vrot.slane %v6636_v1, %v15247_v0  ;;  %v6652_v23 = vrot.slane %v6637_v42, %v15247_v0 }
 0x5e2   : > { %v6660_v5 = vcombine.low %v6645_v14, %v6652_v23 }
 0x5e4   : > { %v6667_v45 = vrot.slane %v6660_v5, %v15247_v0 }
 0x659   : > { %v6568_v56 = vpop.f32.mrf.mxu1 }
 0x65b   : > { %v6570_v25 = vpop.f32.mrf.mxu1 }
 0x65c   : > { %v6638_v8 = vcombine.low %v6568_v56, %v6570_v25 }
 0x65e   : > { %v6659_v6 = vrot.slane %v6638_v8, %v15247_v0 }
 0x660   : > { %v6674_v59 = vrot.slane %v6659_v6, %v15247_v0 }
 0x662   : > { %v6675_v15 = vcombine.low %v6667_v45, %v6674_v59 }
 0x664   : > { %v6679_v27 = vadd.f32 %v6675_v15, %v6075_v57 }
 0x666   : > { %6685 = vst.msk [vmem:[#allocation2 + $0x8] sm:$0x3f] %vm15709_vm0, %v6679_v27 }
 0x66d   : > { %v6690_v50 = vld [vmem:[#allocation2 + $0x8] sm:$0x3f] }
 0x66e   : > { %v6692_v48 = vmul.f32 0.00390625, %v6690_v50 }
 0x670   : > { %v6730_v51 = vrot.slane %v6692_v48, %v17720_v4  ;;  %v6734_v55 = vrot.slane %v6692_v48, %v17721_v34  ;;  %v6738_v63 = vrot.slane %v6692_v48, %v17722_v11  ;;  %v6742_v54 = vrot.slane %v6692_v48, %v17723_v58 }
 0x671   : > { %v6746_v60 = vrot.slane %v6692_v48, %v17724_v29  ;;  %v6750_v21 = vrot.slane %v6692_v48, %v17725_v13 }
 0x672   : > { %v7652_v17 = vpack.c.bf16 %v6734_v55, %v6730_v51  ;;  %v7653_v31 = vpack.c.bf16 %v6742_v54, %v6738_v63 }
 0x673   : > { %v7654_v35 = vpack.c.bf16 %v6750_v21, %v6746_v60 }
 0x674   : > { %v6851_v22 = vrot.slane %v7652_v17, %v15247_v0  ;;  %v6858_v46 = vrot.slane %v7653_v31, %v15247_v0 }
 0x675   : > { %v6865_v3 = vrot.slane %v7654_v35, %v15247_v0 }
 0x676   : > { %v6866_v2 = vcombine.low %v6851_v22, %v6858_v46 }
 0x677   : > { %v6880_v40 = vrot.slane %v6865_v3, %v15247_v0 }
 0x678   : > { %v6873_v47 = vrot.slane %v6866_v2, %v15247_v0 }
 0x67a   : > { %v6881_v53 = vcombine.low %v6873_v47, %v6880_v40 }
 0x67c   : > { %v6919_v10 = vsel %vm6906_vm9, %v6881_v53, %v6918_v43 }
 0x67d   : > { %6920 = vst [vmem:[%s15455_s24 + $0x8] sm:$0x3f] %v6919_v10 }
 0x67e PF: > { %s16_s17 = sadd.s32 1, %s9954_s17   ;;  %s17728_s15 = smov %s9950_s16 }
 0x67f   : > { %p13_p3 = scmp.ge.s32.totalorder %s16_s17, 4   ;;  %s17729_s16 = smov %s17731_s19 }
 0x681   :  { %15 = sbr.rel (!%p13_p3) target bundleno = 3 (0x3), region = 83 }
 0x686   :  { %6940 = vsyncpa [#allocation4], 1 }
 0x687   :  { %6942 = vsyncpa [#allocation4 + $0x1], 1 }
 0x688   :  { %6943 = vsyncpa [#allocation6], 1 }

</bundles_post_ra>
